<compile_context>
chip_gen: v7x
topology: tpu7x:2x2x1
jax: 0.10.0
libtpu: 0.0.40
codegen_flags: <defaults>
</compile_context>

<pallas_src>
import jax
import jax.numpy as jnp
from jax.experimental import pallas as pl
from jax.experimental.pallas import tpu as pltpu

VMEM_LIMIT = 48 * 1024 * 1024        # <= 64 MiB physical VMEM on v7x
BN_EPS = 1e-5

M_TILE = 512                         # row tile cap
N_SINGLE_MAX = 1536                  # take the whole N as one block up to this
N_TILE = 2048                        # otherwise tile N at 2048 (layer-1 weight streaming)
K_CANDS = (1024, 768, 512, 384, 256, 128)

# architecture constants of the Generator (kernel sizes / paddings / out channels)
KSIZES = [(2, 20), (4, 4), (4, 4), (4, 4), (4, 4)]
PADS = [(0, 0), (1, 1), (1, 1), (1, 1), (2, 11)]
NC_OUT = 3


# ----------------------------- small helpers -----------------------------

def _round_up(x, m):
    return (x + m - 1) // m * m


def _pick_div(dim, cands):
    for c in cands:
        if dim % c == 0:
            return c
    return dim


def _plan_m(m):
    """(row tile, padded rows).  Rows are the only axis that ever gets zero-padded
    per-call; K/N are lane-aligned by construction / pre-packing."""
    mp = _round_up(m, 8)
    if mp <= M_TILE:
        return mp, mp
    return M_TILE, _round_up(m, M_TILE)


def _plan_n(n_raw):
    """(n tile, padded n) used both by the weight packer and the matmul wrapper."""
    np_ = _round_up(n_raw, 128)
    if np_ <= N_SINGLE_MAX:
        return np_, np_
    return N_TILE, _round_up(np_, N_TILE)


def _phase_taps(k, s, p):
    """Sub-pixel decomposition along one axis: for each output phase r, the
    (descending) kernel taps it uses and the input base offset."""
    out = []
    for r in range(s):
        taps = sorted((t for t in range(k) if (r + p - t) % s == 0), reverse=True)
        base = (r + p - taps[0]) // s
        out.append((base, taps))
    return out


def _axis_phase_plan(size_in, k, s, p):
    """Per-phase (r, base, count, taps) + required lo/hi zero padding + out size.
    Output position s*m + r reads padded-input index (pad_lo + base + m + d) with
    kernel tap taps[d]."""
    size_out = (size_in - 1) * s - 2 * p + k
    plans, pad_lo, pad_hi = [], 0, 0
    for r, (base, taps) in enumerate(_phase_taps(k, s, p)):
        count = (size_out - 1 - r) // s + 1
        pad_lo = max(pad_lo, -base)
        pad_hi = max(pad_hi, base + count - 1 + len(taps) - 1 - (size_in - 1))
        plans.append((r, base, count, taps))
    return plans, max(pad_lo, 0), max(pad_hi, 0), size_out


# ----------------------------- Pallas kernels -----------------------------

def _mm_stats_kernel(a_ref, b_ref, y_ref, stat_ref, acc_ref):
    """Tiled matmul (K innermost, f32 VMEM accumulator) fused with per-channel
    sum / sum-of-squares partials for training-mode BatchNorm.  Grid is 5-D
    (phase_h, phase_w, N-block, M-block, K-block); phase/M/N are 'parallel'."""
    k = pl.program_id(4)

    @pl.when(k == 0)
    def _init():
        acc_ref[...] = jnp.zeros_like(acc_ref)

    acc_ref[...] += jnp.dot(a_ref[...], b_ref[...],
                            preferred_element_type=jnp.float32)

    @pl.when(k == pl.num_programs(4) - 1)
    def _fin():
        y = acc_ref[...]
        y_ref[...] = y.astype(y_ref.dtype)
        s = jnp.sum(y, axis=0, keepdims=True)           # (1, tn)
        q = jnp.sum(y * y, axis=0, keepdims=True)       # (1, tn)
        pad = jnp.zeros((6, s.shape[1]), jnp.float32)
        stat_ref[...] = jnp.concatenate([s, q, pad], axis=0)[None]   # (1, 8, tn)


def _mm_tanh_kernel(a_ref, b_ref, y_ref, acc_ref):
    """Tiled matmul fused with the final Tanh (bf16 output)."""
    k = pl.program_id(2)

    @pl.when(k == 0)
    def _init():
        acc_ref[...] = jnp.zeros_like(acc_ref)

    acc_ref[...] += jnp.dot(a_ref[...], b_ref[...],
                            preferred_element_type=jnp.float32)

    @pl.when(k == pl.num_programs(2) - 1)
    def _fin():
        y_ref[...] = jnp.tanh(acc_ref[...]).astype(y_ref.dtype)


# ----------------------------- Pallas wrappers -----------------------------

def _mm_stats(a, b):
    """a: (P, Q, M, K) bf16 (phases leading; (1,1,..) for plain matmul),
       b: (P, Q, K, Np) bf16 pre-packed (K mult of 128, Np already tile-padded).
    Returns y (P, Q, Mp, Np) bf16 and packed stats (P, Q, gi, 8, Np) f32
    (row 0 = per-column sum, row 1 = per-column sum of squares)."""
    P, Q, m, k = a.shape
    n_p = b.shape[-1]
    tm, mp = _plan_m(m)
    if mp != m:
        a = jnp.pad(a, ((0, 0), (0, 0), (0, mp - m), (0, 0)))
    tk = _pick_div(k, K_CANDS)
    tn = n_p if n_p <= N_SINGLE_MAX else N_TILE
    gi = mp // tm
    grid = (P, Q, n_p // tn, gi, k // tk)
    y, stats = pl.pallas_call(
        _mm_stats_kernel,
        out_shape=(jax.ShapeDtypeStruct((P, Q, mp, n_p), jnp.bfloat16),
                   jax.ShapeDtypeStruct((P, Q, gi, 8, n_p), jnp.float32)),
        grid_spec=pltpu.PrefetchScalarGridSpec(
            num_scalar_prefetch=0,
            grid=grid,
            in_specs=[
                pl.BlockSpec((None, None, tm, tk),
                             lambda p, q, j, i, kk: (p, q, i, kk)),
                pl.BlockSpec((None, None, tk, tn),
                             lambda p, q, j, i, kk: (p, q, kk, j)),
            ],
            out_specs=(
                pl.BlockSpec((None, None, tm, tn),
                             lambda p, q, j, i, kk: (p, q, i, j)),
                pl.BlockSpec((None, None, 1, 8, tn),
                             lambda p, q, j, i, kk: (p, q, i, 0, j)),
            ),
            scratch_shapes=[pltpu.VMEM((tm, tn), jnp.float32)]),
        compiler_params=pltpu.CompilerParams(
            dimension_semantics=("parallel", "parallel", "parallel",
                                 "parallel", "arbitrary"),
            vmem_limit_bytes=VMEM_LIMIT),
    )(a, b)
    return y, stats


def _mm_tanh(a, b):
    """a: (M, K) bf16, b: (K, Np) bf16 pre-packed; returns tanh(a @ b) (Mp, Np) bf16."""
    m, k = a.shape
    n_p = b.shape[-1]
    tm, mp = _plan_m(m)
    if mp != m:
        a = jnp.pad(a, ((0, mp - m), (0, 0)))
    tk = _pick_div(k, K_CANDS)
    tn = n_p if n_p <= N_SINGLE_MAX else N_TILE
    grid = (n_p // tn, mp // tm, k // tk)
    return pl.pallas_call(
        _mm_tanh_kernel,
        out_shape=jax.ShapeDtypeStruct((mp, n_p), jnp.bfloat16),
        grid_spec=pltpu.PrefetchScalarGridSpec(
            num_scalar_prefetch=0,
            grid=grid,
            in_specs=[pl.BlockSpec((tm, tk), lambda j, i, kk: (i, kk)),
                      pl.BlockSpec((tk, tn), lambda j, i, kk: (kk, j))],
            out_specs=pl.BlockSpec((tm, tn), lambda j, i, kk: (i, j)),
            scratch_shapes=[pltpu.VMEM((tm, tn), jnp.float32)]),
        compiler_params=pltpu.CompilerParams(
            dimension_semantics=("parallel", "parallel", "arbitrary"),
            vmem_limit_bytes=VMEM_LIMIT),
    )(a, b)


# ----------------------- BatchNorm (batch statistics) -----------------------

def _bn_scale_shift(stats, groups, m_true, gamma, beta, coutp, eps=BN_EPS):
    """Fold per-block (sum, sumsq) partials into per-channel affine scale/shift."""
    cout = gamma.shape[0]
    npad = stats.shape[-1]
    s_all = stats[..., 0, :].reshape(-1, npad).sum(axis=0)
    q_all = stats[..., 1, :].reshape(-1, npad).sum(axis=0)
    s_tot = s_all[:groups * coutp].reshape(groups, coutp).sum(axis=0)
    q_tot = q_all[:groups * coutp].reshape(groups, coutp).sum(axis=0)
    mean = s_tot / m_true
    var = jnp.maximum(q_tot / m_true - mean * mean, 0.0)
    g = jnp.zeros((coutp,), jnp.float32).at[:cout].set(gamma.astype(jnp.float32))
    b = jnp.zeros((coutp,), jnp.float32).at[:cout].set(beta.astype(jnp.float32))
    scale = g * jax.lax.rsqrt(var + eps)
    shift = b - mean * scale
    return scale, shift


# ------------------------ per-layer forward lowering ------------------------

def _layer1(z, b1, gamma, beta):
    """ConvTranspose2d over a 1x1 input == plain matmul (columns (kh, kw, C_out)),
    fused with batch statistics; BN affine + ReLU ride on the output reshape."""
    kh, kw = KSIZES[0]
    n = z.shape[0]
    nzp = b1.shape[0]
    coutp = _round_up(gamma.shape[0], 128)
    a = jnp.zeros((n, nzp), jnp.bfloat16).at[:, :z.shape[1]].set(z.astype(jnp.bfloat16))
    y, stats = _mm_stats(a.reshape(1, 1, n, nzp), b1.reshape(1, 1, *b1.shape))
    scale, shift = _bn_scale_shift(stats, kh * kw, n * kh * kw, gamma, beta, coutp)
    y = y[0, 0, :n, :kh * kw * coutp].reshape(n, kh, kw, coutp).astype(jnp.float32)
    return jnp.maximum(y * scale + shift, 0.0).astype(jnp.bfloat16)   # NHWC, lane-padded C


def _deconv_s2_stats(x, b_all, gamma, beta, ksize, padding):
    """Stride-2 ConvTranspose2d(bias=False): 4 dense stride-1 phase convolutions run
    as ONE pallas_call (phase = leading grid axes) with fused batch statistics.
    BN affine + ReLU are applied on the phase-interleave copy to the next NHWC
    activation (true zeros at the deconv borders are preserved)."""
    n, h, wd, cp = x.shape
    kh, kw = ksize
    coutp = _round_up(gamma.shape[0], 128)
    plans_h, pl_h, ph_h, hout = _axis_phase_plan(h, kh, 2, padding[0])
    plans_w, pl_w, ph_w, wout = _axis_phase_plan(wd, kw, 2, padding[1])
    sh, sw = len(plans_h), len(plans_w)
    ch, cw = plans_h[0][2], plans_w[0][2]
    assert all(p[2] == ch for p in plans_h) and all(p[2] == cw for p in plans_w)
    assert hout == sh * ch and wout == sw * cw

    xp = jnp.pad(x, ((0, 0), (pl_h, ph_h), (pl_w, ph_w), (0, 0)))
    a_list = []
    for _, base_h, _, taps_h in plans_h:
        oh = base_h + pl_h
        for _, base_w, _, taps_w in plans_w:
            ow = base_w + pl_w
            cols = [xp[:, oh + dh:oh + dh + ch, ow + dw:ow + dw + cw, :]
                    for dh in range(len(taps_h)) for dw in range(len(taps_w))]
            a_list.append(jnp.stack(cols, axis=3).reshape(n * ch * cw, -1))
    kdim = a_list[0].shape[1]
    a_all = jnp.stack(a_list, axis=0).reshape(sh, sw, n * ch * cw, kdim)

    y, stats = _mm_stats(a_all, b_all)
    scale, shift = _bn_scale_shift(stats, 1, n * hout * wout, gamma, beta, coutp)

    m = n * ch * cw
    yv = y[:, :, :m, :coutp].reshape(sh, sw, n, ch, cw, coutp).astype(jnp.float32)
    yv = jnp.maximum(yv * scale + shift, 0.0).astype(jnp.bfloat16)
    # interleave phases: out[b, sh*mh+rh, sw*mw+rw, c]
    return jnp.transpose(yv, (2, 3, 0, 4, 1, 5)).reshape(n, hout, wout, coutp)


def _final_tanh(x, b5, ksize, padding, nc_out):
    """Final stride-2 ConvTranspose2d + Tanh using the union-of-taps formulation:
    one matmul whose 4*nc=12 output columns carry all 4 phases (bf16 output)."""
    n, h, wd, cp = x.shape
    kh, kw = ksize
    plans_h, _, _, hout = _axis_phase_plan(h, kh, 2, padding[0])
    plans_w, _, _, wout = _axis_phase_plan(wd, kw, 2, padding[1])
    sh, sw = len(plans_h), len(plans_w)
    ch, cw = plans_h[0][2], plans_w[0][2]
    assert all(p[2] == ch for p in plans_h) and all(p[2] == cw for p in plans_w)
    assert hout == sh * ch and wout == sw * cw
    th_list = [(p[1], p[3]) for p in plans_h]
    tw_list = [(p[1], p[3]) for p in plans_w]
    ubh = min(b for b, _ in th_list)
    wuh = max(b - ubh + len(t) for b, t in th_list)
    ubw = min(b for b, _ in tw_list)
    wuw = max(b - ubw + len(t) for b, t in tw_list)
    pad_lo_h = max(0, -ubh)
    pad_hi_h = max(0, ubh + ch - 1 + wuh - 1 - (h - 1))
    pad_lo_w = max(0, -ubw)
    pad_hi_w = max(0, ubw + cw - 1 + wuw - 1 - (wd - 1))
    xp = jnp.pad(x, ((0, 0), (pad_lo_h, pad_hi_h), (pad_lo_w, pad_hi_w), (0, 0)))
    oh0, ow0 = ubh + pad_lo_h, ubw + pad_lo_w
    cols = [xp[:, oh0 + uh:oh0 + uh + ch, ow0 + uw:ow0 + uw + cw, :]
            for uh in range(wuh) for uw in range(wuw)]
    a = jnp.stack(cols, axis=3).reshape(n * ch * cw, wuh * wuw * cp)

    y = _mm_tanh(a, b5)
    m = n * ch * cw
    y = y[:m, :sh * sw * nc_out].reshape(n, ch, cw, sh, sw, nc_out)
    return jnp.transpose(y, (0, 1, 3, 2, 4, 5)).reshape(n, hout, wout, nc_out)


# ------------------------------ full generator ------------------------------

def generator_forward(z_nchw, packed):
    """Matches Generator.forward: 5 ConvTranspose2d blocks, BN+ReLU x4, Tanh last."""
    n = z_nchw.shape[0]
    z = z_nchw.reshape(n, -1).astype(jnp.float32)

    b1, g1, be1 = packed["l1"]
    x = _layer1(z, b1, g1, be1)                                   # (N, 2, 20, Cp)
    for idx, name in enumerate(("l2", "l3", "l4")):
        b_all, gm, bt = packed[name]
        x = _deconv_s2_stats(x, b_all, gm, bt, KSIZES[idx + 1], PADS[idx + 1])
    out = _final_tanh(x, packed["l5"], KSIZES[4], PADS[4], NC_OUT)  # (N, 30, 300, 3)
    return jnp.transpose(out, (0, 3, 1, 2)).astype(jnp.float32)     # NHWC -> NCHW


# --------------------------- one-time weight packing ---------------------------

def _pack_phase(w, padding):
    """(Cin, Cout, kH, kW) -> (sh, sw, n_taps*Cinp, Np) bf16 (phase-decomposed)."""
    cin, cout, kh, kw = w.shape
    cinp = _round_up(cin, 128)
    coutp = _round_up(cout, 128)
    _, np_ = _plan_n(coutp)
    th_list = _phase_taps(kh, 2, padding[0])
    tw_list = _phase_taps(kw, 2, padding[1])
    nth, ntw = len(th_list[0][1]), len(tw_list[0][1])
    assert all(len(t) == nth for _, t in th_list) and all(len(t) == ntw for _, t in tw_list)
    rows = []
    for _, taps_h in th_list:
        cols = []
        for _, taps_w in tw_list:
            wsel = jnp.stack([jnp.stack([w[:, :, th_, tw_] for tw_ in taps_w], 0)
                              for th_ in taps_h], 0)              # (nth, ntw, cin, cout)
            wp = jnp.zeros((nth, ntw, cinp, np_), jnp.float32)
            wp = wp.at[:, :, :cin, :cout].set(wsel)
            cols.append(wp.reshape(nth * ntw * cinp, np_))
        rows.append(jnp.stack(cols, 0))
    return jnp.stack(rows, 0).astype(jnp.bfloat16)


def _pack_final(w, padding):
    """(Cin, nc, kH, kW) -> (wuh*wuw*Cinp, 128) bf16 union-of-taps weight with the
    4 phases' nc outputs packed into the lane dimension."""
    cin, cout, kh, kw = w.shape
    cinp = _round_up(cin, 128)
    th_list = _phase_taps(kh, 2, padding[0])
    tw_list = _phase_taps(kw, 2, padding[1])
    sh, sw = len(th_list), len(tw_list)
    ubh = min(b for b, _ in th_list)
    wuh = max(b - ubh + len(t) for b, t in th_list)
    ubw = min(b for b, _ in tw_list)
    wuw = max(b - ubw + len(t) for b, t in tw_list)
    np_ = _round_up(sh * sw * cout, 128)
    bmat = jnp.zeros((wuh * wuw * cinp, np_), jnp.float32)
    for rh, (bh, taps_h) in enumerate(th_list):
        for rw, (bw, taps_w) in enumerate(tw_list):
            col0 = (rh * sw + rw) * cout
            for dh, th_ in enumerate(taps_h):
                uh = bh - ubh + dh
                for dw, tw_ in enumerate(taps_w):
                    uw = bw - ubw + dw
                    k0 = (uh * wuw + uw) * cinp
                    bmat = bmat.at[k0:k0 + cin, col0:col0 + cout].set(w[:, :, th_, tw_])
    return bmat.astype(jnp.bfloat16)


def pack_params(params):
    """Pad / transpose / phase-split / cast the PyTorch-layout weights once."""
    (w1, g1, be1), (w2, g2, be2), (w3, g3, be3), (w4, g4, be4), (w5,) = params
    cin1, cout1, kh1, kw1 = w1.shape
    nzp = _round_up(cin1, 128)
    coutp1 = _round_up(cout1, 128)
    n1 = kh1 * kw1 * coutp1
    _, np1 = _plan_n(n1)
    wb = jnp.zeros((nzp, kh1, kw1, coutp1), jnp.float32)
    wb = wb.at[:cin1, :, :, :cout1].set(jnp.transpose(w1, (0, 2, 3, 1)))
    b1 = jnp.pad(wb.reshape(nzp, n1), ((0, 0), (0, np1 - n1))).astype(jnp.bfloat16)
    return {
        "l1": (b1, g1, be1),
        "l2": (_pack_phase(w2, PADS[1]), g2, be2),
        "l3": (_pack_phase(w3, PADS[2]), g3, be3),
        "l4": (_pack_phase(w4, PADS[3]), g4, be4),
        "l5": _pack_final(w5, PADS[4]),
    }


def init_params(key, nz, ngf, nc):
    shapes = [(nz, ngf * 8, 2, 20), (ngf * 8, ngf * 4, 4, 4),
              (ngf * 4, ngf * 2, 4, 4), (ngf * 2, ngf, 4, 4),
              (ngf, nc, 4, 4)]
    params = []
    for li, shp in enumerate(shapes):
        key, kw_, kg, kb = jax.random.split(key, 4)
        w = 0.02 * jax.random.normal(kw_, shp, jnp.float32)
        if li < 4:
            cout = shp[1]
            g = 1.0 + 0.02 * jax.random.normal(kg, (cout,), jnp.float32)
            b = 0.02 * jax.random.normal(kb, (cout,), jnp.float32)
            params.append((w, g, b))
        else:
            params.append((w,))
    return params


# ------------------------- pure-JAX f32 reference (check) -------------------------

def _ref_conv_transpose(x_nchw, w, stride, padding):
    x = jnp.transpose(x_nchw, (0, 2, 3, 1))                       # NHWC
    _, _, kh, kw = w.shape
    if stride > 1:
        x = jax.lax.pad(x, jnp.zeros((), x.dtype),
                        [(0, 0, 0), (0, 0, stride - 1), (0, 0, stride - 1), (0, 0, 0)])
    eh, ew = kh - 1 - padding[0], kw - 1 - padding[1]
    x = jax.lax.pad(x, jnp.zeros((), x.dtype),
                    [(0, 0, 0), (eh, eh, 0), (ew, ew, 0), (0, 0, 0)])
    rhs = jnp.transpose(w[:, :, ::-1, ::-1], (2, 3, 0, 1))        # HWIO, flipped
    out = jax.lax.conv_general_dilated(x, rhs, (1, 1), 'VALID',
                                       dimension_numbers=('NHWC', 'HWIO', 'NHWC'))
    return jnp.transpose(out, (0, 3, 1, 2))


def _ref_forward(z, params, eps=BN_EPS):
    specs = [(1, (0, 0)), (2, (1, 1)), (2, (1, 1)), (2, (1, 1)), (2, (2, 11))]
    x = z
    for p, (stride, pad) in zip(params, specs):
        x = _ref_conv_transpose(x, p[0], stride, pad)
        if len(p) == 3:
            g, b = p[1], p[2]
            mean = x.mean(axis=(0, 2, 3), keepdims=True)
            var = x.var(axis=(0, 2, 3), keepdims=True)            # biased, like BN
            x = (x - mean) * jax.lax.rsqrt(var + eps)
            x = x * g.reshape(1, -1, 1, 1) + b.reshape(1, -1, 1, 1)
            x = jnp.maximum(x, 0.0)
        else:
            x = jnp.tanh(x)
    return x


# ------------------------------------ main ------------------------------------

if __name__ == "__main__":
    # Small but structurally identical hyper-parameters (original: nz=100, ngf=300, nc=3).
    nz_, ngf_, nc_, batch = 16, 8, 3, 2
    key = jax.random.PRNGKey(0)
    kz, kp = jax.random.split(key)
    z = jax.random.normal(kz, (batch, nz_, 1, 1), jnp.float32)    # NCHW latent
    params = init_params(kp, nz_, ngf_, nc_)
    packed = pack_params(params)                                  # one-time weight packing

    fwd = jax.jit(generator_forward)
    out = jax.block_until_ready(fwd(z, packed))

    assert out.shape == (batch, nc_, 30, 300), out.shape          # (1,1)->(2,20)->...->(30,300)
    assert bool(jnp.all(jnp.isfinite(out)))

    # Loose check against a pure-JAX f32 reference (bf16 MXU inputs => small numeric drift).
    ref = _ref_forward(z, params)
    err_max = float(jnp.max(jnp.abs(out - ref)))
    err_mean = float(jnp.mean(jnp.abs(out - ref)))
    assert err_max < 0.15 and err_mean < 0.02, (err_max, err_mean)

    print("KERNEL_OK")
</pallas_src>

<mosaic_0001>
module attributes {stable_mosaic.version = 11 : i64} {
  func.func @_mm_stats_kernel(%arg0: i32, %arg1: i32, %arg2: i32, %arg3: i32, %arg4: i32, %arg5: memref<1x1x8x128xbf16, #tpu.memory_space<vmem>>, %arg6: memref<1x1x128x2048xbf16, #tpu.memory_space<vmem>>, %arg7: memref<1x1x8x2048xbf16, #tpu.memory_space<vmem>>, %arg8: memref<1x1x1x8x2048xf32, #tpu.memory_space<vmem>>, %arg9: memref<8x2048xf32, #tpu.memory_space<vmem>>) attributes {dimension_semantics = [#tpu.dimension_semantics<parallel>, #tpu.dimension_semantics<parallel>, #tpu.dimension_semantics<parallel>, #tpu.dimension_semantics<parallel>, #tpu.dimension_semantics<arbitrary>], iteration_bounds = array<i64: 1, 1, 3, 1, 1>, scalar_prefetch = 0 : i64, scratch_operands = 1 : i64, tpu.core_type = #tpu.core_type<tc>, window_params = [{transform_indices = @transform_0, window_bounds = array<i64: 1, 1, 8, 128>}, {transform_indices = @transform_1, window_bounds = array<i64: 1, 1, 128, 2048>}, {transform_indices = @transform_2, window_bounds = array<i64: 1, 1, 8, 2048>}, {transform_indices = @transform_3, window_bounds = array<i64: 1, 1, 1, 8, 2048>}]} {
    %c0_i32 = arith.constant 0 : i32
    %0 = arith.cmpi eq, %arg4, %c0_i32 : i32
    %1 = arith.extui %0 : i1 to i32
    %c0_i32_0 = arith.constant 0 : i32
    %2 = arith.cmpi ne, %1, %c0_i32_0 : i32
    scf.if %2 {
      %cst_14 = arith.constant 0.000000e+00 : f32
      %14 = vector.broadcast %cst_14 : f32 to vector<8x2048xf32>
      %c0_15 = arith.constant 0 : index
      %c0_16 = arith.constant 0 : index
      %15 = vector.load %arg9[%c0_15, %c0_16] : memref<8x2048xf32, #tpu.memory_space<vmem>>, vector<8x2048xf32>
      tpu.vector_store %arg9[%c0_15, %c0_16], %14 {strides = array<i32>} : memref<8x2048xf32, #tpu.memory_space<vmem>>, vector<8x2048xf32>,
    } else {
    }
    %c0 = arith.constant 0 : index
    %c0_1 = arith.constant 0 : index
    %3 = vector.load %arg9[%c0, %c0_1] : memref<8x2048xf32, #tpu.memory_space<vmem>>, vector<8x2048xf32>
    %c0_2 = arith.constant 0 : index
    %c0_3 = arith.constant 0 : index
    %c0_4 = arith.constant 0 : index
    %c0_5 = arith.constant 0 : index
    %4 = vector.load %arg5[%c0_2, %c0_3, %c0_4, %c0_5] : memref<1x1x8x128xbf16, #tpu.memory_space<vmem>>, vector<1x1x8x128xbf16>
    %5 = vector.shape_cast %4 : vector<1x1x8x128xbf16> to vector<8x128xbf16>
    %c0_6 = arith.constant 0 : index
    %c0_7 = arith.constant 0 : index
    %c0_8 = arith.constant 0 : index
    %c0_9 = arith.constant 0 : index
    %6 = vector.load %arg6[%c0_6, %c0_7, %c0_8, %c0_9] : memref<1x1x128x2048xbf16, #tpu.memory_space<vmem>>, vector<1x1x128x2048xbf16>
    %7 = vector.shape_cast %6 : vector<1x1x128x2048xbf16> to vector<128x2048xbf16>
    %cst = arith.constant dense<0.000000e+00> : vector<8x2048xf32>
    %8 = tpu.matmul %5, %7, %cst {dimension_numbers = #tpu.dot_dimension_numbers<[1], [0], [0], [1], [0, 0, 1, 1], [], []>} : vector<8x128xbf16>, vector<128x2048xbf16>, vector<8x2048xf32> -> vector<8x2048xf32>
    %9 = arith.addf %3, %8 : vector<8x2048xf32>
    %c0_10 = arith.constant 0 : index
    %c0_11 = arith.constant 0 : index
    %10 = vector.load %arg9[%c0_10, %c0_11] : memref<8x2048xf32, #tpu.memory_space<vmem>>, vector<8x2048xf32>
    tpu.vector_store %arg9[%c0_10, %c0_11], %9 {strides = array<i32>} : memref<8x2048xf32, #tpu.memory_space<vmem>>, vector<8x2048xf32>,
    %c0_i32_12 = arith.constant 0 : i32
    %11 = arith.cmpi eq, %arg4, %c0_i32_12 : i32
    %12 = arith.extui %11 : i1 to i32
    %c0_i32_13 = arith.constant 0 : i32
    %13 = arith.cmpi ne, %12, %c0_i32_13 : i32
    scf.if %13 {
      %c0_14 = arith.constant 0 : index
      %c0_15 = arith.constant 0 : index
      %14 = vector.load %arg9[%c0_14, %c0_15] : memref<8x2048xf32, #tpu.memory_space<vmem>>, vector<8x2048xf32>
      %15 = arith.truncf %14 : vector<8x2048xf32> to vector<8x2048xbf16>
      %c0_16 = arith.constant 0 : index
      %c0_17 = arith.constant 0 : index
      %c0_18 = arith.constant 0 : index
      %c0_19 = arith.constant 0 : index
      %16 = vector.load %arg7[%c0_16, %c0_17, %c0_18, %c0_19] : memref<1x1x8x2048xbf16, #tpu.memory_space<vmem>>, vector<1x1x8x2048xbf16>
      %17 = vector.shape_cast %16 : vector<1x1x8x2048xbf16> to vector<8x2048xbf16>
      %18 = vector.shape_cast %15 : vector<8x2048xbf16> to vector<1x1x8x2048xbf16>
      tpu.vector_store %arg7[%c0_16, %c0_17, %c0_18, %c0_19], %18 {strides = array<i32>} : memref<1x1x8x2048xbf16, #tpu.memory_space<vmem>>, vector<1x1x8x2048xbf16>,
      %cst_20 = arith.constant dense<0.000000e+00> : vector<2048xf32>
      %19 = vector.multi_reduction <add>, %14, %cst_20 [0] : vector<8x2048xf32> to vector<2048xf32>
      %20 = vector.shape_cast %19 : vector<2048xf32> to vector<1x2048xf32>
      %21 = arith.mulf %14, %14 : vector<8x2048xf32>
      %cst_21 = arith.constant dense<0.000000e+00> : vector<2048xf32>
      %22 = vector.multi_reduction <add>, %21, %cst_21 [0] : vector<8x2048xf32> to vector<2048xf32>
      %23 = vector.shape_cast %22 : vector<2048xf32> to vector<1x2048xf32>
      %cst_22 = arith.constant 0.000000e+00 : f32
      %24 = vector.broadcast %cst_22 : f32 to vector<6x2048xf32>
      %25 = tpu.concatenate %20, %23, %24 in 0 : vector<1x2048xf32>, vector<1x2048xf32>, vector<6x2048xf32> -> vector<8x2048xf32>
      %26 = vector.shape_cast %25 : vector<8x2048xf32> to vector<1x8x2048xf32>
      %c0_23 = arith.constant 0 : index
      %c0_24 = arith.constant 0 : index
      %c0_25 = arith.constant 0 : index
      %c0_26 = arith.constant 0 : index
      %c0_27 = arith.constant 0 : index
      %27 = vector.load %arg8[%c0_23, %c0_24, %c0_25, %c0_26, %c0_27] : memref<1x1x1x8x2048xf32, #tpu.memory_space<vmem>>, vector<1x1x1x8x2048xf32>
      %28 = vector.shape_cast %27 : vector<1x1x1x8x2048xf32> to vector<1x8x2048xf32>
      %29 = vector.shape_cast %26 : vector<1x8x2048xf32> to vector<1x1x1x8x2048xf32>
      tpu.vector_store %arg8[%c0_23, %c0_24, %c0_25, %c0_26, %c0_27], %29 {strides = array<i32>} : memref<1x1x1x8x2048xf32, #tpu.memory_space<vmem>>, vector<1x1x1x8x2048xf32>,
    } else {
    }
    return
  }
  func.func @transform_0(%arg0: i32, %arg1: i32, %arg2: i32, %arg3: i32, %arg4: i32) -> (i32, i32, i32, i32) {
    %c0_i32 = arith.constant 0 : i32
    return %arg0, %arg1, %arg3, %arg4 : i32, i32, i32, i32
  }
  func.func @transform_1(%arg0: i32, %arg1: i32, %arg2: i32, %arg3: i32, %arg4: i32) -> (i32, i32, i32, i32) {
    %c0_i32 = arith.constant 0 : i32
    return %arg0, %arg1, %arg4, %arg2 : i32, i32, i32, i32
  }
  func.func @transform_2(%arg0: i32, %arg1: i32, %arg2: i32, %arg3: i32, %arg4: i32) -> (i32, i32, i32, i32) {
    %c0_i32 = arith.constant 0 : i32
    return %arg0, %arg1, %arg3, %arg2 : i32, i32, i32, i32
  }
  func.func @transform_3(%arg0: i32, %arg1: i32, %arg2: i32, %arg3: i32, %arg4: i32) -> (i32, i32, i32, i32, i32) {
    %c0_i32 = arith.constant 0 : i32
    %c0_i32_0 = arith.constant 0 : i32
    return %arg0, %arg1, %arg3, %c0_i32, %arg2 : i32, i32, i32, i32, i32
  }
}

module attributes {stable_mosaic.version = 11 : i64} {
  func.func @_mm_stats_kernel(%arg0: i32, %arg1: i32, %arg2: i32, %arg3: i32, %arg4: i32, %arg5: memref<1x1x80x512xbf16, #tpu.memory_space<vmem>>, %arg6: memref<1x1x512x128xbf16, #tpu.memory_space<vmem>>, %arg7: memref<1x1x80x128xbf16, #tpu.memory_space<vmem>>, %arg8: memref<1x1x1x8x128xf32, #tpu.memory_space<vmem>>, %arg9: memref<80x128xf32, #tpu.memory_space<vmem>>) attributes {dimension_semantics = [#tpu.dimension_semantics<parallel>, #tpu.dimension_semantics<parallel>, #tpu.dimension_semantics<parallel>, #tpu.dimension_semantics<parallel>, #tpu.dimension_semantics<arbitrary>], iteration_bounds = array<i64: 2, 2, 1, 1, 1>, scalar_prefetch = 0 : i64, scratch_operands = 1 : i64, tpu.core_type = #tpu.core_type<tc>, window_params = [{transform_indices = @transform_0, window_bounds = array<i64: 1, 1, 80, 512>}, {transform_indices = @transform_1, window_bounds = array<i64: 1, 1, 512, 128>}, {transform_indices = @transform_2, window_bounds = array<i64: 1, 1, 80, 128>}, {transform_indices = @transform_3, window_bounds = array<i64: 1, 1, 1, 8, 128>}]} {
    %c0_i32 = arith.constant 0 : i32
    %0 = arith.cmpi eq, %arg4, %c0_i32 : i32
    %1 = arith.extui %0 : i1 to i32
    %c0_i32_0 = arith.constant 0 : i32
    %2 = arith.cmpi ne, %1, %c0_i32_0 : i32
    scf.if %2 {
      %cst_14 = arith.constant 0.000000e+00 : f32
      %14 = vector.broadcast %cst_14 : f32 to vector<80x128xf32>
      %c0_15 = arith.constant 0 : index
      %c0_16 = arith.constant 0 : index
      %15 = vector.load %arg9[%c0_15, %c0_16] : memref<80x128xf32, #tpu.memory_space<vmem>>, vector<80x128xf32>
      tpu.vector_store %arg9[%c0_15, %c0_16], %14 {strides = array<i32>} : memref<80x128xf32, #tpu.memory_space<vmem>>, vector<80x128xf32>,
    } else {
    }
    %c0 = arith.constant 0 : index
    %c0_1 = arith.constant 0 : index
    %3 = vector.load %arg9[%c0, %c0_1] : memref<80x128xf32, #tpu.memory_space<vmem>>, vector<80x128xf32>
    %c0_2 = arith.constant 0 : index
    %c0_3 = arith.constant 0 : index
    %c0_4 = arith.constant 0 : index
    %c0_5 = arith.constant 0 : index
    %4 = vector.load %arg5[%c0_2, %c0_3, %c0_4, %c0_5] : memref<1x1x80x512xbf16, #tpu.memory_space<vmem>>, vector<1x1x80x512xbf16>
    %5 = vector.shape_cast %4 : vector<1x1x80x512xbf16> to vector<80x512xbf16>
    %c0_6 = arith.constant 0 : index
    %c0_7 = arith.constant 0 : index
    %c0_8 = arith.constant 0 : index
    %c0_9 = arith.constant 0 : index
    %6 = vector.load %arg6[%c0_6, %c0_7, %c0_8, %c0_9] : memref<1x1x512x128xbf16, #tpu.memory_space<vmem>>, vector<1x1x512x128xbf16>
    %7 = vector.shape_cast %6 : vector<1x1x512x128xbf16> to vector<512x128xbf16>
    %cst = arith.constant dense<0.000000e+00> : vector<80x128xf32>
    %8 = tpu.matmul %5, %7, %cst {dimension_numbers = #tpu.dot_dimension_numbers<[1], [0], [0], [1], [0, 0, 1, 1], [], []>} : vector<80x512xbf16>, vector<512x128xbf16>, vector<80x128xf32> -> vector<80x128xf32>
    %9 = arith.addf %3, %8 : vector<80x128xf32>
    %c0_10 = arith.constant 0 : index
    %c0_11 = arith.constant 0 : index
    %10 = vector.load %arg9[%c0_10, %c0_11] : memref<80x128xf32, #tpu.memory_space<vmem>>, vector<80x128xf32>
    tpu.vector_store %arg9[%c0_10, %c0_11], %9 {strides = array<i32>} : memref<80x128xf32, #tpu.memory_space<vmem>>, vector<80x128xf32>,
    %c0_i32_12 = arith.constant 0 : i32
    %11 = arith.cmpi eq, %arg4, %c0_i32_12 : i32
    %12 = arith.extui %11 : i1 to i32
    %c0_i32_13 = arith.constant 0 : i32
    %13 = arith.cmpi ne, %12, %c0_i32_13 : i32
    scf.if %13 {
      %c0_14 = arith.constant 0 : index
      %c0_15 = arith.constant 0 : index
      %14 = vector.load %arg9[%c0_14, %c0_15] : memref<80x128xf32, #tpu.memory_space<vmem>>, vector<80x128xf32>
      %15 = arith.truncf %14 : vector<80x128xf32> to vector<80x128xbf16>
      %c0_16 = arith.constant 0 : index
      %c0_17 = arith.constant 0 : index
      %c0_18 = arith.constant 0 : index
      %c0_19 = arith.constant 0 : index
      %16 = vector.load %arg7[%c0_16, %c0_17, %c0_18, %c0_19] : memref<1x1x80x128xbf16, #tpu.memory_space<vmem>>, vector<1x1x80x128xbf16>
      %17 = vector.shape_cast %16 : vector<1x1x80x128xbf16> to vector<80x128xbf16>
      %18 = vector.shape_cast %15 : vector<80x128xbf16> to vector<1x1x80x128xbf16>
      tpu.vector_store %arg7[%c0_16, %c0_17, %c0_18, %c0_19], %18 {strides = array<i32>} : memref<1x1x80x128xbf16, #tpu.memory_space<vmem>>, vector<1x1x80x128xbf16>,
      %cst_20 = arith.constant dense<0.000000e+00> : vector<128xf32>
      %19 = vector.multi_reduction <add>, %14, %cst_20 [0] : vector<80x128xf32> to vector<128xf32>
      %20 = vector.shape_cast %19 : vector<128xf32> to vector<1x128xf32>
      %21 = arith.mulf %14, %14 : vector<80x128xf32>
      %cst_21 = arith.constant dense<0.000000e+00> : vector<128xf32>
      %22 = vector.multi_reduction <add>, %21, %cst_21 [0] : vector<80x128xf32> to vector<128xf32>
      %23 = vector.shape_cast %22 : vector<128xf32> to vector<1x128xf32>
      %cst_22 = arith.constant 0.000000e+00 : f32
      %24 = vector.broadcast %cst_22 : f32 to vector<6x128xf32>
      %25 = tpu.concatenate %20, %23, %24 in 0 : vector<1x128xf32>, vector<1x128xf32>, vector<6x128xf32> -> vector<8x128xf32>
      %26 = vector.shape_cast %25 : vector<8x128xf32> to vector<1x8x128xf32>
      %c0_23 = arith.constant 0 : index
      %c0_24 = arith.constant 0 : index
      %c0_25 = arith.constant 0 : index
      %c0_26 = arith.constant 0 : index
      %c0_27 = arith.constant 0 : index
      %27 = vector.load %arg8[%c0_23, %c0_24, %c0_25, %c0_26, %c0_27] : memref<1x1x1x8x128xf32, #tpu.memory_space<vmem>>, vector<1x1x1x8x128xf32>
      %28 = vector.shape_cast %27 : vector<1x1x1x8x128xf32> to vector<1x8x128xf32>
      %29 = vector.shape_cast %26 : vector<1x8x128xf32> to vector<1x1x1x8x128xf32>
      tpu.vector_store %arg8[%c0_23, %c0_24, %c0_25, %c0_26, %c0_27], %29 {strides = array<i32>} : memref<1x1x1x8x128xf32, #tpu.memory_space<vmem>>, vector<1x1x1x8x128xf32>,
    } else {
    }
    return
  }
  func.func @transform_0(%arg0: i32, %arg1: i32, %arg2: i32, %arg3: i32, %arg4: i32) -> (i32, i32, i32, i32) {
    %c0_i32 = arith.constant 0 : i32
    return %arg0, %arg1, %arg3, %arg4 : i32, i32, i32, i32
  }
  func.func @transform_1(%arg0: i32, %arg1: i32, %arg2: i32, %arg3: i32, %arg4: i32) -> (i32, i32, i32, i32) {
    %c0_i32 = arith.constant 0 : i32
    return %arg0, %arg1, %arg4, %arg2 : i32, i32, i32, i32
  }
  func.func @transform_2(%arg0: i32, %arg1: i32, %arg2: i32, %arg3: i32, %arg4: i32) -> (i32, i32, i32, i32) {
    %c0_i32 = arith.constant 0 : i32
    return %arg0, %arg1, %arg3, %arg2 : i32, i32, i32, i32
  }
  func.func @transform_3(%arg0: i32, %arg1: i32, %arg2: i32, %arg3: i32, %arg4: i32) -> (i32, i32, i32, i32, i32) {
    %c0_i32 = arith.constant 0 : i32
    %c0_i32_0 = arith.constant 0 : i32
    return %arg0, %arg1, %arg3, %c0_i32, %arg2 : i32, i32, i32, i32, i32
  }
}

module attributes {stable_mosaic.version = 11 : i64} {
  func.func @_mm_stats_kernel(%arg0: i32, %arg1: i32, %arg2: i32, %arg3: i32, %arg4: i32, %arg5: memref<1x1x320x512xbf16, #tpu.memory_space<vmem>>, %arg6: memref<1x1x512x128xbf16, #tpu.memory_space<vmem>>, %arg7: memref<1x1x320x128xbf16, #tpu.memory_space<vmem>>, %arg8: memref<1x1x1x8x128xf32, #tpu.memory_space<vmem>>, %arg9: memref<320x128xf32, #tpu.memory_space<vmem>>) attributes {dimension_semantics = [#tpu.dimension_semantics<parallel>, #tpu.dimension_semantics<parallel>, #tpu.dimension_semantics<parallel>, #tpu.dimension_semantics<parallel>, #tpu.dimension_semantics<arbitrary>], iteration_bounds = array<i64: 2, 2, 1, 1, 1>, scalar_prefetch = 0 : i64, scratch_operands = 1 : i64, tpu.core_type = #tpu.core_type<tc>, window_params = [{transform_indices = @transform_0, window_bounds = array<i64: 1, 1, 320, 512>}, {transform_indices = @transform_1, window_bounds = array<i64: 1, 1, 512, 128>}, {transform_indices = @transform_2, window_bounds = array<i64: 1, 1, 320, 128>}, {transform_indices = @transform_3, window_bounds = array<i64: 1, 1, 1, 8, 128>}]} {
    %c0_i32 = arith.constant 0 : i32
    %0 = arith.cmpi eq, %arg4, %c0_i32 : i32
    %1 = arith.extui %0 : i1 to i32
    %c0_i32_0 = arith.constant 0 : i32
    %2 = arith.cmpi ne, %1, %c0_i32_0 : i32
    scf.if %2 {
      %cst_14 = arith.constant 0.000000e+00 : f32
      %14 = vector.broadcast %cst_14 : f32 to vector<320x128xf32>
      %c0_15 = arith.constant 0 : index
      %c0_16 = arith.constant 0 : index
      %15 = vector.load %arg9[%c0_15, %c0_16] : memref<320x128xf32, #tpu.memory_space<vmem>>, vector<320x128xf32>
      tpu.vector_store %arg9[%c0_15, %c0_16], %14 {strides = array<i32>} : memref<320x128xf32, #tpu.memory_space<vmem>>, vector<320x128xf32>,
    } else {
    }
    %c0 = arith.constant 0 : index
    %c0_1 = arith.constant 0 : index
    %3 = vector.load %arg9[%c0, %c0_1] : memref<320x128xf32, #tpu.memory_space<vmem>>, vector<320x128xf32>
    %c0_2 = arith.constant 0 : index
    %c0_3 = arith.constant 0 : index
    %c0_4 = arith.constant 0 : index
    %c0_5 = arith.constant 0 : index
    %4 = vector.load %arg5[%c0_2, %c0_3, %c0_4, %c0_5] : memref<1x1x320x512xbf16, #tpu.memory_space<vmem>>, vector<1x1x320x512xbf16>
    %5 = vector.shape_cast %4 : vector<1x1x320x512xbf16> to vector<320x512xbf16>
    %c0_6 = arith.constant 0 : index
    %c0_7 = arith.constant 0 : index
    %c0_8 = arith.constant 0 : index
    %c0_9 = arith.constant 0 : index
    %6 = vector.load %arg6[%c0_6, %c0_7, %c0_8, %c0_9] : memref<1x1x512x128xbf16, #tpu.memory_space<vmem>>, vector<1x1x512x128xbf16>
    %7 = vector.shape_cast %6 : vector<1x1x512x128xbf16> to vector<512x128xbf16>
    %cst = arith.constant dense<0.000000e+00> : vector<320x128xf32>
    %8 = tpu.matmul %5, %7, %cst {dimension_numbers = #tpu.dot_dimension_numbers<[1], [0], [0], [1], [0, 0, 1, 1], [], []>} : vector<320x512xbf16>, vector<512x128xbf16>, vector<320x128xf32> -> vector<320x128xf32>
    %9 = arith.addf %3, %8 : vector<320x128xf32>
    %c0_10 = arith.constant 0 : index
    %c0_11 = arith.constant 0 : index
    %10 = vector.load %arg9[%c0_10, %c0_11] : memref<320x128xf32, #tpu.memory_space<vmem>>, vector<320x128xf32>
    tpu.vector_store %arg9[%c0_10, %c0_11], %9 {strides = array<i32>} : memref<320x128xf32, #tpu.memory_space<vmem>>, vector<320x128xf32>,
    %c0_i32_12 = arith.constant 0 : i32
    %11 = arith.cmpi eq, %arg4, %c0_i32_12 : i32
    %12 = arith.extui %11 : i1 to i32
    %c0_i32_13 = arith.constant 0 : i32
    %13 = arith.cmpi ne, %12, %c0_i32_13 : i32
    scf.if %13 {
      %c0_14 = arith.constant 0 : index
      %c0_15 = arith.constant 0 : index
      %14 = vector.load %arg9[%c0_14, %c0_15] : memref<320x128xf32, #tpu.memory_space<vmem>>, vector<320x128xf32>
      %15 = arith.truncf %14 : vector<320x128xf32> to vector<320x128xbf16>
      %c0_16 = arith.constant 0 : index
      %c0_17 = arith.constant 0 : index
      %c0_18 = arith.constant 0 : index
      %c0_19 = arith.constant 0 : index
      %16 = vector.load %arg7[%c0_16, %c0_17, %c0_18, %c0_19] : memref<1x1x320x128xbf16, #tpu.memory_space<vmem>>, vector<1x1x320x128xbf16>
      %17 = vector.shape_cast %16 : vector<1x1x320x128xbf16> to vector<320x128xbf16>
      %18 = vector.shape_cast %15 : vector<320x128xbf16> to vector<1x1x320x128xbf16>
      tpu.vector_store %arg7[%c0_16, %c0_17, %c0_18, %c0_19], %18 {strides = array<i32>} : memref<1x1x320x128xbf16, #tpu.memory_space<vmem>>, vector<1x1x320x128xbf16>,
      %cst_20 = arith.constant dense<0.000000e+00> : vector<128xf32>
      %19 = vector.multi_reduction <add>, %14, %cst_20 [0] : vector<320x128xf32> to vector<128xf32>
      %20 = vector.shape_cast %19 : vector<128xf32> to vector<1x128xf32>
      %21 = arith.mulf %14, %14 : vector<320x128xf32>
      %cst_21 = arith.constant dense<0.000000e+00> : vector<128xf32>
      %22 = vector.multi_reduction <add>, %21, %cst_21 [0] : vector<320x128xf32> to vector<128xf32>
      %23 = vector.shape_cast %22 : vector<128xf32> to vector<1x128xf32>
      %cst_22 = arith.constant 0.000000e+00 : f32
      %24 = vector.broadcast %cst_22 : f32 to vector<6x128xf32>
      %25 = tpu.concatenate %20, %23, %24 in 0 : vector<1x128xf32>, vector<1x128xf32>, vector<6x128xf32> -> vector<8x128xf32>
      %26 = vector.shape_cast %25 : vector<8x128xf32> to vector<1x8x128xf32>
      %c0_23 = arith.constant 0 : index
      %c0_24 = arith.constant 0 : index
      %c0_25 = arith.constant 0 : index
      %c0_26 = arith.constant 0 : index
      %c0_27 = arith.constant 0 : index
      %27 = vector.load %arg8[%c0_23, %c0_24, %c0_25, %c0_26, %c0_27] : memref<1x1x1x8x128xf32, #tpu.memory_space<vmem>>, vector<1x1x1x8x128xf32>
      %28 = vector.shape_cast %27 : vector<1x1x1x8x128xf32> to vector<1x8x128xf32>
      %29 = vector.shape_cast %26 : vector<1x8x128xf32> to vector<1x1x1x8x128xf32>
      tpu.vector_store %arg8[%c0_23, %c0_24, %c0_25, %c0_26, %c0_27], %29 {strides = array<i32>} : memref<1x1x1x8x128xf32, #tpu.memory_space<vmem>>, vector<1x1x1x8x128xf32>,
    } else {
    }
    return
  }
  func.func @transform_0(%arg0: i32, %arg1: i32, %arg2: i32, %arg3: i32, %arg4: i32) -> (i32, i32, i32, i32) {
    %c0_i32 = arith.constant 0 : i32
    return %arg0, %arg1, %arg3, %arg4 : i32, i32, i32, i32
  }
  func.func @transform_1(%arg0: i32, %arg1: i32, %arg2: i32, %arg3: i32, %arg4: i32) -> (i32, i32, i32, i32) {
    %c0_i32 = arith.constant 0 : i32
    return %arg0, %arg1, %arg4, %arg2 : i32, i32, i32, i32
  }
  func.func @transform_2(%arg0: i32, %arg1: i32, %arg2: i32, %arg3: i32, %arg4: i32) -> (i32, i32, i32, i32) {
    %c0_i32 = arith.constant 0 : i32
    return %arg0, %arg1, %arg3, %arg2 : i32, i32, i32, i32
  }
  func.func @transform_3(%arg0: i32, %arg1: i32, %arg2: i32, %arg3: i32, %arg4: i32) -> (i32, i32, i32, i32, i32) {
    %c0_i32 = arith.constant 0 : i32
    %c0_i32_0 = arith.constant 0 : i32
    return %arg0, %arg1, %arg3, %c0_i32, %arg2 : i32, i32, i32, i32, i32
  }
}

module attributes {stable_mosaic.version = 11 : i64} {
  func.func @_mm_stats_kernel(%arg0: i32, %arg1: i32, %arg2: i32, %arg3: i32, %arg4: i32, %arg5: memref<1x1x512x512xbf16, #tpu.memory_space<vmem>>, %arg6: memref<1x1x512x128xbf16, #tpu.memory_space<vmem>>, %arg7: memref<1x1x512x128xbf16, #tpu.memory_space<vmem>>, %arg8: memref<1x1x1x8x128xf32, #tpu.memory_space<vmem>>, %arg9: memref<512x128xf32, #tpu.memory_space<vmem>>) attributes {dimension_semantics = [#tpu.dimension_semantics<parallel>, #tpu.dimension_semantics<parallel>, #tpu.dimension_semantics<parallel>, #tpu.dimension_semantics<parallel>, #tpu.dimension_semantics<arbitrary>], iteration_bounds = array<i64: 2, 2, 1, 3, 1>, scalar_prefetch = 0 : i64, scratch_operands = 1 : i64, tpu.core_type = #tpu.core_type<tc>, window_params = [{transform_indices = @transform_0, window_bounds = array<i64: 1, 1, 512, 512>}, {transform_indices = @transform_1, window_bounds = array<i64: 1, 1, 512, 128>}, {transform_indices = @transform_2, window_bounds = array<i64: 1, 1, 512, 128>}, {transform_indices = @transform_3, window_bounds = array<i64: 1, 1, 1, 8, 128>}]} {
    %c0_i32 = arith.constant 0 : i32
    %0 = arith.cmpi eq, %arg4, %c0_i32 : i32
    %1 = arith.extui %0 : i1 to i32
    %c0_i32_0 = arith.constant 0 : i32
    %2 = arith.cmpi ne, %1, %c0_i32_0 : i32
    scf.if %2 {
      %cst_14 = arith.constant 0.000000e+00 : f32
      %14 = vector.broadcast %cst_14 : f32 to vector<512x128xf32>
      %c0_15 = arith.constant 0 : index
      %c0_16 = arith.constant 0 : index
      %15 = vector.load %arg9[%c0_15, %c0_16] : memref<512x128xf32, #tpu.memory_space<vmem>>, vector<512x128xf32>
      tpu.vector_store %arg9[%c0_15, %c0_16], %14 {strides = array<i32>} : memref<512x128xf32, #tpu.memory_space<vmem>>, vector<512x128xf32>,
    } else {
    }
    %c0 = arith.constant 0 : index
    %c0_1 = arith.constant 0 : index
    %3 = vector.load %arg9[%c0, %c0_1] : memref<512x128xf32, #tpu.memory_space<vmem>>, vector<512x128xf32>
    %c0_2 = arith.constant 0 : index
    %c0_3 = arith.constant 0 : index
    %c0_4 = arith.constant 0 : index
    %c0_5 = arith.constant 0 : index
    %4 = vector.load %arg5[%c0_2, %c0_3, %c0_4, %c0_5] : memref<1x1x512x512xbf16, #tpu.memory_space<vmem>>, vector<1x1x512x512xbf16>
    %5 = vector.shape_cast %4 : vector<1x1x512x512xbf16> to vector<512x512xbf16>
    %c0_6 = arith.constant 0 : index
    %c0_7 = arith.constant 0 : index
    %c0_8 = arith.constant 0 : index
    %c0_9 = arith.constant 0 : index
    %6 = vector.load %arg6[%c0_6, %c0_7, %c0_8, %c0_9] : memref<1x1x512x128xbf16, #tpu.memory_space<vmem>>, vector<1x1x512x128xbf16>
    %7 = vector.shape_cast %6 : vector<1x1x512x128xbf16> to vector<512x128xbf16>
    %cst = arith.constant dense<0.000000e+00> : vector<512x128xf32>
    %8 = tpu.matmul %5, %7, %cst {dimension_numbers = #tpu.dot_dimension_numbers<[1], [0], [0], [1], [0, 0, 1, 1], [], []>} : vector<512x512xbf16>, vector<512x128xbf16>, vector<512x128xf32> -> vector<512x128xf32>
    %9 = arith.addf %3, %8 : vector<512x128xf32>
    %c0_10 = arith.constant 0 : index
    %c0_11 = arith.constant 0 : index
    %10 = vector.load %arg9[%c0_10, %c0_11] : memref<512x128xf32, #tpu.memory_space<vmem>>, vector<512x128xf32>
    tpu.vector_store %arg9[%c0_10, %c0_11], %9 {strides = array<i32>} : memref<512x128xf32, #tpu.memory_space<vmem>>, vector<512x128xf32>,
    %c0_i32_12 = arith.constant 0 : i32
    %11 = arith.cmpi eq, %arg4, %c0_i32_12 : i32
    %12 = arith.extui %11 : i1 to i32
    %c0_i32_13 = arith.constant 0 : i32
    %13 = arith.cmpi ne, %12, %c0_i32_13 : i32
    scf.if %13 {
      %c0_14 = arith.constant 0 : index
      %c0_15 = arith.constant 0 : index
      %14 = vector.load %arg9[%c0_14, %c0_15] : memref<512x128xf32, #tpu.memory_space<vmem>>, vector<512x128xf32>
      %15 = arith.truncf %14 : vector<512x128xf32> to vector<512x128xbf16>
      %c0_16 = arith.constant 0 : index
      %c0_17 = arith.constant 0 : index
      %c0_18 = arith.constant 0 : index
      %c0_19 = arith.constant 0 : index
      %16 = vector.load %arg7[%c0_16, %c0_17, %c0_18, %c0_19] : memref<1x1x512x128xbf16, #tpu.memory_space<vmem>>, vector<1x1x512x128xbf16>
      %17 = vector.shape_cast %16 : vector<1x1x512x128xbf16> to vector<512x128xbf16>
      %18 = vector.shape_cast %15 : vector<512x128xbf16> to vector<1x1x512x128xbf16>
      tpu.vector_store %arg7[%c0_16, %c0_17, %c0_18, %c0_19], %18 {strides = array<i32>} : memref<1x1x512x128xbf16, #tpu.memory_space<vmem>>, vector<1x1x512x128xbf16>,
      %cst_20 = arith.constant dense<0.000000e+00> : vector<128xf32>
      %19 = vector.multi_reduction <add>, %14, %cst_20 [0] : vector<512x128xf32> to vector<128xf32>
      %20 = vector.shape_cast %19 : vector<128xf32> to vector<1x128xf32>
      %21 = arith.mulf %14, %14 : vector<512x128xf32>
      %cst_21 = arith.constant dense<0.000000e+00> : vector<128xf32>
      %22 = vector.multi_reduction <add>, %21, %cst_21 [0] : vector<512x128xf32> to vector<128xf32>
      %23 = vector.shape_cast %22 : vector<128xf32> to vector<1x128xf32>
      %cst_22 = arith.constant 0.000000e+00 : f32
      %24 = vector.broadcast %cst_22 : f32 to vector<6x128xf32>
      %25 = tpu.concatenate %20, %23, %24 in 0 : vector<1x128xf32>, vector<1x128xf32>, vector<6x128xf32> -> vector<8x128xf32>
      %26 = vector.shape_cast %25 : vector<8x128xf32> to vector<1x8x128xf32>
      %c0_23 = arith.constant 0 : index
      %c0_24 = arith.constant 0 : index
      %c0_25 = arith.constant 0 : index
      %c0_26 = arith.constant 0 : index
      %c0_27 = arith.constant 0 : index
      %27 = vector.load %arg8[%c0_23, %c0_24, %c0_25, %c0_26, %c0_27] : memref<1x1x1x8x128xf32, #tpu.memory_space<vmem>>, vector<1x1x1x8x128xf32>
      %28 = vector.shape_cast %27 : vector<1x1x1x8x128xf32> to vector<1x8x128xf32>
      %29 = vector.shape_cast %26 : vector<1x8x128xf32> to vector<1x1x1x8x128xf32>
      tpu.vector_store %arg8[%c0_23, %c0_24, %c0_25, %c0_26, %c0_27], %29 {strides = array<i32>} : memref<1x1x1x8x128xf32, #tpu.memory_space<vmem>>, vector<1x1x1x8x128xf32>,
    } else {
    }
    return
  }
  func.func @transform_0(%arg0: i32, %arg1: i32, %arg2: i32, %arg3: i32, %arg4: i32) -> (i32, i32, i32, i32) {
    %c0_i32 = arith.constant 0 : i32
    return %arg0, %arg1, %arg3, %arg4 : i32, i32, i32, i32
  }
  func.func @transform_1(%arg0: i32, %arg1: i32, %arg2: i32, %arg3: i32, %arg4: i32) -> (i32, i32, i32, i32) {
    %c0_i32 = arith.constant 0 : i32
    return %arg0, %arg1, %arg4, %arg2 : i32, i32, i32, i32
  }
  func.func @transform_2(%arg0: i32, %arg1: i32, %arg2: i32, %arg3: i32, %arg4: i32) -> (i32, i32, i32, i32) {
    %c0_i32 = arith.constant 0 : i32
    return %arg0, %arg1, %arg3, %arg2 : i32, i32, i32, i32
  }
  func.func @transform_3(%arg0: i32, %arg1: i32, %arg2: i32, %arg3: i32, %arg4: i32) -> (i32, i32, i32, i32, i32) {
    %c0_i32 = arith.constant 0 : i32
    %c0_i32_0 = arith.constant 0 : i32
    return %arg0, %arg1, %arg3, %c0_i32, %arg2 : i32, i32, i32, i32, i32
  }
}

module attributes {stable_mosaic.version = 11 : i64} {
  func.func @_mm_tanh_kernel(%arg0: i32, %arg1: i32, %arg2: i32, %arg3: memref<512x768xbf16, #tpu.memory_space<vmem>>, %arg4: memref<768x128xbf16, #tpu.memory_space<vmem>>, %arg5: memref<512x128xbf16, #tpu.memory_space<vmem>>, %arg6: memref<512x128xf32, #tpu.memory_space<vmem>>) attributes {dimension_semantics = [#tpu.dimension_semantics<parallel>, #tpu.dimension_semantics<parallel>, #tpu.dimension_semantics<arbitrary>], iteration_bounds = array<i64: 1, 9, 1>, scalar_prefetch = 0 : i64, scratch_operands = 1 : i64, tpu.core_type = #tpu.core_type<tc>, window_params = [{transform_indices = @transform_0, window_bounds = array<i64: 512, 768>}, {transform_indices = @transform_1, window_bounds = array<i64: 768, 128>}, {transform_indices = @transform_2, window_bounds = array<i64: 512, 128>}]} {
    %c0_i32 = arith.constant 0 : i32
    %0 = arith.cmpi eq, %arg2, %c0_i32 : i32
    %1 = arith.extui %0 : i1 to i32
    %c0_i32_0 = arith.constant 0 : i32
    %2 = arith.cmpi ne, %1, %c0_i32_0 : i32
    scf.if %2 {
      %cst_10 = arith.constant 0.000000e+00 : f32
      %12 = vector.broadcast %cst_10 : f32 to vector<512x128xf32>
      %c0_11 = arith.constant 0 : index
      %c0_12 = arith.constant 0 : index
      %13 = vector.load %arg6[%c0_11, %c0_12] : memref<512x128xf32, #tpu.memory_space<vmem>>, vector<512x128xf32>
      tpu.vector_store %arg6[%c0_11, %c0_12], %12 {strides = array<i32>} : memref<512x128xf32, #tpu.memory_space<vmem>>, vector<512x128xf32>,
    } else {
    }
    %c0 = arith.constant 0 : index
    %c0_1 = arith.constant 0 : index
    %3 = vector.load %arg6[%c0, %c0_1] : memref<512x128xf32, #tpu.memory_space<vmem>>, vector<512x128xf32>
    %c0_2 = arith.constant 0 : index
    %c0_3 = arith.constant 0 : index
    %4 = vector.load %arg3[%c0_2, %c0_3] : memref<512x768xbf16, #tpu.memory_space<vmem>>, vector<512x768xbf16>
    %c0_4 = arith.constant 0 : index
    %c0_5 = arith.constant 0 : index
    %5 = vector.load %arg4[%c0_4, %c0_5] : memref<768x128xbf16, #tpu.memory_space<vmem>>, vector<768x128xbf16>
    %cst = arith.constant dense<0.000000e+00> : vector<512x128xf32>
    %6 = tpu.matmul %4, %5, %cst {dimension_numbers = #tpu.dot_dimension_numbers<[1], [0], [0], [1], [0, 0, 1, 1], [], []>} : vector<512x768xbf16>, vector<768x128xbf16>, vector<512x128xf32> -> vector<512x128xf32>
    %7 = arith.addf %3, %6 : vector<512x128xf32>
    %c0_6 = arith.constant 0 : index
    %c0_7 = arith.constant 0 : index
    %8 = vector.load %arg6[%c0_6, %c0_7] : memref<512x128xf32, #tpu.memory_space<vmem>>, vector<512x128xf32>
    tpu.vector_store %arg6[%c0_6, %c0_7], %7 {strides = array<i32>} : memref<512x128xf32, #tpu.memory_space<vmem>>, vector<512x128xf32>,
    %c0_i32_8 = arith.constant 0 : i32
    %9 = arith.cmpi eq, %arg2, %c0_i32_8 : i32
    %10 = arith.extui %9 : i1 to i32
    %c0_i32_9 = arith.constant 0 : i32
    %11 = arith.cmpi ne, %10, %c0_i32_9 : i32
    scf.if %11 {
      %c0_10 = arith.constant 0 : index
      %c0_11 = arith.constant 0 : index
      %12 = vector.load %arg6[%c0_10, %c0_11] : memref<512x128xf32, #tpu.memory_space<vmem>>, vector<512x128xf32>
      %13 = math.tanh %12 : vector<512x128xf32>
      %14 = arith.truncf %13 : vector<512x128xf32> to vector<512x128xbf16>
      %c0_12 = arith.constant 0 : index
      %c0_13 = arith.constant 0 : index
      %15 = vector.load %arg5[%c0_12, %c0_13] : memref<512x128xbf16, #tpu.memory_space<vmem>>, vector<512x128xbf16>
      tpu.vector_store %arg5[%c0_12, %c0_13], %14 {strides = array<i32>} : memref<512x128xbf16, #tpu.memory_space<vmem>>, vector<512x128xbf16>,
    } else {
    }
    return
  }
  func.func @transform_0(%arg0: i32, %arg1: i32, %arg2: i32) -> (i32, i32) {
    %c0_i32 = arith.constant 0 : i32
    return %arg1, %arg2 : i32, i32
  }
  func.func @transform_1(%arg0: i32, %arg1: i32, %arg2: i32) -> (i32, i32) {
    %c0_i32 = arith.constant 0 : i32
    return %arg2, %arg0 : i32, i32
  }
  func.func @transform_2(%arg0: i32, %arg1: i32, %arg2: i32) -> (i32, i32) {
    %c0_i32 = arith.constant 0 : i32
    return %arg1, %arg0 : i32, i32
  }
}

</mosaic_0001>

<bundles_post_ra>
// kernel: generator_forward.5
= control target key start
LH: loop header
LB: loop body
LE: loop exit
PB: predicated region body
PF: predicated region fallthrough
CT: control target
= control target key end

     0   :  { %9 = vsyncpa [#allocation4], 0  ;;  %s2795_s0 = inlined_call_operand.vmem [shape: bf16[1,1,8,128], index: 0, kind: input, shape index: {}]   ;;  %s2796_s1 = inlined_call_operand.hbm [shape: bf16[1,1,128,6144], index: 1, kind: input, shape index: {}]   ;;  %s2797_s2 = inlined_call_operand.vmem [shape: bf16[1,1,8,6144], index: 2, kind: output, shape index: {0}]   ;;  %s2798_s3 = inlined_call_operand.vmem [shape: f32[1,1,1,8,6144], index: 3, kind: output, shape index: {1}]  }
   0x1   :  { %11 = vsyncpa [#allocation4 + $0x1], 0  ;;  %s2452_s12 = smov 0   ;;  %s2454_s13 = smov 0  }
   0x2   :  { %s2456_s14 = smov 0   ;;  %s2458_s15 = smov 0  }
   0x3   :  { %s2460_s16 = smov 0   ;;  %s2462_s17 = smov 0  }
   0x4 LB: > { %s2125_s18 = sadd.s32 4294967295, %s2425_s17   ;;  %s42_s19 = sadd.s32 1, %s2421_s16  ;;  %s2425_s17 = sphi %s2462_s17, %s17_s17   ;;  %s2421_s16 = sphi %s2460_s16, %s2807_s16   ;;  %s2417_s15 = sphi %s2458_s15, %s2806_s15   ;;  %s2413_s14 = sphi %s2456_s14, %s2805_s14   ;;  %s2409_s13 = sphi %s2454_s13, %s2804_s13   ;;  %s2405_s12 = sphi %s2452_s12, %s2803_s12  }
   0x5   : > { %p44_p0 = scmp.ge.s32.totalorder %s42_s19, 3  ;;  %s95_s20 = sadd.s32 1, %s2413_s14 }
   0x6   : > { %p102_p1 = scmp.ne.s32.totalorder %s2413_s14, %s2409_s13  ;;  %p103_p2 = scmp.eq.s32.totalorder %s2425_s17, 0 }
   0x7   : > { %s2809_s19 = smov (%p44_p0, %s42_s19), 0  ;;  %p108_p4 = scmp.ne.s32.totalorder %s2409_s13, %s2405_s12 }
   0x8   : > { %p2488_p3 = por %p103_p2, %p102_p1  ;;  %s91_s22 = ssub.s32 %s2421_s16, %s2809_s19 }
   0x9   : > { %p109_p5 = scmp.eq.s32.totalorder %s2125_s18, 0  ;;  %p93_p6 = scmp.eq.s32.totalorder %s91_s22, 0 }
   0xa   : > { %p2292_p8 = scmp.lt.s32.totalorder %s2425_s17, 3  ;;  %s212_s25 = sand.u32 1, %s2413_s14  }
   0xb   : > { %p2495_p7 = por %p109_p5, %p108_p4  ;;  %s2277_s26 = sshll.u32 %s2421_s16, 10 }
   0xc   : > { %s2501_s24 = scalar_select %p93_p6, %s2413_s14, %s95_s20  }
   0xd   : > { %s2130_s27 = sshll.u32 %s212_s25, 10  ;;  %s2508_s30 = scalar_lea.hbm %s2796_s1, %s2277_s26 }
   0xe   : > { %s216_s4 = scalar_lea.vmem [#allocation3], %s2130_s27  ;;  %p2512_p9 = pnand %p2292_p8, %p2488_p3 }
   0xf   : > { %s230_s5 = sshll.u32 %s216_s4, 4  ;;  %s2519_s7 = scalar_lea.sflag [#allocation4], %s212_s25  ;;  %s2516_s5 = int_to_ptr.vmem [resolvable:$true] %s230_s5 }
  0x10   : > { %s2345_s8 = scalar_lea.hbm %s2508_s30, 16384  ;;  %p2347_p12 = pneg %p2512_p9 }
  0x11   : > { %p2346_p11 = scmp.ne.s32.totalorder %s2508_s30, %s2345_s8  ;;  %s2350_s11 = scalar_lea.hbm %s2796_s1, 49152 }
  0x12   : > { %p2351_p1 = scmp.lt.u32.totalorder %s2508_s30, %s2796_s1  ;;  %p2352_p2 = scmp.lt.u32.totalorder %s2350_s11, %s2345_s8 }
  0x13   : > { %p2348_p13 = pnand %p2347_p12, %p2346_p11  ;;  %p2354_p4 = scmp.lt.u32.totalorder %s2345_s8, %s2508_s30 }
  0x14   : > { %p2353_p3 = por %p2352_p2, %p2351_p1 }
  0x15   : > { %p2349_p0 = pneg %p2348_p13 }
  0x16   : > { %p2355_p5 = por %p2354_p4, %p2353_p3 }
  0x18   : > { %p2356_p6 = pnand %p2355_p5, %p2349_p0 }
  0x1a   : > { %2359 = shalt.err (!%p2356_p6)
}
  0x1b   : > { %s2360_s20 = scalar_lea.vmem %s2516_s5, 16384  ;;  %s2427_s21 = smov [#allocation3]  }
  0x1c   : > { %p2361_p8 = scmp.ne.s32.totalorder %s2516_s5, %s2360_s20  ;;  %s2365_s22 = sshll.u32 %s2427_s21, 4  ;;  %s2366_s22 = int_to_ptr.vmem [resolvable:$false] %s2365_s22 }
  0x1d   : > { %s2367_s25 = scalar_lea.vmem %s2366_s22, 32768  ;;  %p2368_p10 = scmp.lt.s32.totalorder %s2516_s5, %s2366_s22 }
  0x1e   : > { %p2363_p11 = pnand %p2361_p8, %p2347_p12  ;;  %p2369_p1 = scmp.lt.s32.totalorder %s2367_s25, %s2360_s20 }
  0x20   : > { %p2364_p13 = pneg %p2363_p11  ;;  %p2370_p2 = por %p2369_p1, %p2368_p10 }
  0x22   : > { %p2371_p3 = pnand %p2370_p2, %p2364_p13 }
  0x24   : > { %2374 = shalt.err (!%p2371_p3)
}
  0x25   : > { %s2428_s26 = smov 3072   ;;  %s2429_s27 = smov 1024  }
  0x26   : > { %s2430_s28 = smov 64   ;;  %p238_p12 = scmp.lt.s32.totalorder %s2425_s17, 4 }
  0x27   : > { %2291 = dma.hbm_to_vmem [thread:$0]  (!%p2512_p9), %s2508_s30, 16384, %s2516_s5, %s2519_s7, %s2428_s26, %s2429_s27, %s2430_s28  }
  0x28   : > { %p2802_p0 = scmp.ge.s32.totalorder %s2425_s17, 1 }
  0x2a   : > { %p239_p4 = pnand %p2802_p0, %p238_p12 }
  0x2b   : > { %s244_s29 = sand.u32 (!%p239_p4), 1, %s2409_s13  }
  0x2c   : > { %242 = sbr.rel (%p239_p4) target bundleno = 416 (0x1a0), region = 28  ;;  %s2134_s4 = sshll.u32 (!%p239_p4), %s244_s29, 10 }
  0x2d   : > { %s245_s8 = scalar_lea.sflag (!%p239_p4), [#allocation4], %s244_s29  ;;  %s2551_s9 = scalar_lea.vmem (!%p239_p4), [#allocation3], %s2134_s4 }
  0x33   : > { %2400 = dma.done.wait (%p2495_p7), %s245_s8, 16384  }
  0x34   : > { %2402 = vsyncadd (%p2495_p7), %s245_s8, 4294950912  ;;  %v2431_v0 = vmov 0   ;;  %v402_v1 = vld [vmem:[%s2551_s9] sm:$0xff]  ;;  %v403_v3 = vld [vmem:[%s2551_s9 + $0x8] sm:$0xff]  ;;  %s2135_s5 = sshll.u32 %s2417_s15, 4  ;;  %vm1829_vm0 = vcmask 1040384  }
  0x35   : > { %1202 = vmatprep.mubr.bf16.mxu0 %v2431_v0  ;;  %1243 = vmatprep.mubr.bf16.mxu1 %v2431_v0  ;;  %v410_v2 = vld [vmem:[%s2551_s9 + $0x40] sm:$0xff]  ;;  %v411_v5 = vld [vmem:[%s2551_s9 + $0x48] sm:$0xff]  ;;  %v404_v63 = vld [vmem:[%s2551_s9 + $0x10] sm:$0xff]  ;;  %p335_p7 = scmp.lt.s32.totalorder %s2135_s5, 47  ;;  %vm1846_vm1 = vcmask 1041408  }
  0x36   : > { %v2140_v4 = vcombine.high %v402_v1, %v410_v2  ;;  %v2139_v6 = vcombine.low %v402_v1, %v410_v2  ;;  %v418_v7 = vld [vmem:[%s2551_s9 + $0x80] sm:$0xff]  ;;  %v2142_v9 = vcombine.high %v403_v3, %v411_v5  ;;  %v2141_v10 = vcombine.low %v403_v3, %v411_v5  ;;  %v419_v12 = vld [vmem:[%s2551_s9 + $0x88] sm:$0xff]  ;;  %v412_v1 = vld [vmem:[%s2551_s9 + $0x50] sm:$0xff] }
  0x37   : > { %v426_v8 = vld [vmem:[%s2551_s9 + $0xc0] sm:$0xff]  ;;  %v427_v13 = vld [vmem:[%s2551_s9 + $0xc8] sm:$0xff]  ;;  %v405_v2 = vld [vmem:[%s2551_s9 + $0x18] sm:$0xff]  ;;  %s2811_s5 = smov (!%p335_p7, %s2135_s5), 47 }
  0x38   : > { %v2156_v11 = vcombine.high %v418_v7, %v426_v8  ;;  %v434_v14 = vld [vmem:[%s2551_s9 + $0x100] sm:$0xff]  ;;  %1170 = vmatprep.subr.bf16.mxu0 %v2140_v4  ;;  %v2158_v15 = vcombine.high %v419_v12, %v427_v13  ;;  %v435_v17 = vld [vmem:[%s2551_s9 + $0x108] sm:$0xff]  ;;  %1211 = vmatprep.subr.bf16.mxu1 %v2142_v9  ;;  %v2155_v19 = vcombine.low %v418_v7, %v426_v8  ;;  %v413_v3 = vld [vmem:[%s2551_s9 + $0x58] sm:$0xff]  ;;  %s2136_s6 = sshll.u32 %s2811_s5, 2  ;;  %s2138_s15 = sshll.u32 %s2811_s5, 3 }
  0x39   : > { %v442_v16 = vld [vmem:[%s2551_s9 + $0x140] sm:$0xff]  ;;  %v443_v18 = vld [vmem:[%s2551_s9 + $0x148] sm:$0xff]  ;;  %1171 = vmatpush1.bf16.msra.mxu0 %v2139_v6  ;;  %1212 = vmatpush1.bf16.msra.mxu1 %v2141_v10  ;;  %v2157_v20 = vcombine.low %v419_v12, %v427_v13  ;;  %v2144_v6 = vcombine.high %v404_v63, %v412_v1  ;;  %v2146_v7 = vcombine.high %v405_v2, %v413_v3  ;;  %v420_v8 = vld [vmem:[%s2551_s9 + $0x90] sm:$0xff]  ;;  %s2713_s11 = scalar_lea.vmem %s2797_s2, %s2136_s6  ;;  %s2721_s20 = scalar_lea.vmem %s2798_s3, %s2138_s15 }
  0x3a   : > { %1172 = vmatprep.subr.bf16.mxu0 %v2156_v11  ;;  %v2172_v21 = vcombine.high %v434_v14, %v442_v16  ;;  %1213 = vmatprep.subr.bf16.mxu1 %v2158_v15  ;;  %v2174_v22 = vcombine.high %v435_v17, %v443_v18  ;;  %v450_v23 = vld [vmem:[%s2551_s9 + $0x180] sm:$0xff]  ;;  %v451_v25 = vld [vmem:[%s2551_s9 + $0x188] sm:$0xff]  ;;  %v2171_v27 = vcombine.low %v434_v14, %v442_v16  ;;  %v428_v9 = vld [vmem:[%s2551_s9 + $0xd0] sm:$0xff] }
  0x3b   : > { %v458_v24 = vld [vmem:[%s2551_s9 + $0x1c0] sm:$0xff]  ;;  %v459_v26 = vld [vmem:[%s2551_s9 + $0x1c8] sm:$0xff]  ;;  %v2173_v28 = vcombine.low %v435_v17, %v443_v18  ;;  %v421_v10 = vld [vmem:[%s2551_s9 + $0x98] sm:$0xff]  ;;  %v2143_v13 = vcombine.low %v404_v63, %v412_v1  ;;  %v2145_v14 = vcombine.low %v405_v2, %v413_v3  ;;  %v2160_v15 = vcombine.high %v420_v8, %v428_v9 }
  0x3c   : > { %v2188_v29 = vcombine.high %v450_v23, %v458_v24  ;;  %v2190_v30 = vcombine.high %v451_v25, %v459_v26  ;;  %v466_v31 = vld [vmem:[%s2551_s9 + $0x200] sm:$0xff]  ;;  %v467_v33 = vld [vmem:[%s2551_s9 + $0x208] sm:$0xff]  ;;  %v2187_v35 = vcombine.low %v450_v23, %v458_v24  ;;  %v2189_v36 = vcombine.low %v451_v25, %v459_v26  ;;  %v429_v11 = vld [vmem:[%s2551_s9 + $0xd8] sm:$0xff] }
  0x3d   : > { %1173 = vmatpush1.bf16.msra.mxu0 %v2155_v19  ;;  %1214 = vmatpush1.bf16.msra.mxu1 %v2157_v20  ;;  %v474_v32 = vld [vmem:[%s2551_s9 + $0x240] sm:$0xff]  ;;  %v475_v34 = vld [vmem:[%s2551_s9 + $0x248] sm:$0xff]  ;;  %v2162_v16 = vcombine.high %v421_v10, %v429_v11  ;;  %v436_v17 = vld [vmem:[%s2551_s9 + $0x110] sm:$0xff] }
  0x3e   : > { %1174 = vmatprep.subr.bf16.mxu0 %v2172_v21  ;;  %1215 = vmatprep.subr.bf16.mxu1 %v2174_v22  ;;  %v2204_v37 = vcombine.high %v466_v31, %v474_v32  ;;  %v2206_v38 = vcombine.high %v467_v33, %v475_v34  ;;  %v482_v39 = vld [vmem:[%s2551_s9 + $0x280] sm:$0xff]  ;;  %v483_v41 = vld [vmem:[%s2551_s9 + $0x288] sm:$0xff]  ;;  %v2203_v43 = vcombine.low %v466_v31, %v474_v32  ;;  %v444_v18 = vld [vmem:[%s2551_s9 + $0x150] sm:$0xff] }
  0x3f   : > { %v490_v40 = vld [vmem:[%s2551_s9 + $0x2c0] sm:$0xff]  ;;  %v491_v42 = vld [vmem:[%s2551_s9 + $0x2c8] sm:$0xff]  ;;  %v2205_v44 = vcombine.low %v467_v33, %v475_v34  ;;  %v437_v19 = vld [vmem:[%s2551_s9 + $0x118] sm:$0xff]  ;;  %v2159_v21 = vcombine.low %v420_v8, %v428_v9  ;;  %v2161_v22 = vcombine.low %v421_v10, %v429_v11  ;;  %v2176_v23 = vcombine.high %v436_v17, %v444_v18 }
  0x40   : > { %v2220_v45 = vcombine.high %v482_v39, %v490_v40  ;;  %v2222_v46 = vcombine.high %v483_v41, %v491_v42  ;;  %v498_v47 = vld [vmem:[%s2551_s9 + $0x300] sm:$0xff]  ;;  %v499_v49 = vld [vmem:[%s2551_s9 + $0x308] sm:$0xff]  ;;  %v2219_v51 = vcombine.low %v482_v39, %v490_v40  ;;  %v2221_v52 = vcombine.low %v483_v41, %v491_v42  ;;  %v445_v20 = vld [vmem:[%s2551_s9 + $0x158] sm:$0xff] }
  0x41   : > { %1175 = vmatpush1.bf16.msra.mxu0 %v2171_v27  ;;  %1216 = vmatpush1.bf16.msra.mxu1 %v2173_v28  ;;  %v506_v48 = vld [vmem:[%s2551_s9 + $0x340] sm:$0xff]  ;;  %v507_v50 = vld [vmem:[%s2551_s9 + $0x348] sm:$0xff]  ;;  %v2178_v24 = vcombine.high %v437_v19, %v445_v20  ;;  %v452_v25 = vld [vmem:[%s2551_s9 + $0x190] sm:$0xff] }
  0x42   : > { %1176 = vmatprep.subr.bf16.mxu0 %v2188_v29  ;;  %1217 = vmatprep.subr.bf16.mxu1 %v2190_v30  ;;  %v2236_v53 = vcombine.high %v498_v47, %v506_v48  ;;  %v2238_v54 = vcombine.high %v499_v49, %v507_v50  ;;  %v514_v55 = vld [vmem:[%s2551_s9 + $0x380] sm:$0xff]  ;;  %v515_v57 = vld [vmem:[%s2551_s9 + $0x388] sm:$0xff]  ;;  %v2235_v59 = vcombine.low %v498_v47, %v506_v48  ;;  %v460_v26 = vld [vmem:[%s2551_s9 + $0x1d0] sm:$0xff] }
  0x43   : > { %v522_v56 = vld [vmem:[%s2551_s9 + $0x3c0] sm:$0xff]  ;;  %v523_v58 = vld [vmem:[%s2551_s9 + $0x3c8] sm:$0xff]  ;;  %v2237_v60 = vcombine.low %v499_v49, %v507_v50  ;;  %v453_v27 = vld [vmem:[%s2551_s9 + $0x198] sm:$0xff]  ;;  %v2175_v29 = vcombine.low %v436_v17, %v444_v18  ;;  %v2177_v30 = vcombine.low %v437_v19, %v445_v20  ;;  %v2192_v31 = vcombine.high %v452_v25, %v460_v26 }
  0x44   : > { %v2252_v61 = vcombine.high %v514_v55, %v522_v56  ;;  %v2254_v62 = vcombine.high %v515_v57, %v523_v58  ;;  %v2251_v4 = vcombine.low %v514_v55, %v522_v56  ;;  %v2253_v5 = vcombine.low %v515_v57, %v523_v58  ;;  %v2602_v12 = vld [vmem:[%s2795_s0] sm:$0xf]  ;;  %v461_v28 = vld [vmem:[%s2551_s9 + $0x1d8] sm:$0xff]  ;;  %v468_v33 = vld [vmem:[%s2551_s9 + $0x210] sm:$0xff] }
  0x45   : > { %1177 = vmatpush1.bf16.msra.mxu0 %v2187_v35  ;;  %1218 = vmatpush1.bf16.msra.mxu1 %v2189_v36  ;;  %v2194_v32 = vcombine.high %v453_v27, %v461_v28  ;;  %v476_v34 = vld [vmem:[%s2551_s9 + $0x250] sm:$0xff]  ;;  %v469_v35 = vld [vmem:[%s2551_s9 + $0x218] sm:$0xff]  ;;  %v406_v2 = vld [vmem:[%s2551_s9 + $0x20] sm:$0xff] }
  0x46   : > { %1178 = vmatprep.subr.bf16.mxu0 %v2204_v37  ;;  %1219 = vmatprep.subr.bf16.mxu1 %v2206_v38  ;;  %v477_v36 = vld [vmem:[%s2551_s9 + $0x258] sm:$0xff]  ;;  %v2191_v37 = vcombine.low %v452_v25, %v460_v26  ;;  %v2193_v38 = vcombine.low %v453_v27, %v461_v28  ;;  %v2208_v39 = vcombine.high %v468_v33, %v476_v34  ;;  %v484_v41 = vld [vmem:[%s2551_s9 + $0x290] sm:$0xff]  ;;  %v414_v3 = vld [vmem:[%s2551_s9 + $0x60] sm:$0xff] }
  0x47   : > { %v2210_v40 = vcombine.high %v469_v35, %v477_v36  ;;  %v492_v42 = vld [vmem:[%s2551_s9 + $0x2d0] sm:$0xff]  ;;  %v2148_v8 = vcombine.high %v406_v2, %v414_v3  ;;  %v422_v10 = vld [vmem:[%s2551_s9 + $0xa0] sm:$0xff] }
  0x48   : > { %v2224_v47 = vcombine.high %v484_v41, %v492_v42  ;;  %v500_v49 = vld [vmem:[%s2551_s9 + $0x310] sm:$0xff]  ;;  %v430_v11 = vld [vmem:[%s2551_s9 + $0xe0] sm:$0xff] }
  0x49   : > { %1179 = vmatpush1.bf16.msra.mxu0 %v2203_v43  ;;  %1220 = vmatpush1.bf16.msra.mxu1 %v2205_v44  ;;  %v485_v43 = vld [vmem:[%s2551_s9 + $0x298] sm:$0xff]  ;;  %v508_v50 = vld [vmem:[%s2551_s9 + $0x350] sm:$0xff]  ;;  %v2164_v17 = vcombine.high %v422_v10, %v430_v11  ;;  %v438_v19 = vld [vmem:[%s2551_s9 + $0x120] sm:$0xff] }
  0x4a   : > { %1180 = vmatprep.subr.bf16.mxu0 %v2220_v45  ;;  %1221 = vmatprep.subr.bf16.mxu1 %v2222_v46  ;;  %v493_v44 = vld [vmem:[%s2551_s9 + $0x2d8] sm:$0xff]  ;;  %v2207_v45 = vcombine.low %v468_v33, %v476_v34  ;;  %v2209_v46 = vcombine.low %v469_v35, %v477_v36  ;;  %v2240_v55 = vcombine.high %v500_v49, %v508_v50  ;;  %v516_v57 = vld [vmem:[%s2551_s9 + $0x390] sm:$0xff]  ;;  %v446_v20 = vld [vmem:[%s2551_s9 + $0x160] sm:$0xff] }
  0x4b   : > { %v2226_v48 = vcombine.high %v485_v43, %v493_v44  ;;  %v524_v58 = vld [vmem:[%s2551_s9 + $0x3d0] sm:$0xff]  ;;  %v2180_v25 = vcombine.high %v438_v19, %v446_v20  ;;  %v454_v27 = vld [vmem:[%s2551_s9 + $0x1a0] sm:$0xff] }
  0x4c   : > { %v2256_v63 = vcombine.high %v516_v57, %v524_v58  ;;  %v462_v28 = vld [vmem:[%s2551_s9 + $0x1e0] sm:$0xff] }
  0x4d   : > { %1181 = vmatpush1.bf16.msra.mxu0 %v2219_v51  ;;  %1222 = vmatpush1.bf16.msra.mxu1 %v2221_v52  ;;  %v501_v51 = vld [vmem:[%s2551_s9 + $0x318] sm:$0xff]  ;;  %v2196_v33 = vcombine.high %v454_v27, %v462_v28  ;;  %v470_v35 = vld [vmem:[%s2551_s9 + $0x220] sm:$0xff] }
  0x4e   : > { %1182 = vmatprep.subr.bf16.mxu0 %v2236_v53  ;;  %1223 = vmatprep.subr.bf16.mxu1 %v2238_v54  ;;  %v509_v52 = vld [vmem:[%s2551_s9 + $0x358] sm:$0xff]  ;;  %v2223_v53 = vcombine.low %v484_v41, %v492_v42  ;;  %v2225_v54 = vcombine.low %v485_v43, %v493_v44  ;;  %v478_v36 = vld [vmem:[%s2551_s9 + $0x260] sm:$0xff] }
  0x4f   : > { %v2242_v56 = vcombine.high %v501_v51, %v509_v52  ;;  %v2212_v41 = vcombine.high %v470_v35, %v478_v36  ;;  %v486_v43 = vld [vmem:[%s2551_s9 + $0x2a0] sm:$0xff] }
  0x50   : > { %v494_v44 = vld [vmem:[%s2551_s9 + $0x2e0] sm:$0xff] }
  0x51   : > { %1183 = vmatpush1.bf16.msra.mxu0 %v2235_v59  ;;  %1224 = vmatpush1.bf16.msra.mxu1 %v2237_v60  ;;  %v517_v59 = vld [vmem:[%s2551_s9 + $0x398] sm:$0xff] }
  0x52   : > { %1184 = vmatprep.subr.bf16.mxu0 %v2252_v61  ;;  %1225 = vmatprep.subr.bf16.mxu1 %v2254_v62  ;;  %v525_v60 = vld [vmem:[%s2551_s9 + $0x3d8] sm:$0xff]  ;;  %v2239_v61 = vcombine.low %v500_v49, %v508_v50  ;;  %v2241_v62 = vcombine.low %v501_v51, %v509_v52  ;;  %v2228_v49 = vcombine.high %v486_v43, %v494_v44  ;;  %v502_v51 = vld [vmem:[%s2551_s9 + $0x320] sm:$0xff] }
  0x53   : > { %v2258_v1 = vcombine.high %v517_v59, %v525_v60  ;;  %v510_v52 = vld [vmem:[%s2551_s9 + $0x360] sm:$0xff] }
  0x55   : > { %1185 = vmatpush1.bf16.msra.mxu0 %v2251_v4  ;;  %1226 = vmatpush1.bf16.msra.mxu1 %v2253_v5  ;;  %v407_v4 = vld [vmem:[%s2551_s9 + $0x28] sm:$0xff] }
  0x56   : > { %1252 = vmatprep.subr.bf16.mxu0 %v2144_v6  ;;  %1293 = vmatprep.subr.bf16.mxu1 %v2146_v7  ;;  %v415_v5 = vld [vmem:[%s2551_s9 + $0x68] sm:$0xff]  ;;  %v2255_v6 = vcombine.low %v516_v57, %v524_v58  ;;  %v2257_v7 = vcombine.low %v517_v59, %v525_v60  ;;  %v2244_v57 = vcombine.high %v502_v51, %v510_v52  ;;  %v518_v59 = vld [vmem:[%s2551_s9 + $0x3a0] sm:$0xff] }
  0x57   : > { %v2150_v9 = vcombine.high %v407_v4, %v415_v5  ;;  %v526_v60 = vld [vmem:[%s2551_s9 + $0x3e0] sm:$0xff] }
  0x58   : > { %1203 = vmatmul.mubr.bf16.vlgmr.msra.gmra.mrb[0].mxu0 %v2602_v12  ;;  %1244 = vmatmul.mubr.bf16.vlgmr.msra.gmra.mrb[0].mxu1 %v2602_v12 }
  0x59   : > { %1253 = vmatpush1.bf16.msra.mxu0 %v2143_v13  ;;  %1294 = vmatpush1.bf16.msra.mxu1 %v2145_v14  ;;  %v423_v13 = vld [vmem:[%s2551_s9 + $0xa8] sm:$0xff] }
  0x5a   : > { %1254 = vmatprep.subr.bf16.mxu0 %v2160_v15  ;;  %1295 = vmatprep.subr.bf16.mxu1 %v2162_v16  ;;  %v431_v14 = vld [vmem:[%s2551_s9 + $0xe8] sm:$0xff]  ;;  %v2147_v15 = vcombine.low %v406_v2, %v414_v3  ;;  %v2149_v16 = vcombine.low %v407_v4, %v415_v5  ;;  %v2260_v2 = vcombine.high %v518_v59, %v526_v60  ;;  %v408_v4 = vld [vmem:[%s2551_s9 + $0x30] sm:$0xff] }
  0x5b   : > { %1284 = vmatprep.mubr.bf16.mxu0 %v2431_v0  ;;  %1325 = vmatprep.mubr.bf16.mxu1 %v2431_v0  ;;  %v2166_v18 = vcombine.high %v423_v13, %v431_v14  ;;  %v416_v5 = vld [vmem:[%s2551_s9 + $0x70] sm:$0xff] }
  0x5d   : > { %1255 = vmatpush1.bf16.msra.mxu0 %v2159_v21  ;;  %1296 = vmatpush1.bf16.msra.mxu1 %v2161_v22  ;;  %v439_v21 = vld [vmem:[%s2551_s9 + $0x128] sm:$0xff] }
  0x5e   : > { %1256 = vmatprep.subr.bf16.mxu0 %v2176_v23  ;;  %1297 = vmatprep.subr.bf16.mxu1 %v2178_v24  ;;  %v447_v22 = vld [vmem:[%s2551_s9 + $0x168] sm:$0xff]  ;;  %v2163_v23 = vcombine.low %v422_v10, %v430_v11  ;;  %v2165_v24 = vcombine.low %v423_v13, %v431_v14  ;;  %v2152_v10 = vcombine.high %v408_v4, %v416_v5  ;;  %v424_v13 = vld [vmem:[%s2551_s9 + $0xb0] sm:$0xff] }
  0x5f   : > { %v2182_v26 = vcombine.high %v439_v21, %v447_v22  ;;  %v432_v14 = vld [vmem:[%s2551_s9 + $0xf0] sm:$0xff] }
  0x61   : > { %1257 = vmatpush1.bf16.msra.mxu0 %v2175_v29  ;;  %1298 = vmatpush1.bf16.msra.mxu1 %v2177_v30  ;;  %v455_v29 = vld [vmem:[%s2551_s9 + $0x1a8] sm:$0xff] }
  0x62   : > { %1258 = vmatprep.subr.bf16.mxu0 %v2192_v31  ;;  %1299 = vmatprep.subr.bf16.mxu1 %v2194_v32  ;;  %v463_v30 = vld [vmem:[%s2551_s9 + $0x1e8] sm:$0xff]  ;;  %v2179_v31 = vcombine.low %v438_v19, %v446_v20  ;;  %v2181_v32 = vcombine.low %v439_v21, %v447_v22  ;;  %v2168_v19 = vcombine.high %v424_v13, %v432_v14  ;;  %v440_v21 = vld [vmem:[%s2551_s9 + $0x130] sm:$0xff] }
  0x63   : > { %v2198_v34 = vcombine.high %v455_v29, %v463_v30  ;;  %v448_v22 = vld [vmem:[%s2551_s9 + $0x170] sm:$0xff] }
  0x65   : > { %1259 = vmatpush1.bf16.msra.mxu0 %v2191_v37  ;;  %1300 = vmatpush1.bf16.msra.mxu1 %v2193_v38  ;;  %v471_v37 = vld [vmem:[%s2551_s9 + $0x228] sm:$0xff] }
  0x66   : > { %1260 = vmatprep.subr.bf16.mxu0 %v2208_v39  ;;  %1301 = vmatprep.subr.bf16.mxu1 %v2210_v40  ;;  %v479_v38 = vld [vmem:[%s2551_s9 + $0x268] sm:$0xff]  ;;  %v2195_v39 = vcombine.low %v454_v27, %v462_v28  ;;  %v2197_v40 = vcombine.low %v455_v29, %v463_v30  ;;  %v2184_v27 = vcombine.high %v440_v21, %v448_v22  ;;  %v456_v29 = vld [vmem:[%s2551_s9 + $0x1b0] sm:$0xff] }
  0x67   : > { %v2214_v42 = vcombine.high %v471_v37, %v479_v38  ;;  %v464_v30 = vld [vmem:[%s2551_s9 + $0x1f0] sm:$0xff] }
  0x69   : > { %1261 = vmatpush1.bf16.msra.mxu0 %v2207_v45  ;;  %1302 = vmatpush1.bf16.msra.mxu1 %v2209_v46  ;;  %v487_v45 = vld [vmem:[%s2551_s9 + $0x2a8] sm:$0xff] }
  0x6a   : > { %1262 = vmatprep.subr.bf16.mxu0 %v2224_v47  ;;  %1303 = vmatprep.subr.bf16.mxu1 %v2226_v48  ;;  %v495_v46 = vld [vmem:[%s2551_s9 + $0x2e8] sm:$0xff]  ;;  %v2211_v47 = vcombine.low %v470_v35, %v478_v36  ;;  %v2213_v48 = vcombine.low %v471_v37, %v479_v38  ;;  %v2200_v35 = vcombine.high %v456_v29, %v464_v30  ;;  %v472_v37 = vld [vmem:[%s2551_s9 + $0x230] sm:$0xff] }
  0x6b   : > { %v2230_v50 = vcombine.high %v487_v45, %v495_v46  ;;  %v480_v38 = vld [vmem:[%s2551_s9 + $0x270] sm:$0xff] }
  0x6d   : > { %1263 = vmatpush1.bf16.msra.mxu0 %v2223_v53  ;;  %1304 = vmatpush1.bf16.msra.mxu1 %v2225_v54  ;;  %v503_v53 = vld [vmem:[%s2551_s9 + $0x328] sm:$0xff] }
  0x6e   : > { %1264 = vmatprep.subr.bf16.mxu0 %v2240_v55  ;;  %1305 = vmatprep.subr.bf16.mxu1 %v2242_v56  ;;  %v511_v54 = vld [vmem:[%s2551_s9 + $0x368] sm:$0xff]  ;;  %v2227_v55 = vcombine.low %v486_v43, %v494_v44  ;;  %v2229_v56 = vcombine.low %v487_v45, %v495_v46  ;;  %v488_v44 = vld [vmem:[%s2551_s9 + $0x2b0] sm:$0xff]  ;;  %v489_v46 = vld [vmem:[%s2551_s9 + $0x2b8] sm:$0xff] }
  0x6f   : > { %v2246_v58 = vcombine.high %v503_v53, %v511_v54  ;;  %v496_v45 = vld [vmem:[%s2551_s9 + $0x2f0] sm:$0xff] }
  0x71   : > { %1265 = vmatpush1.bf16.msra.mxu0 %v2239_v61  ;;  %1306 = vmatpush1.bf16.msra.mxu1 %v2241_v62  ;;  %v519_v61 = vld [vmem:[%s2551_s9 + $0x3a8] sm:$0xff] }
  0x72   : > { %1266 = vmatprep.subr.bf16.mxu0 %v2256_v63  ;;  %1307 = vmatprep.subr.bf16.mxu1 %v2258_v1  ;;  %v527_v62 = vld [vmem:[%s2551_s9 + $0x3e8] sm:$0xff]  ;;  %v2243_v63 = vcombine.low %v502_v51, %v510_v52  ;;  %v2245_v1 = vcombine.low %v503_v53, %v511_v54  ;;  %v504_v52 = vld [vmem:[%s2551_s9 + $0x330] sm:$0xff]  ;;  %v505_v54 = vld [vmem:[%s2551_s9 + $0x338] sm:$0xff] }
  0x73   : > { %v2262_v3 = vcombine.high %v519_v61, %v527_v62  ;;  %v512_v53 = vld [vmem:[%s2551_s9 + $0x370] sm:$0xff] }
  0x75   : > { %1267 = vmatpush1.bf16.msra.mxu0 %v2255_v6  ;;  %1308 = vmatpush1.bf16.msra.mxu1 %v2257_v7  ;;  %v409_v6 = vld [vmem:[%s2551_s9 + $0x38] sm:$0xff] }
  0x76   : > { %1334 = vmatprep.subr.bf16.mxu0 %v2148_v8  ;;  %1375 = vmatprep.subr.bf16.mxu1 %v2150_v9  ;;  %v417_v7 = vld [vmem:[%s2551_s9 + $0x78] sm:$0xff]  ;;  %v2259_v8 = vcombine.low %v518_v59, %v526_v60  ;;  %v2261_v9 = vcombine.low %v519_v61, %v527_v62  ;;  %v520_v60 = vld [vmem:[%s2551_s9 + $0x3b0] sm:$0xff] }
  0x77   : > { %v2154_v11 = vcombine.high %v409_v6, %v417_v7  ;;  %v528_v61 = vld [vmem:[%s2551_s9 + $0x3f0] sm:$0xff]  ;;  %v521_v62 = vld [vmem:[%s2551_s9 + $0x3b8] sm:$0xff] }
  0x78   : > { %1285 = vmatmul.mubr.bf16.vlgmr.msra.gmra.mrb[4].mxu0 %v2602_v12  ;;  %1326 = vmatmul.mubr.bf16.vlgmr.msra.gmra.mrb[4].mxu1 %v2602_v12 }
  0x79   : > { %1335 = vmatpush1.bf16.msra.mxu0 %v2147_v15  ;;  %1376 = vmatpush1.bf16.msra.mxu1 %v2149_v16  ;;  %v425_v15 = vld [vmem:[%s2551_s9 + $0xb8] sm:$0xff] }
  0x7a   : > { %1336 = vmatprep.subr.bf16.mxu0 %v2164_v17  ;;  %1377 = vmatprep.subr.bf16.mxu1 %v2166_v18  ;;  %v433_v16 = vld [vmem:[%s2551_s9 + $0xf8] sm:$0xff]  ;;  %v2151_v17 = vcombine.low %v408_v4, %v416_v5  ;;  %v2153_v18 = vcombine.low %v409_v6, %v417_v7  ;;  %v2263_v5 = vcombine.low %v520_v60, %v528_v61 }
  0x7b   : > { %1366 = vmatprep.mubr.bf16.mxu0 %v2431_v0  ;;  %1407 = vmatprep.mubr.bf16.mxu1 %v2431_v0  ;;  %v2170_v20 = vcombine.high %v425_v15, %v433_v16 }
  0x7d   : > { %1337 = vmatpush1.bf16.msra.mxu0 %v2163_v23  ;;  %1378 = vmatpush1.bf16.msra.mxu1 %v2165_v24  ;;  %v441_v23 = vld [vmem:[%s2551_s9 + $0x138] sm:$0xff] }
  0x7e   : > { %1338 = vmatprep.subr.bf16.mxu0 %v2180_v25  ;;  %1379 = vmatprep.subr.bf16.mxu1 %v2182_v26  ;;  %v449_v24 = vld [vmem:[%s2551_s9 + $0x178] sm:$0xff]  ;;  %v2167_v25 = vcombine.low %v424_v13, %v432_v14  ;;  %v2169_v26 = vcombine.low %v425_v15, %v433_v16 }
  0x7f   : > { %v2186_v28 = vcombine.high %v441_v23, %v449_v24 }
  0x81   : > { %1339 = vmatpush1.bf16.msra.mxu0 %v2179_v31  ;;  %1380 = vmatpush1.bf16.msra.mxu1 %v2181_v32  ;;  %v457_v31 = vld [vmem:[%s2551_s9 + $0x1b8] sm:$0xff] }
  0x82   : > { %1340 = vmatprep.subr.bf16.mxu0 %v2196_v33  ;;  %1381 = vmatprep.subr.bf16.mxu1 %v2198_v34  ;;  %v465_v32 = vld [vmem:[%s2551_s9 + $0x1f8] sm:$0xff]  ;;  %v2183_v33 = vcombine.low %v440_v21, %v448_v22  ;;  %v2185_v34 = vcombine.low %v441_v23, %v449_v24 }
  0x83   : > { %v2202_v36 = vcombine.high %v457_v31, %v465_v32 }
  0x85   : > { %1341 = vmatpush1.bf16.msra.mxu0 %v2195_v39  ;;  %1382 = vmatpush1.bf16.msra.mxu1 %v2197_v40  ;;  %v473_v39 = vld [vmem:[%s2551_s9 + $0x238] sm:$0xff] }
  0x86   : > { %1342 = vmatprep.subr.bf16.mxu0 %v2212_v41  ;;  %1383 = vmatprep.subr.bf16.mxu1 %v2214_v42  ;;  %v481_v40 = vld [vmem:[%s2551_s9 + $0x278] sm:$0xff]  ;;  %v2199_v41 = vcombine.low %v456_v29, %v464_v30  ;;  %v2216_v42 = vcombine.high %v472_v37, %v480_v38 }
  0x87   : > { %v2218_v43 = vcombine.high %v473_v39, %v481_v40 }
  0x89   : > { %1343 = vmatpush1.bf16.msra.mxu0 %v2211_v47  ;;  %1384 = vmatpush1.bf16.msra.mxu1 %v2213_v48  ;;  %v497_v47 = vld [vmem:[%s2551_s9 + $0x2f8] sm:$0xff]  ;;  %v2215_v48 = vcombine.low %v472_v37, %v480_v38 }
  0x8a   : > { %1344 = vmatprep.subr.bf16.mxu0 %v2228_v49  ;;  %1385 = vmatprep.subr.bf16.mxu1 %v2230_v50  ;;  %v2217_v49 = vcombine.low %v473_v39, %v481_v40  ;;  %v2232_v50 = vcombine.high %v488_v44, %v496_v45  ;;  %v2234_v51 = vcombine.high %v489_v46, %v497_v47 }
  0x8d   : > { %1345 = vmatpush1.bf16.msra.mxu0 %v2227_v55  ;;  %1386 = vmatpush1.bf16.msra.mxu1 %v2229_v56  ;;  %v513_v55 = vld [vmem:[%s2551_s9 + $0x378] sm:$0xff]  ;;  %v2231_v56 = vcombine.low %v488_v44, %v496_v45 }
  0x8e   : > { %1346 = vmatprep.subr.bf16.mxu0 %v2244_v57  ;;  %1387 = vmatprep.subr.bf16.mxu1 %v2246_v58  ;;  %v2233_v57 = vcombine.low %v489_v46, %v497_v47  ;;  %v2248_v58 = vcombine.high %v504_v52, %v512_v53  ;;  %v2250_v59 = vcombine.high %v505_v54, %v513_v55 }
  0x91   : > { %1347 = vmatpush1.bf16.msra.mxu0 %v2243_v63  ;;  %1388 = vmatpush1.bf16.msra.mxu1 %v2245_v1  ;;  %v529_v63 = vld [vmem:[%s2551_s9 + $0x3f8] sm:$0xff]  ;;  %v2247_v1 = vcombine.low %v504_v52, %v512_v53 }
  0x92   : > { %1348 = vmatprep.subr.bf16.mxu0 %v2260_v2  ;;  %1389 = vmatprep.subr.bf16.mxu1 %v2262_v3  ;;  %v2249_v2 = vcombine.low %v505_v54, %v513_v55  ;;  %v2264_v3 = vcombine.high %v520_v60, %v528_v61  ;;  %v2266_v4 = vcombine.high %v521_v62, %v529_v63 }
  0x93   : > { %v2265_v6 = vcombine.low %v521_v62, %v529_v63 }
  0x95   : > { %1349 = vmatpush1.bf16.msra.mxu0 %v2259_v8  ;;  %1390 = vmatpush1.bf16.msra.mxu1 %v2261_v9 }
  0x96   : > { %1416 = vmatprep.subr.bf16.mxu0 %v2152_v10  ;;  %1457 = vmatprep.subr.bf16.mxu1 %v2154_v11 }
  0x98   : > { %1367 = vmatmul.mubr.bf16.vlgmr.msra.gmra.mrb[8].mxu0 %v2602_v12  ;;  %1408 = vmatmul.mubr.bf16.vlgmr.msra.gmra.mrb[8].mxu1 %v2602_v12 }
  0x99   : > { %1417 = vmatpush1.bf16.msra.mxu0 %v2151_v17  ;;  %1458 = vmatpush1.bf16.msra.mxu1 %v2153_v18 }
  0x9a   : > { %1418 = vmatprep.subr.bf16.mxu0 %v2168_v19  ;;  %1459 = vmatprep.subr.bf16.mxu1 %v2170_v20 }
  0x9b   : > { %1448 = vmatprep.mubr.bf16.mxu0 %v2431_v0  ;;  %1489 = vmatprep.mubr.bf16.mxu1 %v2431_v0  ;;  %v2201_v0 = vcombine.low %v457_v31, %v465_v32 }
  0x9d   : > { %1419 = vmatpush1.bf16.msra.mxu0 %v2167_v25  ;;  %1460 = vmatpush1.bf16.msra.mxu1 %v2169_v26 }
  0x9e   : > { %1420 = vmatprep.subr.bf16.mxu0 %v2184_v27  ;;  %1461 = vmatprep.subr.bf16.mxu1 %v2186_v28 }
  0xa1   : > { %1421 = vmatpush1.bf16.msra.mxu0 %v2183_v33  ;;  %1462 = vmatpush1.bf16.msra.mxu1 %v2185_v34 }
  0xa2   : > { %1422 = vmatprep.subr.bf16.mxu0 %v2200_v35  ;;  %1463 = vmatprep.subr.bf16.mxu1 %v2202_v36 }
  0xa5   : > { %1423 = vmatpush1.bf16.msra.mxu0 %v2199_v41  ;;  %1464 = vmatpush1.bf16.msra.mxu1 %v2201_v0 }
  0xa6   : > { %1424 = vmatprep.subr.bf16.mxu0 %v2216_v42  ;;  %1465 = vmatprep.subr.bf16.mxu1 %v2218_v43 }
  0xa9   : > { %1425 = vmatpush1.bf16.msra.mxu0 %v2215_v48  ;;  %1466 = vmatpush1.bf16.msra.mxu1 %v2217_v49 }
  0xaa   : > { %1426 = vmatprep.subr.bf16.mxu0 %v2232_v50  ;;  %1467 = vmatprep.subr.bf16.mxu1 %v2234_v51 }
  0xad   : > { %1427 = vmatpush1.bf16.msra.mxu0 %v2231_v56  ;;  %1468 = vmatpush1.bf16.msra.mxu1 %v2233_v57 }
  0xae   : > { %1428 = vmatprep.subr.bf16.mxu0 %v2248_v58  ;;  %1469 = vmatprep.subr.bf16.mxu1 %v2250_v59 }
  0xb1   : > { %1429 = vmatpush1.bf16.msra.mxu0 %v2247_v1  ;;  %1470 = vmatpush1.bf16.msra.mxu1 %v2249_v2 }
  0xb2   : > { %1430 = vmatprep.subr.bf16.mxu0 %v2264_v3  ;;  %1471 = vmatprep.subr.bf16.mxu1 %v2266_v4 }
  0xb5   : > { %1431 = vmatpush1.bf16.msra.mxu0 %v2263_v5  ;;  %1472 = vmatpush1.bf16.msra.mxu1 %v2265_v6 }
  0xb8   : > { %1449 = vmatmul.mubr.bf16.vlgmr.msra.gmra.mrb[12].mxu0 %v2602_v12  ;;  %1490 = vmatmul.mubr.bf16.vlgmr.msra.gmra.mrb[12].mxu1 %v2602_v12 }
 0x12b   : > { %v1204_v7 = vpop.f32.mrb[0].mxu0  ;;  %v1245_v10 = vpop.f32.mrb[0].mxu1 }
 0x12c   : > { %v1621_v8 = vrot.slane %v1204_v7, 4  ;;  %v1717_v9 = vmul.f32 %v1204_v7, %v1204_v7  ;;  %v1206_v11 = vpop.f32.mrb[1].mxu0  ;;  %v1633_v13 = vrot.slane %v1245_v10, 4  ;;  %v1719_v14 = vmul.f32 %v1245_v10, %v1245_v10  ;;  %v1247_v16 = vpop.f32.mrb[1].mxu1 }
 0x12d   : > { %v2278_v12 = vpack.c.bf16 %v1206_v11, %v1204_v7  ;;  %v1627_v15 = vrot.slane %v1206_v11, 4  ;;  %v1208_v17 = vpop.f32.mrb[2].mxu0  ;;  %v1718_v20 = vmul.f32 %v1206_v11, %v1206_v11  ;;  %v2279_v21 = vpack.c.bf16 %v1247_v16, %v1245_v10  ;;  %v1249_v22 = vpop.f32.mrb[2].mxu1 }
 0x12e   : > { %v1622_v18 = vadd.f32 %v1621_v8, %v1204_v7  ;;  %v1733_v19 = vrot.slane %v1717_v9, 4  ;;  %v1209_v23 = vpop.f32.mrb[3].mxu0  ;;  %v1634_v24 = vadd.f32 %v1633_v13, %v1245_v10  ;;  %v1745_v25 = vrot.slane %v1719_v14, 4  ;;  %v1250_v28 = vpop.f32.mrb[3].mxu1 }
 0x12f   : > { %1613 = vst [vmem:[%s2713_s11] sm:$0xff] %v2278_v12  ;;  %v1628_v26 = vadd.f32 %v1627_v15, %v1206_v11  ;;  %v1639_v27 = vrot.slane %v1247_v16, 4  ;;  %v1739_v31 = vrot.slane %v1718_v20, 4  ;;  %1614 = vst [vmem:[%s2713_s11 + $0x8] sm:$0xff] %v2279_v21  ;;  %v1720_v32 = vmul.f32 %v1247_v16, %v1247_v16 }
 0x130   : > { %v1623_v29 = vrot.slane %v1622_v18, 2  ;;  %v1734_v30 = vadd.f32 %v1733_v19, %v1717_v9  ;;  %v1635_v33 = vrot.slane %v1634_v24, 2  ;;  %v1746_v34 = vadd.f32 %v1745_v25, %v1719_v14 }
 0x131   : > { %v1629_v35 = vrot.slane %v1628_v26, 2  ;;  %v1640_v36 = vadd.f32 %v1639_v27, %v1247_v16  ;;  %v1740_v39 = vadd.f32 %v1739_v31, %v1718_v20  ;;  %v1751_v40 = vrot.slane %v1720_v32, 4 }
 0x132   : > { %v1624_v37 = vadd.f32 %v1623_v29, %v1622_v18  ;;  %v1735_v38 = vrot.slane %v1734_v30, 2  ;;  %v1636_v41 = vadd.f32 %v1635_v33, %v1634_v24  ;;  %v1747_v0 = vrot.slane %v1746_v34, 2 }
 0x133   : > { %v1630_v42 = vadd.f32 %v1629_v35, %v1628_v26  ;;  %v1641_v43 = vrot.slane %v1640_v36, 2  ;;  %v1741_v46 = vrot.slane %v1740_v39, 2  ;;  %v1752_v47 = vadd.f32 %v1751_v40, %v1720_v32 }
 0x134   : > { %v1625_v44 = vrot.slane %v1624_v37, 1  ;;  %v1736_v45 = vadd.f32 %v1735_v38, %v1734_v30  ;;  %v1637_v48 = vrot.slane %v1636_v41, 1  ;;  %v1748_v49 = vadd.f32 %v1747_v0, %v1746_v34 }
 0x135   : > { %v1642_v50 = vadd.f32 %v1641_v43, %v1640_v36  ;;  %v1631_v52 = vrot.slane %v1630_v42, 1  ;;  %v1742_v53 = vadd.f32 %v1741_v46, %v1740_v39  ;;  %v1753_v54 = vrot.slane %v1752_v47, 2 }
 0x136   : > { %v1737_v51 = vrot.slane %v1736_v45, 1  ;;  %v1626_v55 = vadd.f32 %v1625_v44, %v1624_v37  ;;  %v1749_v56 = vrot.slane %v1748_v49, 1  ;;  %v1638_v61 = vadd.f32 %v1637_v48, %v1636_v41 }
 0x137   : > { %v1743_v58 = vrot.slane %v1742_v53, 1  ;;  %v1643_v59 = vrot.slane %v1642_v50, 1  ;;  %v1754_v60 = vadd.f32 %v1753_v54, %v1752_v47  ;;  %v1632_v1 = vadd.f32 %v1631_v52, %v1630_v42 }
 0x138   : > { %v1738_v57 = vadd.f32 %v1737_v51, %v1736_v45  ;;  %v1750_v62 = vadd.f32 %v1749_v56, %v1748_v49 }
 0x139   : > { %v1744_v2 = vadd.f32 %v1743_v58, %v1742_v53  ;;  %v1755_v3 = vrot.slane %v1754_v60, 1  ;;  %v1644_v8 = vadd.f32 %v1643_v59, %v1642_v50 }
 0x13a   : > { %v1830_v63 = vsel %vm1829_vm0, %v1626_v55, %v1738_v57  ;;  %v1832_v5 = vsel %vm1829_vm0, %v1638_v61, %v1750_v62 }
 0x13b   : > { %v1847_v4 = vsel %vm1846_vm1, %v1830_v63, 0.0  ;;  %v1849_v6 = vsel %vm1846_vm1, %v1832_v5, 0.0  ;;  %v1831_v7 = vsel %vm1829_vm0, %v1632_v1, %v1744_v2  ;;  %v1756_v9 = vadd.f32 %v1755_v3, %v1754_v60 }
 0x13c   : > { %1863 = vst [vmem:[%s2721_s20] sm:$0xff] %v1847_v4  ;;  %1865 = vst [vmem:[%s2721_s20 + $0x10] sm:$0xff] %v1849_v6  ;;  %v1848_v10 = vsel %vm1846_vm1, %v1831_v7, 0.0 }
 0x13d   : > { %1864 = vst [vmem:[%s2721_s20 + $0x8] sm:$0xff] %v1848_v10  ;;  %v1833_v11 = vsel %vm1829_vm0, %v1644_v8, %v1756_v9 }
 0x13e   : > { %v1850_v13 = vsel %vm1846_vm1, %v1833_v11, 0.0 }
 0x13f   : > { %1866 = vst [vmem:[%s2721_s20 + $0x18] sm:$0xff] %v1850_v13 }
 0x14b   : > { %v1286_v14 = vpop.f32.mrb[4].mxu0  ;;  %v1327_v16 = vpop.f32.mrb[4].mxu1 }
 0x14c   : > { %v1645_v12 = vrot.slane %v1286_v14, 4  ;;  %v1721_v15 = vmul.f32 %v1286_v14, %v1286_v14  ;;  %v1288_v17 = vpop.f32.mrb[5].mxu0  ;;  %v1657_v18 = vrot.slane %v1327_v16, 4  ;;  %v1723_v19 = vmul.f32 %v1327_v16, %v1327_v16  ;;  %v1329_v22 = vpop.f32.mrb[5].mxu1 }
 0x14d   : > { %v2280_v20 = vpack.c.bf16 %v1288_v17, %v1286_v14  ;;  %v1651_v21 = vrot.slane %v1288_v17, 4  ;;  %v1290_v23 = vpop.f32.mrb[6].mxu0  ;;  %v1722_v26 = vmul.f32 %v1288_v17, %v1288_v17  ;;  %v2281_v27 = vpack.c.bf16 %v1329_v22, %v1327_v16  ;;  %v1331_v28 = vpop.f32.mrb[6].mxu1 }
 0x14e   : > { %v1646_v24 = vadd.f32 %v1645_v12, %v1286_v14  ;;  %v1757_v25 = vrot.slane %v1721_v15, 4  ;;  %v1291_v29 = vpop.f32.mrb[7].mxu0  ;;  %v1658_v30 = vadd.f32 %v1657_v18, %v1327_v16  ;;  %v1769_v31 = vrot.slane %v1723_v19, 4  ;;  %v1332_v34 = vpop.f32.mrb[7].mxu1 }
 0x14f   : > { %1615 = vst [vmem:[%s2713_s11 + $0x10] sm:$0xff] %v2280_v20  ;;  %v1652_v32 = vadd.f32 %v1651_v21, %v1288_v17  ;;  %v1663_v33 = vrot.slane %v1329_v22, 4  ;;  %v1763_v37 = vrot.slane %v1722_v26, 4  ;;  %1616 = vst [vmem:[%s2713_s11 + $0x18] sm:$0xff] %v2281_v27  ;;  %v1724_v38 = vmul.f32 %v1329_v22, %v1329_v22 }
 0x150   : > { %v1647_v35 = vrot.slane %v1646_v24, 2  ;;  %v1758_v36 = vadd.f32 %v1757_v25, %v1721_v15  ;;  %v1659_v39 = vrot.slane %v1658_v30, 2  ;;  %v1770_v40 = vadd.f32 %v1769_v31, %v1723_v19 }
 0x151   : > { %v1653_v41 = vrot.slane %v1652_v32, 2  ;;  %v1664_v0 = vadd.f32 %v1663_v33, %v1329_v22  ;;  %v1764_v44 = vadd.f32 %v1763_v37, %v1722_v26  ;;  %v1775_v45 = vrot.slane %v1724_v38, 4 }
 0x152   : > { %v1648_v42 = vadd.f32 %v1647_v35, %v1646_v24  ;;  %v1759_v43 = vrot.slane %v1758_v36, 2  ;;  %v1660_v46 = vadd.f32 %v1659_v39, %v1658_v30  ;;  %v1771_v47 = vrot.slane %v1770_v40, 2 }
 0x153   : > { %v1654_v48 = vadd.f32 %v1653_v41, %v1652_v32  ;;  %v1665_v49 = vrot.slane %v1664_v0, 2  ;;  %v1765_v52 = vrot.slane %v1764_v44, 2  ;;  %v1776_v53 = vadd.f32 %v1775_v45, %v1724_v38 }
 0x154   : > { %v1649_v50 = vrot.slane %v1648_v42, 1  ;;  %v1760_v51 = vadd.f32 %v1759_v43, %v1758_v36  ;;  %v1661_v54 = vrot.slane %v1660_v46, 1  ;;  %v1772_v55 = vadd.f32 %v1771_v47, %v1770_v40 }
 0x155   : > { %v1666_v56 = vadd.f32 %v1665_v49, %v1664_v0  ;;  %v1655_v58 = vrot.slane %v1654_v48, 1  ;;  %v1766_v59 = vadd.f32 %v1765_v52, %v1764_v44  ;;  %v1777_v60 = vrot.slane %v1776_v53, 2 }
 0x156   : > { %v1761_v57 = vrot.slane %v1760_v51, 1  ;;  %v1650_v61 = vadd.f32 %v1649_v50, %v1648_v42  ;;  %v1773_v62 = vrot.slane %v1772_v55, 1  ;;  %v1662_v4 = vadd.f32 %v1661_v54, %v1660_v46 }
 0x157   : > { %v1767_v1 = vrot.slane %v1766_v59, 1  ;;  %v1667_v2 = vrot.slane %v1666_v56, 1  ;;  %v1778_v3 = vadd.f32 %v1777_v60, %v1776_v53  ;;  %v1656_v7 = vadd.f32 %v1655_v58, %v1654_v48 }
 0x158   : > { %v1762_v63 = vadd.f32 %v1761_v57, %v1760_v51  ;;  %v1774_v5 = vadd.f32 %v1773_v62, %v1772_v55 }
 0x159   : > { %v1768_v8 = vadd.f32 %v1767_v1, %v1766_v59  ;;  %v1779_v9 = vrot.slane %v1778_v3, 1  ;;  %v1668_v12 = vadd.f32 %v1667_v2, %v1666_v56 }
 0x15a   : > { %v1834_v6 = vsel %vm1829_vm0, %v1650_v61, %v1762_v63  ;;  %v1836_v11 = vsel %vm1829_vm0, %v1662_v4, %v1774_v5 }
 0x15b   : > { %v1851_v10 = vsel %vm1846_vm1, %v1834_v6, 0.0  ;;  %v1853_v13 = vsel %vm1846_vm1, %v1836_v11, 0.0  ;;  %v1835_v14 = vsel %vm1829_vm0, %v1656_v7, %v1768_v8  ;;  %v1780_v15 = vadd.f32 %v1779_v9, %v1778_v3 }
 0x15c   : > { %1867 = vst [vmem:[%s2721_s20 + $0x20] sm:$0xff] %v1851_v10  ;;  %1869 = vst [vmem:[%s2721_s20 + $0x30] sm:$0xff] %v1853_v13  ;;  %v1852_v16 = vsel %vm1846_vm1, %v1835_v14, 0.0 }
 0x15d   : > { %1868 = vst [vmem:[%s2721_s20 + $0x28] sm:$0xff] %v1852_v16  ;;  %v1837_v17 = vsel %vm1829_vm0, %v1668_v12, %v1780_v15 }
 0x15e   : > { %v1854_v18 = vsel %vm1846_vm1, %v1837_v17, 0.0 }
 0x15f   : > { %1870 = vst [vmem:[%s2721_s20 + $0x38] sm:$0xff] %v1854_v18 }
 0x16b   : > { %v1368_v19 = vpop.f32.mrb[8].mxu0  ;;  %v1409_v22 = vpop.f32.mrb[8].mxu1 }
 0x16c   : > { %v1669_v20 = vrot.slane %v1368_v19, 4  ;;  %v1725_v21 = vmul.f32 %v1368_v19, %v1368_v19  ;;  %v1370_v23 = vpop.f32.mrb[9].mxu0  ;;  %v1681_v24 = vrot.slane %v1409_v22, 4  ;;  %v1727_v25 = vmul.f32 %v1409_v22, %v1409_v22  ;;  %v1411_v28 = vpop.f32.mrb[9].mxu1 }
 0x16d   : > { %v2282_v26 = vpack.c.bf16 %v1370_v23, %v1368_v19  ;;  %v1675_v27 = vrot.slane %v1370_v23, 4  ;;  %v1372_v29 = vpop.f32.mrb[10].mxu0  ;;  %v1726_v32 = vmul.f32 %v1370_v23, %v1370_v23  ;;  %v2283_v33 = vpack.c.bf16 %v1411_v28, %v1409_v22  ;;  %v1413_v34 = vpop.f32.mrb[10].mxu1 }
 0x16e   : > { %v1670_v30 = vadd.f32 %v1669_v20, %v1368_v19  ;;  %v1781_v31 = vrot.slane %v1725_v21, 4  ;;  %v1373_v35 = vpop.f32.mrb[11].mxu0  ;;  %v1682_v36 = vadd.f32 %v1681_v24, %v1409_v22  ;;  %v1793_v37 = vrot.slane %v1727_v25, 4  ;;  %v1414_v40 = vpop.f32.mrb[11].mxu1 }
 0x16f   : > { %1617 = vst [vmem:[%s2713_s11 + $0x20] sm:$0xff] %v2282_v26  ;;  %v1676_v38 = vadd.f32 %v1675_v27, %v1370_v23  ;;  %v1687_v39 = vrot.slane %v1411_v28, 4  ;;  %v1787_v42 = vrot.slane %v1726_v32, 4  ;;  %1618 = vst [vmem:[%s2713_s11 + $0x28] sm:$0xff] %v2283_v33  ;;  %v1728_v43 = vmul.f32 %v1411_v28, %v1411_v28 }
 0x170   : > { %v1671_v41 = vrot.slane %v1670_v30, 2  ;;  %v1782_v0 = vadd.f32 %v1781_v31, %v1725_v21  ;;  %v1683_v44 = vrot.slane %v1682_v36, 2  ;;  %v1794_v45 = vadd.f32 %v1793_v37, %v1727_v25 }
 0x171   : > { %v1677_v46 = vrot.slane %v1676_v38, 2  ;;  %v1688_v47 = vadd.f32 %v1687_v39, %v1411_v28  ;;  %v1788_v50 = vadd.f32 %v1787_v42, %v1726_v32  ;;  %v1799_v51 = vrot.slane %v1728_v43, 4 }
 0x172   : > { %v1672_v48 = vadd.f32 %v1671_v41, %v1670_v30  ;;  %v1783_v49 = vrot.slane %v1782_v0, 2  ;;  %v1684_v52 = vadd.f32 %v1683_v44, %v1682_v36  ;;  %v1795_v53 = vrot.slane %v1794_v45, 2 }
 0x173   : > { %v1678_v54 = vadd.f32 %v1677_v46, %v1676_v38  ;;  %v1689_v55 = vrot.slane %v1688_v47, 2  ;;  %v1789_v58 = vrot.slane %v1788_v50, 2  ;;  %v1800_v59 = vadd.f32 %v1799_v51, %v1728_v43 }
 0x174   : > { %v1673_v56 = vrot.slane %v1672_v48, 1  ;;  %v1784_v57 = vadd.f32 %v1783_v49, %v1782_v0  ;;  %v1685_v60 = vrot.slane %v1684_v52, 1  ;;  %v1796_v61 = vadd.f32 %v1795_v53, %v1794_v45 }
 0x175   : > { %v1690_v62 = vadd.f32 %v1689_v55, %v1688_v47  ;;  %v1679_v1 = vrot.slane %v1678_v54, 1  ;;  %v1790_v2 = vadd.f32 %v1789_v58, %v1788_v50  ;;  %v1801_v3 = vrot.slane %v1800_v59, 2 }
 0x176   : > { %v1785_v63 = vrot.slane %v1784_v57, 1  ;;  %v1674_v4 = vadd.f32 %v1673_v56, %v1672_v48  ;;  %v1797_v5 = vrot.slane %v1796_v61, 1  ;;  %v1686_v10 = vadd.f32 %v1685_v60, %v1684_v52 }
 0x177   : > { %v1791_v7 = vrot.slane %v1790_v2, 1  ;;  %v1691_v8 = vrot.slane %v1690_v62, 1  ;;  %v1802_v9 = vadd.f32 %v1801_v3, %v1800_v59  ;;  %v1680_v14 = vadd.f32 %v1679_v1, %v1678_v54 }
 0x178   : > { %v1786_v6 = vadd.f32 %v1785_v63, %v1784_v57  ;;  %v1798_v11 = vadd.f32 %v1797_v5, %v1796_v61 }
 0x179   : > { %v1792_v12 = vadd.f32 %v1791_v7, %v1790_v2  ;;  %v1803_v15 = vrot.slane %v1802_v9, 1  ;;  %v1692_v20 = vadd.f32 %v1691_v8, %v1690_v62 }
 0x17a   : > { %v1838_v13 = vsel %vm1829_vm0, %v1674_v4, %v1786_v6  ;;  %v1840_v17 = vsel %vm1829_vm0, %v1686_v10, %v1798_v11 }
 0x17b   : > { %v1855_v16 = vsel %vm1846_vm1, %v1838_v13, 0.0  ;;  %v1857_v18 = vsel %vm1846_vm1, %v1840_v17, 0.0  ;;  %v1839_v19 = vsel %vm1829_vm0, %v1680_v14, %v1792_v12  ;;  %v1804_v21 = vadd.f32 %v1803_v15, %v1802_v9 }
 0x17c   : > { %1871 = vst [vmem:[%s2721_s20 + $0x40] sm:$0xff] %v1855_v16  ;;  %1873 = vst [vmem:[%s2721_s20 + $0x50] sm:$0xff] %v1857_v18  ;;  %v1856_v22 = vsel %vm1846_vm1, %v1839_v19, 0.0 }
 0x17d   : > { %1872 = vst [vmem:[%s2721_s20 + $0x48] sm:$0xff] %v1856_v22  ;;  %v1841_v23 = vsel %vm1829_vm0, %v1692_v20, %v1804_v21 }
 0x17e   : > { %v1858_v24 = vsel %vm1846_vm1, %v1841_v23, 0.0 }
 0x17f   : > { %1874 = vst [vmem:[%s2721_s20 + $0x58] sm:$0xff] %v1858_v24 }
 0x18b   : > { %v1450_v25 = vpop.f32.mrb[12].mxu0  ;;  %v1491_v28 = vpop.f32.mrb[12].mxu1 }
 0x18c   : > { %v1693_v26 = vrot.slane %v1450_v25, 4  ;;  %v1729_v27 = vmul.f32 %v1450_v25, %v1450_v25  ;;  %v1452_v29 = vpop.f32.mrb[13].mxu0  ;;  %v1705_v30 = vrot.slane %v1491_v28, 4  ;;  %v1731_v31 = vmul.f32 %v1491_v28, %v1491_v28  ;;  %v1493_v34 = vpop.f32.mrb[13].mxu1 }
 0x18d   : > { %v2284_v32 = vpack.c.bf16 %v1452_v29, %v1450_v25  ;;  %v1699_v33 = vrot.slane %v1452_v29, 4  ;;  %v1454_v35 = vpop.f32.mrb[14].mxu0  ;;  %v1730_v38 = vmul.f32 %v1452_v29, %v1452_v29  ;;  %v2285_v39 = vpack.c.bf16 %v1493_v34, %v1491_v28  ;;  %v1495_v40 = vpop.f32.mrb[14].mxu1 }
 0x18e   : > { %v1694_v36 = vadd.f32 %v1693_v26, %v1450_v25  ;;  %v1805_v37 = vrot.slane %v1729_v27, 4  ;;  %v1455_v41 = vpop.f32.mrb[15].mxu0  ;;  %v1706_v0 = vadd.f32 %v1705_v30, %v1491_v28  ;;  %v1817_v42 = vrot.slane %v1731_v31, 4  ;;  %v1496_v45 = vpop.f32.mrb[15].mxu1 }
 0x18f   : > { %1619 = vst [vmem:[%s2713_s11 + $0x30] sm:$0xff] %v2284_v32  ;;  %v1700_v43 = vadd.f32 %v1699_v33, %v1452_v29  ;;  %v1711_v44 = vrot.slane %v1493_v34, 4  ;;  %v1811_v48 = vrot.slane %v1730_v38, 4  ;;  %1620 = vst [vmem:[%s2713_s11 + $0x38] sm:$0xff] %v2285_v39  ;;  %v1732_v49 = vmul.f32 %v1493_v34, %v1493_v34 }
 0x190   : > { %v1695_v46 = vrot.slane %v1694_v36, 2  ;;  %v1806_v47 = vadd.f32 %v1805_v37, %v1729_v27  ;;  %v1707_v50 = vrot.slane %v1706_v0, 2  ;;  %v1818_v51 = vadd.f32 %v1817_v42, %v1731_v31 }
 0x191   : > { %v1701_v52 = vrot.slane %v1700_v43, 2  ;;  %v1712_v53 = vadd.f32 %v1711_v44, %v1493_v34  ;;  %v1812_v56 = vadd.f32 %v1811_v48, %v1730_v38  ;;  %v1823_v57 = vrot.slane %v1732_v49, 4 }
 0x192   : > { %v1696_v54 = vadd.f32 %v1695_v46, %v1694_v36  ;;  %v1807_v55 = vrot.slane %v1806_v47, 2  ;;  %v1708_v58 = vadd.f32 %v1707_v50, %v1706_v0  ;;  %v1819_v59 = vrot.slane %v1818_v51, 2 }
 0x193   : > { %v1702_v60 = vadd.f32 %v1701_v52, %v1700_v43  ;;  %v1713_v61 = vrot.slane %v1712_v53, 2  ;;  %v1813_v1 = vrot.slane %v1812_v56, 2  ;;  %v1824_v2 = vadd.f32 %v1823_v57, %v1732_v49 }
 0x194   : > { %v1697_v62 = vrot.slane %v1696_v54, 1  ;;  %v1808_v63 = vadd.f32 %v1807_v55, %v1806_v47  ;;  %v1709_v3 = vrot.slane %v1708_v58, 1  ;;  %v1820_v4 = vadd.f32 %v1819_v59, %v1818_v51 }
 0x195   : > { %v1714_v5 = vadd.f32 %v1713_v61, %v1712_v53  ;;  %v1703_v7 = vrot.slane %v1702_v60, 1  ;;  %v1814_v8 = vadd.f32 %v1813_v1, %v1812_v56  ;;  %v1825_v9 = vrot.slane %v1824_v2, 2 }
 0x196   : > { %v1809_v6 = vrot.slane %v1808_v63, 1  ;;  %v1698_v10 = vadd.f32 %v1697_v62, %v1696_v54  ;;  %v1821_v11 = vrot.slane %v1820_v4, 1  ;;  %v1710_v16 = vadd.f32 %v1709_v3, %v1708_v58 }
 0x197   : > { %v1815_v14 = vrot.slane %v1814_v8, 1  ;;  %v1715_v12 = vrot.slane %v1714_v5, 1  ;;  %v1826_v15 = vadd.f32 %v1825_v9, %v1824_v2  ;;  %v1704_v19 = vadd.f32 %v1703_v7, %v1702_v60 }
 0x198   : > { %v1810_v13 = vadd.f32 %v1809_v6, %v1808_v63  ;;  %v1822_v17 = vadd.f32 %v1821_v11, %v1820_v4 }
 0x199   : > { %v1816_v20 = vadd.f32 %v1815_v14, %v1814_v8  ;;  %v1827_v21 = vrot.slane %v1826_v15, 1  ;;  %v1716_v26 = vadd.f32 %v1715_v12, %v1714_v5 }
 0x19a   : > { %v1842_v18 = vsel %vm1829_vm0, %v1698_v10, %v1810_v13  ;;  %v1844_v23 = vsel %vm1829_vm0, %v1710_v16, %v1822_v17 }
 0x19b   : > { %v1859_v22 = vsel %vm1846_vm1, %v1842_v18, 0.0  ;;  %v1861_v24 = vsel %vm1846_vm1, %v1844_v23, 0.0  ;;  %v1843_v25 = vsel %vm1829_vm0, %v1704_v19, %v1816_v20  ;;  %v1828_v27 = vadd.f32 %v1827_v21, %v1826_v15 }
 0x19c   : > { %1875 = vst [vmem:[%s2721_s20 + $0x60] sm:$0xff] %v1859_v22  ;;  %1877 = vst [vmem:[%s2721_s20 + $0x70] sm:$0xff] %v1861_v24  ;;  %v1860_v28 = vsel %vm1846_vm1, %v1843_v25, 0.0 }
 0x19d   : > { %1876 = vst [vmem:[%s2721_s20 + $0x68] sm:$0xff] %v1860_v28  ;;  %v1845_v29 = vsel %vm1829_vm0, %v1716_v26, %v1828_v27 }
 0x19e   : > { %v1862_v30 = vsel %vm1846_vm1, %v1845_v29, 0.0 }
 0x19f   : > { %1878 = vst [vmem:[%s2721_s20 + $0x78] sm:$0xff] %v1862_v30 }
 0x1a0 PF: > { %s17_s17 = sadd.s32 1, %s2425_s17   ;;  %s2803_s12 = smov %s2409_s13 }
 0x1a1   : > { %p14_p9 = scmp.ge.s32.totalorder %s17_s17, 5   ;;  %s2804_s13 = smov %s2413_s14 }
 0x1a2   : > { %s2805_s14 = smov %s2501_s24  ;;  %s2806_s15 = smov %s2421_s16 }
 0x1a3   : > { %s2807_s16 = smov %s2809_s19  ;;  %16 = sbr.rel (!%p14_p9) target bundleno = 4 (0x4), region = 91 }
 0x1aa   :  { %1966 = vsyncpa [#allocation4], 1 }
 0x1ab   :  { %1968 = vsyncpa [#allocation4 + $0x1], 1 }

// kernel: generator_forward.6
= control target key start
LH: loop header
LB: loop body
LE: loop exit
PB: predicated region body
PF: predicated region fallthrough
CT: control target
= control target key end

     0   :  { %s1659_s12 = smov 0   ;;  %s1661_s13 = smov 0   ;;  %s1791_s0 = inlined_call_operand.vmem [shape: bf16[2,2,80,512], index: 0, kind: input, shape index: {}]   ;;  %s1792_s1 = inlined_call_operand.vmem [shape: bf16[2,2,512,128], index: 1, kind: input, shape index: {}]   ;;  %s1793_s2 = inlined_call_operand.vmem [shape: bf16[2,2,80,128], index: 2, kind: output, shape index: {0}]   ;;  %s1794_s3 = inlined_call_operand.vmem [shape: f32[2,2,1,8,128], index: 3, kind: output, shape index: {1}]  }
   0x1   :  { %s1663_s14 = smov 0   ;;  %s1665_s15 = smov 0  }
   0x2   :  { %s1667_s16 = smov 0  }
   0x3 LB: > { %s43_s17 = sadd.s32 1, %s1629_s14  ;;  %s47_s18 = sadd.s32 1, %s1633_s15  ;;  %s1637_s16 = sphi %s1667_s16, %s14_s16   ;;  %s1633_s15 = sphi %s1665_s15, %s1798_s15   ;;  %s1629_s14 = sphi %s1663_s14, %s1797_s14   ;;  %s1625_s13 = sphi %s1661_s13, %s1796_s13   ;;  %s1621_s12 = sphi %s1659_s12, %s1795_s12  }
   0x4   : > { %p45_p0 = scmp.ge.s32.totalorder %s43_s17, 2  ;;  %p1290_p1 = scmp.ge.s32.totalorder %s1637_s16, 1 }
   0x5   : > { %p234_p2 = scmp.lt.s32.totalorder %s1637_s16, 5 }
   0x6   : > { %s1800_s17 = smov (%p45_p0, %s43_s17), 0  ;;  %s1802_s18 = smov (!%p45_p0, %s47_s18), %s1633_s15 }
   0x7   : > { %p235_p3 = pnand %p1290_p1, %p234_p2  ;;  %p49_p4 = scmp.ge.s32.totalorder %s1802_s18, 2 }
   0x8   : > { %p314_p5 = scmp.lt.s32.totalorder (!%p235_p3), %s1625_s13, 1  ;;  %p316_p6 = scmp.lt.s32.totalorder (!%p235_p3), %s1621_s12, 1  ;;  %vm1050_vm0 = vcmask (!%p235_p3), 1040384   ;;  %vm1052_vm1 = vcmask (!%p235_p3), 1041408  }
   0x9   : > { %s1804_s18 = smov (%p49_p4, %s1802_s18), 0  ;;  %238 = sbr.rel (%p235_p3) target bundleno = 326 (0x146), region = 28 }
  0x10   : > { %s1806_s13 = smov (!%p314_p5, %s1625_s13), 1  ;;  %s1808_s12 = smov (!%p316_p6, %s1621_s12), 1 }
  0x11   : > { %s1293_s19 = sshll.u32 %s1806_s13, 7  ;;  %s1292_s20 = sshll.u32 %s1808_s12, 6 }
  0x12   : > { %s345_s21 = sadd.s32 %s1293_s19, %s1292_s20  ;;  %s1494_s26 = smul.u32 80, %s1806_s13 }
  0x13   : > { %s1294_s22 = sshll.u32 %s345_s21, 2  ;;  %s1493_s27 = smul.u32 40, %s1808_s12 }
  0x14   : > { %s1698_s25 = scalar_lea.vmem %s1792_s1, %s1294_s22  ;;  %s1495_s6 = smul.u32 10, %s1808_s12 }
  0x15   : > { %v1537_v0 = vld [vmem:[%s1698_s25 + $0x40] sm:$0xff]   ;;  %v1541_v4 = vld [vmem:[%s1698_s25 + $0x48] sm:$0xff]   ;;  %v1545_v8 = vld [vmem:[%s1698_s25 + $0x50] sm:$0xff]   ;;  %s327_s28 = sadd.s32 %s1494_s26, %s1493_s27  ;;  %s1496_s7 = smul.u32 20, %s1806_s13 }
  0x16   : > { %v1538_v1 = vld [vmem:[%s1698_s25 + $0xc0] sm:$0xff]   ;;  %1401 = vmatprep.subr.bf16.mxu0 %v1537_v0  ;;  %v1542_v5 = vld [vmem:[%s1698_s25 + $0xc8] sm:$0xff]   ;;  %v1546_v9 = vld [vmem:[%s1698_s25 + $0xd0] sm:$0xff]   ;;  %s1291_s29 = sshll.u32 %s327_s28, 2  ;;  %s1296_s20 = sshll.u32 %s1806_s13, 1 }
  0x17   : > { %v1539_v2 = vld [vmem:[%s1698_s25] sm:$0xff]   ;;  %1447 = vmatprep.subr.bf16.mxu1 %v1538_v1  ;;  %v1543_v6 = vld [vmem:[%s1698_s25 + $0x8] sm:$0xff]   ;;  %v1547_v10 = vld [vmem:[%s1698_s25 + $0x10] sm:$0xff]   ;;  %s1735_s5 = scalar_lea.vmem %s1791_s0, %s1291_s29  ;;  %s362_s8 = sadd.s32 %s1496_s7, %s1495_s6 }
  0x18   : > { %v1540_v3 = vld [vmem:[%s1698_s25 + $0x80] sm:$0xff]   ;;  %1402 = vmatpush3.bf16.msra.mxu0 %v1539_v2  ;;  %v1544_v7 = vld [vmem:[%s1698_s25 + $0x88] sm:$0xff]   ;;  %v1548_v11 = vld [vmem:[%s1698_s25 + $0x90] sm:$0xff]   ;;  %s1295_s9 = sshll.u32 %s362_s8, 2  ;;  %s377_s21 = sadd.s32 %s1296_s20, %s1808_s12 }
  0x19   : > { %1448 = vmatpush3.bf16.msra.mxu1 %v1540_v3  ;;  %1403 = vmatprep.subr.bf16.mxu0 %v1541_v4  ;;  %v1549_v12 = vld [vmem:[%s1698_s25 + $0x58] sm:$0xff]   ;;  %v1553_v16 = vld [vmem:[%s1698_s25 + $0x60] sm:$0xff]   ;;  %v1557_v20 = vld [vmem:[%s1698_s25 + $0x68] sm:$0xff]   ;;  %s1764_s19 = scalar_lea.vmem %s1793_s2, %s1295_s9  ;;  %s1297_s22 = sshll.u32 %s377_s21, 3 }
  0x1a   : > { %1449 = vmatprep.subr.bf16.mxu1 %v1542_v5  ;;  %v1550_v13 = vld [vmem:[%s1698_s25 + $0xd8] sm:$0xff]   ;;  %v1554_v17 = vld [vmem:[%s1698_s25 + $0xe0] sm:$0xff]   ;;  %v1558_v21 = vld [vmem:[%s1698_s25 + $0xe8] sm:$0xff]  }
  0x1b   : > { %v1551_v14 = vld [vmem:[%s1698_s25 + $0x18] sm:$0xff]   ;;  %v1555_v18 = vld [vmem:[%s1698_s25 + $0x20] sm:$0xff]   ;;  %v1559_v22 = vld [vmem:[%s1698_s25 + $0x28] sm:$0xff]  }
  0x1c   : > { %1404 = vmatpush3.bf16.msra.mxu0 %v1543_v6  ;;  %v1552_v15 = vld [vmem:[%s1698_s25 + $0x98] sm:$0xff]   ;;  %v1556_v19 = vld [vmem:[%s1698_s25 + $0xa0] sm:$0xff]   ;;  %v1560_v23 = vld [vmem:[%s1698_s25 + $0xa8] sm:$0xff]  }
  0x1d   : > { %1450 = vmatpush3.bf16.msra.mxu1 %v1544_v7  ;;  %1405 = vmatprep.subr.bf16.mxu0 %v1545_v8  ;;  %v1561_v24 = vld [vmem:[%s1698_s25 + $0x70] sm:$0xff]   ;;  %v1565_v28 = vld [vmem:[%s1698_s25 + $0x78] sm:$0xff]  }
  0x1e   : > { %1451 = vmatprep.subr.bf16.mxu1 %v1546_v9  ;;  %v1562_v25 = vld [vmem:[%s1698_s25 + $0xf0] sm:$0xff]   ;;  %v1566_v29 = vld [vmem:[%s1698_s25 + $0xf8] sm:$0xff]  }
  0x1f   : > { %v1563_v26 = vld [vmem:[%s1698_s25 + $0x30] sm:$0xff]   ;;  %v1567_v30 = vld [vmem:[%s1698_s25 + $0x38] sm:$0xff]  }
  0x20   : > { %1406 = vmatpush3.bf16.msra.mxu0 %v1547_v10  ;;  %v1564_v27 = vld [vmem:[%s1698_s25 + $0xb0] sm:$0xff]   ;;  %v1568_v31 = vld [vmem:[%s1698_s25 + $0xb8] sm:$0xff]   ;;  %s379_s25 = scalar_lea.vmem %s1794_s3, %s1297_s22 }
  0x21   : > { %1452 = vmatpush3.bf16.msra.mxu1 %v1548_v11  ;;  %1407 = vmatprep.subr.bf16.mxu0 %v1549_v12  ;;  %v1569_v32 = vld [vmem:[%s1735_s5] ss:$16 sps:$4 sm:$0xff]   ;;  %v1571_v33 = vld [vmem:[%s1735_s5 + $0x4] ss:$16 sps:$4 sm:$0xff]   ;;  %v1572_v34 = vld [vmem:[%s1735_s5 + $0x8] ss:$16 sps:$4 sm:$0xff]  }
  0x22   : > { %1453 = vmatprep.subr.bf16.mxu1 %v1550_v13  ;;  %v1574_v35 = vld [vmem:[%s1735_s5 + $0xc] ss:$16 sps:$4 sm:$0xff]   ;;  %813 = vmatprep.mubr.bf16.mxu0 %v1571_v33  ;;  %v1575_v36 = vld [vmem:[%s1735_s5 + $0x24] ss:$16 sps:$4 sm:$0xff]   ;;  %v1579_v38 = vld [vmem:[%s1735_s5 + $0x20] ss:$16 sps:$4 sm:$0xff]  }
  0x23   : > { %886 = vmatprep.mubr.bf16.mxu1 %v1574_v35  ;;  %v1577_v37 = vld [vmem:[%s1735_s5 + $0x2c] ss:$16 sps:$4 sm:$0xff]   ;;  %v1580_v39 = vld [vmem:[%s1735_s5 + $0x28] ss:$16 sps:$4 sm:$0xff]   ;;  %v1581_v40 = vld [vmem:[%s1735_s5 + $0x44] ss:$16 sps:$4 sm:$0xff]  }
  0x24   : > { %1408 = vmatpush3.bf16.msra.mxu0 %v1551_v14  ;;  %v1583_v41 = vld [vmem:[%s1735_s5 + $0x4c] ss:$16 sps:$4 sm:$0xff]   ;;  %v1585_v42 = vld [vmem:[%s1735_s5 + $0x40] ss:$16 sps:$4 sm:$0xff]   ;;  %v1586_v43 = vld [vmem:[%s1735_s5 + $0x48] ss:$16 sps:$4 sm:$0xff]  }
  0x25   : > { %1454 = vmatpush3.bf16.msra.mxu1 %v1552_v15  ;;  %1409 = vmatprep.subr.bf16.mxu0 %v1553_v16  ;;  %v1587_v44 = vld [vmem:[%s1735_s5 + $0x64] ss:$16 sps:$4 sm:$0xff]   ;;  %v1589_v45 = vld [vmem:[%s1735_s5 + $0x6c] ss:$16 sps:$4 sm:$0xff]   ;;  %v1591_v46 = vld [vmem:[%s1735_s5 + $0x60] ss:$16 sps:$4 sm:$0xff]  }
  0x26   : > { %1455 = vmatprep.subr.bf16.mxu1 %v1554_v17  ;;  %v1592_v47 = vld [vmem:[%s1735_s5 + $0x68] ss:$16 sps:$4 sm:$0xff]   ;;  %v1593_v48 = vld [vmem:[%s1735_s5 + $0x84] ss:$16 sps:$4 sm:$0xff]   ;;  %v1595_v49 = vld [vmem:[%s1735_s5 + $0x8c] ss:$16 sps:$4 sm:$0xff]  }
  0x27   : > { %v1597_v50 = vld [vmem:[%s1735_s5 + $0x80] ss:$16 sps:$4 sm:$0xff]   ;;  %v1598_v51 = vld [vmem:[%s1735_s5 + $0x88] ss:$16 sps:$4 sm:$0xff]  }
  0x28   : > { %1410 = vmatpush3.bf16.msra.mxu0 %v1555_v18 }
  0x29   : > { %1456 = vmatpush3.bf16.msra.mxu1 %v1556_v19  ;;  %1411 = vmatprep.subr.bf16.mxu0 %v1557_v20 }
  0x2a   : > { %1457 = vmatprep.subr.bf16.mxu1 %v1558_v21 }
  0x2c   : > { %1412 = vmatpush3.bf16.msra.mxu0 %v1559_v22 }
  0x2d   : > { %1458 = vmatpush3.bf16.msra.mxu1 %v1560_v23  ;;  %1413 = vmatprep.subr.bf16.mxu0 %v1561_v24 }
  0x2e   : > { %1459 = vmatprep.subr.bf16.mxu1 %v1562_v25 }
  0x30   : > { %1414 = vmatpush3.bf16.msra.mxu0 %v1563_v26 }
  0x31   : > { %1460 = vmatpush3.bf16.msra.mxu1 %v1564_v27  ;;  %1415 = vmatprep.subr.bf16.mxu0 %v1565_v28 }
  0x32   : > { %1461 = vmatprep.subr.bf16.mxu1 %v1566_v29 }
  0x34   : > { %1416 = vmatpush3.bf16.msra.mxu0 %v1567_v30 }
  0x35   : > { %1462 = vmatpush3.bf16.msra.mxu1 %v1568_v31 }
  0x37   : > { %814 = vmatmul.mubr.bf16.vlgmr.msra.gmra.mrb[0].mxu0 %v1569_v32 }
  0x38   : > { %887 = vmatmul.mubr.bf16.vlgmr.msra.gmra.mrb[0].mxu1 %v1572_v34  ;;  %821 = vmatprep.mubr.bf16.mxu0 %v1575_v36 }
  0x39   : > { %894 = vmatprep.mubr.bf16.mxu1 %v1577_v37 }
  0x3f   : > { %822 = vmatmul.mubr.bf16.gmra.mrb[4].mxu0 %v1579_v38 }
  0x40   : > { %895 = vmatmul.mubr.bf16.gmra.mrb[4].mxu1 %v1580_v39  ;;  %829 = vmatprep.mubr.bf16.mxu0 %v1581_v40 }
  0x41   : > { %902 = vmatprep.mubr.bf16.mxu1 %v1583_v41 }
  0x47   : > { %830 = vmatmul.mubr.bf16.gmra.mrb[8].mxu0 %v1585_v42 }
  0x48   : > { %903 = vmatmul.mubr.bf16.gmra.mrb[8].mxu1 %v1586_v43  ;;  %837 = vmatprep.mubr.bf16.mxu0 %v1587_v44 }
  0x49   : > { %910 = vmatprep.mubr.bf16.mxu1 %v1589_v45 }
  0x4f   : > { %838 = vmatmul.mubr.bf16.gmra.mrb[12].mxu0 %v1591_v46 }
  0x50   : > { %911 = vmatmul.mubr.bf16.gmra.mrb[12].mxu1 %v1592_v47  ;;  %845 = vmatprep.mubr.bf16.mxu0 %v1593_v48 }
  0x51   : > { %918 = vmatprep.mubr.bf16.mxu1 %v1595_v49 }
  0x57   : > { %846 = vmatmul.mubr.bf16.gmra.mrb[16].mxu0 %v1597_v50 }
  0x58   : > { %919 = vmatmul.mubr.bf16.gmra.mrb[16].mxu1 %v1598_v51 }
 0x10a   : > { %v1417_v52 = vpop.f32.mrb[0].mxu0 }
 0x10b   : > { %v1463_v53 = vpop.f32.mrb[0].mxu1  ;;  %v1418_v54 = vpop.f32.mrb[1].mxu0 }
 0x10c   : > { %v1419_v55 = vadd.f32 %v1418_v54, %v1417_v52  ;;  %v1464_v56 = vpop.f32.mrb[1].mxu1  ;;  %v1420_v57 = vpop.f32.mrb[2].mxu0 }
 0x10d   : > { %v1465_v58 = vadd.f32 %v1464_v56, %v1463_v53  ;;  %v1466_v59 = vpop.f32.mrb[2].mxu1  ;;  %v1421_v60 = vpop.f32.mrb[3].mxu0 }
 0x10e   : > { %v1422_v61 = vadd.f32 %v1421_v60, %v1420_v57  ;;  %v1467_v62 = vpop.f32.mrb[3].mxu1 }
 0x10f   : > { %v889_v63 = vadd.f32 %v1465_v58, %v1419_v55  ;;  %v1468_v0 = vadd.f32 %v1467_v62, %v1466_v59 }
 0x111   : > { %v892_v1 = vadd.f32 %v1468_v0, %v1422_v61  ;;  %v1025_v3 = vmul.f32 %v889_v63, %v889_v63 }
 0x112   : > { %v1423_v2 = vpop.f32.mrb[4].mxu0 }
 0x113   : > { %v1375_v4 = vpack.c.bf16 %v892_v1, %v889_v63  ;;  %v1010_v5 = vadd.f32 %v892_v1, %v889_v63  ;;  %v1026_v6 = vmul.f32 %v892_v1, %v892_v1  ;;  %v1469_v7 = vpop.f32.mrb[4].mxu1  ;;  %v1424_v8 = vpop.f32.mrb[5].mxu0 }
 0x114   : > { %v1425_v9 = vadd.f32 %v1424_v8, %v1423_v2  ;;  %v1470_v10 = vpop.f32.mrb[5].mxu1  ;;  %v1426_v11 = vpop.f32.mrb[6].mxu0 }
 0x115   : > { %1376 = vst [vmem:[%s1764_s19] sm:$0xff] %v1375_v4   ;;  %v1035_v12 = vadd.f32 %v1026_v6, %v1025_v3  ;;  %v1471_v13 = vadd.f32 %v1470_v10, %v1469_v7  ;;  %v1472_v14 = vpop.f32.mrb[6].mxu1  ;;  %v1427_v15 = vpop.f32.mrb[7].mxu0 }
 0x116   : > { %v1428_v16 = vadd.f32 %v1427_v15, %v1426_v11  ;;  %v1473_v17 = vpop.f32.mrb[7].mxu1 }
 0x117   : > { %v897_v18 = vadd.f32 %v1471_v13, %v1425_v9  ;;  %v1474_v19 = vadd.f32 %v1473_v17, %v1472_v14 }
 0x119   : > { %v1011_v20 = vadd.f32 %v1010_v5, %v897_v18  ;;  %v1027_v21 = vmul.f32 %v897_v18, %v897_v18  ;;  %v900_v22 = vadd.f32 %v1474_v19, %v1428_v16 }
 0x11a   : > { %v1429_v23 = vpop.f32.mrb[8].mxu0 }
 0x11b   : > { %v1036_v24 = vadd.f32 %v1035_v12, %v1027_v21  ;;  %v1380_v25 = vpack.c.bf16 %v900_v22, %v897_v18  ;;  %v1012_v26 = vadd.f32 %v1011_v20, %v900_v22  ;;  %v1028_v27 = vmul.f32 %v900_v22, %v900_v22  ;;  %v1475_v28 = vpop.f32.mrb[8].mxu1  ;;  %v1430_v29 = vpop.f32.mrb[9].mxu0 }
 0x11c   : > { %v1431_v30 = vadd.f32 %v1430_v29, %v1429_v23  ;;  %v1476_v31 = vpop.f32.mrb[9].mxu1  ;;  %v1432_v32 = vpop.f32.mrb[10].mxu0 }
 0x11d   : > { %1397 = vst [vmem:[%s1764_s19 + $0x8] sm:$0xff] %v1380_v25   ;;  %v1037_v33 = vadd.f32 %v1036_v24, %v1028_v27  ;;  %v1477_v34 = vadd.f32 %v1476_v31, %v1475_v28  ;;  %v1478_v35 = vpop.f32.mrb[10].mxu1  ;;  %v1433_v36 = vpop.f32.mrb[11].mxu0 }
 0x11e   : > { %v1434_v37 = vadd.f32 %v1433_v36, %v1432_v32  ;;  %v1479_v38 = vpop.f32.mrb[11].mxu1 }
 0x11f   : > { %v905_v39 = vadd.f32 %v1477_v34, %v1431_v30  ;;  %v1480_v40 = vadd.f32 %v1479_v38, %v1478_v35 }
 0x121   : > { %v1013_v41 = vadd.f32 %v1012_v26, %v905_v39  ;;  %v1029_v42 = vmul.f32 %v905_v39, %v905_v39  ;;  %v908_v43 = vadd.f32 %v1480_v40, %v1434_v37 }
 0x122   : > { %v1435_v44 = vpop.f32.mrb[12].mxu0 }
 0x123   : > { %v1038_v45 = vadd.f32 %v1037_v33, %v1029_v42  ;;  %v1385_v46 = vpack.c.bf16 %v908_v43, %v905_v39  ;;  %v1014_v47 = vadd.f32 %v1013_v41, %v908_v43  ;;  %v1030_v48 = vmul.f32 %v908_v43, %v908_v43  ;;  %v1481_v49 = vpop.f32.mrb[12].mxu1  ;;  %v1436_v50 = vpop.f32.mrb[13].mxu0 }
 0x124   : > { %v1437_v51 = vadd.f32 %v1436_v50, %v1435_v44  ;;  %v1482_v52 = vpop.f32.mrb[13].mxu1  ;;  %v1438_v53 = vpop.f32.mrb[14].mxu0 }
 0x125   : > { %1398 = vst [vmem:[%s1764_s19 + $0x10] sm:$0xff] %v1385_v46   ;;  %v1039_v54 = vadd.f32 %v1038_v45, %v1030_v48  ;;  %v1483_v55 = vadd.f32 %v1482_v52, %v1481_v49  ;;  %v1484_v56 = vpop.f32.mrb[14].mxu1  ;;  %v1439_v57 = vpop.f32.mrb[15].mxu0 }
 0x126   : > { %v1440_v58 = vadd.f32 %v1439_v57, %v1438_v53  ;;  %v1485_v59 = vpop.f32.mrb[15].mxu1 }
 0x127   : > { %v913_v60 = vadd.f32 %v1483_v55, %v1437_v51  ;;  %v1486_v61 = vadd.f32 %v1485_v59, %v1484_v56 }
 0x129   : > { %v1015_v62 = vadd.f32 %v1014_v47, %v913_v60  ;;  %v1031_v63 = vmul.f32 %v913_v60, %v913_v60  ;;  %v916_v0 = vadd.f32 %v1486_v61, %v1440_v58 }
 0x12a   : > { %v1441_v1 = vpop.f32.mrb[16].mxu0 }
 0x12b   : > { %v1040_v2 = vadd.f32 %v1039_v54, %v1031_v63  ;;  %v1390_v3 = vpack.c.bf16 %v916_v0, %v913_v60  ;;  %v1016_v4 = vadd.f32 %v1015_v62, %v916_v0  ;;  %v1032_v5 = vmul.f32 %v916_v0, %v916_v0  ;;  %v1487_v6 = vpop.f32.mrb[16].mxu1  ;;  %v1442_v7 = vpop.f32.mrb[17].mxu0 }
 0x12c   : > { %v1443_v8 = vadd.f32 %v1442_v7, %v1441_v1  ;;  %v1488_v9 = vpop.f32.mrb[17].mxu1  ;;  %v1444_v10 = vpop.f32.mrb[18].mxu0 }
 0x12d   : > { %1399 = vst [vmem:[%s1764_s19 + $0x18] sm:$0xff] %v1390_v3   ;;  %v1041_v11 = vadd.f32 %v1040_v2, %v1032_v5  ;;  %v1489_v12 = vadd.f32 %v1488_v9, %v1487_v6  ;;  %v1490_v13 = vpop.f32.mrb[18].mxu1  ;;  %v1445_v14 = vpop.f32.mrb[19].mxu0 }
 0x12e   : > { %v1446_v15 = vadd.f32 %v1445_v14, %v1444_v10  ;;  %v1491_v16 = vpop.f32.mrb[19].mxu1 }
 0x12f   : > { %v921_v17 = vadd.f32 %v1489_v12, %v1443_v8  ;;  %v1492_v18 = vadd.f32 %v1491_v16, %v1490_v13 }
 0x131   : > { %v1017_v19 = vadd.f32 %v1016_v4, %v921_v17  ;;  %v1033_v20 = vmul.f32 %v921_v17, %v921_v17  ;;  %v924_v21 = vadd.f32 %v1492_v18, %v1446_v15 }
 0x133   : > { %v1042_v22 = vadd.f32 %v1041_v11, %v1033_v20  ;;  %v1395_v23 = vpack.c.bf16 %v924_v21, %v921_v17  ;;  %v1018_v24 = vadd.f32 %v1017_v19, %v924_v21  ;;  %v1034_v25 = vmul.f32 %v924_v21, %v924_v21 }
 0x135   : > { %1400 = vst [vmem:[%s1764_s19 + $0x20] sm:$0xff] %v1395_v23   ;;  %v1019_v26 = vrot.slane %v1018_v24, 4  ;;  %v1043_v27 = vadd.f32 %v1042_v22, %v1034_v25 }
 0x137   : > { %v1020_v28 = vadd.f32 %v1019_v26, %v1018_v24  ;;  %v1044_v29 = vrot.slane %v1043_v27, 4 }
 0x139   : > { %v1021_v30 = vrot.slane %v1020_v28, 2  ;;  %v1045_v31 = vadd.f32 %v1044_v29, %v1043_v27 }
 0x13b   : > { %v1022_v32 = vadd.f32 %v1021_v30, %v1020_v28  ;;  %v1046_v33 = vrot.slane %v1045_v31, 2 }
 0x13d   : > { %v1023_v34 = vrot.slane %v1022_v32, 1  ;;  %v1047_v35 = vadd.f32 %v1046_v33, %v1045_v31 }
 0x13f   : > { %v1048_v36 = vrot.slane %v1047_v35, 1  ;;  %v1024_v37 = vadd.f32 %v1023_v34, %v1022_v32 }
 0x141   : > { %v1049_v38 = vadd.f32 %v1048_v36, %v1047_v35 }
 0x143   : > { %v1051_v39 = vsel %vm1050_vm0, %v1024_v37, %v1049_v38 }
 0x144   : > { %v1053_v40 = vsel %vm1052_vm1, %v1051_v39, 0.0 }
 0x145   : > { %1054 = vst [vmem:[%s379_s25] sm:$0xff] %v1053_v40 }
 0x146 PF: > { %s14_s16 = sadd.s32 1, %s1637_s16   ;;  %s1795_s12 = smov %s1629_s14 }
 0x147   : > { %p11_p7 = scmp.ge.s32.totalorder %s14_s16, 6   ;;  %s1796_s13 = smov %s1633_s15 }
 0x148   : > { %s1797_s14 = smov %s1800_s17  ;;  %s1798_s15 = smov %s1804_s18 }
 0x149   :  { %13 = sbr.rel (!%p11_p7) target bundleno = 3 (0x3), region = 81 }

// kernel: generator_forward.7
= control target key start
LH: loop header
LB: loop body
LE: loop exit
PB: predicated region body
PF: predicated region fallthrough
CT: control target
= control target key end

     0   :  { %s2899_s12 = smov 0   ;;  %s2901_s13 = smov 0   ;;  %s3138_s0 = inlined_call_operand.vmem [shape: bf16[2,2,320,512], index: 0, kind: input, shape index: {}]   ;;  %s3139_s1 = inlined_call_operand.vmem [shape: bf16[2,2,512,128], index: 1, kind: input, shape index: {}]   ;;  %s3140_s2 = inlined_call_operand.vmem [shape: bf16[2,2,320,128], index: 2, kind: output, shape index: {0}]   ;;  %s3141_s3 = inlined_call_operand.vmem [shape: f32[2,2,1,8,128], index: 3, kind: output, shape index: {1}]  }
   0x1   :  { %s2903_s14 = smov 0   ;;  %s2905_s15 = smov 0  }
   0x2   :  { %s2907_s16 = smov 0  }
   0x3 LB: > { %s43_s17 = sadd.s32 1, %s2868_s14  ;;  %s47_s18 = sadd.s32 1, %s2872_s15  ;;  %s2876_s16 = sphi %s2907_s16, %s14_s16   ;;  %s2872_s15 = sphi %s2905_s15, %s3145_s15   ;;  %s2868_s14 = sphi %s2903_s14, %s3144_s14   ;;  %s2864_s13 = sphi %s2901_s13, %s3143_s13   ;;  %s2860_s12 = sphi %s2899_s12, %s3142_s12  }
   0x4   : > { %p45_p0 = scmp.ge.s32.totalorder %s43_s17, 2  ;;  %p2280_p1 = scmp.ge.s32.totalorder %s2876_s16, 1 }
   0x5   : > { %p234_p2 = scmp.lt.s32.totalorder %s2876_s16, 5 }
   0x6   : > { %s3147_s17 = smov (%p45_p0, %s43_s17), 0  ;;  %s3149_s18 = smov (!%p45_p0, %s47_s18), %s2872_s15 }
   0x7   : > { %p235_p3 = pnand %p2280_p1, %p234_p2  ;;  %p49_p4 = scmp.ge.s32.totalorder %s3149_s18, 2 }
   0x8   : > { %p314_p5 = scmp.lt.s32.totalorder (!%p235_p3), %s2864_s13, 1  ;;  %p316_p6 = scmp.lt.s32.totalorder (!%p235_p3), %s2860_s12, 1  ;;  %v2878_v0 = vmov (!%p235_p3), 0   ;;  %vm2040_vm0 = vcmask (!%p235_p3), 1040384   ;;  %vm2042_vm1 = vcmask (!%p235_p3), 1041408  }
   0x9   : > { %s3151_s18 = smov (%p49_p4, %s3149_s18), 0  ;;  %238 = sbr.rel (%p235_p3) target bundleno = 473 (0x1d9), region = 28 }
   0xa   : > { %1201 = vmatprep.subr.bf16.mxu1 (!%p235_p3), %v2878_v0  ;;  %1394 = vmatprep.subr.bf16.mxu0 (!%p235_p3), %v2878_v0 }
  0x10   : > { %s3153_s13 = smov (!%p314_p5, %s2864_s13), 1  ;;  %s3155_s12 = smov (!%p316_p6, %s2860_s12), 1 }
  0x11   : > { %s2283_s19 = sshll.u32 %s3153_s13, 7  ;;  %s2282_s20 = sshll.u32 %s3155_s12, 6 }
  0x12   : > { %s345_s21 = sadd.s32 %s2283_s19, %s2282_s20  ;;  %s2642_s26 = smul.u32 320, %s3153_s13 }
  0x13   : > { %s2284_s22 = sshll.u32 %s345_s21, 2  ;;  %s2641_s27 = smul.u32 160, %s3155_s12 }
  0x14   : > { %s2940_s25 = scalar_lea.vmem %s3139_s1, %s2284_s22  ;;  %s2643_s6 = smul.u32 40, %s3155_s12 }
  0x15   : > { %v2686_v1 = vld [vmem:[%s2940_s25] sm:$0xff]   ;;  %v2688_v3 = vld [vmem:[%s2940_s25 + $0x8] sm:$0xff]   ;;  %v2690_v5 = vld [vmem:[%s2940_s25 + $0x10] sm:$0xff]   ;;  %s327_s28 = sadd.s32 %s2642_s26, %s2641_s27  ;;  %s2644_s7 = smul.u32 80, %s3153_s13 }
  0x16   : > { %v2687_v2 = vld [vmem:[%s2940_s25 + $0x80] sm:$0xff]   ;;  %1202 = vmatpush1.bf16.msra.mxu1 %v2686_v1  ;;  %v2689_v4 = vld [vmem:[%s2940_s25 + $0x88] sm:$0xff]   ;;  %v2691_v6 = vld [vmem:[%s2940_s25 + $0x90] sm:$0xff]   ;;  %s2281_s29 = sshll.u32 %s327_s28, 2  ;;  %s2286_s20 = sshll.u32 %s3153_s13, 1 }
  0x17   : > { %1395 = vmatpush1.bf16.msra.mxu0 %v2687_v2  ;;  %1203 = vmatprep.subr.bf16.mxu1 %v2878_v0  ;;  %v2692_v7 = vld [vmem:[%s2940_s25 + $0x18] sm:$0xff]   ;;  %v2694_v9 = vld [vmem:[%s2940_s25 + $0x20] sm:$0xff]   ;;  %v2696_v11 = vld [vmem:[%s2940_s25 + $0x28] sm:$0xff]   ;;  %s2977_s5 = scalar_lea.vmem %s3138_s0, %s2281_s29  ;;  %s362_s8 = sadd.s32 %s2644_s7, %s2643_s6 }
  0x18   : > { %1396 = vmatprep.subr.bf16.mxu0 %v2878_v0  ;;  %v2693_v8 = vld [vmem:[%s2940_s25 + $0x98] sm:$0xff]   ;;  %v2695_v10 = vld [vmem:[%s2940_s25 + $0xa0] sm:$0xff]   ;;  %v2697_v12 = vld [vmem:[%s2940_s25 + $0xa8] sm:$0xff]   ;;  %s2285_s9 = sshll.u32 %s362_s8, 2  ;;  %s377_s21 = sadd.s32 %s2286_s20, %s3155_s12 }
  0x19   : > { %v2698_v13 = vld [vmem:[%s2940_s25 + $0x30] sm:$0xff]   ;;  %v2700_v15 = vld [vmem:[%s2940_s25 + $0x38] sm:$0xff]   ;;  %v2702_v17 = vld [vmem:[%s2940_s25 + $0x40] sm:$0xff]   ;;  %s3096_s19 = scalar_lea.vmem %s3140_s2, %s2285_s9  ;;  %s2287_s22 = sshll.u32 %s377_s21, 3 }
  0x1a   : > { %1204 = vmatpush1.bf16.msra.mxu1 %v2688_v3  ;;  %v2699_v14 = vld [vmem:[%s2940_s25 + $0xb0] sm:$0xff]   ;;  %v2701_v16 = vld [vmem:[%s2940_s25 + $0xb8] sm:$0xff]   ;;  %v2703_v18 = vld [vmem:[%s2940_s25 + $0xc0] sm:$0xff]  }
  0x1b   : > { %1397 = vmatpush1.bf16.msra.mxu0 %v2689_v4  ;;  %1205 = vmatprep.subr.bf16.mxu1 %v2878_v0  ;;  %v2720_v19 = vld [vmem:[%s2977_s5 + $0x4] ss:$16 sps:$4 sm:$0xff]   ;;  %v2704_v20 = vld [vmem:[%s2940_s25 + $0x48] sm:$0xff]   ;;  %v2708_v25 = vld [vmem:[%s2940_s25 + $0x58] sm:$0xff]  }
  0x1c   : > { %1398 = vmatprep.subr.bf16.mxu0 %v2878_v0  ;;  %v2723_v21 = vld [vmem:[%s2977_s5 + $0xc] ss:$16 sps:$4 sm:$0xff]   ;;  %1233 = vmatprep.mubr.bf16.mxu1 %v2720_v19  ;;  %v2706_v23 = vld [vmem:[%s2940_s25 + $0x50] sm:$0xff]   ;;  %v2710_v27 = vld [vmem:[%s2940_s25 + $0x60] sm:$0xff]  }
  0x1d   : > { %v2705_v22 = vld [vmem:[%s2940_s25 + $0xc8] sm:$0xff]   ;;  %1426 = vmatprep.mubr.bf16.mxu0 %v2723_v21  ;;  %v2707_v24 = vld [vmem:[%s2940_s25 + $0xd0] sm:$0xff]   ;;  %v2709_v26 = vld [vmem:[%s2940_s25 + $0xd8] sm:$0xff]  }
  0x1e   : > { %1206 = vmatpush1.bf16.msra.mxu1 %v2690_v5  ;;  %v2711_v28 = vld [vmem:[%s2940_s25 + $0xe0] sm:$0xff]   ;;  %v2712_v29 = vld [vmem:[%s2940_s25 + $0x68] sm:$0xff]   ;;  %v2714_v31 = vld [vmem:[%s2940_s25 + $0x70] sm:$0xff]  }
  0x1f   : > { %1399 = vmatpush1.bf16.msra.mxu0 %v2691_v6  ;;  %1207 = vmatprep.subr.bf16.mxu1 %v2878_v0  ;;  %v2713_v30 = vld [vmem:[%s2940_s25 + $0xe8] sm:$0xff]   ;;  %v2715_v32 = vld [vmem:[%s2940_s25 + $0xf0] sm:$0xff]   ;;  %v2716_v33 = vld [vmem:[%s2940_s25 + $0x78] sm:$0xff]  }
  0x20   : > { %1400 = vmatprep.subr.bf16.mxu0 %v2878_v0  ;;  %v2717_v34 = vld [vmem:[%s2940_s25 + $0xf8] sm:$0xff]   ;;  %v2718_v35 = vld [vmem:[%s2977_s5] ss:$16 sps:$4 sm:$0xff]   ;;  %v2724_v37 = vld [vmem:[%s2977_s5 + $0x24] ss:$16 sps:$4 sm:$0xff]   ;;  %s379_s25 = scalar_lea.vmem %s3141_s3, %s2287_s22 }
  0x21   : > { %v2721_v36 = vld [vmem:[%s2977_s5 + $0x8] ss:$16 sps:$4 sm:$0xff]   ;;  %v2726_v38 = vld [vmem:[%s2977_s5 + $0x2c] ss:$16 sps:$4 sm:$0xff]   ;;  %v2728_v39 = vld [vmem:[%s2977_s5 + $0x20] ss:$16 sps:$4 sm:$0xff]  }
  0x22   : > { %1208 = vmatpush1.bf16.msra.mxu1 %v2692_v7  ;;  %v2729_v40 = vld [vmem:[%s2977_s5 + $0x28] ss:$16 sps:$4 sm:$0xff]   ;;  %v2730_v41 = vld [vmem:[%s2977_s5 + $0x44] ss:$16 sps:$4 sm:$0xff]   ;;  %v2732_v42 = vld [vmem:[%s2977_s5 + $0x4c] ss:$16 sps:$4 sm:$0xff]  }
  0x23   : > { %1401 = vmatpush1.bf16.msra.mxu0 %v2693_v8  ;;  %1209 = vmatprep.subr.bf16.mxu1 %v2878_v0  ;;  %v2734_v43 = vld [vmem:[%s2977_s5 + $0x40] ss:$16 sps:$4 sm:$0xff]   ;;  %v2735_v44 = vld [vmem:[%s2977_s5 + $0x48] ss:$16 sps:$4 sm:$0xff]   ;;  %v2736_v45 = vld [vmem:[%s2977_s5 + $0x64] ss:$16 sps:$4 sm:$0xff]  }
  0x24   : > { %1402 = vmatprep.subr.bf16.mxu0 %v2878_v0  ;;  %v2738_v46 = vld [vmem:[%s2977_s5 + $0x6c] ss:$16 sps:$4 sm:$0xff]   ;;  %v2740_v47 = vld [vmem:[%s2977_s5 + $0x60] ss:$16 sps:$4 sm:$0xff]   ;;  %v2741_v48 = vld [vmem:[%s2977_s5 + $0x68] ss:$16 sps:$4 sm:$0xff]  }
  0x25   : > { %v2742_v49 = vld [vmem:[%s2977_s5 + $0x84] ss:$16 sps:$4 sm:$0xff]   ;;  %v2744_v50 = vld [vmem:[%s2977_s5 + $0x8c] ss:$16 sps:$4 sm:$0xff]   ;;  %v2746_v51 = vld [vmem:[%s2977_s5 + $0x80] ss:$16 sps:$4 sm:$0xff]  }
  0x26   : > { %1210 = vmatpush1.bf16.msra.mxu1 %v2694_v9  ;;  %v2747_v52 = vld [vmem:[%s2977_s5 + $0x88] ss:$16 sps:$4 sm:$0xff]   ;;  %v2748_v53 = vld [vmem:[%s2977_s5 + $0xa4] ss:$16 sps:$4 sm:$0xff]   ;;  %v2750_v54 = vld [vmem:[%s2977_s5 + $0xac] ss:$16 sps:$4 sm:$0xff]  }
  0x27   : > { %1403 = vmatpush1.bf16.msra.mxu0 %v2695_v10  ;;  %1211 = vmatprep.subr.bf16.mxu1 %v2878_v0  ;;  %v2752_v55 = vld [vmem:[%s2977_s5 + $0xa0] ss:$16 sps:$4 sm:$0xff]   ;;  %v2753_v56 = vld [vmem:[%s2977_s5 + $0xa8] ss:$16 sps:$4 sm:$0xff]   ;;  %v2754_v57 = vld [vmem:[%s2977_s5 + $0xc4] ss:$16 sps:$4 sm:$0xff]  }
  0x28   : > { %1404 = vmatprep.subr.bf16.mxu0 %v2878_v0  ;;  %v2756_v58 = vld [vmem:[%s2977_s5 + $0xcc] ss:$16 sps:$4 sm:$0xff]   ;;  %v2758_v59 = vld [vmem:[%s2977_s5 + $0xc0] ss:$16 sps:$4 sm:$0xff]   ;;  %v2759_v60 = vld [vmem:[%s2977_s5 + $0xc8] ss:$16 sps:$4 sm:$0xff]  }
  0x29   : > { %v2760_v61 = vld [vmem:[%s2977_s5 + $0xe4] ss:$16 sps:$4 sm:$0xff]   ;;  %v2762_v62 = vld [vmem:[%s2977_s5 + $0xec] ss:$16 sps:$4 sm:$0xff]   ;;  %v2764_v63 = vld [vmem:[%s2977_s5 + $0xe0] ss:$16 sps:$4 sm:$0xff]  }
  0x2a   : > { %1212 = vmatpush1.bf16.msra.mxu1 %v2696_v11  ;;  %v2766_v1 = vld [vmem:[%s2977_s5 + $0x104] ss:$16 sps:$4 sm:$0xff]   ;;  %v2768_v2 = vld [vmem:[%s2977_s5 + $0x10c] ss:$16 sps:$4 sm:$0xff]   ;;  %v2770_v3 = vld [vmem:[%s2977_s5 + $0x100] ss:$16 sps:$4 sm:$0xff]  }
  0x2b   : > { %1405 = vmatpush1.bf16.msra.mxu0 %v2697_v12  ;;  %1213 = vmatprep.subr.bf16.mxu1 %v2878_v0  ;;  %v2771_v4 = vld [vmem:[%s2977_s5 + $0x108] ss:$16 sps:$4 sm:$0xff]   ;;  %v2772_v5 = vld [vmem:[%s2977_s5 + $0x124] ss:$16 sps:$4 sm:$0xff]   ;;  %v2774_v6 = vld [vmem:[%s2977_s5 + $0x12c] ss:$16 sps:$4 sm:$0xff]  }
  0x2c   : > { %1406 = vmatprep.subr.bf16.mxu0 %v2878_v0  ;;  %v2776_v7 = vld [vmem:[%s2977_s5 + $0x120] ss:$16 sps:$4 sm:$0xff]   ;;  %v2777_v8 = vld [vmem:[%s2977_s5 + $0x128] ss:$16 sps:$4 sm:$0xff]   ;;  %v2778_v9 = vld [vmem:[%s2977_s5 + $0x144] ss:$16 sps:$4 sm:$0xff]  }
  0x2d   : > { %v2780_v10 = vld [vmem:[%s2977_s5 + $0x14c] ss:$16 sps:$4 sm:$0xff]   ;;  %v2782_v11 = vld [vmem:[%s2977_s5 + $0x140] ss:$16 sps:$4 sm:$0xff]   ;;  %v2783_v12 = vld [vmem:[%s2977_s5 + $0x148] ss:$16 sps:$4 sm:$0xff]  }
  0x2e   : > { %1214 = vmatpush1.bf16.msra.mxu1 %v2698_v13  ;;  %v2784_v13 = vld [vmem:[%s2977_s5 + $0x164] ss:$16 sps:$4 sm:$0xff]   ;;  %v2794_v19 = vld [vmem:[%s2977_s5 + $0x180] ss:$16 sps:$4 sm:$0xff]  }
  0x2f   : > { %1407 = vmatpush1.bf16.msra.mxu0 %v2699_v14  ;;  %1215 = vmatprep.subr.bf16.mxu1 %v2878_v0  ;;  %v2786_v14 = vld [vmem:[%s2977_s5 + $0x16c] ss:$16 sps:$4 sm:$0xff]   ;;  %v2796_v21 = vld [vmem:[%s2977_s5 + $0x1a4] ss:$16 sps:$4 sm:$0xff]  }
  0x30   : > { %1408 = vmatprep.subr.bf16.mxu0 %v2878_v0 }
  0x32   : > { %1216 = vmatpush1.bf16.msra.mxu1 %v2700_v15  ;;  %v2788_v15 = vld [vmem:[%s2977_s5 + $0x160] ss:$16 sps:$4 sm:$0xff]  }
  0x33   : > { %1409 = vmatpush1.bf16.msra.mxu0 %v2701_v16  ;;  %1217 = vmatprep.subr.bf16.mxu1 %v2878_v0  ;;  %v2789_v16 = vld [vmem:[%s2977_s5 + $0x168] ss:$16 sps:$4 sm:$0xff]  }
  0x34   : > { %1410 = vmatprep.subr.bf16.mxu0 %v2878_v0 }
  0x36   : > { %1218 = vmatpush1.bf16.msra.mxu1 %v2702_v17  ;;  %v2790_v17 = vld [vmem:[%s2977_s5 + $0x184] ss:$16 sps:$4 sm:$0xff]  }
  0x37   : > { %1411 = vmatpush1.bf16.msra.mxu0 %v2703_v18  ;;  %1219 = vmatprep.subr.bf16.mxu1 %v2878_v0  ;;  %v2792_v18 = vld [vmem:[%s2977_s5 + $0x18c] ss:$16 sps:$4 sm:$0xff]  }
  0x38   : > { %1412 = vmatprep.subr.bf16.mxu0 %v2878_v0 }
  0x3a   : > { %1220 = vmatpush1.bf16.msra.mxu1 %v2704_v20  ;;  %v2795_v20 = vld [vmem:[%s2977_s5 + $0x188] ss:$16 sps:$4 sm:$0xff]  }
  0x3b   : > { %1413 = vmatpush1.bf16.msra.mxu0 %v2705_v22  ;;  %1221 = vmatprep.subr.bf16.mxu1 %v2878_v0  ;;  %v2798_v22 = vld [vmem:[%s2977_s5 + $0x1ac] ss:$16 sps:$4 sm:$0xff]  }
  0x3c   : > { %1414 = vmatprep.subr.bf16.mxu0 %v2878_v0 }
  0x3e   : > { %1222 = vmatpush1.bf16.msra.mxu1 %v2706_v23  ;;  %v2800_v23 = vld [vmem:[%s2977_s5 + $0x1a0] ss:$16 sps:$4 sm:$0xff]  }
  0x3f   : > { %1415 = vmatpush1.bf16.msra.mxu0 %v2707_v24  ;;  %1223 = vmatprep.subr.bf16.mxu1 %v2878_v0  ;;  %v2801_v24 = vld [vmem:[%s2977_s5 + $0x1a8] ss:$16 sps:$4 sm:$0xff]  }
  0x40   : > { %1416 = vmatprep.subr.bf16.mxu0 %v2878_v0 }
  0x42   : > { %1224 = vmatpush1.bf16.msra.mxu1 %v2708_v25  ;;  %v2802_v25 = vld [vmem:[%s2977_s5 + $0x1c4] ss:$16 sps:$4 sm:$0xff]  }
  0x43   : > { %1417 = vmatpush1.bf16.msra.mxu0 %v2709_v26  ;;  %1225 = vmatprep.subr.bf16.mxu1 %v2878_v0  ;;  %v2804_v26 = vld [vmem:[%s2977_s5 + $0x1cc] ss:$16 sps:$4 sm:$0xff]  }
  0x44   : > { %1418 = vmatprep.subr.bf16.mxu0 %v2878_v0 }
  0x46   : > { %1226 = vmatpush1.bf16.msra.mxu1 %v2710_v27  ;;  %v2806_v27 = vld [vmem:[%s2977_s5 + $0x1c0] ss:$16 sps:$4 sm:$0xff]  }
  0x47   : > { %1419 = vmatpush1.bf16.msra.mxu0 %v2711_v28  ;;  %1227 = vmatprep.subr.bf16.mxu1 %v2878_v0  ;;  %v2807_v28 = vld [vmem:[%s2977_s5 + $0x1c8] ss:$16 sps:$4 sm:$0xff]  }
  0x48   : > { %1420 = vmatprep.subr.bf16.mxu0 %v2878_v0 }
  0x4a   : > { %1228 = vmatpush1.bf16.msra.mxu1 %v2712_v29  ;;  %v2808_v29 = vld [vmem:[%s2977_s5 + $0x1e4] ss:$16 sps:$4 sm:$0xff]  }
  0x4b   : > { %1421 = vmatpush1.bf16.msra.mxu0 %v2713_v30  ;;  %1229 = vmatprep.subr.bf16.mxu1 %v2878_v0  ;;  %v2810_v30 = vld [vmem:[%s2977_s5 + $0x1ec] ss:$16 sps:$4 sm:$0xff]  }
  0x4c   : > { %1422 = vmatprep.subr.bf16.mxu0 %v2878_v0 }
  0x4e   : > { %1230 = vmatpush1.bf16.msra.mxu1 %v2714_v31  ;;  %v2812_v31 = vld [vmem:[%s2977_s5 + $0x1e0] ss:$16 sps:$4 sm:$0xff]  }
  0x4f   : > { %1423 = vmatpush1.bf16.msra.mxu0 %v2715_v32  ;;  %1231 = vmatprep.subr.bf16.mxu1 %v2878_v0  ;;  %v2813_v32 = vld [vmem:[%s2977_s5 + $0x1e8] ss:$16 sps:$4 sm:$0xff]  }
  0x50   : > { %1424 = vmatprep.subr.bf16.mxu0 %v2878_v0  ;;  %v2765_v0 = vld [vmem:[%s2977_s5 + $0xe8] ss:$16 sps:$4 sm:$0xff]  }
  0x52   : > { %1232 = vmatpush1.bf16.msra.mxu1 %v2716_v33  ;;  %v2814_v33 = vld [vmem:[%s2977_s5 + $0x204] ss:$16 sps:$4 sm:$0xff]  }
  0x53   : > { %1425 = vmatpush1.bf16.msra.mxu0 %v2717_v34  ;;  %v2816_v34 = vld [vmem:[%s2977_s5 + $0x20c] ss:$16 sps:$4 sm:$0xff]  }
  0x55   : > { %1234 = vmatmul.mubr.bf16.vlgmr.msra.gmra.mrb[0].mxu1 %v2718_v35  ;;  %v2818_v35 = vld [vmem:[%s2977_s5 + $0x200] ss:$16 sps:$4 sm:$0xff]  }
  0x56   : > { %1427 = vmatmul.mubr.bf16.vlgmr.msra.gmra.mrb[0].mxu0 %v2721_v36  ;;  %1241 = vmatprep.mubr.bf16.mxu1 %v2724_v37  ;;  %v2819_v36 = vld [vmem:[%s2977_s5 + $0x208] ss:$16 sps:$4 sm:$0xff]   ;;  %v2820_v37 = vld [vmem:[%s2977_s5 + $0x224] ss:$16 sps:$4 sm:$0xff]  }
  0x57   : > { %1434 = vmatprep.mubr.bf16.mxu0 %v2726_v38  ;;  %v2822_v38 = vld [vmem:[%s2977_s5 + $0x22c] ss:$16 sps:$4 sm:$0xff]  }
  0x5d   : > { %1242 = vmatmul.mubr.bf16.gmra.mrb[4].mxu1 %v2728_v39  ;;  %v2824_v39 = vld [vmem:[%s2977_s5 + $0x220] ss:$16 sps:$4 sm:$0xff]  }
  0x5e   : > { %1435 = vmatmul.mubr.bf16.gmra.mrb[4].mxu0 %v2729_v40  ;;  %1249 = vmatprep.mubr.bf16.mxu1 %v2730_v41  ;;  %v2825_v40 = vld [vmem:[%s2977_s5 + $0x228] ss:$16 sps:$4 sm:$0xff]   ;;  %v2826_v41 = vld [vmem:[%s2977_s5 + $0x244] ss:$16 sps:$4 sm:$0xff]  }
  0x5f   : > { %1442 = vmatprep.mubr.bf16.mxu0 %v2732_v42  ;;  %v2828_v42 = vld [vmem:[%s2977_s5 + $0x24c] ss:$16 sps:$4 sm:$0xff]  }
  0x65   : > { %1250 = vmatmul.mubr.bf16.gmra.mrb[8].mxu1 %v2734_v43  ;;  %v2830_v43 = vld [vmem:[%s2977_s5 + $0x240] ss:$16 sps:$4 sm:$0xff]  }
  0x66   : > { %1443 = vmatmul.mubr.bf16.gmra.mrb[8].mxu0 %v2735_v44  ;;  %1257 = vmatprep.mubr.bf16.mxu1 %v2736_v45  ;;  %v2831_v44 = vld [vmem:[%s2977_s5 + $0x248] ss:$16 sps:$4 sm:$0xff]   ;;  %v2832_v45 = vld [vmem:[%s2977_s5 + $0x264] ss:$16 sps:$4 sm:$0xff]  }
  0x67   : > { %1450 = vmatprep.mubr.bf16.mxu0 %v2738_v46  ;;  %v2834_v46 = vld [vmem:[%s2977_s5 + $0x26c] ss:$16 sps:$4 sm:$0xff]  }
  0x6d   : > { %1258 = vmatmul.mubr.bf16.gmra.mrb[12].mxu1 %v2740_v47  ;;  %v2836_v47 = vld [vmem:[%s2977_s5 + $0x260] ss:$16 sps:$4 sm:$0xff]  }
  0x6e   : > { %1451 = vmatmul.mubr.bf16.gmra.mrb[12].mxu0 %v2741_v48  ;;  %1265 = vmatprep.mubr.bf16.mxu1 %v2742_v49  ;;  %v2837_v48 = vld [vmem:[%s2977_s5 + $0x268] ss:$16 sps:$4 sm:$0xff]  }
  0x6f   : > { %1458 = vmatprep.mubr.bf16.mxu0 %v2744_v50 }
  0x75   : > { %1266 = vmatmul.mubr.bf16.gmra.mrb[16].mxu1 %v2746_v51 }
  0x76   : > { %1459 = vmatmul.mubr.bf16.gmra.mrb[16].mxu0 %v2747_v52  ;;  %1273 = vmatprep.mubr.bf16.mxu1 %v2748_v53 }
  0x77   : > { %1466 = vmatprep.mubr.bf16.mxu0 %v2750_v54 }
  0x7d   : > { %1274 = vmatmul.mubr.bf16.gmra.mrb[20].mxu1 %v2752_v55 }
  0x7e   : > { %1467 = vmatmul.mubr.bf16.gmra.mrb[20].mxu0 %v2753_v56  ;;  %1281 = vmatprep.mubr.bf16.mxu1 %v2754_v57 }
  0x7f   : > { %1474 = vmatprep.mubr.bf16.mxu0 %v2756_v58 }
  0x85   : > { %1282 = vmatmul.mubr.bf16.gmra.mrb[24].mxu1 %v2758_v59 }
  0x86   : > { %1475 = vmatmul.mubr.bf16.gmra.mrb[24].mxu0 %v2759_v60  ;;  %1289 = vmatprep.mubr.bf16.mxu1 %v2760_v61 }
  0x87   : > { %1482 = vmatprep.mubr.bf16.mxu0 %v2762_v62 }
  0x8d   : > { %1290 = vmatmul.mubr.bf16.gmra.mrb[28].mxu1 %v2764_v63 }
  0x8e   : > { %1483 = vmatmul.mubr.bf16.gmra.mrb[28].mxu0 %v2765_v0  ;;  %1297 = vmatprep.mubr.bf16.mxu1 %v2766_v1 }
  0x8f   : > { %1490 = vmatprep.mubr.bf16.mxu0 %v2768_v2 }
  0x95   : > { %1298 = vmatmul.mubr.bf16.gmra.mrb[32].mxu1 %v2770_v3 }
  0x96   : > { %1491 = vmatmul.mubr.bf16.gmra.mrb[32].mxu0 %v2771_v4  ;;  %1305 = vmatprep.mubr.bf16.mxu1 %v2772_v5 }
  0x97   : > { %1498 = vmatprep.mubr.bf16.mxu0 %v2774_v6 }
  0x9d   : > { %1306 = vmatmul.mubr.bf16.gmra.mrb[36].mxu1 %v2776_v7 }
  0x9e   : > { %1499 = vmatmul.mubr.bf16.gmra.mrb[36].mxu0 %v2777_v8  ;;  %1313 = vmatprep.mubr.bf16.mxu1 %v2778_v9 }
  0x9f   : > { %1506 = vmatprep.mubr.bf16.mxu0 %v2780_v10 }
  0xa5   : > { %1314 = vmatmul.mubr.bf16.gmra.mrb[40].mxu1 %v2782_v11 }
  0xa6   : > { %1507 = vmatmul.mubr.bf16.gmra.mrb[40].mxu0 %v2783_v12  ;;  %1321 = vmatprep.mubr.bf16.mxu1 %v2784_v13 }
  0xa7   : > { %1514 = vmatprep.mubr.bf16.mxu0 %v2786_v14 }
  0xad   : > { %1322 = vmatmul.mubr.bf16.gmra.mrb[44].mxu1 %v2788_v15 }
  0xae   : > { %1515 = vmatmul.mubr.bf16.gmra.mrb[44].mxu0 %v2789_v16  ;;  %1329 = vmatprep.mubr.bf16.mxu1 %v2790_v17 }
  0xaf   : > { %1522 = vmatprep.mubr.bf16.mxu0 %v2792_v18 }
  0xb5   : > { %1330 = vmatmul.mubr.bf16.gmra.mrb[48].mxu1 %v2794_v19 }
  0xb6   : > { %1523 = vmatmul.mubr.bf16.gmra.mrb[48].mxu0 %v2795_v20  ;;  %1337 = vmatprep.mubr.bf16.mxu1 %v2796_v21 }
  0xb7   : > { %1530 = vmatprep.mubr.bf16.mxu0 %v2798_v22 }
  0xbd   : > { %1338 = vmatmul.mubr.bf16.gmra.mrb[52].mxu1 %v2800_v23 }
  0xbe   : > { %1531 = vmatmul.mubr.bf16.gmra.mrb[52].mxu0 %v2801_v24  ;;  %1345 = vmatprep.mubr.bf16.mxu1 %v2802_v25 }
  0xbf   : > { %1538 = vmatprep.mubr.bf16.mxu0 %v2804_v26 }
  0xc5   : > { %1346 = vmatmul.mubr.bf16.gmra.mrb[56].mxu1 %v2806_v27 }
  0xc6   : > { %1539 = vmatmul.mubr.bf16.gmra.mrb[56].mxu0 %v2807_v28  ;;  %1353 = vmatprep.mubr.bf16.mxu1 %v2808_v29 }
  0xc7   : > { %1546 = vmatprep.mubr.bf16.mxu0 %v2810_v30 }
  0xcd   : > { %1354 = vmatmul.mubr.bf16.gmra.mrb[60].mxu1 %v2812_v31 }
  0xce   : > { %1547 = vmatmul.mubr.bf16.gmra.mrb[60].mxu0 %v2813_v32  ;;  %1361 = vmatprep.mubr.bf16.mxu1 %v2814_v33 }
  0xcf   : > { %1554 = vmatprep.mubr.bf16.mxu0 %v2816_v34 }
  0xd5   : > { %1362 = vmatmul.mubr.bf16.gmra.mrb[64].mxu1 %v2818_v35 }
  0xd6   : > { %1555 = vmatmul.mubr.bf16.gmra.mrb[64].mxu0 %v2819_v36  ;;  %1369 = vmatprep.mubr.bf16.mxu1 %v2820_v37 }
  0xd7   : > { %1562 = vmatprep.mubr.bf16.mxu0 %v2822_v38 }
  0xdd   : > { %1370 = vmatmul.mubr.bf16.gmra.mrb[68].mxu1 %v2824_v39 }
  0xde   : > { %1563 = vmatmul.mubr.bf16.gmra.mrb[68].mxu0 %v2825_v40  ;;  %1377 = vmatprep.mubr.bf16.mxu1 %v2826_v41 }
  0xdf   : > { %1570 = vmatprep.mubr.bf16.mxu0 %v2828_v42 }
  0xe5   : > { %1378 = vmatmul.mubr.bf16.gmra.mrb[72].mxu1 %v2830_v43 }
  0xe6   : > { %1571 = vmatmul.mubr.bf16.gmra.mrb[72].mxu0 %v2831_v44  ;;  %1385 = vmatprep.mubr.bf16.mxu1 %v2832_v45 }
  0xe7   : > { %1578 = vmatprep.mubr.bf16.mxu0 %v2834_v46 }
  0xed   : > { %1386 = vmatmul.mubr.bf16.gmra.mrb[76].mxu1 %v2836_v47 }
  0xee   : > { %1579 = vmatmul.mubr.bf16.gmra.mrb[76].mxu0 %v2837_v48 }
 0x128   : > { %v1235_v49 = vpop.f32.mrb[0].mxu1 }
 0x129   : > { %v1428_v50 = vpop.f32.mrb[0].mxu0  ;;  %v1237_v51 = vpop.f32.mrb[1].mxu1 }
 0x12a   : > { %v1429_v52 = vadd.f32 %v1428_v50, %v1235_v49  ;;  %v1430_v53 = vpop.f32.mrb[1].mxu0  ;;  %v1238_v54 = vpop.f32.mrb[2].mxu1 }
 0x12b   : > { %v1431_v55 = vpop.f32.mrb[2].mxu0  ;;  %v1240_v56 = vpop.f32.mrb[3].mxu1 }
 0x12c   : > { %v1432_v57 = vadd.f32 %v1431_v55, %v1238_v54  ;;  %v1433_v58 = vpop.f32.mrb[3].mxu0  ;;  %v1955_v59 = vmul.f32 %v1429_v52, %v1429_v52 }
 0x12e   : > { %v2485_v60 = vpack.c.bf16 %v1432_v57, %v1429_v52  ;;  %v1910_v61 = vadd.f32 %v1432_v57, %v1429_v52  ;;  %v1956_v62 = vmul.f32 %v1432_v57, %v1432_v57 }
 0x130   : > { %2486 = vst [vmem:[%s3096_s19] sm:$0xff] %v2485_v60   ;;  %v1995_v63 = vadd.f32 %v1956_v62, %v1955_v59  ;;  %v1243_v0 = vpop.f32.mrb[4].mxu1 }
 0x131   : > { %v1436_v1 = vpop.f32.mrb[4].mxu0  ;;  %v1245_v2 = vpop.f32.mrb[5].mxu1 }
 0x132   : > { %v1437_v3 = vadd.f32 %v1436_v1, %v1243_v0  ;;  %v1438_v4 = vpop.f32.mrb[5].mxu0  ;;  %v1246_v5 = vpop.f32.mrb[6].mxu1 }
 0x133   : > { %v1439_v6 = vpop.f32.mrb[6].mxu0  ;;  %v1248_v7 = vpop.f32.mrb[7].mxu1 }
 0x134   : > { %v1911_v8 = vadd.f32 %v1910_v61, %v1437_v3  ;;  %v1957_v9 = vmul.f32 %v1437_v3, %v1437_v3  ;;  %v1440_v10 = vadd.f32 %v1439_v6, %v1246_v5  ;;  %v1441_v11 = vpop.f32.mrb[7].mxu0 }
 0x136   : > { %v1996_v12 = vadd.f32 %v1995_v63, %v1957_v9  ;;  %v2490_v13 = vpack.c.bf16 %v1440_v10, %v1437_v3  ;;  %v1912_v14 = vadd.f32 %v1911_v8, %v1440_v10  ;;  %v1958_v15 = vmul.f32 %v1440_v10, %v1440_v10 }
 0x138   : > { %2582 = vst [vmem:[%s3096_s19 + $0x8] sm:$0xff] %v2490_v13   ;;  %v1997_v16 = vadd.f32 %v1996_v12, %v1958_v15  ;;  %v1251_v17 = vpop.f32.mrb[8].mxu1 }
 0x139   : > { %v1444_v18 = vpop.f32.mrb[8].mxu0  ;;  %v1253_v19 = vpop.f32.mrb[9].mxu1 }
 0x13a   : > { %v1445_v20 = vadd.f32 %v1444_v18, %v1251_v17  ;;  %v1446_v21 = vpop.f32.mrb[9].mxu0  ;;  %v1254_v22 = vpop.f32.mrb[10].mxu1 }
 0x13b   : > { %v1447_v23 = vpop.f32.mrb[10].mxu0  ;;  %v1256_v24 = vpop.f32.mrb[11].mxu1 }
 0x13c   : > { %v1913_v25 = vadd.f32 %v1912_v14, %v1445_v20  ;;  %v1959_v26 = vmul.f32 %v1445_v20, %v1445_v20  ;;  %v1448_v27 = vadd.f32 %v1447_v23, %v1254_v22  ;;  %v1449_v28 = vpop.f32.mrb[11].mxu0 }
 0x13e   : > { %v1998_v29 = vadd.f32 %v1997_v16, %v1959_v26  ;;  %v2495_v30 = vpack.c.bf16 %v1448_v27, %v1445_v20  ;;  %v1914_v31 = vadd.f32 %v1913_v25, %v1448_v27  ;;  %v1960_v32 = vmul.f32 %v1448_v27, %v1448_v27 }
 0x140   : > { %2583 = vst [vmem:[%s3096_s19 + $0x10] sm:$0xff] %v2495_v30   ;;  %v1999_v33 = vadd.f32 %v1998_v29, %v1960_v32  ;;  %v1259_v34 = vpop.f32.mrb[12].mxu1 }
 0x141   : > { %v1452_v35 = vpop.f32.mrb[12].mxu0  ;;  %v1261_v36 = vpop.f32.mrb[13].mxu1 }
 0x142   : > { %v1453_v37 = vadd.f32 %v1452_v35, %v1259_v34  ;;  %v1454_v38 = vpop.f32.mrb[13].mxu0  ;;  %v1262_v39 = vpop.f32.mrb[14].mxu1 }
 0x143   : > { %v1455_v40 = vpop.f32.mrb[14].mxu0  ;;  %v1264_v41 = vpop.f32.mrb[15].mxu1 }
 0x144   : > { %v1915_v42 = vadd.f32 %v1914_v31, %v1453_v37  ;;  %v1961_v43 = vmul.f32 %v1453_v37, %v1453_v37  ;;  %v1456_v44 = vadd.f32 %v1455_v40, %v1262_v39  ;;  %v1457_v45 = vpop.f32.mrb[15].mxu0 }
 0x146   : > { %v2000_v46 = vadd.f32 %v1999_v33, %v1961_v43  ;;  %v2500_v47 = vpack.c.bf16 %v1456_v44, %v1453_v37  ;;  %v1916_v48 = vadd.f32 %v1915_v42, %v1456_v44  ;;  %v1962_v49 = vmul.f32 %v1456_v44, %v1456_v44 }
 0x148   : > { %2584 = vst [vmem:[%s3096_s19 + $0x18] sm:$0xff] %v2500_v47   ;;  %v2001_v50 = vadd.f32 %v2000_v46, %v1962_v49  ;;  %v1267_v51 = vpop.f32.mrb[16].mxu1 }
 0x149   : > { %v1460_v52 = vpop.f32.mrb[16].mxu0  ;;  %v1269_v53 = vpop.f32.mrb[17].mxu1 }
 0x14a   : > { %v1461_v54 = vadd.f32 %v1460_v52, %v1267_v51  ;;  %v1462_v55 = vpop.f32.mrb[17].mxu0  ;;  %v1270_v56 = vpop.f32.mrb[18].mxu1 }
 0x14b   : > { %v1463_v57 = vpop.f32.mrb[18].mxu0  ;;  %v1272_v58 = vpop.f32.mrb[19].mxu1 }
 0x14c   : > { %v1917_v59 = vadd.f32 %v1916_v48, %v1461_v54  ;;  %v1963_v60 = vmul.f32 %v1461_v54, %v1461_v54  ;;  %v1464_v61 = vadd.f32 %v1463_v57, %v1270_v56  ;;  %v1465_v62 = vpop.f32.mrb[19].mxu0 }
 0x14e   : > { %v2002_v63 = vadd.f32 %v2001_v50, %v1963_v60  ;;  %v2505_v0 = vpack.c.bf16 %v1464_v61, %v1461_v54  ;;  %v1918_v1 = vadd.f32 %v1917_v59, %v1464_v61  ;;  %v1964_v2 = vmul.f32 %v1464_v61, %v1464_v61 }
 0x150   : > { %2585 = vst [vmem:[%s3096_s19 + $0x20] sm:$0xff] %v2505_v0   ;;  %v2003_v3 = vadd.f32 %v2002_v63, %v1964_v2  ;;  %v1275_v4 = vpop.f32.mrb[20].mxu1 }
 0x151   : > { %v1468_v5 = vpop.f32.mrb[20].mxu0  ;;  %v1277_v6 = vpop.f32.mrb[21].mxu1 }
 0x152   : > { %v1469_v7 = vadd.f32 %v1468_v5, %v1275_v4  ;;  %v1470_v8 = vpop.f32.mrb[21].mxu0  ;;  %v1278_v9 = vpop.f32.mrb[22].mxu1 }
 0x153   : > { %v1471_v10 = vpop.f32.mrb[22].mxu0  ;;  %v1280_v11 = vpop.f32.mrb[23].mxu1 }
 0x154   : > { %v1919_v12 = vadd.f32 %v1918_v1, %v1469_v7  ;;  %v1965_v13 = vmul.f32 %v1469_v7, %v1469_v7  ;;  %v1472_v14 = vadd.f32 %v1471_v10, %v1278_v9  ;;  %v1473_v15 = vpop.f32.mrb[23].mxu0 }
 0x156   : > { %v2004_v16 = vadd.f32 %v2003_v3, %v1965_v13  ;;  %v2510_v17 = vpack.c.bf16 %v1472_v14, %v1469_v7  ;;  %v1920_v18 = vadd.f32 %v1919_v12, %v1472_v14  ;;  %v1966_v19 = vmul.f32 %v1472_v14, %v1472_v14 }
 0x158   : > { %2586 = vst [vmem:[%s3096_s19 + $0x28] sm:$0xff] %v2510_v17   ;;  %v2005_v20 = vadd.f32 %v2004_v16, %v1966_v19  ;;  %v1283_v21 = vpop.f32.mrb[24].mxu1 }
 0x159   : > { %v1476_v22 = vpop.f32.mrb[24].mxu0  ;;  %v1285_v23 = vpop.f32.mrb[25].mxu1 }
 0x15a   : > { %v1477_v24 = vadd.f32 %v1476_v22, %v1283_v21  ;;  %v1478_v25 = vpop.f32.mrb[25].mxu0  ;;  %v1286_v26 = vpop.f32.mrb[26].mxu1 }
 0x15b   : > { %v1479_v27 = vpop.f32.mrb[26].mxu0  ;;  %v1288_v28 = vpop.f32.mrb[27].mxu1 }
 0x15c   : > { %v1921_v29 = vadd.f32 %v1920_v18, %v1477_v24  ;;  %v1967_v30 = vmul.f32 %v1477_v24, %v1477_v24  ;;  %v1480_v31 = vadd.f32 %v1479_v27, %v1286_v26  ;;  %v1481_v32 = vpop.f32.mrb[27].mxu0 }
 0x15e   : > { %v2006_v33 = vadd.f32 %v2005_v20, %v1967_v30  ;;  %v2515_v34 = vpack.c.bf16 %v1480_v31, %v1477_v24  ;;  %v1922_v35 = vadd.f32 %v1921_v29, %v1480_v31  ;;  %v1968_v36 = vmul.f32 %v1480_v31, %v1480_v31 }
 0x160   : > { %2587 = vst [vmem:[%s3096_s19 + $0x30] sm:$0xff] %v2515_v34   ;;  %v2007_v37 = vadd.f32 %v2006_v33, %v1968_v36  ;;  %v1291_v38 = vpop.f32.mrb[28].mxu1 }
 0x161   : > { %v1484_v39 = vpop.f32.mrb[28].mxu0  ;;  %v1293_v40 = vpop.f32.mrb[29].mxu1 }
 0x162   : > { %v1485_v41 = vadd.f32 %v1484_v39, %v1291_v38  ;;  %v1486_v42 = vpop.f32.mrb[29].mxu0  ;;  %v1294_v43 = vpop.f32.mrb[30].mxu1 }
 0x163   : > { %v1487_v44 = vpop.f32.mrb[30].mxu0  ;;  %v1296_v45 = vpop.f32.mrb[31].mxu1 }
 0x164   : > { %v1923_v46 = vadd.f32 %v1922_v35, %v1485_v41  ;;  %v1969_v47 = vmul.f32 %v1485_v41, %v1485_v41  ;;  %v1488_v48 = vadd.f32 %v1487_v44, %v1294_v43  ;;  %v1489_v49 = vpop.f32.mrb[31].mxu0 }
 0x166   : > { %v2008_v50 = vadd.f32 %v2007_v37, %v1969_v47  ;;  %v2520_v51 = vpack.c.bf16 %v1488_v48, %v1485_v41  ;;  %v1924_v52 = vadd.f32 %v1923_v46, %v1488_v48  ;;  %v1970_v53 = vmul.f32 %v1488_v48, %v1488_v48 }
 0x168   : > { %2588 = vst [vmem:[%s3096_s19 + $0x38] sm:$0xff] %v2520_v51   ;;  %v2009_v54 = vadd.f32 %v2008_v50, %v1970_v53  ;;  %v1299_v55 = vpop.f32.mrb[32].mxu1 }
 0x169   : > { %v1492_v56 = vpop.f32.mrb[32].mxu0  ;;  %v1301_v57 = vpop.f32.mrb[33].mxu1 }
 0x16a   : > { %v1493_v58 = vadd.f32 %v1492_v56, %v1299_v55  ;;  %v1494_v59 = vpop.f32.mrb[33].mxu0  ;;  %v1302_v60 = vpop.f32.mrb[34].mxu1 }
 0x16b   : > { %v1495_v61 = vpop.f32.mrb[34].mxu0  ;;  %v1304_v62 = vpop.f32.mrb[35].mxu1 }
 0x16c   : > { %v1925_v63 = vadd.f32 %v1924_v52, %v1493_v58  ;;  %v1971_v0 = vmul.f32 %v1493_v58, %v1493_v58  ;;  %v1496_v1 = vadd.f32 %v1495_v61, %v1302_v60  ;;  %v1497_v2 = vpop.f32.mrb[35].mxu0 }
 0x16e   : > { %v2010_v3 = vadd.f32 %v2009_v54, %v1971_v0  ;;  %v2525_v4 = vpack.c.bf16 %v1496_v1, %v1493_v58  ;;  %v1926_v5 = vadd.f32 %v1925_v63, %v1496_v1  ;;  %v1972_v6 = vmul.f32 %v1496_v1, %v1496_v1 }
 0x170   : > { %2589 = vst [vmem:[%s3096_s19 + $0x40] sm:$0xff] %v2525_v4   ;;  %v2011_v7 = vadd.f32 %v2010_v3, %v1972_v6  ;;  %v1307_v8 = vpop.f32.mrb[36].mxu1 }
 0x171   : > { %v1500_v9 = vpop.f32.mrb[36].mxu0  ;;  %v1309_v10 = vpop.f32.mrb[37].mxu1 }
 0x172   : > { %v1501_v11 = vadd.f32 %v1500_v9, %v1307_v8  ;;  %v1502_v12 = vpop.f32.mrb[37].mxu0  ;;  %v1310_v13 = vpop.f32.mrb[38].mxu1 }
 0x173   : > { %v1503_v14 = vpop.f32.mrb[38].mxu0  ;;  %v1312_v15 = vpop.f32.mrb[39].mxu1 }
 0x174   : > { %v1927_v16 = vadd.f32 %v1926_v5, %v1501_v11  ;;  %v1973_v17 = vmul.f32 %v1501_v11, %v1501_v11  ;;  %v1504_v18 = vadd.f32 %v1503_v14, %v1310_v13  ;;  %v1505_v19 = vpop.f32.mrb[39].mxu0 }
 0x176   : > { %v2012_v20 = vadd.f32 %v2011_v7, %v1973_v17  ;;  %v2530_v21 = vpack.c.bf16 %v1504_v18, %v1501_v11  ;;  %v1928_v22 = vadd.f32 %v1927_v16, %v1504_v18  ;;  %v1974_v23 = vmul.f32 %v1504_v18, %v1504_v18 }
 0x178   : > { %2590 = vst [vmem:[%s3096_s19 + $0x48] sm:$0xff] %v2530_v21   ;;  %v2013_v24 = vadd.f32 %v2012_v20, %v1974_v23  ;;  %v1315_v25 = vpop.f32.mrb[40].mxu1 }
 0x179   : > { %v1508_v26 = vpop.f32.mrb[40].mxu0  ;;  %v1317_v27 = vpop.f32.mrb[41].mxu1 }
 0x17a   : > { %v1509_v28 = vadd.f32 %v1508_v26, %v1315_v25  ;;  %v1510_v29 = vpop.f32.mrb[41].mxu0  ;;  %v1318_v30 = vpop.f32.mrb[42].mxu1 }
 0x17b   : > { %v1511_v31 = vpop.f32.mrb[42].mxu0  ;;  %v1320_v32 = vpop.f32.mrb[43].mxu1 }
 0x17c   : > { %v1929_v33 = vadd.f32 %v1928_v22, %v1509_v28  ;;  %v1975_v34 = vmul.f32 %v1509_v28, %v1509_v28  ;;  %v1512_v35 = vadd.f32 %v1511_v31, %v1318_v30  ;;  %v1513_v36 = vpop.f32.mrb[43].mxu0 }
 0x17e   : > { %v2014_v37 = vadd.f32 %v2013_v24, %v1975_v34  ;;  %v2535_v38 = vpack.c.bf16 %v1512_v35, %v1509_v28  ;;  %v1930_v39 = vadd.f32 %v1929_v33, %v1512_v35  ;;  %v1976_v40 = vmul.f32 %v1512_v35, %v1512_v35 }
 0x180   : > { %2591 = vst [vmem:[%s3096_s19 + $0x50] sm:$0xff] %v2535_v38   ;;  %v2015_v41 = vadd.f32 %v2014_v37, %v1976_v40  ;;  %v1323_v42 = vpop.f32.mrb[44].mxu1 }
 0x181   : > { %v1516_v43 = vpop.f32.mrb[44].mxu0  ;;  %v1325_v44 = vpop.f32.mrb[45].mxu1 }
 0x182   : > { %v1517_v45 = vadd.f32 %v1516_v43, %v1323_v42  ;;  %v1518_v46 = vpop.f32.mrb[45].mxu0  ;;  %v1326_v47 = vpop.f32.mrb[46].mxu1 }
 0x183   : > { %v1519_v48 = vpop.f32.mrb[46].mxu0  ;;  %v1328_v49 = vpop.f32.mrb[47].mxu1 }
 0x184   : > { %v1931_v50 = vadd.f32 %v1930_v39, %v1517_v45  ;;  %v1977_v51 = vmul.f32 %v1517_v45, %v1517_v45  ;;  %v1520_v52 = vadd.f32 %v1519_v48, %v1326_v47  ;;  %v1521_v53 = vpop.f32.mrb[47].mxu0 }
 0x186   : > { %v2016_v54 = vadd.f32 %v2015_v41, %v1977_v51  ;;  %v2540_v55 = vpack.c.bf16 %v1520_v52, %v1517_v45  ;;  %v1932_v56 = vadd.f32 %v1931_v50, %v1520_v52  ;;  %v1978_v57 = vmul.f32 %v1520_v52, %v1520_v52 }
 0x188   : > { %2592 = vst [vmem:[%s3096_s19 + $0x58] sm:$0xff] %v2540_v55   ;;  %v2017_v58 = vadd.f32 %v2016_v54, %v1978_v57  ;;  %v1331_v59 = vpop.f32.mrb[48].mxu1 }
 0x189   : > { %v1524_v60 = vpop.f32.mrb[48].mxu0  ;;  %v1333_v61 = vpop.f32.mrb[49].mxu1 }
 0x18a   : > { %v1525_v62 = vadd.f32 %v1524_v60, %v1331_v59  ;;  %v1526_v63 = vpop.f32.mrb[49].mxu0  ;;  %v1334_v0 = vpop.f32.mrb[50].mxu1 }
 0x18b   : > { %v1527_v1 = vpop.f32.mrb[50].mxu0  ;;  %v1336_v2 = vpop.f32.mrb[51].mxu1 }
 0x18c   : > { %v1933_v3 = vadd.f32 %v1932_v56, %v1525_v62  ;;  %v1979_v4 = vmul.f32 %v1525_v62, %v1525_v62  ;;  %v1528_v5 = vadd.f32 %v1527_v1, %v1334_v0  ;;  %v1529_v6 = vpop.f32.mrb[51].mxu0 }
 0x18e   : > { %v2018_v7 = vadd.f32 %v2017_v58, %v1979_v4  ;;  %v2545_v8 = vpack.c.bf16 %v1528_v5, %v1525_v62  ;;  %v1934_v9 = vadd.f32 %v1933_v3, %v1528_v5  ;;  %v1980_v10 = vmul.f32 %v1528_v5, %v1528_v5 }
 0x190   : > { %2593 = vst [vmem:[%s3096_s19 + $0x60] sm:$0xff] %v2545_v8   ;;  %v2019_v11 = vadd.f32 %v2018_v7, %v1980_v10  ;;  %v1339_v12 = vpop.f32.mrb[52].mxu1 }
 0x191   : > { %v1532_v13 = vpop.f32.mrb[52].mxu0  ;;  %v1341_v14 = vpop.f32.mrb[53].mxu1 }
 0x192   : > { %v1533_v15 = vadd.f32 %v1532_v13, %v1339_v12  ;;  %v1534_v16 = vpop.f32.mrb[53].mxu0  ;;  %v1342_v17 = vpop.f32.mrb[54].mxu1 }
 0x193   : > { %v1535_v18 = vpop.f32.mrb[54].mxu0  ;;  %v1344_v19 = vpop.f32.mrb[55].mxu1 }
 0x194   : > { %v1935_v20 = vadd.f32 %v1934_v9, %v1533_v15  ;;  %v1981_v21 = vmul.f32 %v1533_v15, %v1533_v15  ;;  %v1536_v22 = vadd.f32 %v1535_v18, %v1342_v17  ;;  %v1537_v23 = vpop.f32.mrb[55].mxu0 }
 0x196   : > { %v2020_v24 = vadd.f32 %v2019_v11, %v1981_v21  ;;  %v2550_v25 = vpack.c.bf16 %v1536_v22, %v1533_v15  ;;  %v1936_v26 = vadd.f32 %v1935_v20, %v1536_v22  ;;  %v1982_v27 = vmul.f32 %v1536_v22, %v1536_v22 }
 0x198   : > { %2594 = vst [vmem:[%s3096_s19 + $0x68] sm:$0xff] %v2550_v25   ;;  %v2021_v28 = vadd.f32 %v2020_v24, %v1982_v27  ;;  %v1347_v29 = vpop.f32.mrb[56].mxu1 }
 0x199   : > { %v1540_v30 = vpop.f32.mrb[56].mxu0  ;;  %v1349_v31 = vpop.f32.mrb[57].mxu1 }
 0x19a   : > { %v1541_v32 = vadd.f32 %v1540_v30, %v1347_v29  ;;  %v1542_v33 = vpop.f32.mrb[57].mxu0  ;;  %v1350_v34 = vpop.f32.mrb[58].mxu1 }
 0x19b   : > { %v1543_v35 = vpop.f32.mrb[58].mxu0  ;;  %v1352_v36 = vpop.f32.mrb[59].mxu1 }
 0x19c   : > { %v1937_v37 = vadd.f32 %v1936_v26, %v1541_v32  ;;  %v1983_v38 = vmul.f32 %v1541_v32, %v1541_v32  ;;  %v1544_v39 = vadd.f32 %v1543_v35, %v1350_v34  ;;  %v1545_v40 = vpop.f32.mrb[59].mxu0 }
 0x19e   : > { %v2022_v41 = vadd.f32 %v2021_v28, %v1983_v38  ;;  %v2555_v42 = vpack.c.bf16 %v1544_v39, %v1541_v32  ;;  %v1938_v43 = vadd.f32 %v1937_v37, %v1544_v39  ;;  %v1984_v44 = vmul.f32 %v1544_v39, %v1544_v39 }
 0x1a0   : > { %2595 = vst [vmem:[%s3096_s19 + $0x70] sm:$0xff] %v2555_v42   ;;  %v2023_v45 = vadd.f32 %v2022_v41, %v1984_v44  ;;  %v1355_v46 = vpop.f32.mrb[60].mxu1 }
 0x1a1   : > { %v1548_v47 = vpop.f32.mrb[60].mxu0  ;;  %v1357_v48 = vpop.f32.mrb[61].mxu1 }
 0x1a2   : > { %v1549_v49 = vadd.f32 %v1548_v47, %v1355_v46  ;;  %v1550_v50 = vpop.f32.mrb[61].mxu0  ;;  %v1358_v51 = vpop.f32.mrb[62].mxu1 }
 0x1a3   : > { %v1551_v52 = vpop.f32.mrb[62].mxu0  ;;  %v1360_v53 = vpop.f32.mrb[63].mxu1 }
 0x1a4   : > { %v1939_v54 = vadd.f32 %v1938_v43, %v1549_v49  ;;  %v1985_v55 = vmul.f32 %v1549_v49, %v1549_v49  ;;  %v1552_v56 = vadd.f32 %v1551_v52, %v1358_v51  ;;  %v1553_v57 = vpop.f32.mrb[63].mxu0 }
 0x1a6   : > { %v2024_v58 = vadd.f32 %v2023_v45, %v1985_v55  ;;  %v2560_v59 = vpack.c.bf16 %v1552_v56, %v1549_v49  ;;  %v1940_v60 = vadd.f32 %v1939_v54, %v1552_v56  ;;  %v1986_v61 = vmul.f32 %v1552_v56, %v1552_v56 }
 0x1a8   : > { %2596 = vst [vmem:[%s3096_s19 + $0x78] sm:$0xff] %v2560_v59   ;;  %v2025_v62 = vadd.f32 %v2024_v58, %v1986_v61  ;;  %v1363_v63 = vpop.f32.mrb[64].mxu1 }
 0x1a9   : > { %v1556_v0 = vpop.f32.mrb[64].mxu0  ;;  %v1365_v1 = vpop.f32.mrb[65].mxu1 }
 0x1aa   : > { %v1557_v2 = vadd.f32 %v1556_v0, %v1363_v63  ;;  %v1558_v3 = vpop.f32.mrb[65].mxu0  ;;  %v1366_v4 = vpop.f32.mrb[66].mxu1 }
 0x1ab   : > { %v1559_v5 = vpop.f32.mrb[66].mxu0  ;;  %v1368_v6 = vpop.f32.mrb[67].mxu1 }
 0x1ac   : > { %v1941_v7 = vadd.f32 %v1940_v60, %v1557_v2  ;;  %v1987_v8 = vmul.f32 %v1557_v2, %v1557_v2  ;;  %v1560_v9 = vadd.f32 %v1559_v5, %v1366_v4  ;;  %v1561_v10 = vpop.f32.mrb[67].mxu0 }
 0x1ae   : > { %v2026_v11 = vadd.f32 %v2025_v62, %v1987_v8  ;;  %v2565_v12 = vpack.c.bf16 %v1560_v9, %v1557_v2  ;;  %v1942_v13 = vadd.f32 %v1941_v7, %v1560_v9  ;;  %v1988_v14 = vmul.f32 %v1560_v9, %v1560_v9 }
 0x1b0   : > { %2597 = vst [vmem:[%s3096_s19 + $0x80] sm:$0xff] %v2565_v12   ;;  %v2027_v15 = vadd.f32 %v2026_v11, %v1988_v14  ;;  %v1371_v16 = vpop.f32.mrb[68].mxu1 }
 0x1b1   : > { %v1564_v17 = vpop.f32.mrb[68].mxu0  ;;  %v1373_v18 = vpop.f32.mrb[69].mxu1 }
 0x1b2   : > { %v1565_v19 = vadd.f32 %v1564_v17, %v1371_v16  ;;  %v1566_v20 = vpop.f32.mrb[69].mxu0  ;;  %v1374_v21 = vpop.f32.mrb[70].mxu1 }
 0x1b3   : > { %v1567_v22 = vpop.f32.mrb[70].mxu0  ;;  %v1376_v23 = vpop.f32.mrb[71].mxu1 }
 0x1b4   : > { %v1943_v24 = vadd.f32 %v1942_v13, %v1565_v19  ;;  %v1989_v25 = vmul.f32 %v1565_v19, %v1565_v19  ;;  %v1568_v26 = vadd.f32 %v1567_v22, %v1374_v21  ;;  %v1569_v27 = vpop.f32.mrb[71].mxu0 }
 0x1b6   : > { %v2028_v28 = vadd.f32 %v2027_v15, %v1989_v25  ;;  %v2570_v29 = vpack.c.bf16 %v1568_v26, %v1565_v19  ;;  %v1944_v30 = vadd.f32 %v1943_v24, %v1568_v26  ;;  %v1990_v31 = vmul.f32 %v1568_v26, %v1568_v26 }
 0x1b8   : > { %2598 = vst [vmem:[%s3096_s19 + $0x88] sm:$0xff] %v2570_v29   ;;  %v2029_v32 = vadd.f32 %v2028_v28, %v1990_v31  ;;  %v1379_v33 = vpop.f32.mrb[72].mxu1 }
 0x1b9   : > { %v1572_v34 = vpop.f32.mrb[72].mxu0  ;;  %v1381_v35 = vpop.f32.mrb[73].mxu1 }
 0x1ba   : > { %v1573_v36 = vadd.f32 %v1572_v34, %v1379_v33  ;;  %v1574_v37 = vpop.f32.mrb[73].mxu0  ;;  %v1382_v38 = vpop.f32.mrb[74].mxu1 }
 0x1bb   : > { %v1575_v39 = vpop.f32.mrb[74].mxu0  ;;  %v1384_v40 = vpop.f32.mrb[75].mxu1 }
 0x1bc   : > { %v1945_v41 = vadd.f32 %v1944_v30, %v1573_v36  ;;  %v1991_v42 = vmul.f32 %v1573_v36, %v1573_v36  ;;  %v1576_v43 = vadd.f32 %v1575_v39, %v1382_v38  ;;  %v1577_v44 = vpop.f32.mrb[75].mxu0 }
 0x1be   : > { %v2030_v45 = vadd.f32 %v2029_v32, %v1991_v42  ;;  %v2575_v46 = vpack.c.bf16 %v1576_v43, %v1573_v36  ;;  %v1946_v47 = vadd.f32 %v1945_v41, %v1576_v43  ;;  %v1992_v48 = vmul.f32 %v1576_v43, %v1576_v43 }
 0x1c0   : > { %2599 = vst [vmem:[%s3096_s19 + $0x90] sm:$0xff] %v2575_v46   ;;  %v2031_v49 = vadd.f32 %v2030_v45, %v1992_v48  ;;  %v1387_v50 = vpop.f32.mrb[76].mxu1 }
 0x1c1   : > { %v1580_v51 = vpop.f32.mrb[76].mxu0  ;;  %v1389_v52 = vpop.f32.mrb[77].mxu1 }
 0x1c2   : > { %v1581_v53 = vadd.f32 %v1580_v51, %v1387_v50  ;;  %v1582_v54 = vpop.f32.mrb[77].mxu0  ;;  %v1390_v55 = vpop.f32.mrb[78].mxu1 }
 0x1c3   : > { %v1583_v56 = vpop.f32.mrb[78].mxu0  ;;  %v1392_v57 = vpop.f32.mrb[79].mxu1 }
 0x1c4   : > { %v1947_v58 = vadd.f32 %v1946_v47, %v1581_v53  ;;  %v1993_v59 = vmul.f32 %v1581_v53, %v1581_v53  ;;  %v1584_v60 = vadd.f32 %v1583_v56, %v1390_v55  ;;  %v1585_v61 = vpop.f32.mrb[79].mxu0 }
 0x1c6   : > { %v2032_v62 = vadd.f32 %v2031_v49, %v1993_v59  ;;  %v2580_v63 = vpack.c.bf16 %v1584_v60, %v1581_v53  ;;  %v1948_v0 = vadd.f32 %v1947_v58, %v1584_v60  ;;  %v1994_v1 = vmul.f32 %v1584_v60, %v1584_v60 }
 0x1c8   : > { %2600 = vst [vmem:[%s3096_s19 + $0x98] sm:$0xff] %v2580_v63   ;;  %v1949_v2 = vrot.slane %v1948_v0, 4  ;;  %v2033_v3 = vadd.f32 %v2032_v62, %v1994_v1 }
 0x1ca   : > { %v1950_v4 = vadd.f32 %v1949_v2, %v1948_v0  ;;  %v2034_v5 = vrot.slane %v2033_v3, 4 }
 0x1cc   : > { %v1951_v6 = vrot.slane %v1950_v4, 2  ;;  %v2035_v7 = vadd.f32 %v2034_v5, %v2033_v3 }
 0x1ce   : > { %v1952_v8 = vadd.f32 %v1951_v6, %v1950_v4  ;;  %v2036_v9 = vrot.slane %v2035_v7, 2 }
 0x1d0   : > { %v1953_v10 = vrot.slane %v1952_v8, 1  ;;  %v2037_v11 = vadd.f32 %v2036_v9, %v2035_v7 }
 0x1d2   : > { %v2038_v12 = vrot.slane %v2037_v11, 1  ;;  %v1954_v13 = vadd.f32 %v1953_v10, %v1952_v8 }
 0x1d4   : > { %v2039_v14 = vadd.f32 %v2038_v12, %v2037_v11 }
 0x1d6   : > { %v2041_v15 = vsel %vm2040_vm0, %v1954_v13, %v2039_v14 }
 0x1d7   : > { %v2043_v16 = vsel %vm2042_vm1, %v2041_v15, 0.0 }
 0x1d8   : > { %2044 = vst [vmem:[%s379_s25] sm:$0xff] %v2043_v16 }
 0x1d9 PF: > { %s14_s16 = sadd.s32 1, %s2876_s16   ;;  %s3142_s12 = smov %s2868_s14 }
 0x1da   : > { %p11_p7 = scmp.ge.s32.totalorder %s14_s16, 6   ;;  %s3143_s13 = smov %s2872_s15 }
 0x1db   : > { %s3144_s14 = smov %s3147_s17  ;;  %s3145_s15 = smov %s3151_s18 }
 0x1dc   :  { %13 = sbr.rel (!%p11_p7) target bundleno = 3 (0x3), region = 81 }

// kernel: generator_forward.8
= control target key start
LH: loop header
LB: loop body
LE: loop exit
PB: predicated region body
PF: predicated region fallthrough
CT: control target
= control target key end

     0   :  { %s4002_s12 = smov 0   ;;  %s4004_s13 = smov 0   ;;  %s4328_s0 = inlined_call_operand.vmem [shape: bf16[2,2,1536,512], index: 0, kind: input, shape index: {}]   ;;  %s4329_s1 = inlined_call_operand.vmem [shape: bf16[2,2,512,128], index: 1, kind: input, shape index: {}]   ;;  %s4330_s2 = inlined_call_operand.vmem [shape: bf16[2,2,1536,128], index: 2, kind: output, shape index: {0}]   ;;  %s4331_s3 = inlined_call_operand.vmem [shape: f32[2,2,3,8,128], index: 3, kind: output, shape index: {1}]  }
   0x1   :  { %s4006_s14 = smov 0   ;;  %s4008_s15 = smov 0  }
   0x2   :  { %s4010_s16 = smov 0   ;;  %s4012_s17 = smov 0  }
   0x3   :  { %s4014_s18 = smov 0  }
   0x4 LB: > { %s35_s19 = sadd.s32 1, %s3967_s15  ;;  %s43_s20 = sadd.s32 1, %s3971_s16  ;;  %s3979_s18 = sphi %s4014_s18, %s14_s18   ;;  %s3975_s17 = sphi %s4012_s17, %s4337_s17   ;;  %s3971_s16 = sphi %s4010_s16, %s4336_s16   ;;  %s3967_s15 = sphi %s4008_s15, %s4335_s15   ;;  %s3963_s14 = sphi %s4006_s14, %s4334_s14   ;;  %s3959_s13 = sphi %s4004_s13, %s4333_s13   ;;  %s3955_s12 = sphi %s4002_s12, %s4332_s12  }
   0x5   : > { %p37_p0 = scmp.ge.s32.totalorder %s35_s19, 3  ;;  %p3083_p1 = scmp.ge.s32.totalorder %s3979_s18, 1 }
   0x6   : > { %p234_p2 = scmp.lt.s32.totalorder %s3979_s18, 13  ;;  %s47_s21 = sadd.s32 1, %s3975_s17 }
   0x7   : > { %s4339_s19 = smov (%p37_p0, %s35_s19), 0  ;;  %s4341_s20 = smov (!%p37_p0, %s43_s20), %s3971_s16 }
   0x8   : > { %p235_p3 = pnand %p3083_p1, %p234_p2  ;;  %p45_p4 = scmp.ge.s32.totalorder %s4341_s20, 2 }
   0x9   : > { %p315_p6 = scmp.lt.s32.totalorder (!%p235_p3), %s3963_s14, 1  ;;  %p317_p7 = scmp.lt.s32.totalorder (!%p235_p3), %s3959_s13, 1  ;;  %v3981_v0 = vmov (!%p235_p3), 0   ;;  %vm2834_vm0 = vcmask (!%p235_p3), 1040384   ;;  %vm2836_vm1 = vcmask (!%p235_p3), 1041408  }
   0xa   : > { %s4343_s20 = smov (%p45_p4, %s4341_s20), 0  ;;  %s4345_s21 = smov (!%p45_p4, %s47_s21), %s3975_s17 }
   0xb   : > { %p49_p5 = scmp.ge.s32.totalorder %s4345_s21, 2  ;;  %238 = sbr.rel (%p235_p3) target bundleno = 571 (0x23b), region = 28  ;;  %1539 = vmatprep.subr.bf16.mxu1 (!%p235_p3), %v3981_v0  ;;  %1828 = vmatprep.subr.bf16.mxu0 (!%p235_p3), %v3981_v0 }
   0xc   : > { %s3084_s29 = sshll.u32 (!%p235_p3), %s3955_s12, 6  ;;  %p371_p9 = scmp.lt.s32.totalorder (!%p235_p3), %s3955_s12, 2 }
   0xd   : > { %s4347_s21 = smov (%p49_p5, %s4345_s21), 0  ;;  %p319_p8 = scmp.lt.s32.totalorder (!%p235_p3), %s3084_s29, 191 }
  0x12   : > { %s4349_s14 = smov (!%p315_p6, %s3963_s14), 1  ;;  %s4351_s13 = smov (!%p317_p7, %s3959_s13), 1 }
  0x13   : > { %s3088_s22 = sshll.u32 %s4349_s14, 7  ;;  %s3087_s23 = sshll.u32 %s4351_s13, 6 }
  0x14   : > { %s346_s24 = sadd.s32 %s3088_s22, %s3087_s23  ;;  %s4353_s29 = smov (!%p319_p8, %s3084_s29), 191 }
  0x15   : > { %s3089_s25 = sshll.u32 %s346_s24, 2  ;;  %s3638_s30 = smul.u32 768, %s4351_s13 }
  0x16   : > { %s4057_s28 = scalar_lea.vmem %s4329_s1, %s3089_s25  ;;  %s3085_s4 = sshll.u32 %s4353_s29, 2 }
  0x17   : > { %v3701_v1 = vld [vmem:[%s4057_s28] sm:$0xff]   ;;  %v3703_v3 = vld [vmem:[%s4057_s28 + $0x8] sm:$0xff]   ;;  %v3705_v5 = vld [vmem:[%s4057_s28 + $0x10] sm:$0xff]   ;;  %s3639_s5 = smul.u32 1536, %s4349_s14  ;;  %s326_s6 = sadd.s32 %s3638_s30, %s3085_s4 }
  0x18   : > { %v3702_v2 = vld [vmem:[%s4057_s28 + $0x80] sm:$0xff]   ;;  %1540 = vmatpush1.bf16.msra.mxu1 %v3701_v1  ;;  %v3704_v4 = vld [vmem:[%s4057_s28 + $0x88] sm:$0xff]   ;;  %v3706_v6 = vld [vmem:[%s4057_s28 + $0x90] sm:$0xff]   ;;  %s3640_s22 = smul.u32 192, %s4351_s13  ;;  %s4355_s12 = smov (!%p371_p9, %s3955_s12), 2 }
  0x19   : > { %1829 = vmatpush1.bf16.msra.mxu0 %v3702_v2  ;;  %1541 = vmatprep.subr.bf16.mxu1 %v3981_v0  ;;  %v3707_v7 = vld [vmem:[%s4057_s28 + $0x18] sm:$0xff]   ;;  %v3709_v9 = vld [vmem:[%s4057_s28 + $0x20] sm:$0xff]   ;;  %v3711_v11 = vld [vmem:[%s4057_s28 + $0x28] sm:$0xff]   ;;  %s328_s7 = sadd.s32 %s3639_s5, %s326_s6  ;;  %s3641_s23 = smul.u32 384, %s4349_s14 }
  0x1a   : > { %1830 = vmatprep.subr.bf16.mxu0 %v3981_v0  ;;  %v3708_v8 = vld [vmem:[%s4057_s28 + $0x98] sm:$0xff]   ;;  %v3710_v10 = vld [vmem:[%s4057_s28 + $0xa0] sm:$0xff]   ;;  %v3712_v12 = vld [vmem:[%s4057_s28 + $0xa8] sm:$0xff]   ;;  %s3086_s8 = sshll.u32 %s328_s7, 2  ;;  %s361_s24 = sadd.s32 %s3640_s22, %s4353_s29 }
  0x1b   : > { %v3713_v13 = vld [vmem:[%s4057_s28 + $0x30] sm:$0xff]   ;;  %v3715_v15 = vld [vmem:[%s4057_s28 + $0x38] sm:$0xff]   ;;  %v3717_v17 = vld [vmem:[%s4057_s28 + $0x40] sm:$0xff]   ;;  %s4099_s11 = scalar_lea.vmem %s4328_s0, %s3086_s8  ;;  %s363_s25 = sadd.s32 %s3641_s23, %s361_s24 }
  0x1c   : > { %1542 = vmatpush1.bf16.msra.mxu1 %v3703_v3  ;;  %v3714_v14 = vld [vmem:[%s4057_s28 + $0xb0] sm:$0xff]   ;;  %v3716_v16 = vld [vmem:[%s4057_s28 + $0xb8] sm:$0xff]   ;;  %v3718_v18 = vld [vmem:[%s4057_s28 + $0xc0] sm:$0xff]   ;;  %s3091_s26 = sshll.u32 %s363_s25, 2  ;;  %s3642_s30 = smul.u32 3, %s4351_s13 }
  0x1d   : > { %1831 = vmatpush1.bf16.msra.mxu0 %v3704_v4  ;;  %1543 = vmatprep.subr.bf16.mxu1 %v3981_v0  ;;  %v3735_v19 = vld [vmem:[%s4099_s11 + $0x4] ss:$16 sps:$4 sm:$0xff]   ;;  %v3719_v20 = vld [vmem:[%s4057_s28 + $0x48] sm:$0xff]   ;;  %v3723_v25 = vld [vmem:[%s4057_s28 + $0x58] sm:$0xff]   ;;  %s4252_s29 = scalar_lea.vmem %s4330_s2, %s3091_s26  ;;  %s3643_s4 = smul.u32 6, %s4349_s14 }
  0x1e   : > { %1832 = vmatprep.subr.bf16.mxu0 %v3981_v0  ;;  %v3738_v21 = vld [vmem:[%s4099_s11 + $0xc] ss:$16 sps:$4 sm:$0xff]   ;;  %1571 = vmatprep.mubr.bf16.mxu1 %v3735_v19  ;;  %v3721_v23 = vld [vmem:[%s4057_s28 + $0x50] sm:$0xff]   ;;  %v3725_v27 = vld [vmem:[%s4057_s28 + $0x60] sm:$0xff]   ;;  %s377_s5 = sadd.s32 %s3642_s30, %s4355_s12 }
  0x1f   : > { %v3720_v22 = vld [vmem:[%s4057_s28 + $0xc8] sm:$0xff]   ;;  %1860 = vmatprep.mubr.bf16.mxu0 %v3738_v21  ;;  %v3722_v24 = vld [vmem:[%s4057_s28 + $0xd0] sm:$0xff]   ;;  %v3724_v26 = vld [vmem:[%s4057_s28 + $0xd8] sm:$0xff]   ;;  %s379_s6 = sadd.s32 %s3643_s4, %s377_s5 }
  0x20   : > { %1544 = vmatpush1.bf16.msra.mxu1 %v3705_v5  ;;  %v3726_v28 = vld [vmem:[%s4057_s28 + $0xe0] sm:$0xff]   ;;  %v3727_v29 = vld [vmem:[%s4057_s28 + $0x68] sm:$0xff]   ;;  %v3729_v31 = vld [vmem:[%s4057_s28 + $0x70] sm:$0xff]   ;;  %s3092_s7 = sshll.u32 %s379_s6, 3 }
  0x21   : > { %1833 = vmatpush1.bf16.msra.mxu0 %v3706_v6  ;;  %1545 = vmatprep.subr.bf16.mxu1 %v3981_v0  ;;  %v3728_v30 = vld [vmem:[%s4057_s28 + $0xe8] sm:$0xff]   ;;  %v3730_v32 = vld [vmem:[%s4057_s28 + $0xf0] sm:$0xff]   ;;  %v3731_v33 = vld [vmem:[%s4057_s28 + $0x78] sm:$0xff]   ;;  %s381_s9 = scalar_lea.vmem %s4331_s3, %s3092_s7 }
  0x22   : > { %1834 = vmatprep.subr.bf16.mxu0 %v3981_v0  ;;  %v3732_v34 = vld [vmem:[%s4057_s28 + $0xf8] sm:$0xff]   ;;  %v3733_v35 = vld [vmem:[%s4099_s11] ss:$16 sps:$4 sm:$0xff]   ;;  %v3739_v37 = vld [vmem:[%s4099_s11 + $0x24] ss:$16 sps:$4 sm:$0xff]  }
  0x23   : > { %v3736_v36 = vld [vmem:[%s4099_s11 + $0x8] ss:$16 sps:$4 sm:$0xff]   ;;  %v3741_v38 = vld [vmem:[%s4099_s11 + $0x2c] ss:$16 sps:$4 sm:$0xff]   ;;  %v3743_v39 = vld [vmem:[%s4099_s11 + $0x20] ss:$16 sps:$4 sm:$0xff]  }
  0x24   : > { %1546 = vmatpush1.bf16.msra.mxu1 %v3707_v7  ;;  %v3744_v40 = vld [vmem:[%s4099_s11 + $0x28] ss:$16 sps:$4 sm:$0xff]   ;;  %v3745_v41 = vld [vmem:[%s4099_s11 + $0x44] ss:$16 sps:$4 sm:$0xff]   ;;  %v3747_v42 = vld [vmem:[%s4099_s11 + $0x4c] ss:$16 sps:$4 sm:$0xff]  }
  0x25   : > { %1835 = vmatpush1.bf16.msra.mxu0 %v3708_v8  ;;  %1547 = vmatprep.subr.bf16.mxu1 %v3981_v0  ;;  %v3749_v43 = vld [vmem:[%s4099_s11 + $0x40] ss:$16 sps:$4 sm:$0xff]   ;;  %v3750_v44 = vld [vmem:[%s4099_s11 + $0x48] ss:$16 sps:$4 sm:$0xff]   ;;  %v3751_v45 = vld [vmem:[%s4099_s11 + $0x64] ss:$16 sps:$4 sm:$0xff]  }
  0x26   : > { %1836 = vmatprep.subr.bf16.mxu0 %v3981_v0  ;;  %v3753_v46 = vld [vmem:[%s4099_s11 + $0x6c] ss:$16 sps:$4 sm:$0xff]   ;;  %v3755_v47 = vld [vmem:[%s4099_s11 + $0x60] ss:$16 sps:$4 sm:$0xff]   ;;  %v3756_v48 = vld [vmem:[%s4099_s11 + $0x68] ss:$16 sps:$4 sm:$0xff]  }
  0x27   : > { %v3757_v49 = vld [vmem:[%s4099_s11 + $0x84] ss:$16 sps:$4 sm:$0xff]   ;;  %v3759_v50 = vld [vmem:[%s4099_s11 + $0x8c] ss:$16 sps:$4 sm:$0xff]   ;;  %v3761_v51 = vld [vmem:[%s4099_s11 + $0x80] ss:$16 sps:$4 sm:$0xff]  }
  0x28   : > { %1548 = vmatpush1.bf16.msra.mxu1 %v3709_v9  ;;  %v3762_v52 = vld [vmem:[%s4099_s11 + $0x88] ss:$16 sps:$4 sm:$0xff]   ;;  %v3763_v53 = vld [vmem:[%s4099_s11 + $0xa4] ss:$16 sps:$4 sm:$0xff]   ;;  %v3765_v54 = vld [vmem:[%s4099_s11 + $0xac] ss:$16 sps:$4 sm:$0xff]  }
  0x29   : > { %1837 = vmatpush1.bf16.msra.mxu0 %v3710_v10  ;;  %1549 = vmatprep.subr.bf16.mxu1 %v3981_v0  ;;  %v3767_v55 = vld [vmem:[%s4099_s11 + $0xa0] ss:$16 sps:$4 sm:$0xff]   ;;  %v3768_v56 = vld [vmem:[%s4099_s11 + $0xa8] ss:$16 sps:$4 sm:$0xff]   ;;  %v3769_v57 = vld [vmem:[%s4099_s11 + $0xc4] ss:$16 sps:$4 sm:$0xff]  }
  0x2a   : > { %1838 = vmatprep.subr.bf16.mxu0 %v3981_v0  ;;  %v3771_v58 = vld [vmem:[%s4099_s11 + $0xcc] ss:$16 sps:$4 sm:$0xff]   ;;  %v3773_v59 = vld [vmem:[%s4099_s11 + $0xc0] ss:$16 sps:$4 sm:$0xff]   ;;  %v3774_v60 = vld [vmem:[%s4099_s11 + $0xc8] ss:$16 sps:$4 sm:$0xff]  }
  0x2b   : > { %v3775_v61 = vld [vmem:[%s4099_s11 + $0xe4] ss:$16 sps:$4 sm:$0xff]   ;;  %v3777_v62 = vld [vmem:[%s4099_s11 + $0xec] ss:$16 sps:$4 sm:$0xff]   ;;  %v3779_v63 = vld [vmem:[%s4099_s11 + $0xe0] ss:$16 sps:$4 sm:$0xff]  }
  0x2c   : > { %1550 = vmatpush1.bf16.msra.mxu1 %v3711_v11  ;;  %v3781_v1 = vld [vmem:[%s4099_s11 + $0x104] ss:$16 sps:$4 sm:$0xff]   ;;  %v3783_v2 = vld [vmem:[%s4099_s11 + $0x10c] ss:$16 sps:$4 sm:$0xff]   ;;  %v3785_v3 = vld [vmem:[%s4099_s11 + $0x100] ss:$16 sps:$4 sm:$0xff]  }
  0x2d   : > { %1839 = vmatpush1.bf16.msra.mxu0 %v3712_v12  ;;  %1551 = vmatprep.subr.bf16.mxu1 %v3981_v0  ;;  %v3786_v4 = vld [vmem:[%s4099_s11 + $0x108] ss:$16 sps:$4 sm:$0xff]   ;;  %v3787_v5 = vld [vmem:[%s4099_s11 + $0x124] ss:$16 sps:$4 sm:$0xff]   ;;  %v3789_v6 = vld [vmem:[%s4099_s11 + $0x12c] ss:$16 sps:$4 sm:$0xff]  }
  0x2e   : > { %1840 = vmatprep.subr.bf16.mxu0 %v3981_v0  ;;  %v3791_v7 = vld [vmem:[%s4099_s11 + $0x120] ss:$16 sps:$4 sm:$0xff]   ;;  %v3792_v8 = vld [vmem:[%s4099_s11 + $0x128] ss:$16 sps:$4 sm:$0xff]   ;;  %v3793_v9 = vld [vmem:[%s4099_s11 + $0x144] ss:$16 sps:$4 sm:$0xff]  }
  0x2f   : > { %v3795_v10 = vld [vmem:[%s4099_s11 + $0x14c] ss:$16 sps:$4 sm:$0xff]   ;;  %v3797_v11 = vld [vmem:[%s4099_s11 + $0x140] ss:$16 sps:$4 sm:$0xff]   ;;  %v3798_v12 = vld [vmem:[%s4099_s11 + $0x148] ss:$16 sps:$4 sm:$0xff]  }
  0x30   : > { %1552 = vmatpush1.bf16.msra.mxu1 %v3713_v13  ;;  %v3799_v13 = vld [vmem:[%s4099_s11 + $0x164] ss:$16 sps:$4 sm:$0xff]   ;;  %v3809_v19 = vld [vmem:[%s4099_s11 + $0x180] ss:$16 sps:$4 sm:$0xff]  }
  0x31   : > { %1841 = vmatpush1.bf16.msra.mxu0 %v3714_v14  ;;  %1553 = vmatprep.subr.bf16.mxu1 %v3981_v0  ;;  %v3801_v14 = vld [vmem:[%s4099_s11 + $0x16c] ss:$16 sps:$4 sm:$0xff]   ;;  %v3811_v21 = vld [vmem:[%s4099_s11 + $0x1a4] ss:$16 sps:$4 sm:$0xff]  }
  0x32   : > { %1842 = vmatprep.subr.bf16.mxu0 %v3981_v0 }
  0x34   : > { %1554 = vmatpush1.bf16.msra.mxu1 %v3715_v15  ;;  %v3803_v15 = vld [vmem:[%s4099_s11 + $0x160] ss:$16 sps:$4 sm:$0xff]  }
  0x35   : > { %1843 = vmatpush1.bf16.msra.mxu0 %v3716_v16  ;;  %1555 = vmatprep.subr.bf16.mxu1 %v3981_v0  ;;  %v3804_v16 = vld [vmem:[%s4099_s11 + $0x168] ss:$16 sps:$4 sm:$0xff]  }
  0x36   : > { %1844 = vmatprep.subr.bf16.mxu0 %v3981_v0 }
  0x38   : > { %1556 = vmatpush1.bf16.msra.mxu1 %v3717_v17  ;;  %v3805_v17 = vld [vmem:[%s4099_s11 + $0x184] ss:$16 sps:$4 sm:$0xff]  }
  0x39   : > { %1845 = vmatpush1.bf16.msra.mxu0 %v3718_v18  ;;  %1557 = vmatprep.subr.bf16.mxu1 %v3981_v0  ;;  %v3807_v18 = vld [vmem:[%s4099_s11 + $0x18c] ss:$16 sps:$4 sm:$0xff]  }
  0x3a   : > { %1846 = vmatprep.subr.bf16.mxu0 %v3981_v0 }
  0x3c   : > { %1558 = vmatpush1.bf16.msra.mxu1 %v3719_v20  ;;  %v3810_v20 = vld [vmem:[%s4099_s11 + $0x188] ss:$16 sps:$4 sm:$0xff]  }
  0x3d   : > { %1847 = vmatpush1.bf16.msra.mxu0 %v3720_v22  ;;  %1559 = vmatprep.subr.bf16.mxu1 %v3981_v0  ;;  %v3813_v22 = vld [vmem:[%s4099_s11 + $0x1ac] ss:$16 sps:$4 sm:$0xff]  }
  0x3e   : > { %1848 = vmatprep.subr.bf16.mxu0 %v3981_v0 }
  0x40   : > { %1560 = vmatpush1.bf16.msra.mxu1 %v3721_v23  ;;  %v3815_v23 = vld [vmem:[%s4099_s11 + $0x1a0] ss:$16 sps:$4 sm:$0xff]  }
  0x41   : > { %1849 = vmatpush1.bf16.msra.mxu0 %v3722_v24  ;;  %1561 = vmatprep.subr.bf16.mxu1 %v3981_v0  ;;  %v3816_v24 = vld [vmem:[%s4099_s11 + $0x1a8] ss:$16 sps:$4 sm:$0xff]  }
  0x42   : > { %1850 = vmatprep.subr.bf16.mxu0 %v3981_v0 }
  0x44   : > { %1562 = vmatpush1.bf16.msra.mxu1 %v3723_v25  ;;  %v3817_v25 = vld [vmem:[%s4099_s11 + $0x1c4] ss:$16 sps:$4 sm:$0xff]  }
  0x45   : > { %1851 = vmatpush1.bf16.msra.mxu0 %v3724_v26  ;;  %1563 = vmatprep.subr.bf16.mxu1 %v3981_v0  ;;  %v3819_v26 = vld [vmem:[%s4099_s11 + $0x1cc] ss:$16 sps:$4 sm:$0xff]  }
  0x46   : > { %1852 = vmatprep.subr.bf16.mxu0 %v3981_v0 }
  0x48   : > { %1564 = vmatpush1.bf16.msra.mxu1 %v3725_v27  ;;  %v3821_v27 = vld [vmem:[%s4099_s11 + $0x1c0] ss:$16 sps:$4 sm:$0xff]  }
  0x49   : > { %1853 = vmatpush1.bf16.msra.mxu0 %v3726_v28  ;;  %1565 = vmatprep.subr.bf16.mxu1 %v3981_v0  ;;  %v3822_v28 = vld [vmem:[%s4099_s11 + $0x1c8] ss:$16 sps:$4 sm:$0xff]  }
  0x4a   : > { %1854 = vmatprep.subr.bf16.mxu0 %v3981_v0 }
  0x4c   : > { %1566 = vmatpush1.bf16.msra.mxu1 %v3727_v29  ;;  %v3823_v29 = vld [vmem:[%s4099_s11 + $0x1e4] ss:$16 sps:$4 sm:$0xff]  }
  0x4d   : > { %1855 = vmatpush1.bf16.msra.mxu0 %v3728_v30  ;;  %1567 = vmatprep.subr.bf16.mxu1 %v3981_v0  ;;  %v3825_v30 = vld [vmem:[%s4099_s11 + $0x1ec] ss:$16 sps:$4 sm:$0xff]  }
  0x4e   : > { %1856 = vmatprep.subr.bf16.mxu0 %v3981_v0 }
  0x50   : > { %1568 = vmatpush1.bf16.msra.mxu1 %v3729_v31  ;;  %v3827_v31 = vld [vmem:[%s4099_s11 + $0x1e0] ss:$16 sps:$4 sm:$0xff]  }
  0x51   : > { %1857 = vmatpush1.bf16.msra.mxu0 %v3730_v32  ;;  %1569 = vmatprep.subr.bf16.mxu1 %v3981_v0  ;;  %v3828_v32 = vld [vmem:[%s4099_s11 + $0x1e8] ss:$16 sps:$4 sm:$0xff]  }
  0x52   : > { %1858 = vmatprep.subr.bf16.mxu0 %v3981_v0  ;;  %v3780_v0 = vld [vmem:[%s4099_s11 + $0xe8] ss:$16 sps:$4 sm:$0xff]  }
  0x54   : > { %1570 = vmatpush1.bf16.msra.mxu1 %v3731_v33  ;;  %v3829_v33 = vld [vmem:[%s4099_s11 + $0x204] ss:$16 sps:$4 sm:$0xff]  }
  0x55   : > { %1859 = vmatpush1.bf16.msra.mxu0 %v3732_v34  ;;  %v3831_v34 = vld [vmem:[%s4099_s11 + $0x20c] ss:$16 sps:$4 sm:$0xff]  }
  0x57   : > { %1572 = vmatmul.mubr.bf16.vlgmr.msra.gmra.mrb[0].mxu1 %v3733_v35  ;;  %v3833_v35 = vld [vmem:[%s4099_s11 + $0x200] ss:$16 sps:$4 sm:$0xff]  }
  0x58   : > { %1861 = vmatmul.mubr.bf16.vlgmr.msra.gmra.mrb[0].mxu0 %v3736_v36  ;;  %1579 = vmatprep.mubr.bf16.mxu1 %v3739_v37  ;;  %v3834_v36 = vld [vmem:[%s4099_s11 + $0x208] ss:$16 sps:$4 sm:$0xff]   ;;  %v3835_v37 = vld [vmem:[%s4099_s11 + $0x224] ss:$16 sps:$4 sm:$0xff]  }
  0x59   : > { %1868 = vmatprep.mubr.bf16.mxu0 %v3741_v38  ;;  %v3837_v38 = vld [vmem:[%s4099_s11 + $0x22c] ss:$16 sps:$4 sm:$0xff]  }
  0x5f   : > { %1580 = vmatmul.mubr.bf16.gmra.mrb[4].mxu1 %v3743_v39  ;;  %v3839_v39 = vld [vmem:[%s4099_s11 + $0x220] ss:$16 sps:$4 sm:$0xff]  }
  0x60   : > { %1869 = vmatmul.mubr.bf16.gmra.mrb[4].mxu0 %v3744_v40  ;;  %1587 = vmatprep.mubr.bf16.mxu1 %v3745_v41  ;;  %v3840_v40 = vld [vmem:[%s4099_s11 + $0x228] ss:$16 sps:$4 sm:$0xff]   ;;  %v3841_v41 = vld [vmem:[%s4099_s11 + $0x244] ss:$16 sps:$4 sm:$0xff]  }
  0x61   : > { %1876 = vmatprep.mubr.bf16.mxu0 %v3747_v42  ;;  %v3843_v42 = vld [vmem:[%s4099_s11 + $0x24c] ss:$16 sps:$4 sm:$0xff]  }
  0x67   : > { %1588 = vmatmul.mubr.bf16.gmra.mrb[8].mxu1 %v3749_v43  ;;  %v3845_v43 = vld [vmem:[%s4099_s11 + $0x240] ss:$16 sps:$4 sm:$0xff]  }
  0x68   : > { %1877 = vmatmul.mubr.bf16.gmra.mrb[8].mxu0 %v3750_v44  ;;  %1595 = vmatprep.mubr.bf16.mxu1 %v3751_v45  ;;  %v3846_v44 = vld [vmem:[%s4099_s11 + $0x248] ss:$16 sps:$4 sm:$0xff]   ;;  %v3847_v45 = vld [vmem:[%s4099_s11 + $0x264] ss:$16 sps:$4 sm:$0xff]  }
  0x69   : > { %1884 = vmatprep.mubr.bf16.mxu0 %v3753_v46  ;;  %v3849_v46 = vld [vmem:[%s4099_s11 + $0x26c] ss:$16 sps:$4 sm:$0xff]  }
  0x6f   : > { %1596 = vmatmul.mubr.bf16.gmra.mrb[12].mxu1 %v3755_v47  ;;  %v3851_v47 = vld [vmem:[%s4099_s11 + $0x260] ss:$16 sps:$4 sm:$0xff]  }
  0x70   : > { %1885 = vmatmul.mubr.bf16.gmra.mrb[12].mxu0 %v3756_v48  ;;  %1603 = vmatprep.mubr.bf16.mxu1 %v3757_v49  ;;  %v3852_v48 = vld [vmem:[%s4099_s11 + $0x268] ss:$16 sps:$4 sm:$0xff]   ;;  %v3853_v49 = vld [vmem:[%s4099_s11 + $0x284] ss:$16 sps:$4 sm:$0xff]  }
  0x71   : > { %1892 = vmatprep.mubr.bf16.mxu0 %v3759_v50  ;;  %v3855_v50 = vld [vmem:[%s4099_s11 + $0x28c] ss:$16 sps:$4 sm:$0xff]  }
  0x77   : > { %1604 = vmatmul.mubr.bf16.gmra.mrb[16].mxu1 %v3761_v51  ;;  %v3857_v51 = vld [vmem:[%s4099_s11 + $0x280] ss:$16 sps:$4 sm:$0xff]  }
  0x78   : > { %1893 = vmatmul.mubr.bf16.gmra.mrb[16].mxu0 %v3762_v52  ;;  %1611 = vmatprep.mubr.bf16.mxu1 %v3763_v53  ;;  %v3858_v52 = vld [vmem:[%s4099_s11 + $0x288] ss:$16 sps:$4 sm:$0xff]   ;;  %v3859_v53 = vld [vmem:[%s4099_s11 + $0x2a4] ss:$16 sps:$4 sm:$0xff]  }
  0x79   : > { %1900 = vmatprep.mubr.bf16.mxu0 %v3765_v54  ;;  %v3861_v54 = vld [vmem:[%s4099_s11 + $0x2ac] ss:$16 sps:$4 sm:$0xff]  }
  0x7f   : > { %1612 = vmatmul.mubr.bf16.gmra.mrb[20].mxu1 %v3767_v55  ;;  %v3863_v55 = vld [vmem:[%s4099_s11 + $0x2a0] ss:$16 sps:$4 sm:$0xff]  }
  0x80   : > { %1901 = vmatmul.mubr.bf16.gmra.mrb[20].mxu0 %v3768_v56  ;;  %1619 = vmatprep.mubr.bf16.mxu1 %v3769_v57  ;;  %v3864_v56 = vld [vmem:[%s4099_s11 + $0x2a8] ss:$16 sps:$4 sm:$0xff]   ;;  %v3865_v57 = vld [vmem:[%s4099_s11 + $0x2c4] ss:$16 sps:$4 sm:$0xff]  }
  0x81   : > { %1908 = vmatprep.mubr.bf16.mxu0 %v3771_v58  ;;  %v3867_v58 = vld [vmem:[%s4099_s11 + $0x2cc] ss:$16 sps:$4 sm:$0xff]  }
  0x87   : > { %1620 = vmatmul.mubr.bf16.gmra.mrb[24].mxu1 %v3773_v59  ;;  %v3869_v59 = vld [vmem:[%s4099_s11 + $0x2c0] ss:$16 sps:$4 sm:$0xff]  }
  0x88   : > { %1909 = vmatmul.mubr.bf16.gmra.mrb[24].mxu0 %v3774_v60  ;;  %1627 = vmatprep.mubr.bf16.mxu1 %v3775_v61  ;;  %v3870_v60 = vld [vmem:[%s4099_s11 + $0x2c8] ss:$16 sps:$4 sm:$0xff]   ;;  %v3871_v61 = vld [vmem:[%s4099_s11 + $0x2e4] ss:$16 sps:$4 sm:$0xff]  }
  0x89   : > { %1916 = vmatprep.mubr.bf16.mxu0 %v3777_v62  ;;  %v3873_v62 = vld [vmem:[%s4099_s11 + $0x2ec] ss:$16 sps:$4 sm:$0xff]  }
  0x8f   : > { %1628 = vmatmul.mubr.bf16.gmra.mrb[28].mxu1 %v3779_v63  ;;  %v3875_v63 = vld [vmem:[%s4099_s11 + $0x2e0] ss:$16 sps:$4 sm:$0xff]  }
  0x90   : > { %1917 = vmatmul.mubr.bf16.gmra.mrb[28].mxu0 %v3780_v0  ;;  %1635 = vmatprep.mubr.bf16.mxu1 %v3781_v1  ;;  %v3876_v0 = vld [vmem:[%s4099_s11 + $0x2e8] ss:$16 sps:$4 sm:$0xff]   ;;  %v3877_v1 = vld [vmem:[%s4099_s11 + $0x304] ss:$16 sps:$4 sm:$0xff]  }
  0x91   : > { %1924 = vmatprep.mubr.bf16.mxu0 %v3783_v2  ;;  %v3879_v2 = vld [vmem:[%s4099_s11 + $0x30c] ss:$16 sps:$4 sm:$0xff]  }
  0x97   : > { %1636 = vmatmul.mubr.bf16.gmra.mrb[32].mxu1 %v3785_v3  ;;  %v3881_v3 = vld [vmem:[%s4099_s11 + $0x300] ss:$16 sps:$4 sm:$0xff]  }
  0x98   : > { %1925 = vmatmul.mubr.bf16.gmra.mrb[32].mxu0 %v3786_v4  ;;  %1643 = vmatprep.mubr.bf16.mxu1 %v3787_v5  ;;  %v3882_v4 = vld [vmem:[%s4099_s11 + $0x308] ss:$16 sps:$4 sm:$0xff]   ;;  %v3883_v5 = vld [vmem:[%s4099_s11 + $0x324] ss:$16 sps:$4 sm:$0xff]  }
  0x99   : > { %1932 = vmatprep.mubr.bf16.mxu0 %v3789_v6  ;;  %v3885_v6 = vld [vmem:[%s4099_s11 + $0x32c] ss:$16 sps:$4 sm:$0xff]  }
  0x9f   : > { %1644 = vmatmul.mubr.bf16.gmra.mrb[36].mxu1 %v3791_v7  ;;  %v3887_v7 = vld [vmem:[%s4099_s11 + $0x320] ss:$16 sps:$4 sm:$0xff]  }
  0xa0   : > { %1933 = vmatmul.mubr.bf16.gmra.mrb[36].mxu0 %v3792_v8  ;;  %1651 = vmatprep.mubr.bf16.mxu1 %v3793_v9  ;;  %v3888_v8 = vld [vmem:[%s4099_s11 + $0x328] ss:$16 sps:$4 sm:$0xff]   ;;  %v3889_v9 = vld [vmem:[%s4099_s11 + $0x344] ss:$16 sps:$4 sm:$0xff]  }
  0xa1   : > { %1940 = vmatprep.mubr.bf16.mxu0 %v3795_v10  ;;  %v3891_v10 = vld [vmem:[%s4099_s11 + $0x34c] ss:$16 sps:$4 sm:$0xff]  }
  0xa7   : > { %1652 = vmatmul.mubr.bf16.gmra.mrb[40].mxu1 %v3797_v11  ;;  %v3893_v11 = vld [vmem:[%s4099_s11 + $0x340] ss:$16 sps:$4 sm:$0xff]  }
  0xa8   : > { %1941 = vmatmul.mubr.bf16.gmra.mrb[40].mxu0 %v3798_v12  ;;  %1659 = vmatprep.mubr.bf16.mxu1 %v3799_v13  ;;  %v3894_v12 = vld [vmem:[%s4099_s11 + $0x348] ss:$16 sps:$4 sm:$0xff]   ;;  %v3895_v13 = vld [vmem:[%s4099_s11 + $0x364] ss:$16 sps:$4 sm:$0xff]  }
  0xa9   : > { %1948 = vmatprep.mubr.bf16.mxu0 %v3801_v14  ;;  %v3897_v14 = vld [vmem:[%s4099_s11 + $0x36c] ss:$16 sps:$4 sm:$0xff]  }
  0xaf   : > { %1660 = vmatmul.mubr.bf16.gmra.mrb[44].mxu1 %v3803_v15 }
  0xb0   : > { %1949 = vmatmul.mubr.bf16.gmra.mrb[44].mxu0 %v3804_v16  ;;  %1667 = vmatprep.mubr.bf16.mxu1 %v3805_v17 }
  0xb1   : > { %1956 = vmatprep.mubr.bf16.mxu0 %v3807_v18  ;;  %v3899_v18 = vld [vmem:[%s4099_s11 + $0x360] ss:$16 sps:$4 sm:$0xff]  }
  0xb7   : > { %1668 = vmatmul.mubr.bf16.gmra.mrb[48].mxu1 %v3809_v19  ;;  %v3900_v19 = vld [vmem:[%s4099_s11 + $0x368] ss:$16 sps:$4 sm:$0xff]  }
  0xb8   : > { %1957 = vmatmul.mubr.bf16.gmra.mrb[48].mxu0 %v3810_v20  ;;  %1675 = vmatprep.mubr.bf16.mxu1 %v3811_v21 }
  0xb9   : > { %1964 = vmatprep.mubr.bf16.mxu0 %v3813_v22 }
  0xbf   : > { %1676 = vmatmul.mubr.bf16.gmra.mrb[52].mxu1 %v3815_v23  ;;  %v3901_v23 = vld [vmem:[%s4099_s11 + $0x384] ss:$16 sps:$4 sm:$0xff]  }
  0xc0   : > { %1965 = vmatmul.mubr.bf16.gmra.mrb[52].mxu0 %v3816_v24  ;;  %1683 = vmatprep.mubr.bf16.mxu1 %v3817_v25 }
  0xc1   : > { %1972 = vmatprep.mubr.bf16.mxu0 %v3819_v26  ;;  %v3903_v26 = vld [vmem:[%s4099_s11 + $0x38c] ss:$16 sps:$4 sm:$0xff]  }
  0xc7   : > { %1684 = vmatmul.mubr.bf16.gmra.mrb[56].mxu1 %v3821_v27 }
  0xc8   : > { %1973 = vmatmul.mubr.bf16.gmra.mrb[56].mxu0 %v3822_v28  ;;  %1691 = vmatprep.mubr.bf16.mxu1 %v3823_v29 }
  0xc9   : > { %1980 = vmatprep.mubr.bf16.mxu0 %v3825_v30 }
  0xcf   : > { %1692 = vmatmul.mubr.bf16.gmra.mrb[60].mxu1 %v3827_v31 }
  0xd0   : > { %1981 = vmatmul.mubr.bf16.gmra.mrb[60].mxu0 %v3828_v32  ;;  %1699 = vmatprep.mubr.bf16.mxu1 %v3829_v33 }
  0xd1   : > { %1988 = vmatprep.mubr.bf16.mxu0 %v3831_v34 }
  0xd7   : > { %1700 = vmatmul.mubr.bf16.gmra.mrb[64].mxu1 %v3833_v35 }
  0xd8   : > { %1989 = vmatmul.mubr.bf16.gmra.mrb[64].mxu0 %v3834_v36  ;;  %1707 = vmatprep.mubr.bf16.mxu1 %v3835_v37  ;;  %v3905_v37 = vld [vmem:[%s4099_s11 + $0x380] ss:$16 sps:$4 sm:$0xff]  }
  0xd9   : > { %1996 = vmatprep.mubr.bf16.mxu0 %v3837_v38 }
  0xdf   : > { %1708 = vmatmul.mubr.bf16.gmra.mrb[68].mxu1 %v3839_v39 }
  0xe0   : > { %1997 = vmatmul.mubr.bf16.gmra.mrb[68].mxu0 %v3840_v40  ;;  %1715 = vmatprep.mubr.bf16.mxu1 %v3841_v41  ;;  %v3906_v41 = vld [vmem:[%s4099_s11 + $0x388] ss:$16 sps:$4 sm:$0xff]  }
  0xe1   : > { %2004 = vmatprep.mubr.bf16.mxu0 %v3843_v42 }
  0xe7   : > { %1716 = vmatmul.mubr.bf16.gmra.mrb[72].mxu1 %v3845_v43 }
  0xe8   : > { %2005 = vmatmul.mubr.bf16.gmra.mrb[72].mxu0 %v3846_v44  ;;  %1723 = vmatprep.mubr.bf16.mxu1 %v3847_v45  ;;  %v3907_v44 = vld [vmem:[%s4099_s11 + $0x3a4] ss:$16 sps:$4 sm:$0xff]   ;;  %v3909_v45 = vld [vmem:[%s4099_s11 + $0x3ac] ss:$16 sps:$4 sm:$0xff]  }
  0xe9   : > { %2012 = vmatprep.mubr.bf16.mxu0 %v3849_v46 }
  0xef   : > { %1724 = vmatmul.mubr.bf16.gmra.mrb[76].mxu1 %v3851_v47 }
  0xf0   : > { %2013 = vmatmul.mubr.bf16.gmra.mrb[76].mxu0 %v3852_v48  ;;  %1731 = vmatprep.mubr.bf16.mxu1 %v3853_v49 }
  0xf1   : > { %2020 = vmatprep.mubr.bf16.mxu0 %v3855_v50 }
  0xf7   : > { %1732 = vmatmul.mubr.bf16.gmra.mrb[80].mxu1 %v3857_v51 }
  0xf8   : > { %2021 = vmatmul.mubr.bf16.gmra.mrb[80].mxu0 %v3858_v52  ;;  %1739 = vmatprep.mubr.bf16.mxu1 %v3859_v53 }
  0xf9   : > { %2028 = vmatprep.mubr.bf16.mxu0 %v3861_v54 }
  0xff   : > { %1740 = vmatmul.mubr.bf16.gmra.mrb[84].mxu1 %v3863_v55 }
 0x100   : > { %2029 = vmatmul.mubr.bf16.gmra.mrb[84].mxu0 %v3864_v56  ;;  %1747 = vmatprep.mubr.bf16.mxu1 %v3865_v57 }
 0x101   : > { %2036 = vmatprep.mubr.bf16.mxu0 %v3867_v58  ;;  %v3911_v58 = vld [vmem:[%s4099_s11 + $0x3a0] ss:$16 sps:$4 sm:$0xff]  }
 0x107   : > { %1748 = vmatmul.mubr.bf16.gmra.mrb[88].mxu1 %v3869_v59 }
 0x108   : > { %2037 = vmatmul.mubr.bf16.gmra.mrb[88].mxu0 %v3870_v60  ;;  %1755 = vmatprep.mubr.bf16.mxu1 %v3871_v61 }
 0x109   : > { %2044 = vmatprep.mubr.bf16.mxu0 %v3873_v62  ;;  %v3912_v62 = vld [vmem:[%s4099_s11 + $0x3a8] ss:$16 sps:$4 sm:$0xff]  }
 0x10f   : > { %1756 = vmatmul.mubr.bf16.gmra.mrb[92].mxu1 %v3875_v63 }
 0x110   : > { %2045 = vmatmul.mubr.bf16.gmra.mrb[92].mxu0 %v3876_v0  ;;  %1763 = vmatprep.mubr.bf16.mxu1 %v3877_v1  ;;  %v3913_v1 = vld [vmem:[%s4099_s11 + $0x3c4] ss:$16 sps:$4 sm:$0xff]  }
 0x111   : > { %2052 = vmatprep.mubr.bf16.mxu0 %v3879_v2  ;;  %v3915_v2 = vld [vmem:[%s4099_s11 + $0x3cc] ss:$16 sps:$4 sm:$0xff]  }
 0x117   : > { %1764 = vmatmul.mubr.bf16.gmra.mrb[96].mxu1 %v3881_v3 }
 0x118   : > { %2053 = vmatmul.mubr.bf16.gmra.mrb[96].mxu0 %v3882_v4  ;;  %1771 = vmatprep.mubr.bf16.mxu1 %v3883_v5 }
 0x119   : > { %2060 = vmatprep.mubr.bf16.mxu0 %v3885_v6 }
 0x11f   : > { %1772 = vmatmul.mubr.bf16.gmra.mrb[100].mxu1 %v3887_v7 }
 0x120   : > { %2061 = vmatmul.mubr.bf16.gmra.mrb[100].mxu0 %v3888_v8  ;;  %1779 = vmatprep.mubr.bf16.mxu1 %v3889_v9 }
 0x121   : > { %2068 = vmatprep.mubr.bf16.mxu0 %v3891_v10 }
 0x127   : > { %1780 = vmatmul.mubr.bf16.gmra.mrb[104].mxu1 %v3893_v11 }
 0x128   : > { %2069 = vmatmul.mubr.bf16.gmra.mrb[104].mxu0 %v3894_v12  ;;  %1787 = vmatprep.mubr.bf16.mxu1 %v3895_v13 }
 0x129   : > { %2076 = vmatprep.mubr.bf16.mxu0 %v3897_v14 }
 0x12a   : > { %v1573_v15 = vpop.f32.mrb[0].mxu1 }
 0x12b   : > { %v1862_v16 = vpop.f32.mrb[0].mxu0  ;;  %v1575_v17 = vpop.f32.mrb[1].mxu1 }
 0x12c   : > { %v1863_v20 = vadd.f32 %v1862_v16, %v1573_v15  ;;  %v1864_v21 = vpop.f32.mrb[1].mxu0  ;;  %v1576_v22 = vpop.f32.mrb[2].mxu1  ;;  %v3917_v15 = vld [vmem:[%s4099_s11 + $0x3c0] ss:$16 sps:$4 sm:$0xff]  }
 0x12d   : > { %v1865_v24 = vpop.f32.mrb[2].mxu0  ;;  %v1578_v25 = vpop.f32.mrb[3].mxu1 }
 0x12e   : > { %v1866_v27 = vadd.f32 %v1865_v24, %v1576_v22  ;;  %v1867_v28 = vpop.f32.mrb[3].mxu0  ;;  %v2701_v29 = vmul.f32 %v1863_v20, %v1863_v20  ;;  %v3919_v22 = vld [vmem:[%s4099_s11 + $0x3e4] ss:$16 sps:$4 sm:$0xff]  }
 0x12f   : > { %1788 = vmatmul.mubr.bf16.gmra.mrb[108].mxu1 %v3899_v18 }
 0x130   : > { %v3386_v30 = vpack.c.bf16 %v1866_v27, %v1863_v20  ;;  %v2632_v31 = vadd.f32 %v1866_v27, %v1863_v20  ;;  %v2702_v32 = vmul.f32 %v1866_v27, %v1866_v27  ;;  %2077 = vmatmul.mubr.bf16.gmra.mrb[108].mxu0 %v3900_v19  ;;  %1795 = vmatprep.mubr.bf16.mxu1 %v3901_v23  ;;  %v3918_v19 = vld [vmem:[%s4099_s11 + $0x3c8] ss:$16 sps:$4 sm:$0xff]   ;;  %v3921_v23 = vld [vmem:[%s4099_s11 + $0x3ec] ss:$16 sps:$4 sm:$0xff]  }
 0x131   : > { %2084 = vmatprep.mubr.bf16.mxu0 %v3903_v26 }
 0x132   : > { %3387 = vst [vmem:[%s4252_s29] sm:$0xff] %v3386_v30   ;;  %v2765_v33 = vadd.f32 %v2702_v32, %v2701_v29  ;;  %v1581_v34 = vpop.f32.mrb[4].mxu1 }
 0x133   : > { %v1870_v35 = vpop.f32.mrb[4].mxu0  ;;  %v1583_v36 = vpop.f32.mrb[5].mxu1 }
 0x134   : > { %v1871_v38 = vadd.f32 %v1870_v35, %v1581_v34  ;;  %v1872_v39 = vpop.f32.mrb[5].mxu0  ;;  %v1584_v40 = vpop.f32.mrb[6].mxu1  ;;  %v3923_v36 = vld [vmem:[%s4099_s11 + $0x3e0] ss:$16 sps:$4 sm:$0xff]  }
 0x135   : > { %v1873_v42 = vpop.f32.mrb[6].mxu0  ;;  %v1586_v43 = vpop.f32.mrb[7].mxu1 }
 0x136   : > { %v2633_v46 = vadd.f32 %v2632_v31, %v1871_v38  ;;  %v2703_v47 = vmul.f32 %v1871_v38, %v1871_v38  ;;  %v1874_v48 = vadd.f32 %v1873_v42, %v1584_v40  ;;  %v1875_v49 = vpop.f32.mrb[7].mxu0  ;;  %v3924_v40 = vld [vmem:[%s4099_s11 + $0x3e8] ss:$16 sps:$4 sm:$0xff]  }
 0x137   : > { %1796 = vmatmul.mubr.bf16.gmra.mrb[112].mxu1 %v3905_v37 }
 0x138   : > { %v2766_v50 = vadd.f32 %v2765_v33, %v2703_v47  ;;  %v3391_v51 = vpack.c.bf16 %v1874_v48, %v1871_v38  ;;  %v2634_v52 = vadd.f32 %v2633_v46, %v1874_v48  ;;  %v2704_v53 = vmul.f32 %v1874_v48, %v1874_v48  ;;  %2085 = vmatmul.mubr.bf16.gmra.mrb[112].mxu0 %v3906_v41 }
 0x139   : > { %1803 = vmatprep.mubr.bf16.mxu1 %v3907_v44  ;;  %2092 = vmatprep.mubr.bf16.mxu0 %v3909_v45 }
 0x13a   : > { %3543 = vst [vmem:[%s4252_s29 + $0x8] sm:$0xff] %v3391_v51   ;;  %v2767_v54 = vadd.f32 %v2766_v50, %v2704_v53  ;;  %v1589_v55 = vpop.f32.mrb[8].mxu1 }
 0x13b   : > { %v1878_v56 = vpop.f32.mrb[8].mxu0  ;;  %v1591_v57 = vpop.f32.mrb[9].mxu1 }
 0x13c   : > { %v1879_v59 = vadd.f32 %v1878_v56, %v1589_v55  ;;  %v1880_v60 = vpop.f32.mrb[9].mxu0  ;;  %v1592_v61 = vpop.f32.mrb[10].mxu1 }
 0x13d   : > { %v1881_v63 = vpop.f32.mrb[10].mxu0  ;;  %v1594_v0 = vpop.f32.mrb[11].mxu1 }
 0x13e   : > { %v2635_v3 = vadd.f32 %v2634_v52, %v1879_v59  ;;  %v2705_v4 = vmul.f32 %v1879_v59, %v1879_v59  ;;  %v1882_v5 = vadd.f32 %v1881_v63, %v1592_v61  ;;  %v1883_v6 = vpop.f32.mrb[11].mxu0 }
 0x13f   : > { %1804 = vmatmul.mubr.bf16.gmra.mrb[116].mxu1 %v3911_v58 }
 0x140   : > { %v2768_v7 = vadd.f32 %v2767_v54, %v2705_v4  ;;  %v3396_v8 = vpack.c.bf16 %v1882_v5, %v1879_v59  ;;  %v2636_v9 = vadd.f32 %v2635_v3, %v1882_v5  ;;  %v2706_v10 = vmul.f32 %v1882_v5, %v1882_v5  ;;  %2093 = vmatmul.mubr.bf16.gmra.mrb[116].mxu0 %v3912_v62 }
 0x141   : > { %1811 = vmatprep.mubr.bf16.mxu1 %v3913_v1  ;;  %2100 = vmatprep.mubr.bf16.mxu0 %v3915_v2 }
 0x142   : > { %3544 = vst [vmem:[%s4252_s29 + $0x10] sm:$0xff] %v3396_v8   ;;  %v2769_v11 = vadd.f32 %v2768_v7, %v2706_v10  ;;  %v1597_v12 = vpop.f32.mrb[12].mxu1 }
 0x143   : > { %v1886_v13 = vpop.f32.mrb[12].mxu0  ;;  %v1599_v14 = vpop.f32.mrb[13].mxu1 }
 0x144   : > { %v1887_v16 = vadd.f32 %v1886_v13, %v1597_v12  ;;  %v1888_v17 = vpop.f32.mrb[13].mxu0  ;;  %v1600_v18 = vpop.f32.mrb[14].mxu1 }
 0x145   : > { %v1889_v20 = vpop.f32.mrb[14].mxu0  ;;  %v1602_v21 = vpop.f32.mrb[15].mxu1 }
 0x146   : > { %v2637_v24 = vadd.f32 %v2636_v9, %v1887_v16  ;;  %v2707_v25 = vmul.f32 %v1887_v16, %v1887_v16  ;;  %v1890_v26 = vadd.f32 %v1889_v20, %v1600_v18  ;;  %v1891_v27 = vpop.f32.mrb[15].mxu0 }
 0x147   : > { %1812 = vmatmul.mubr.bf16.gmra.mrb[120].mxu1 %v3917_v15 }
 0x148   : > { %v2770_v28 = vadd.f32 %v2769_v11, %v2707_v25  ;;  %v3401_v29 = vpack.c.bf16 %v1890_v26, %v1887_v16  ;;  %v2638_v30 = vadd.f32 %v2637_v24, %v1890_v26  ;;  %v2708_v31 = vmul.f32 %v1890_v26, %v1890_v26  ;;  %2101 = vmatmul.mubr.bf16.gmra.mrb[120].mxu0 %v3918_v19 }
 0x149   : > { %1819 = vmatprep.mubr.bf16.mxu1 %v3919_v22  ;;  %2108 = vmatprep.mubr.bf16.mxu0 %v3921_v23 }
 0x14a   : > { %3545 = vst [vmem:[%s4252_s29 + $0x18] sm:$0xff] %v3401_v29   ;;  %v2771_v32 = vadd.f32 %v2770_v28, %v2708_v31  ;;  %v1605_v33 = vpop.f32.mrb[16].mxu1 }
 0x14b   : > { %v1894_v34 = vpop.f32.mrb[16].mxu0  ;;  %v1607_v35 = vpop.f32.mrb[17].mxu1 }
 0x14c   : > { %v1895_v37 = vadd.f32 %v1894_v34, %v1605_v33  ;;  %v1896_v38 = vpop.f32.mrb[17].mxu0  ;;  %v1608_v39 = vpop.f32.mrb[18].mxu1 }
 0x14d   : > { %v1897_v41 = vpop.f32.mrb[18].mxu0  ;;  %v1610_v42 = vpop.f32.mrb[19].mxu1 }
 0x14e   : > { %v2639_v43 = vadd.f32 %v2638_v30, %v1895_v37  ;;  %v2709_v44 = vmul.f32 %v1895_v37, %v1895_v37  ;;  %v1898_v45 = vadd.f32 %v1897_v41, %v1608_v39  ;;  %v1899_v46 = vpop.f32.mrb[19].mxu0 }
 0x14f   : > { %1820 = vmatmul.mubr.bf16.gmra.mrb[124].mxu1 %v3923_v36 }
 0x150   : > { %v2772_v47 = vadd.f32 %v2771_v32, %v2709_v44  ;;  %v3406_v48 = vpack.c.bf16 %v1898_v45, %v1895_v37  ;;  %v2640_v49 = vadd.f32 %v2639_v43, %v1898_v45  ;;  %v2710_v50 = vmul.f32 %v1898_v45, %v1898_v45  ;;  %2109 = vmatmul.mubr.bf16.gmra.mrb[124].mxu0 %v3924_v40 }
 0x152   : > { %3546 = vst [vmem:[%s4252_s29 + $0x20] sm:$0xff] %v3406_v48   ;;  %v2773_v51 = vadd.f32 %v2772_v47, %v2710_v50  ;;  %v1613_v52 = vpop.f32.mrb[20].mxu1 }
 0x153   : > { %v1902_v53 = vpop.f32.mrb[20].mxu0  ;;  %v1615_v54 = vpop.f32.mrb[21].mxu1 }
 0x154   : > { %v1903_v55 = vadd.f32 %v1902_v53, %v1613_v52  ;;  %v1904_v56 = vpop.f32.mrb[21].mxu0  ;;  %v1616_v57 = vpop.f32.mrb[22].mxu1 }
 0x155   : > { %v1905_v58 = vpop.f32.mrb[22].mxu0  ;;  %v1618_v59 = vpop.f32.mrb[23].mxu1 }
 0x156   : > { %v2641_v60 = vadd.f32 %v2640_v49, %v1903_v55  ;;  %v2711_v61 = vmul.f32 %v1903_v55, %v1903_v55  ;;  %v1906_v62 = vadd.f32 %v1905_v58, %v1616_v57  ;;  %v1907_v63 = vpop.f32.mrb[23].mxu0 }
 0x158   : > { %v2774_v0 = vadd.f32 %v2773_v51, %v2711_v61  ;;  %v3411_v1 = vpack.c.bf16 %v1906_v62, %v1903_v55  ;;  %v2642_v2 = vadd.f32 %v2641_v60, %v1906_v62  ;;  %v2712_v3 = vmul.f32 %v1906_v62, %v1906_v62 }
 0x15a   : > { %3547 = vst [vmem:[%s4252_s29 + $0x28] sm:$0xff] %v3411_v1   ;;  %v2775_v4 = vadd.f32 %v2774_v0, %v2712_v3  ;;  %v1621_v5 = vpop.f32.mrb[24].mxu1 }
 0x15b   : > { %v1910_v6 = vpop.f32.mrb[24].mxu0  ;;  %v1623_v7 = vpop.f32.mrb[25].mxu1 }
 0x15c   : > { %v1911_v8 = vadd.f32 %v1910_v6, %v1621_v5  ;;  %v1912_v9 = vpop.f32.mrb[25].mxu0  ;;  %v1624_v10 = vpop.f32.mrb[26].mxu1 }
 0x15d   : > { %v1913_v11 = vpop.f32.mrb[26].mxu0  ;;  %v1626_v12 = vpop.f32.mrb[27].mxu1 }
 0x15e   : > { %v2643_v13 = vadd.f32 %v2642_v2, %v1911_v8  ;;  %v2713_v14 = vmul.f32 %v1911_v8, %v1911_v8  ;;  %v1914_v15 = vadd.f32 %v1913_v11, %v1624_v10  ;;  %v1915_v16 = vpop.f32.mrb[27].mxu0 }
 0x160   : > { %v2776_v17 = vadd.f32 %v2775_v4, %v2713_v14  ;;  %v3416_v18 = vpack.c.bf16 %v1914_v15, %v1911_v8  ;;  %v2644_v19 = vadd.f32 %v2643_v13, %v1914_v15  ;;  %v2714_v20 = vmul.f32 %v1914_v15, %v1914_v15 }
 0x162   : > { %3548 = vst [vmem:[%s4252_s29 + $0x30] sm:$0xff] %v3416_v18   ;;  %v2777_v21 = vadd.f32 %v2776_v17, %v2714_v20  ;;  %v1629_v22 = vpop.f32.mrb[28].mxu1 }
 0x163   : > { %v1918_v23 = vpop.f32.mrb[28].mxu0  ;;  %v1631_v24 = vpop.f32.mrb[29].mxu1 }
 0x164   : > { %v1919_v25 = vadd.f32 %v1918_v23, %v1629_v22  ;;  %v1920_v26 = vpop.f32.mrb[29].mxu0  ;;  %v1632_v27 = vpop.f32.mrb[30].mxu1 }
 0x165   : > { %v1921_v28 = vpop.f32.mrb[30].mxu0  ;;  %v1634_v29 = vpop.f32.mrb[31].mxu1 }
 0x166   : > { %v2645_v30 = vadd.f32 %v2644_v19, %v1919_v25  ;;  %v2715_v31 = vmul.f32 %v1919_v25, %v1919_v25  ;;  %v1922_v32 = vadd.f32 %v1921_v28, %v1632_v27  ;;  %v1923_v33 = vpop.f32.mrb[31].mxu0 }
 0x168   : > { %v2778_v34 = vadd.f32 %v2777_v21, %v2715_v31  ;;  %v3421_v35 = vpack.c.bf16 %v1922_v32, %v1919_v25  ;;  %v2646_v36 = vadd.f32 %v2645_v30, %v1922_v32  ;;  %v2716_v37 = vmul.f32 %v1922_v32, %v1922_v32 }
 0x16a   : > { %3549 = vst [vmem:[%s4252_s29 + $0x38] sm:$0xff] %v3421_v35   ;;  %v2779_v38 = vadd.f32 %v2778_v34, %v2716_v37  ;;  %v1637_v39 = vpop.f32.mrb[32].mxu1 }
 0x16b   : > { %v1926_v40 = vpop.f32.mrb[32].mxu0  ;;  %v1639_v41 = vpop.f32.mrb[33].mxu1 }
 0x16c   : > { %v1927_v42 = vadd.f32 %v1926_v40, %v1637_v39  ;;  %v1928_v43 = vpop.f32.mrb[33].mxu0  ;;  %v1640_v44 = vpop.f32.mrb[34].mxu1 }
 0x16d   : > { %v1929_v45 = vpop.f32.mrb[34].mxu0  ;;  %v1642_v46 = vpop.f32.mrb[35].mxu1 }
 0x16e   : > { %v2647_v47 = vadd.f32 %v2646_v36, %v1927_v42  ;;  %v2717_v48 = vmul.f32 %v1927_v42, %v1927_v42  ;;  %v1930_v49 = vadd.f32 %v1929_v45, %v1640_v44  ;;  %v1931_v50 = vpop.f32.mrb[35].mxu0 }
 0x170   : > { %v2780_v51 = vadd.f32 %v2779_v38, %v2717_v48  ;;  %v3426_v52 = vpack.c.bf16 %v1930_v49, %v1927_v42  ;;  %v2648_v53 = vadd.f32 %v2647_v47, %v1930_v49  ;;  %v2718_v54 = vmul.f32 %v1930_v49, %v1930_v49 }
 0x172   : > { %3550 = vst [vmem:[%s4252_s29 + $0x40] sm:$0xff] %v3426_v52   ;;  %v2781_v55 = vadd.f32 %v2780_v51, %v2718_v54  ;;  %v1645_v56 = vpop.f32.mrb[36].mxu1 }
 0x173   : > { %v1934_v57 = vpop.f32.mrb[36].mxu0  ;;  %v1647_v58 = vpop.f32.mrb[37].mxu1 }
 0x174   : > { %v1935_v59 = vadd.f32 %v1934_v57, %v1645_v56  ;;  %v1936_v60 = vpop.f32.mrb[37].mxu0  ;;  %v1648_v61 = vpop.f32.mrb[38].mxu1 }
 0x175   : > { %v1937_v62 = vpop.f32.mrb[38].mxu0  ;;  %v1650_v63 = vpop.f32.mrb[39].mxu1 }
 0x176   : > { %v2649_v0 = vadd.f32 %v2648_v53, %v1935_v59  ;;  %v2719_v1 = vmul.f32 %v1935_v59, %v1935_v59  ;;  %v1938_v2 = vadd.f32 %v1937_v62, %v1648_v61  ;;  %v1939_v3 = vpop.f32.mrb[39].mxu0 }
 0x178   : > { %v2782_v4 = vadd.f32 %v2781_v55, %v2719_v1  ;;  %v3431_v5 = vpack.c.bf16 %v1938_v2, %v1935_v59  ;;  %v2650_v6 = vadd.f32 %v2649_v0, %v1938_v2  ;;  %v2720_v7 = vmul.f32 %v1938_v2, %v1938_v2 }
 0x17a   : > { %3551 = vst [vmem:[%s4252_s29 + $0x48] sm:$0xff] %v3431_v5   ;;  %v2783_v8 = vadd.f32 %v2782_v4, %v2720_v7  ;;  %v1653_v9 = vpop.f32.mrb[40].mxu1 }
 0x17b   : > { %v1942_v10 = vpop.f32.mrb[40].mxu0  ;;  %v1655_v11 = vpop.f32.mrb[41].mxu1 }
 0x17c   : > { %v1943_v12 = vadd.f32 %v1942_v10, %v1653_v9  ;;  %v1944_v13 = vpop.f32.mrb[41].mxu0  ;;  %v1656_v14 = vpop.f32.mrb[42].mxu1 }
 0x17d   : > { %v1945_v15 = vpop.f32.mrb[42].mxu0  ;;  %v1658_v16 = vpop.f32.mrb[43].mxu1 }
 0x17e   : > { %v2651_v17 = vadd.f32 %v2650_v6, %v1943_v12  ;;  %v2721_v18 = vmul.f32 %v1943_v12, %v1943_v12  ;;  %v1946_v19 = vadd.f32 %v1945_v15, %v1656_v14  ;;  %v1947_v20 = vpop.f32.mrb[43].mxu0 }
 0x180   : > { %v2784_v21 = vadd.f32 %v2783_v8, %v2721_v18  ;;  %v3436_v22 = vpack.c.bf16 %v1946_v19, %v1943_v12  ;;  %v2652_v23 = vadd.f32 %v2651_v17, %v1946_v19  ;;  %v2722_v24 = vmul.f32 %v1946_v19, %v1946_v19 }
 0x182   : > { %3552 = vst [vmem:[%s4252_s29 + $0x50] sm:$0xff] %v3436_v22   ;;  %v2785_v25 = vadd.f32 %v2784_v21, %v2722_v24  ;;  %v1661_v26 = vpop.f32.mrb[44].mxu1 }
 0x183   : > { %v1950_v27 = vpop.f32.mrb[44].mxu0  ;;  %v1663_v28 = vpop.f32.mrb[45].mxu1 }
 0x184   : > { %v1951_v29 = vadd.f32 %v1950_v27, %v1661_v26  ;;  %v1952_v30 = vpop.f32.mrb[45].mxu0  ;;  %v1664_v31 = vpop.f32.mrb[46].mxu1 }
 0x185   : > { %v1953_v32 = vpop.f32.mrb[46].mxu0  ;;  %v1666_v33 = vpop.f32.mrb[47].mxu1 }
 0x186   : > { %v2653_v34 = vadd.f32 %v2652_v23, %v1951_v29  ;;  %v2723_v35 = vmul.f32 %v1951_v29, %v1951_v29  ;;  %v1954_v36 = vadd.f32 %v1953_v32, %v1664_v31  ;;  %v1955_v37 = vpop.f32.mrb[47].mxu0 }
 0x188   : > { %v2786_v38 = vadd.f32 %v2785_v25, %v2723_v35  ;;  %v3441_v39 = vpack.c.bf16 %v1954_v36, %v1951_v29  ;;  %v2654_v40 = vadd.f32 %v2653_v34, %v1954_v36  ;;  %v2724_v41 = vmul.f32 %v1954_v36, %v1954_v36 }
 0x18a   : > { %3553 = vst [vmem:[%s4252_s29 + $0x58] sm:$0xff] %v3441_v39   ;;  %v2787_v42 = vadd.f32 %v2786_v38, %v2724_v41  ;;  %v1669_v43 = vpop.f32.mrb[48].mxu1 }
 0x18b   : > { %v1958_v44 = vpop.f32.mrb[48].mxu0  ;;  %v1671_v45 = vpop.f32.mrb[49].mxu1 }
 0x18c   : > { %v1959_v46 = vadd.f32 %v1958_v44, %v1669_v43  ;;  %v1960_v47 = vpop.f32.mrb[49].mxu0  ;;  %v1672_v48 = vpop.f32.mrb[50].mxu1 }
 0x18d   : > { %v1961_v49 = vpop.f32.mrb[50].mxu0  ;;  %v1674_v50 = vpop.f32.mrb[51].mxu1 }
 0x18e   : > { %v2655_v51 = vadd.f32 %v2654_v40, %v1959_v46  ;;  %v2725_v52 = vmul.f32 %v1959_v46, %v1959_v46  ;;  %v1962_v53 = vadd.f32 %v1961_v49, %v1672_v48  ;;  %v1963_v54 = vpop.f32.mrb[51].mxu0 }
 0x190   : > { %v2788_v55 = vadd.f32 %v2787_v42, %v2725_v52  ;;  %v3446_v56 = vpack.c.bf16 %v1962_v53, %v1959_v46  ;;  %v2656_v57 = vadd.f32 %v2655_v51, %v1962_v53  ;;  %v2726_v58 = vmul.f32 %v1962_v53, %v1962_v53 }
 0x192   : > { %3554 = vst [vmem:[%s4252_s29 + $0x60] sm:$0xff] %v3446_v56   ;;  %v2789_v59 = vadd.f32 %v2788_v55, %v2726_v58  ;;  %v1677_v60 = vpop.f32.mrb[52].mxu1 }
 0x193   : > { %v1966_v61 = vpop.f32.mrb[52].mxu0  ;;  %v1679_v62 = vpop.f32.mrb[53].mxu1 }
 0x194   : > { %v1967_v63 = vadd.f32 %v1966_v61, %v1677_v60  ;;  %v1968_v0 = vpop.f32.mrb[53].mxu0  ;;  %v1680_v1 = vpop.f32.mrb[54].mxu1 }
 0x195   : > { %v1969_v2 = vpop.f32.mrb[54].mxu0  ;;  %v1682_v3 = vpop.f32.mrb[55].mxu1 }
 0x196   : > { %v2657_v4 = vadd.f32 %v2656_v57, %v1967_v63  ;;  %v2727_v5 = vmul.f32 %v1967_v63, %v1967_v63  ;;  %v1970_v6 = vadd.f32 %v1969_v2, %v1680_v1  ;;  %v1971_v7 = vpop.f32.mrb[55].mxu0 }
 0x198   : > { %v2790_v8 = vadd.f32 %v2789_v59, %v2727_v5  ;;  %v3451_v9 = vpack.c.bf16 %v1970_v6, %v1967_v63  ;;  %v2658_v10 = vadd.f32 %v2657_v4, %v1970_v6  ;;  %v2728_v11 = vmul.f32 %v1970_v6, %v1970_v6 }
 0x19a   : > { %3555 = vst [vmem:[%s4252_s29 + $0x68] sm:$0xff] %v3451_v9   ;;  %v2791_v12 = vadd.f32 %v2790_v8, %v2728_v11  ;;  %v1685_v13 = vpop.f32.mrb[56].mxu1 }
 0x19b   : > { %v1974_v14 = vpop.f32.mrb[56].mxu0  ;;  %v1687_v15 = vpop.f32.mrb[57].mxu1 }
 0x19c   : > { %v1975_v16 = vadd.f32 %v1974_v14, %v1685_v13  ;;  %v1976_v17 = vpop.f32.mrb[57].mxu0  ;;  %v1688_v18 = vpop.f32.mrb[58].mxu1 }
 0x19d   : > { %v1977_v19 = vpop.f32.mrb[58].mxu0  ;;  %v1690_v20 = vpop.f32.mrb[59].mxu1 }
 0x19e   : > { %v2659_v21 = vadd.f32 %v2658_v10, %v1975_v16  ;;  %v2729_v22 = vmul.f32 %v1975_v16, %v1975_v16  ;;  %v1978_v23 = vadd.f32 %v1977_v19, %v1688_v18  ;;  %v1979_v24 = vpop.f32.mrb[59].mxu0 }
 0x1a0   : > { %v2792_v25 = vadd.f32 %v2791_v12, %v2729_v22  ;;  %v3456_v26 = vpack.c.bf16 %v1978_v23, %v1975_v16  ;;  %v2660_v27 = vadd.f32 %v2659_v21, %v1978_v23  ;;  %v2730_v28 = vmul.f32 %v1978_v23, %v1978_v23 }
 0x1a2   : > { %3556 = vst [vmem:[%s4252_s29 + $0x70] sm:$0xff] %v3456_v26   ;;  %v2793_v29 = vadd.f32 %v2792_v25, %v2730_v28  ;;  %v1693_v30 = vpop.f32.mrb[60].mxu1 }
 0x1a3   : > { %v1982_v31 = vpop.f32.mrb[60].mxu0  ;;  %v1695_v32 = vpop.f32.mrb[61].mxu1 }
 0x1a4   : > { %v1983_v33 = vadd.f32 %v1982_v31, %v1693_v30  ;;  %v1984_v34 = vpop.f32.mrb[61].mxu0  ;;  %v1696_v35 = vpop.f32.mrb[62].mxu1 }
 0x1a5   : > { %v1985_v36 = vpop.f32.mrb[62].mxu0  ;;  %v1698_v37 = vpop.f32.mrb[63].mxu1 }
 0x1a6   : > { %v2661_v38 = vadd.f32 %v2660_v27, %v1983_v33  ;;  %v2731_v39 = vmul.f32 %v1983_v33, %v1983_v33  ;;  %v1986_v40 = vadd.f32 %v1985_v36, %v1696_v35  ;;  %v1987_v41 = vpop.f32.mrb[63].mxu0 }
 0x1a8   : > { %v2794_v42 = vadd.f32 %v2793_v29, %v2731_v39  ;;  %v3461_v43 = vpack.c.bf16 %v1986_v40, %v1983_v33  ;;  %v2662_v44 = vadd.f32 %v2661_v38, %v1986_v40  ;;  %v2732_v45 = vmul.f32 %v1986_v40, %v1986_v40 }
 0x1aa   : > { %3557 = vst [vmem:[%s4252_s29 + $0x78] sm:$0xff] %v3461_v43   ;;  %v2795_v46 = vadd.f32 %v2794_v42, %v2732_v45  ;;  %v1701_v47 = vpop.f32.mrb[64].mxu1 }
 0x1ab   : > { %v1990_v48 = vpop.f32.mrb[64].mxu0  ;;  %v1703_v49 = vpop.f32.mrb[65].mxu1 }
 0x1ac   : > { %v1991_v50 = vadd.f32 %v1990_v48, %v1701_v47  ;;  %v1992_v51 = vpop.f32.mrb[65].mxu0  ;;  %v1704_v52 = vpop.f32.mrb[66].mxu1 }
 0x1ad   : > { %v1993_v53 = vpop.f32.mrb[66].mxu0  ;;  %v1706_v54 = vpop.f32.mrb[67].mxu1 }
 0x1ae   : > { %v2663_v55 = vadd.f32 %v2662_v44, %v1991_v50  ;;  %v2733_v56 = vmul.f32 %v1991_v50, %v1991_v50  ;;  %v1994_v57 = vadd.f32 %v1993_v53, %v1704_v52  ;;  %v1995_v58 = vpop.f32.mrb[67].mxu0 }
 0x1b0   : > { %v2796_v59 = vadd.f32 %v2795_v46, %v2733_v56  ;;  %v3466_v60 = vpack.c.bf16 %v1994_v57, %v1991_v50  ;;  %v2664_v61 = vadd.f32 %v2663_v55, %v1994_v57  ;;  %v2734_v62 = vmul.f32 %v1994_v57, %v1994_v57 }
 0x1b2   : > { %3558 = vst [vmem:[%s4252_s29 + $0x80] sm:$0xff] %v3466_v60   ;;  %v2797_v63 = vadd.f32 %v2796_v59, %v2734_v62  ;;  %v1709_v0 = vpop.f32.mrb[68].mxu1 }
 0x1b3   : > { %v1998_v1 = vpop.f32.mrb[68].mxu0  ;;  %v1711_v2 = vpop.f32.mrb[69].mxu1 }
 0x1b4   : > { %v1999_v3 = vadd.f32 %v1998_v1, %v1709_v0  ;;  %v2000_v4 = vpop.f32.mrb[69].mxu0  ;;  %v1712_v5 = vpop.f32.mrb[70].mxu1 }
 0x1b5   : > { %v2001_v6 = vpop.f32.mrb[70].mxu0  ;;  %v1714_v7 = vpop.f32.mrb[71].mxu1 }
 0x1b6   : > { %v2665_v8 = vadd.f32 %v2664_v61, %v1999_v3  ;;  %v2735_v9 = vmul.f32 %v1999_v3, %v1999_v3  ;;  %v2002_v10 = vadd.f32 %v2001_v6, %v1712_v5  ;;  %v2003_v11 = vpop.f32.mrb[71].mxu0 }
 0x1b8   : > { %v2798_v12 = vadd.f32 %v2797_v63, %v2735_v9  ;;  %v3471_v13 = vpack.c.bf16 %v2002_v10, %v1999_v3  ;;  %v2666_v14 = vadd.f32 %v2665_v8, %v2002_v10  ;;  %v2736_v15 = vmul.f32 %v2002_v10, %v2002_v10 }
 0x1ba   : > { %3559 = vst [vmem:[%s4252_s29 + $0x88] sm:$0xff] %v3471_v13   ;;  %v2799_v16 = vadd.f32 %v2798_v12, %v2736_v15  ;;  %v1717_v17 = vpop.f32.mrb[72].mxu1 }
 0x1bb   : > { %v2006_v18 = vpop.f32.mrb[72].mxu0  ;;  %v1719_v19 = vpop.f32.mrb[73].mxu1 }
 0x1bc   : > { %v2007_v20 = vadd.f32 %v2006_v18, %v1717_v17  ;;  %v2008_v21 = vpop.f32.mrb[73].mxu0  ;;  %v1720_v22 = vpop.f32.mrb[74].mxu1 }
 0x1bd   : > { %v2009_v23 = vpop.f32.mrb[74].mxu0  ;;  %v1722_v24 = vpop.f32.mrb[75].mxu1 }
 0x1be   : > { %v2667_v25 = vadd.f32 %v2666_v14, %v2007_v20  ;;  %v2737_v26 = vmul.f32 %v2007_v20, %v2007_v20  ;;  %v2010_v27 = vadd.f32 %v2009_v23, %v1720_v22  ;;  %v2011_v28 = vpop.f32.mrb[75].mxu0 }
 0x1c0   : > { %v2800_v29 = vadd.f32 %v2799_v16, %v2737_v26  ;;  %v3476_v30 = vpack.c.bf16 %v2010_v27, %v2007_v20  ;;  %v2668_v31 = vadd.f32 %v2667_v25, %v2010_v27  ;;  %v2738_v32 = vmul.f32 %v2010_v27, %v2010_v27 }
 0x1c2   : > { %3560 = vst [vmem:[%s4252_s29 + $0x90] sm:$0xff] %v3476_v30   ;;  %v2801_v33 = vadd.f32 %v2800_v29, %v2738_v32  ;;  %v1725_v34 = vpop.f32.mrb[76].mxu1 }
 0x1c3   : > { %v2014_v35 = vpop.f32.mrb[76].mxu0  ;;  %v1727_v36 = vpop.f32.mrb[77].mxu1 }
 0x1c4   : > { %v2015_v37 = vadd.f32 %v2014_v35, %v1725_v34  ;;  %v2016_v38 = vpop.f32.mrb[77].mxu0  ;;  %v1728_v39 = vpop.f32.mrb[78].mxu1 }
 0x1c5   : > { %v2017_v40 = vpop.f32.mrb[78].mxu0  ;;  %v1730_v41 = vpop.f32.mrb[79].mxu1 }
 0x1c6   : > { %v2669_v42 = vadd.f32 %v2668_v31, %v2015_v37  ;;  %v2739_v43 = vmul.f32 %v2015_v37, %v2015_v37  ;;  %v2018_v44 = vadd.f32 %v2017_v40, %v1728_v39  ;;  %v2019_v45 = vpop.f32.mrb[79].mxu0 }
 0x1c8   : > { %v2802_v46 = vadd.f32 %v2801_v33, %v2739_v43  ;;  %v3481_v47 = vpack.c.bf16 %v2018_v44, %v2015_v37  ;;  %v2670_v48 = vadd.f32 %v2669_v42, %v2018_v44  ;;  %v2740_v49 = vmul.f32 %v2018_v44, %v2018_v44 }
 0x1ca   : > { %3561 = vst [vmem:[%s4252_s29 + $0x98] sm:$0xff] %v3481_v47   ;;  %v2803_v50 = vadd.f32 %v2802_v46, %v2740_v49  ;;  %v1733_v51 = vpop.f32.mrb[80].mxu1 }
 0x1cb   : > { %v2022_v52 = vpop.f32.mrb[80].mxu0  ;;  %v1735_v53 = vpop.f32.mrb[81].mxu1 }
 0x1cc   : > { %v2023_v54 = vadd.f32 %v2022_v52, %v1733_v51  ;;  %v2024_v55 = vpop.f32.mrb[81].mxu0  ;;  %v1736_v56 = vpop.f32.mrb[82].mxu1 }
 0x1cd   : > { %v2025_v57 = vpop.f32.mrb[82].mxu0  ;;  %v1738_v58 = vpop.f32.mrb[83].mxu1 }
 0x1ce   : > { %v2671_v59 = vadd.f32 %v2670_v48, %v2023_v54  ;;  %v2741_v60 = vmul.f32 %v2023_v54, %v2023_v54  ;;  %v2026_v61 = vadd.f32 %v2025_v57, %v1736_v56  ;;  %v2027_v62 = vpop.f32.mrb[83].mxu0 }
 0x1d0   : > { %v2804_v63 = vadd.f32 %v2803_v50, %v2741_v60  ;;  %v3486_v0 = vpack.c.bf16 %v2026_v61, %v2023_v54  ;;  %v2672_v1 = vadd.f32 %v2671_v59, %v2026_v61  ;;  %v2742_v2 = vmul.f32 %v2026_v61, %v2026_v61 }
 0x1d2   : > { %3562 = vst [vmem:[%s4252_s29 + $0xa0] sm:$0xff] %v3486_v0   ;;  %v2805_v3 = vadd.f32 %v2804_v63, %v2742_v2  ;;  %v1741_v4 = vpop.f32.mrb[84].mxu1 }
 0x1d3   : > { %v2030_v5 = vpop.f32.mrb[84].mxu0  ;;  %v1743_v6 = vpop.f32.mrb[85].mxu1 }
 0x1d4   : > { %v2031_v7 = vadd.f32 %v2030_v5, %v1741_v4  ;;  %v2032_v8 = vpop.f32.mrb[85].mxu0  ;;  %v1744_v9 = vpop.f32.mrb[86].mxu1 }
 0x1d5   : > { %v2033_v10 = vpop.f32.mrb[86].mxu0  ;;  %v1746_v11 = vpop.f32.mrb[87].mxu1 }
 0x1d6   : > { %v2673_v12 = vadd.f32 %v2672_v1, %v2031_v7  ;;  %v2743_v13 = vmul.f32 %v2031_v7, %v2031_v7  ;;  %v2034_v14 = vadd.f32 %v2033_v10, %v1744_v9  ;;  %v2035_v15 = vpop.f32.mrb[87].mxu0 }
 0x1d8   : > { %v2806_v16 = vadd.f32 %v2805_v3, %v2743_v13  ;;  %v3491_v17 = vpack.c.bf16 %v2034_v14, %v2031_v7  ;;  %v2674_v18 = vadd.f32 %v2673_v12, %v2034_v14  ;;  %v2744_v19 = vmul.f32 %v2034_v14, %v2034_v14 }
 0x1da   : > { %3563 = vst [vmem:[%s4252_s29 + $0xa8] sm:$0xff] %v3491_v17   ;;  %v2807_v20 = vadd.f32 %v2806_v16, %v2744_v19  ;;  %v1749_v21 = vpop.f32.mrb[88].mxu1 }
 0x1db   : > { %v2038_v22 = vpop.f32.mrb[88].mxu0  ;;  %v1751_v23 = vpop.f32.mrb[89].mxu1 }
 0x1dc   : > { %v2039_v24 = vadd.f32 %v2038_v22, %v1749_v21  ;;  %v2040_v25 = vpop.f32.mrb[89].mxu0  ;;  %v1752_v26 = vpop.f32.mrb[90].mxu1 }
 0x1dd   : > { %v2041_v27 = vpop.f32.mrb[90].mxu0  ;;  %v1754_v28 = vpop.f32.mrb[91].mxu1 }
 0x1de   : > { %v2675_v29 = vadd.f32 %v2674_v18, %v2039_v24  ;;  %v2745_v30 = vmul.f32 %v2039_v24, %v2039_v24  ;;  %v2042_v31 = vadd.f32 %v2041_v27, %v1752_v26  ;;  %v2043_v32 = vpop.f32.mrb[91].mxu0 }
 0x1e0   : > { %v2808_v33 = vadd.f32 %v2807_v20, %v2745_v30  ;;  %v3496_v34 = vpack.c.bf16 %v2042_v31, %v2039_v24  ;;  %v2676_v35 = vadd.f32 %v2675_v29, %v2042_v31  ;;  %v2746_v36 = vmul.f32 %v2042_v31, %v2042_v31 }
 0x1e2   : > { %3564 = vst [vmem:[%s4252_s29 + $0xb0] sm:$0xff] %v3496_v34   ;;  %v2809_v37 = vadd.f32 %v2808_v33, %v2746_v36  ;;  %v1757_v38 = vpop.f32.mrb[92].mxu1 }
 0x1e3   : > { %v2046_v39 = vpop.f32.mrb[92].mxu0  ;;  %v1759_v40 = vpop.f32.mrb[93].mxu1 }
 0x1e4   : > { %v2047_v41 = vadd.f32 %v2046_v39, %v1757_v38  ;;  %v2048_v42 = vpop.f32.mrb[93].mxu0  ;;  %v1760_v43 = vpop.f32.mrb[94].mxu1 }
 0x1e5   : > { %v2049_v44 = vpop.f32.mrb[94].mxu0  ;;  %v1762_v45 = vpop.f32.mrb[95].mxu1 }
 0x1e6   : > { %v2677_v46 = vadd.f32 %v2676_v35, %v2047_v41  ;;  %v2747_v47 = vmul.f32 %v2047_v41, %v2047_v41  ;;  %v2050_v48 = vadd.f32 %v2049_v44, %v1760_v43  ;;  %v2051_v49 = vpop.f32.mrb[95].mxu0 }
 0x1e8   : > { %v2810_v50 = vadd.f32 %v2809_v37, %v2747_v47  ;;  %v3501_v51 = vpack.c.bf16 %v2050_v48, %v2047_v41  ;;  %v2678_v52 = vadd.f32 %v2677_v46, %v2050_v48  ;;  %v2748_v53 = vmul.f32 %v2050_v48, %v2050_v48 }
 0x1ea   : > { %3565 = vst [vmem:[%s4252_s29 + $0xb8] sm:$0xff] %v3501_v51   ;;  %v2811_v54 = vadd.f32 %v2810_v50, %v2748_v53  ;;  %v1765_v55 = vpop.f32.mrb[96].mxu1 }
 0x1eb   : > { %v2054_v56 = vpop.f32.mrb[96].mxu0  ;;  %v1767_v57 = vpop.f32.mrb[97].mxu1 }
 0x1ec   : > { %v2055_v58 = vadd.f32 %v2054_v56, %v1765_v55  ;;  %v2056_v59 = vpop.f32.mrb[97].mxu0  ;;  %v1768_v60 = vpop.f32.mrb[98].mxu1 }
 0x1ed   : > { %v2057_v61 = vpop.f32.mrb[98].mxu0  ;;  %v1770_v62 = vpop.f32.mrb[99].mxu1 }
 0x1ee   : > { %v2679_v63 = vadd.f32 %v2678_v52, %v2055_v58  ;;  %v2749_v0 = vmul.f32 %v2055_v58, %v2055_v58  ;;  %v2058_v1 = vadd.f32 %v2057_v61, %v1768_v60  ;;  %v2059_v2 = vpop.f32.mrb[99].mxu0 }
 0x1f0   : > { %v2812_v3 = vadd.f32 %v2811_v54, %v2749_v0  ;;  %v3506_v4 = vpack.c.bf16 %v2058_v1, %v2055_v58  ;;  %v2680_v5 = vadd.f32 %v2679_v63, %v2058_v1  ;;  %v2750_v6 = vmul.f32 %v2058_v1, %v2058_v1 }
 0x1f2   : > { %3566 = vst [vmem:[%s4252_s29 + $0xc0] sm:$0xff] %v3506_v4   ;;  %v2813_v7 = vadd.f32 %v2812_v3, %v2750_v6  ;;  %v1773_v8 = vpop.f32.mrb[100].mxu1 }
 0x1f3   : > { %v2062_v9 = vpop.f32.mrb[100].mxu0  ;;  %v1775_v10 = vpop.f32.mrb[101].mxu1 }
 0x1f4   : > { %v2063_v11 = vadd.f32 %v2062_v9, %v1773_v8  ;;  %v2064_v12 = vpop.f32.mrb[101].mxu0  ;;  %v1776_v13 = vpop.f32.mrb[102].mxu1 }
 0x1f5   : > { %v2065_v14 = vpop.f32.mrb[102].mxu0  ;;  %v1778_v15 = vpop.f32.mrb[103].mxu1 }
 0x1f6   : > { %v2681_v16 = vadd.f32 %v2680_v5, %v2063_v11  ;;  %v2751_v17 = vmul.f32 %v2063_v11, %v2063_v11  ;;  %v2066_v18 = vadd.f32 %v2065_v14, %v1776_v13  ;;  %v2067_v19 = vpop.f32.mrb[103].mxu0 }
 0x1f8   : > { %v2814_v20 = vadd.f32 %v2813_v7, %v2751_v17  ;;  %v3511_v21 = vpack.c.bf16 %v2066_v18, %v2063_v11  ;;  %v2682_v22 = vadd.f32 %v2681_v16, %v2066_v18  ;;  %v2752_v23 = vmul.f32 %v2066_v18, %v2066_v18 }
 0x1fa   : > { %3567 = vst [vmem:[%s4252_s29 + $0xc8] sm:$0xff] %v3511_v21   ;;  %v2815_v24 = vadd.f32 %v2814_v20, %v2752_v23  ;;  %v1781_v25 = vpop.f32.mrb[104].mxu1 }
 0x1fb   : > { %v2070_v26 = vpop.f32.mrb[104].mxu0  ;;  %v1783_v27 = vpop.f32.mrb[105].mxu1 }
 0x1fc   : > { %v2071_v28 = vadd.f32 %v2070_v26, %v1781_v25  ;;  %v2072_v29 = vpop.f32.mrb[105].mxu0  ;;  %v1784_v30 = vpop.f32.mrb[106].mxu1 }
 0x1fd   : > { %v2073_v31 = vpop.f32.mrb[106].mxu0  ;;  %v1786_v32 = vpop.f32.mrb[107].mxu1 }
 0x1fe   : > { %v2683_v33 = vadd.f32 %v2682_v22, %v2071_v28  ;;  %v2753_v34 = vmul.f32 %v2071_v28, %v2071_v28  ;;  %v2074_v35 = vadd.f32 %v2073_v31, %v1784_v30  ;;  %v2075_v36 = vpop.f32.mrb[107].mxu0 }
 0x200   : > { %v2816_v37 = vadd.f32 %v2815_v24, %v2753_v34  ;;  %v3516_v38 = vpack.c.bf16 %v2074_v35, %v2071_v28  ;;  %v2684_v39 = vadd.f32 %v2683_v33, %v2074_v35  ;;  %v2754_v40 = vmul.f32 %v2074_v35, %v2074_v35 }
 0x202   : > { %3568 = vst [vmem:[%s4252_s29 + $0xd0] sm:$0xff] %v3516_v38   ;;  %v2817_v41 = vadd.f32 %v2816_v37, %v2754_v40  ;;  %v1789_v42 = vpop.f32.mrb[108].mxu1 }
 0x203   : > { %v2078_v43 = vpop.f32.mrb[108].mxu0  ;;  %v1791_v44 = vpop.f32.mrb[109].mxu1 }
 0x204   : > { %v2079_v45 = vadd.f32 %v2078_v43, %v1789_v42  ;;  %v2080_v46 = vpop.f32.mrb[109].mxu0  ;;  %v1792_v47 = vpop.f32.mrb[110].mxu1 }
 0x205   : > { %v2081_v48 = vpop.f32.mrb[110].mxu0  ;;  %v1794_v49 = vpop.f32.mrb[111].mxu1 }
 0x206   : > { %v2685_v50 = vadd.f32 %v2684_v39, %v2079_v45  ;;  %v2755_v51 = vmul.f32 %v2079_v45, %v2079_v45  ;;  %v2082_v52 = vadd.f32 %v2081_v48, %v1792_v47  ;;  %v2083_v53 = vpop.f32.mrb[111].mxu0 }
 0x208   : > { %v2818_v54 = vadd.f32 %v2817_v41, %v2755_v51  ;;  %v3521_v55 = vpack.c.bf16 %v2082_v52, %v2079_v45  ;;  %v2686_v56 = vadd.f32 %v2685_v50, %v2082_v52  ;;  %v2756_v57 = vmul.f32 %v2082_v52, %v2082_v52 }
 0x20a   : > { %3569 = vst [vmem:[%s4252_s29 + $0xd8] sm:$0xff] %v3521_v55   ;;  %v2819_v58 = vadd.f32 %v2818_v54, %v2756_v57  ;;  %v1797_v59 = vpop.f32.mrb[112].mxu1 }
 0x20b   : > { %v2086_v60 = vpop.f32.mrb[112].mxu0  ;;  %v1799_v61 = vpop.f32.mrb[113].mxu1 }
 0x20c   : > { %v2087_v62 = vadd.f32 %v2086_v60, %v1797_v59  ;;  %v2088_v63 = vpop.f32.mrb[113].mxu0  ;;  %v1800_v0 = vpop.f32.mrb[114].mxu1 }
 0x20d   : > { %v2089_v1 = vpop.f32.mrb[114].mxu0  ;;  %v1802_v2 = vpop.f32.mrb[115].mxu1 }
 0x20e   : > { %v2687_v3 = vadd.f32 %v2686_v56, %v2087_v62  ;;  %v2757_v4 = vmul.f32 %v2087_v62, %v2087_v62  ;;  %v2090_v5 = vadd.f32 %v2089_v1, %v1800_v0  ;;  %v2091_v6 = vpop.f32.mrb[115].mxu0 }
 0x210   : > { %v2820_v7 = vadd.f32 %v2819_v58, %v2757_v4  ;;  %v3526_v8 = vpack.c.bf16 %v2090_v5, %v2087_v62  ;;  %v2688_v9 = vadd.f32 %v2687_v3, %v2090_v5  ;;  %v2758_v10 = vmul.f32 %v2090_v5, %v2090_v5 }
 0x212   : > { %3570 = vst [vmem:[%s4252_s29 + $0xe0] sm:$0xff] %v3526_v8   ;;  %v2821_v11 = vadd.f32 %v2820_v7, %v2758_v10  ;;  %v1805_v12 = vpop.f32.mrb[116].mxu1 }
 0x213   : > { %v2094_v13 = vpop.f32.mrb[116].mxu0  ;;  %v1807_v14 = vpop.f32.mrb[117].mxu1 }
 0x214   : > { %v2095_v15 = vadd.f32 %v2094_v13, %v1805_v12  ;;  %v2096_v16 = vpop.f32.mrb[117].mxu0  ;;  %v1808_v17 = vpop.f32.mrb[118].mxu1 }
 0x215   : > { %v2097_v18 = vpop.f32.mrb[118].mxu0  ;;  %v1810_v19 = vpop.f32.mrb[119].mxu1 }
 0x216   : > { %v2689_v20 = vadd.f32 %v2688_v9, %v2095_v15  ;;  %v2759_v21 = vmul.f32 %v2095_v15, %v2095_v15  ;;  %v2098_v22 = vadd.f32 %v2097_v18, %v1808_v17  ;;  %v2099_v23 = vpop.f32.mrb[119].mxu0 }
 0x218   : > { %v2822_v24 = vadd.f32 %v2821_v11, %v2759_v21  ;;  %v3531_v25 = vpack.c.bf16 %v2098_v22, %v2095_v15  ;;  %v2690_v26 = vadd.f32 %v2689_v20, %v2098_v22  ;;  %v2760_v27 = vmul.f32 %v2098_v22, %v2098_v22 }
 0x21a   : > { %3571 = vst [vmem:[%s4252_s29 + $0xe8] sm:$0xff] %v3531_v25   ;;  %v2823_v28 = vadd.f32 %v2822_v24, %v2760_v27  ;;  %v1813_v29 = vpop.f32.mrb[120].mxu1 }
 0x21b   : > { %v2102_v30 = vpop.f32.mrb[120].mxu0  ;;  %v1815_v31 = vpop.f32.mrb[121].mxu1 }
 0x21c   : > { %v2103_v32 = vadd.f32 %v2102_v30, %v1813_v29  ;;  %v2104_v33 = vpop.f32.mrb[121].mxu0  ;;  %v1816_v34 = vpop.f32.mrb[122].mxu1 }
 0x21d   : > { %v2105_v35 = vpop.f32.mrb[122].mxu0  ;;  %v1818_v36 = vpop.f32.mrb[123].mxu1 }
 0x21e   : > { %v2691_v37 = vadd.f32 %v2690_v26, %v2103_v32  ;;  %v2761_v38 = vmul.f32 %v2103_v32, %v2103_v32  ;;  %v2106_v39 = vadd.f32 %v2105_v35, %v1816_v34  ;;  %v2107_v40 = vpop.f32.mrb[123].mxu0 }
 0x220   : > { %v2824_v41 = vadd.f32 %v2823_v28, %v2761_v38  ;;  %v3536_v42 = vpack.c.bf16 %v2106_v39, %v2103_v32  ;;  %v2692_v43 = vadd.f32 %v2691_v37, %v2106_v39  ;;  %v2762_v44 = vmul.f32 %v2106_v39, %v2106_v39 }
 0x222   : > { %3572 = vst [vmem:[%s4252_s29 + $0xf0] sm:$0xff] %v3536_v42   ;;  %v2825_v45 = vadd.f32 %v2824_v41, %v2762_v44  ;;  %v1821_v46 = vpop.f32.mrb[124].mxu1 }
 0x223   : > { %v2110_v47 = vpop.f32.mrb[124].mxu0  ;;  %v1823_v48 = vpop.f32.mrb[125].mxu1 }
 0x224   : > { %v2111_v49 = vadd.f32 %v2110_v47, %v1821_v46  ;;  %v2112_v50 = vpop.f32.mrb[125].mxu0  ;;  %v1824_v51 = vpop.f32.mrb[126].mxu1 }
 0x225   : > { %v2113_v52 = vpop.f32.mrb[126].mxu0  ;;  %v1826_v53 = vpop.f32.mrb[127].mxu1 }
 0x226   : > { %v2693_v54 = vadd.f32 %v2692_v43, %v2111_v49  ;;  %v2763_v55 = vmul.f32 %v2111_v49, %v2111_v49  ;;  %v2114_v56 = vadd.f32 %v2113_v52, %v1824_v51  ;;  %v2115_v57 = vpop.f32.mrb[127].mxu0 }
 0x228   : > { %v2826_v58 = vadd.f32 %v2825_v45, %v2763_v55  ;;  %v3541_v59 = vpack.c.bf16 %v2114_v56, %v2111_v49  ;;  %v2694_v60 = vadd.f32 %v2693_v54, %v2114_v56  ;;  %v2764_v61 = vmul.f32 %v2114_v56, %v2114_v56 }
 0x22a   : > { %3573 = vst [vmem:[%s4252_s29 + $0xf8] sm:$0xff] %v3541_v59   ;;  %v2695_v62 = vrot.slane %v2694_v60, 4  ;;  %v2827_v63 = vadd.f32 %v2826_v58, %v2764_v61 }
 0x22c   : > { %v2696_v0 = vadd.f32 %v2695_v62, %v2694_v60  ;;  %v2828_v1 = vrot.slane %v2827_v63, 4 }
 0x22e   : > { %v2697_v2 = vrot.slane %v2696_v0, 2  ;;  %v2829_v3 = vadd.f32 %v2828_v1, %v2827_v63 }
 0x230   : > { %v2698_v4 = vadd.f32 %v2697_v2, %v2696_v0  ;;  %v2830_v5 = vrot.slane %v2829_v3, 2 }
 0x232   : > { %v2699_v6 = vrot.slane %v2698_v4, 1  ;;  %v2831_v7 = vadd.f32 %v2830_v5, %v2829_v3 }
 0x234   : > { %v2832_v8 = vrot.slane %v2831_v7, 1  ;;  %v2700_v9 = vadd.f32 %v2699_v6, %v2698_v4 }
 0x236   : > { %v2833_v10 = vadd.f32 %v2832_v8, %v2831_v7 }
 0x238   : > { %v2835_v11 = vsel %vm2834_vm0, %v2700_v9, %v2833_v10 }
 0x239   : > { %v2837_v12 = vsel %vm2836_vm1, %v2835_v11, 0.0 }
 0x23a   : > { %2838 = vst [vmem:[%s381_s9] sm:$0xff] %v2837_v12 }
 0x23b PF: > { %s14_s18 = sadd.s32 1, %s3979_s18   ;;  %s4332_s12 = smov %s3967_s15 }
 0x23c   : > { %p11_p10 = scmp.ge.s32.totalorder %s14_s18, 14   ;;  %s4333_s13 = smov %s3971_s16 }
 0x23d   : > { %s4334_s14 = smov %s3975_s17  ;;  %s4335_s15 = smov %s4339_s19 }
 0x23e   : > { %s4336_s16 = smov %s4343_s20  ;;  %s4337_s17 = smov %s4347_s21 }
 0x23f   :  { %13 = sbr.rel (!%p11_p10) target bundleno = 4 (0x4), region = 81 }

// kernel: generator_forward.9
= control target key start
LH: loop header
LB: loop body
LE: loop exit
PB: predicated region body
PF: predicated region fallthrough
CT: control target
= control target key end

     0   :  { %s4768_s9 = smov 0   ;;  %s4770_s10 = smov 0   ;;  %s5404_s0 = inlined_call_operand.vmem [shape: bf16[4608,768], index: 0, kind: input, shape index: {}]   ;;  %s5405_s1 = inlined_call_operand.vmem [shape: bf16[768,128], index: 1, kind: input, shape index: {}]   ;;  %s5406_s2 = inlined_call_operand.vmem [shape: bf16[4608,128], index: 2, kind: output, shape index: {}]  }
   0x1   :  { %s4772_s11 = smov 0  }
   0x2 LB: > { %s27_s12 = sadd.s32 1, %s4746_s10  ;;  %p3448_p0 = scmp.ge.s32.totalorder %s4750_s11, 1  ;;  %s4750_s11 = sphi %s4772_s11, %s12_s11   ;;  %s4746_s10 = sphi %s4770_s10, %s5408_s10   ;;  %s4742_s9 = sphi %s4768_s9, %s5407_s9  }
   0x3   : > { %p29_p1 = scmp.ge.s32.totalorder %s27_s12, 9  ;;  %p158_p2 = scmp.lt.s32.totalorder %s4750_s11, 10 }
   0x5   : > { %s5410_s12 = smov (%p29_p1, %s27_s12), 0  ;;  %p159_p3 = pnand %p3448_p0, %p158_p2 }
   0x6   : > { %v4264_v0 = vld [vmem:[%s5405_s1] sm:$0xff] (!%p159_p3)   ;;  %v4752_v1 = vmov (!%p159_p3), 0   ;;  %v4266_v3 = vld [vmem:[%s5405_s1 + $0x8] sm:$0xff] (!%p159_p3)   ;;  %v4268_v5 = vld [vmem:[%s5405_s1 + $0x10] sm:$0xff] (!%p159_p3)   ;;  %s3449_s5 = sshll.u32 (!%p159_p3), %s4742_s9, 6 }
   0x7   : > { %162 = sbr.rel (%p159_p3) target bundleno = 677 (0x2a5), region = 28  ;;  %1895 = vmatprep.subr.bf16.mxu1 (!%p159_p3), %v4752_v1  ;;  %2184 = vmatprep.subr.bf16.mxu0 (!%p159_p3), %v4752_v1  ;;  %v4796_v2 = vld [vmem:[%s5405_s1 + $0x80] sm:$0xff] (!%p159_p3)   ;;  %v4806_v4 = vld [vmem:[%s5405_s1 + $0x88] sm:$0xff] (!%p159_p3)   ;;  %v4817_v6 = vld [vmem:[%s5405_s1 + $0x90] sm:$0xff] (!%p159_p3)   ;;  %p198_p4 = scmp.lt.s32.totalorder (!%p159_p3), %s3449_s5, 575 }
   0x8   : > { %1896 = vmatpush1.bf16.msra.mxu1 (!%p159_p3), %v4264_v0  ;;  %2185 = vmatpush1.bf16.msra.mxu0 (!%p159_p3), %v4796_v2  ;;  %v4270_v7 = vld [vmem:[%s5405_s1 + $0x18] sm:$0xff] (!%p159_p3)   ;;  %v4272_v9 = vld [vmem:[%s5405_s1 + $0x20] sm:$0xff] (!%p159_p3)   ;;  %v4274_v11 = vld [vmem:[%s5405_s1 + $0x28] sm:$0xff] (!%p159_p3)  }
   0x9   : > { %1897 = vmatprep.subr.bf16.mxu1 (!%p159_p3), %v4752_v1  ;;  %2186 = vmatprep.subr.bf16.mxu0 (!%p159_p3), %v4752_v1  ;;  %v4828_v8 = vld [vmem:[%s5405_s1 + $0x98] sm:$0xff] (!%p159_p3)   ;;  %v4839_v10 = vld [vmem:[%s5405_s1 + $0xa0] sm:$0xff] (!%p159_p3)   ;;  %v4851_v12 = vld [vmem:[%s5405_s1 + $0xa8] sm:$0xff] (!%p159_p3)  }
   0xa   : > { %v4276_v13 = vld [vmem:[%s5405_s1 + $0x30] sm:$0xff] (!%p159_p3)   ;;  %v4278_v15 = vld [vmem:[%s5405_s1 + $0x38] sm:$0xff] (!%p159_p3)   ;;  %v4280_v17 = vld [vmem:[%s5405_s1 + $0x40] sm:$0xff] (!%p159_p3)  }
   0xb   : > { %v4864_v14 = vld [vmem:[%s5405_s1 + $0xb0] sm:$0xff] (!%p159_p3)   ;;  %v4876_v16 = vld [vmem:[%s5405_s1 + $0xb8] sm:$0xff] (!%p159_p3)   ;;  %v4892_v18 = vld [vmem:[%s5405_s1 + $0xc0] sm:$0xff] (!%p159_p3)  }
   0xc   : > { %1898 = vmatpush1.bf16.msra.mxu1 (!%p159_p3), %v4266_v3  ;;  %2187 = vmatpush1.bf16.msra.mxu0 (!%p159_p3), %v4806_v4  ;;  %v4282_v20 = vld [vmem:[%s5405_s1 + $0x48] sm:$0xff] (!%p159_p3)   ;;  %v4284_v23 = vld [vmem:[%s5405_s1 + $0x50] sm:$0xff] (!%p159_p3)   ;;  %v4286_v25 = vld [vmem:[%s5405_s1 + $0x58] sm:$0xff] (!%p159_p3)  }
   0xd   : > { %1899 = vmatprep.subr.bf16.mxu1 (!%p159_p3), %v4752_v1  ;;  %2188 = vmatprep.subr.bf16.mxu0 (!%p159_p3), %v4752_v1  ;;  %v4905_v22 = vld [vmem:[%s5405_s1 + $0xc8] sm:$0xff] (!%p159_p3)   ;;  %v4916_v24 = vld [vmem:[%s5405_s1 + $0xd0] sm:$0xff] (!%p159_p3)   ;;  %v4927_v26 = vld [vmem:[%s5405_s1 + $0xd8] sm:$0xff] (!%p159_p3)  }
   0xe   : > { %s5412_s5 = smov (!%p198_p4, %s3449_s5), 575  ;;  %v4288_v27 = vld [vmem:[%s5405_s1 + $0x60] sm:$0xff]   ;;  %v4290_v29 = vld [vmem:[%s5405_s1 + $0x68] sm:$0xff]   ;;  %v4292_v31 = vld [vmem:[%s5405_s1 + $0x70] sm:$0xff]  }
   0xf   : > { %s4238_s19 = smul.u32 24, %s5412_s5  ;;  %v4938_v28 = vld [vmem:[%s5405_s1 + $0xe0] sm:$0xff]   ;;  %v4949_v30 = vld [vmem:[%s5405_s1 + $0xe8] sm:$0xff]   ;;  %v4960_v32 = vld [vmem:[%s5405_s1 + $0xf0] sm:$0xff]  }
  0x10   : > { %1900 = vmatpush1.bf16.msra.mxu1 %v4268_v5  ;;  %2189 = vmatpush1.bf16.msra.mxu0 %v4817_v6  ;;  %v4294_v33 = vld [vmem:[%s5405_s1 + $0x78] sm:$0xff]   ;;  %v4302_v37 = vld [vmem:[%s5405_s1 + $0x100] sm:$0xff]   ;;  %v4309_v40 = vld [vmem:[%s5405_s1 + $0x108] sm:$0xff]  }
  0x11   : > { %1901 = vmatprep.subr.bf16.mxu1 %v4752_v1  ;;  %2190 = vmatprep.subr.bf16.mxu0 %v4752_v1  ;;  %s4885_s26 = scalar_lea.vmem %s5404_s0, %s4238_s19  ;;  %v4971_v34 = vld [vmem:[%s5405_s1 + $0xf8] sm:$0xff]   ;;  %v4316_v45 = vld [vmem:[%s5405_s1 + $0x110] sm:$0xff]   ;;  %v4330_v51 = vld [vmem:[%s5405_s1 + $0x120] sm:$0xff]   ;;  %s3452_s19 = sshll.u32 %s5412_s5, 2 }
  0x12   : > { %v4298_v19 = vld [vmem:[%s4885_s26 + $0x4] ss:$24 sps:$4 sm:$0xff]   ;;  %v4296_v35 = vld [vmem:[%s4885_s26] ss:$24 sps:$4 sm:$0xff]   ;;  %v4303_v38 = vld [vmem:[%s4885_s26 + $0x34] ss:$24 sps:$4 sm:$0xff]   ;;  %s5323_s22 = scalar_lea.vmem %s5406_s2, %s3452_s19 }
  0x13   : > { %v4301_v21 = vld [vmem:[%s4885_s26 + $0xc] ss:$24 sps:$4 sm:$0xff]   ;;  %1927 = vmatprep.mubr.bf16.mxu1 %v4298_v19  ;;  %v4299_v36 = vld [vmem:[%s4885_s26 + $0x8] ss:$24 sps:$4 sm:$0xff]   ;;  %v4305_v39 = vld [vmem:[%s4885_s26 + $0x3c] ss:$24 sps:$4 sm:$0xff]  }
  0x14   : > { %1902 = vmatpush1.bf16.msra.mxu1 %v4270_v7  ;;  %2191 = vmatpush1.bf16.msra.mxu0 %v4828_v8  ;;  %v4307_v41 = vld [vmem:[%s4885_s26 + $0x30] ss:$24 sps:$4 sm:$0xff]   ;;  %v4310_v43 = vld [vmem:[%s4885_s26 + $0x64] ss:$24 sps:$4 sm:$0xff]   ;;  %v4314_v47 = vld [vmem:[%s4885_s26 + $0x60] ss:$24 sps:$4 sm:$0xff]  }
  0x15   : > { %1903 = vmatprep.subr.bf16.mxu1 %v4752_v1  ;;  %2192 = vmatprep.subr.bf16.mxu0 %v4752_v1  ;;  %v4308_v42 = vld [vmem:[%s4885_s26 + $0x38] ss:$24 sps:$4 sm:$0xff]   ;;  %v4312_v44 = vld [vmem:[%s4885_s26 + $0x6c] ss:$24 sps:$4 sm:$0xff]   ;;  %v4315_v48 = vld [vmem:[%s4885_s26 + $0x68] ss:$24 sps:$4 sm:$0xff]  }
  0x16   : > { %2216 = vmatprep.mubr.bf16.mxu0 %v4301_v21  ;;  %v4323_v46 = vld [vmem:[%s5405_s1 + $0x118] sm:$0xff]   ;;  %v4317_v49 = vld [vmem:[%s4885_s26 + $0x94] ss:$24 sps:$4 sm:$0xff]   ;;  %v4321_v53 = vld [vmem:[%s4885_s26 + $0x90] ss:$24 sps:$4 sm:$0xff]  }
  0x17   : > { %v4319_v50 = vld [vmem:[%s4885_s26 + $0x9c] ss:$24 sps:$4 sm:$0xff]   ;;  %v4337_v52 = vld [vmem:[%s5405_s1 + $0x128] sm:$0xff]   ;;  %v4322_v54 = vld [vmem:[%s4885_s26 + $0x98] ss:$24 sps:$4 sm:$0xff]  }
  0x18   : > { %1904 = vmatpush1.bf16.msra.mxu1 %v4272_v9  ;;  %2193 = vmatpush1.bf16.msra.mxu0 %v4839_v10  ;;  %v4324_v55 = vld [vmem:[%s4885_s26 + $0xc4] ss:$24 sps:$4 sm:$0xff]   ;;  %v4344_v57 = vld [vmem:[%s5405_s1 + $0x130] sm:$0xff]   ;;  %v4328_v59 = vld [vmem:[%s4885_s26 + $0xc0] ss:$24 sps:$4 sm:$0xff]  }
  0x19   : > { %1905 = vmatprep.subr.bf16.mxu1 %v4752_v1  ;;  %2194 = vmatprep.subr.bf16.mxu0 %v4752_v1  ;;  %v4326_v56 = vld [vmem:[%s4885_s26 + $0xcc] ss:$24 sps:$4 sm:$0xff]   ;;  %v4351_v58 = vld [vmem:[%s5405_s1 + $0x138] sm:$0xff]   ;;  %v4329_v60 = vld [vmem:[%s4885_s26 + $0xc8] ss:$24 sps:$4 sm:$0xff]  }
  0x1a   : > { %v4331_v61 = vld [vmem:[%s4885_s26 + $0xf4] ss:$24 sps:$4 sm:$0xff]   ;;  %v4358_v63 = vld [vmem:[%s5405_s1 + $0x140] sm:$0xff]   ;;  %v4336_v3 = vld [vmem:[%s4885_s26 + $0xf8] ss:$24 sps:$4 sm:$0xff]  }
  0x1b   : > { %v4333_v62 = vld [vmem:[%s4885_s26 + $0xfc] ss:$24 sps:$4 sm:$0xff]   ;;  %v4365_v0 = vld [vmem:[%s5405_s1 + $0x148] sm:$0xff]   ;;  %v4342_v7 = vld [vmem:[%s4885_s26 + $0x120] ss:$24 sps:$4 sm:$0xff]  }
  0x1c   : > { %1906 = vmatpush1.bf16.msra.mxu1 %v4274_v11  ;;  %2195 = vmatpush1.bf16.msra.mxu0 %v4851_v12  ;;  %v4340_v5 = vld [vmem:[%s4885_s26 + $0x12c] ss:$24 sps:$4 sm:$0xff]   ;;  %v4343_v9 = vld [vmem:[%s4885_s26 + $0x128] ss:$24 sps:$4 sm:$0xff]   ;;  %v4347_v11 = vld [vmem:[%s4885_s26 + $0x15c] ss:$24 sps:$4 sm:$0xff]  }
  0x1d   : > { %1907 = vmatprep.subr.bf16.mxu1 %v4752_v1  ;;  %2196 = vmatprep.subr.bf16.mxu0 %v4752_v1  ;;  %v4356_v19 = vld [vmem:[%s4885_s26 + $0x180] ss:$24 sps:$4 sm:$0xff]  }
  0x1e   : > { %v4357_v21 = vld [vmem:[%s4885_s26 + $0x188] ss:$24 sps:$4 sm:$0xff]  }
  0x20   : > { %1908 = vmatpush1.bf16.msra.mxu1 %v4276_v13  ;;  %2197 = vmatpush1.bf16.msra.mxu0 %v4864_v14  ;;  %v4349_v13 = vld [vmem:[%s4885_s26 + $0x150] ss:$24 sps:$4 sm:$0xff]  }
  0x21   : > { %1909 = vmatprep.subr.bf16.mxu1 %v4752_v1  ;;  %2198 = vmatprep.subr.bf16.mxu0 %v4752_v1 }
  0x24   : > { %1910 = vmatpush1.bf16.msra.mxu1 %v4278_v15  ;;  %2199 = vmatpush1.bf16.msra.mxu0 %v4876_v16  ;;  %v4350_v15 = vld [vmem:[%s4885_s26 + $0x158] ss:$24 sps:$4 sm:$0xff]  }
  0x25   : > { %1911 = vmatprep.subr.bf16.mxu1 %v4752_v1  ;;  %2200 = vmatprep.subr.bf16.mxu0 %v4752_v1 }
  0x28   : > { %1912 = vmatpush1.bf16.msra.mxu1 %v4280_v17  ;;  %2201 = vmatpush1.bf16.msra.mxu0 %v4892_v18  ;;  %v4354_v17 = vld [vmem:[%s4885_s26 + $0x18c] ss:$24 sps:$4 sm:$0xff]  }
  0x29   : > { %1913 = vmatprep.subr.bf16.mxu1 %v4752_v1  ;;  %2202 = vmatprep.subr.bf16.mxu0 %v4752_v1 }
  0x2c   : > { %1914 = vmatpush1.bf16.msra.mxu1 %v4282_v20  ;;  %2203 = vmatpush1.bf16.msra.mxu0 %v4905_v22  ;;  %v4407_v20 = vld [vmem:[%s5405_s1 + $0x178] sm:$0xff]  }
  0x2d   : > { %1915 = vmatprep.subr.bf16.mxu1 %v4752_v1  ;;  %2204 = vmatprep.subr.bf16.mxu0 %v4752_v1 }
  0x30   : > { %1916 = vmatpush1.bf16.msra.mxu1 %v4284_v23  ;;  %2205 = vmatpush1.bf16.msra.mxu0 %v4916_v24  ;;  %v4361_v23 = vld [vmem:[%s4885_s26 + $0x1bc] ss:$24 sps:$4 sm:$0xff]  }
  0x31   : > { %1917 = vmatprep.subr.bf16.mxu1 %v4752_v1  ;;  %2206 = vmatprep.subr.bf16.mxu0 %v4752_v1 }
  0x34   : > { %1918 = vmatpush1.bf16.msra.mxu1 %v4286_v25  ;;  %2207 = vmatpush1.bf16.msra.mxu0 %v4927_v26  ;;  %v4364_v25 = vld [vmem:[%s4885_s26 + $0x1b8] ss:$24 sps:$4 sm:$0xff]  }
  0x35   : > { %1919 = vmatprep.subr.bf16.mxu1 %v4752_v1  ;;  %2208 = vmatprep.subr.bf16.mxu0 %v4752_v1 }
  0x38   : > { %1920 = vmatpush1.bf16.msra.mxu1 %v4288_v27  ;;  %2209 = vmatpush1.bf16.msra.mxu0 %v4938_v28  ;;  %v4368_v27 = vld [vmem:[%s4885_s26 + $0x1ec] ss:$24 sps:$4 sm:$0xff]  }
  0x39   : > { %1921 = vmatprep.subr.bf16.mxu1 %v4752_v1  ;;  %2210 = vmatprep.subr.bf16.mxu0 %v4752_v1 }
  0x3c   : > { %1922 = vmatpush1.bf16.msra.mxu1 %v4290_v29  ;;  %2211 = vmatpush1.bf16.msra.mxu0 %v4949_v30  ;;  %v4373_v29 = vld [vmem:[%s4885_s26 + $0x214] ss:$24 sps:$4 sm:$0xff]  }
  0x3d   : > { %1923 = vmatprep.subr.bf16.mxu1 %v4752_v1  ;;  %2212 = vmatprep.subr.bf16.mxu0 %v4752_v1 }
  0x40   : > { %1924 = vmatpush1.bf16.msra.mxu1 %v4292_v31  ;;  %2213 = vmatpush1.bf16.msra.mxu0 %v4960_v32  ;;  %v4377_v31 = vld [vmem:[%s4885_s26 + $0x210] ss:$24 sps:$4 sm:$0xff]  }
  0x41   : > { %1925 = vmatprep.subr.bf16.mxu1 %v4752_v1  ;;  %2214 = vmatprep.subr.bf16.mxu0 %v4752_v1 }
  0x44   : > { %1926 = vmatpush1.bf16.msra.mxu1 %v4294_v33  ;;  %2215 = vmatpush1.bf16.msra.mxu0 %v4971_v34  ;;  %v4380_v33 = vld [vmem:[%s4885_s26 + $0x244] ss:$24 sps:$4 sm:$0xff]  }
  0x45   : > { %4014 = vmatprep.subr.bf16.mxu1 %v4752_v1  ;;  %2473 = vmatprep.subr.bf16.mxu0 %v4752_v1 }
  0x47   : > { %1928 = vmatmul.mubr.bf16.vlgmr.msra.gmra.mrb[0].mxu1 %v4296_v35  ;;  %2217 = vmatmul.mubr.bf16.vlgmr.msra.gmra.mrb[0].mxu0 %v4299_v36  ;;  %v4384_v35 = vld [vmem:[%s4885_s26 + $0x240] ss:$24 sps:$4 sm:$0xff]  }
  0x48   : > { %4030 = vmatpush1.bf16.msra.mxu1 %v4796_v2  ;;  %2474 = vmatpush1.bf16.msra.mxu0 %v4302_v37  ;;  %v4335_v2 = vld [vmem:[%s4885_s26 + $0xf0] ss:$24 sps:$4 sm:$0xff]   ;;  %v4387_v37 = vld [vmem:[%s4885_s26 + $0x274] ss:$24 sps:$4 sm:$0xff]  }
  0x49   : > { %1935 = vmatprep.mubr.bf16.mxu1 %v4303_v38  ;;  %2224 = vmatprep.mubr.bf16.mxu0 %v4305_v39  ;;  %v4385_v36 = vld [vmem:[%s4885_s26 + $0x248] ss:$24 sps:$4 sm:$0xff]   ;;  %v4389_v38 = vld [vmem:[%s4885_s26 + $0x27c] ss:$24 sps:$4 sm:$0xff]  }
  0x4a   : > { %2475 = vmatprep.subr.bf16.mxu0 %v4752_v1  ;;  %4015 = vmatprep.subr.bf16.mxu1 %v4752_v1  ;;  %v4391_v39 = vld [vmem:[%s4885_s26 + $0x270] ss:$24 sps:$4 sm:$0xff]  }
  0x4c   : > { %4031 = vmatpush1.bf16.msra.mxu1 %v4806_v4  ;;  %2476 = vmatpush1.bf16.msra.mxu0 %v4309_v40  ;;  %v4338_v4 = vld [vmem:[%s4885_s26 + $0x124] ss:$24 sps:$4 sm:$0xff]   ;;  %v4392_v40 = vld [vmem:[%s4885_s26 + $0x278] ss:$24 sps:$4 sm:$0xff]  }
  0x4d   : > { %4016 = vmatprep.subr.bf16.mxu1 %v4752_v1  ;;  %2477 = vmatprep.subr.bf16.mxu0 %v4752_v1 }
  0x4f   : > { %1936 = vmatmul.mubr.bf16.gmra.mrb[4].mxu1 %v4307_v41  ;;  %2225 = vmatmul.mubr.bf16.gmra.mrb[4].mxu0 %v4308_v42  ;;  %v4394_v41 = vld [vmem:[%s4885_s26 + $0x2a4] ss:$24 sps:$4 sm:$0xff]  }
  0x50   : > { %1943 = vmatprep.mubr.bf16.mxu1 %v4310_v43  ;;  %2232 = vmatprep.mubr.bf16.mxu0 %v4312_v44  ;;  %v4396_v42 = vld [vmem:[%s4885_s26 + $0x2ac] ss:$24 sps:$4 sm:$0xff]   ;;  %v4398_v43 = vld [vmem:[%s4885_s26 + $0x2a0] ss:$24 sps:$4 sm:$0xff]  }
  0x51   : > { %2478 = vmatpush1.bf16.msra.mxu0 %v4316_v45  ;;  %4032 = vmatpush1.bf16.msra.mxu1 %v4817_v6  ;;  %v4372_v6 = vld [vmem:[%s5405_s1 + $0x150] sm:$0xff]   ;;  %v4399_v44 = vld [vmem:[%s4885_s26 + $0x2a8] ss:$24 sps:$4 sm:$0xff]  }
  0x52   : > { %2479 = vmatprep.subr.bf16.mxu0 %v4752_v1  ;;  %4017 = vmatprep.subr.bf16.mxu1 %v4752_v1  ;;  %v4401_v45 = vld [vmem:[%s4885_s26 + $0x2d4] ss:$24 sps:$4 sm:$0xff]  }
  0x55   : > { %2480 = vmatpush1.bf16.msra.mxu0 %v4323_v46  ;;  %4033 = vmatpush1.bf16.msra.mxu1 %v4828_v8  ;;  %v4379_v8 = vld [vmem:[%s5405_s1 + $0x158] sm:$0xff]  }
  0x56   : > { %2481 = vmatprep.subr.bf16.mxu0 %v4752_v1  ;;  %4018 = vmatprep.subr.bf16.mxu1 %v4752_v1  ;;  %v4403_v46 = vld [vmem:[%s4885_s26 + $0x2dc] ss:$24 sps:$4 sm:$0xff]  }
  0x57   : > { %1944 = vmatmul.mubr.bf16.gmra.mrb[8].mxu1 %v4314_v47  ;;  %2233 = vmatmul.mubr.bf16.gmra.mrb[8].mxu0 %v4315_v48  ;;  %v4405_v47 = vld [vmem:[%s4885_s26 + $0x2d0] ss:$24 sps:$4 sm:$0xff]  }
  0x58   : > { %1951 = vmatprep.mubr.bf16.mxu1 %v4317_v49  ;;  %2240 = vmatprep.mubr.bf16.mxu0 %v4319_v50  ;;  %v4406_v48 = vld [vmem:[%s4885_s26 + $0x2d8] ss:$24 sps:$4 sm:$0xff]   ;;  %v4408_v49 = vld [vmem:[%s4885_s26 + $0x304] ss:$24 sps:$4 sm:$0xff]   ;;  %v4412_v50 = vld [vmem:[%s4885_s26 + $0x14] ss:$24 sps:$4 sm:$0xff]  }
  0x59   : > { %2482 = vmatpush1.bf16.msra.mxu0 %v4330_v51  ;;  %4034 = vmatpush1.bf16.msra.mxu1 %v4839_v10  ;;  %v4345_v10 = vld [vmem:[%s4885_s26 + $0x154] ss:$24 sps:$4 sm:$0xff]   ;;  %v4413_v51 = vld [vmem:[%s4885_s26 + $0x300] ss:$24 sps:$4 sm:$0xff]  }
  0x5a   : > { %2483 = vmatprep.subr.bf16.mxu0 %v4752_v1  ;;  %4019 = vmatprep.subr.bf16.mxu1 %v4752_v1 }
  0x5d   : > { %2484 = vmatpush1.bf16.msra.mxu0 %v4337_v52  ;;  %4035 = vmatpush1.bf16.msra.mxu1 %v4851_v12  ;;  %v4386_v12 = vld [vmem:[%s5405_s1 + $0x160] sm:$0xff]   ;;  %v4410_v52 = vld [vmem:[%s4885_s26 + $0x10] ss:$24 sps:$4 sm:$0xff]  }
  0x5e   : > { %2485 = vmatprep.subr.bf16.mxu0 %v4752_v1  ;;  %4020 = vmatprep.subr.bf16.mxu1 %v4752_v1 }
  0x5f   : > { %1952 = vmatmul.mubr.bf16.gmra.mrb[12].mxu1 %v4321_v53  ;;  %2241 = vmatmul.mubr.bf16.gmra.mrb[12].mxu0 %v4322_v54  ;;  %v4414_v53 = vld [vmem:[%s4885_s26 + $0x334] ss:$24 sps:$4 sm:$0xff]   ;;  %v4416_v54 = vld [vmem:[%s4885_s26 + $0x44] ss:$24 sps:$4 sm:$0xff]  }
  0x60   : > { %1959 = vmatprep.mubr.bf16.mxu1 %v4324_v55  ;;  %2248 = vmatprep.mubr.bf16.mxu0 %v4326_v56  ;;  %v4418_v55 = vld [vmem:[%s4885_s26 + $0x330] ss:$24 sps:$4 sm:$0xff]   ;;  %v4419_v56 = vld [vmem:[%s4885_s26 + $0x40] ss:$24 sps:$4 sm:$0xff]  }
  0x61   : > { %2486 = vmatpush1.bf16.msra.mxu0 %v4344_v57  ;;  %4036 = vmatpush1.bf16.msra.mxu1 %v4864_v14  ;;  %v4393_v14 = vld [vmem:[%s5405_s1 + $0x168] sm:$0xff]   ;;  %v4420_v57 = vld [vmem:[%s4885_s26 + $0x364] ss:$24 sps:$4 sm:$0xff]  }
  0x62   : > { %2487 = vmatprep.subr.bf16.mxu0 %v4752_v1  ;;  %4021 = vmatprep.subr.bf16.mxu1 %v4752_v1 }
  0x65   : > { %2488 = vmatpush1.bf16.msra.mxu0 %v4351_v58  ;;  %4037 = vmatpush1.bf16.msra.mxu1 %v4876_v16  ;;  %v4352_v16 = vld [vmem:[%s4885_s26 + $0x184] ss:$24 sps:$4 sm:$0xff]   ;;  %v4422_v58 = vld [vmem:[%s4885_s26 + $0x74] ss:$24 sps:$4 sm:$0xff]  }
  0x66   : > { %2489 = vmatprep.subr.bf16.mxu0 %v4752_v1  ;;  %4022 = vmatprep.subr.bf16.mxu1 %v4752_v1 }
  0x67   : > { %1960 = vmatmul.mubr.bf16.gmra.mrb[16].mxu1 %v4328_v59  ;;  %2249 = vmatmul.mubr.bf16.gmra.mrb[16].mxu0 %v4329_v60  ;;  %v4424_v59 = vld [vmem:[%s4885_s26 + $0x360] ss:$24 sps:$4 sm:$0xff]   ;;  %v4425_v60 = vld [vmem:[%s4885_s26 + $0x70] ss:$24 sps:$4 sm:$0xff]  }
  0x68   : > { %1967 = vmatprep.mubr.bf16.mxu1 %v4331_v61  ;;  %2256 = vmatprep.mubr.bf16.mxu0 %v4333_v62  ;;  %v4426_v61 = vld [vmem:[%s4885_s26 + $0x394] ss:$24 sps:$4 sm:$0xff]   ;;  %v4428_v62 = vld [vmem:[%s4885_s26 + $0xa4] ss:$24 sps:$4 sm:$0xff]  }
  0x69   : > { %2490 = vmatpush1.bf16.msra.mxu0 %v4358_v63  ;;  %4038 = vmatpush1.bf16.msra.mxu1 %v4892_v18  ;;  %v4400_v18 = vld [vmem:[%s5405_s1 + $0x170] sm:$0xff]  }
  0x6a   : > { %2491 = vmatprep.subr.bf16.mxu0 %v4752_v1  ;;  %4023 = vmatprep.subr.bf16.mxu1 %v4752_v1  ;;  %v4430_v63 = vld [vmem:[%s4885_s26 + $0x390] ss:$24 sps:$4 sm:$0xff]  }
  0x6d   : > { %2492 = vmatpush1.bf16.msra.mxu0 %v4365_v0  ;;  %4039 = vmatpush1.bf16.msra.mxu1 %v4905_v22  ;;  %v4359_v22 = vld [vmem:[%s4885_s26 + $0x1b4] ss:$24 sps:$4 sm:$0xff]   ;;  %v4431_v0 = vld [vmem:[%s4885_s26 + $0xa0] ss:$24 sps:$4 sm:$0xff]  }
  0x6e   : > { %2493 = vmatprep.subr.bf16.mxu0 %v4752_v1  ;;  %4024 = vmatprep.subr.bf16.mxu1 %v4752_v1 }
  0x6f   : > { %1968 = vmatmul.mubr.bf16.gmra.mrb[20].mxu1 %v4335_v2  ;;  %2257 = vmatmul.mubr.bf16.gmra.mrb[20].mxu0 %v4336_v3  ;;  %v4432_v2 = vld [vmem:[%s4885_s26 + $0x3c4] ss:$24 sps:$4 sm:$0xff]   ;;  %v4434_v3 = vld [vmem:[%s4885_s26 + $0xd4] ss:$24 sps:$4 sm:$0xff]  }
  0x70   : > { %1975 = vmatprep.mubr.bf16.mxu1 %v4338_v4  ;;  %2264 = vmatprep.mubr.bf16.mxu0 %v4340_v5  ;;  %v4436_v4 = vld [vmem:[%s4885_s26 + $0x3c0] ss:$24 sps:$4 sm:$0xff]   ;;  %v4437_v5 = vld [vmem:[%s4885_s26 + $0xd0] ss:$24 sps:$4 sm:$0xff]  }
  0x71   : > { %2494 = vmatpush1.bf16.msra.mxu0 %v4372_v6  ;;  %4040 = vmatpush1.bf16.msra.mxu1 %v4916_v24  ;;  %v4363_v24 = vld [vmem:[%s4885_s26 + $0x1b0] ss:$24 sps:$4 sm:$0xff]   ;;  %v4438_v6 = vld [vmem:[%s4885_s26 + $0x3f4] ss:$24 sps:$4 sm:$0xff]  }
  0x72   : > { %2495 = vmatprep.subr.bf16.mxu0 %v4752_v1  ;;  %4025 = vmatprep.subr.bf16.mxu1 %v4752_v1 }
  0x75   : > { %2496 = vmatpush1.bf16.msra.mxu0 %v4379_v8  ;;  %4041 = vmatpush1.bf16.msra.mxu1 %v4927_v26  ;;  %v4366_v26 = vld [vmem:[%s4885_s26 + $0x1e4] ss:$24 sps:$4 sm:$0xff]   ;;  %v4442_v8 = vld [vmem:[%s4885_s26 + $0x3f0] ss:$24 sps:$4 sm:$0xff]  }
  0x76   : > { %2497 = vmatprep.subr.bf16.mxu0 %v4752_v1  ;;  %4026 = vmatprep.subr.bf16.mxu1 %v4752_v1 }
  0x77   : > { %1976 = vmatmul.mubr.bf16.gmra.mrb[24].mxu1 %v4342_v7  ;;  %2265 = vmatmul.mubr.bf16.gmra.mrb[24].mxu0 %v4343_v9  ;;  %v4440_v7 = vld [vmem:[%s4885_s26 + $0x104] ss:$24 sps:$4 sm:$0xff]   ;;  %v4443_v9 = vld [vmem:[%s4885_s26 + $0x100] ss:$24 sps:$4 sm:$0xff]  }
  0x78   : > { %1983 = vmatprep.mubr.bf16.mxu1 %v4345_v10  ;;  %2272 = vmatprep.mubr.bf16.mxu0 %v4347_v11  ;;  %v4444_v10 = vld [vmem:[%s4885_s26 + $0x424] ss:$24 sps:$4 sm:$0xff]   ;;  %v4446_v11 = vld [vmem:[%s4885_s26 + $0x134] ss:$24 sps:$4 sm:$0xff]  }
  0x79   : > { %2498 = vmatpush1.bf16.msra.mxu0 %v4386_v12  ;;  %4042 = vmatpush1.bf16.msra.mxu1 %v4938_v28  ;;  %v4371_v28 = vld [vmem:[%s4885_s26 + $0x1e8] ss:$24 sps:$4 sm:$0xff]  }
  0x7a   : > { %2499 = vmatprep.subr.bf16.mxu0 %v4752_v1  ;;  %4027 = vmatprep.subr.bf16.mxu1 %v4752_v1  ;;  %v4448_v12 = vld [vmem:[%s4885_s26 + $0x420] ss:$24 sps:$4 sm:$0xff]  }
  0x7d   : > { %2500 = vmatpush1.bf16.msra.mxu0 %v4393_v14  ;;  %4043 = vmatpush1.bf16.msra.mxu1 %v4949_v30  ;;  %v4375_v30 = vld [vmem:[%s4885_s26 + $0x21c] ss:$24 sps:$4 sm:$0xff]  }
  0x7e   : > { %2501 = vmatprep.subr.bf16.mxu0 %v4752_v1  ;;  %4028 = vmatprep.subr.bf16.mxu1 %v4752_v1  ;;  %v4450_v14 = vld [vmem:[%s4885_s26 + $0x454] ss:$24 sps:$4 sm:$0xff]  }
  0x7f   : > { %1984 = vmatmul.mubr.bf16.gmra.mrb[28].mxu1 %v4349_v13  ;;  %2273 = vmatmul.mubr.bf16.gmra.mrb[28].mxu0 %v4350_v15  ;;  %v4449_v13 = vld [vmem:[%s4885_s26 + $0x130] ss:$24 sps:$4 sm:$0xff]   ;;  %v4452_v15 = vld [vmem:[%s4885_s26 + $0x164] ss:$24 sps:$4 sm:$0xff]  }
  0x80   : > { %1991 = vmatprep.mubr.bf16.mxu1 %v4352_v16  ;;  %2280 = vmatprep.mubr.bf16.mxu0 %v4354_v17  ;;  %v4454_v16 = vld [vmem:[%s4885_s26 + $0x450] ss:$24 sps:$4 sm:$0xff]   ;;  %v4455_v17 = vld [vmem:[%s4885_s26 + $0x160] ss:$24 sps:$4 sm:$0xff]  }
  0x81   : > { %2502 = vmatpush1.bf16.msra.mxu0 %v4400_v18  ;;  %4044 = vmatpush1.bf16.msra.mxu1 %v4960_v32  ;;  %v4378_v32 = vld [vmem:[%s4885_s26 + $0x218] ss:$24 sps:$4 sm:$0xff]   ;;  %v4456_v18 = vld [vmem:[%s4885_s26 + $0x484] ss:$24 sps:$4 sm:$0xff]  }
  0x82   : > { %2503 = vmatprep.subr.bf16.mxu0 %v4752_v1  ;;  %4029 = vmatprep.subr.bf16.mxu1 %v4752_v1  ;;  %v4370_v1 = vld [vmem:[%s4885_s26 + $0x1e0] ss:$24 sps:$4 sm:$0xff]  }
  0x85   : > { %2504 = vmatpush1.bf16.msra.mxu0 %v4407_v20  ;;  %4045 = vmatpush1.bf16.msra.mxu1 %v4971_v34  ;;  %v4382_v34 = vld [vmem:[%s4885_s26 + $0x24c] ss:$24 sps:$4 sm:$0xff]   ;;  %v4460_v20 = vld [vmem:[%s4885_s26 + $0x480] ss:$24 sps:$4 sm:$0xff]  }
  0x87   : > { %1992 = vmatmul.mubr.bf16.gmra.mrb[32].mxu1 %v4356_v19  ;;  %2281 = vmatmul.mubr.bf16.gmra.mrb[32].mxu0 %v4357_v21  ;;  %v4458_v19 = vld [vmem:[%s4885_s26 + $0x194] ss:$24 sps:$4 sm:$0xff]   ;;  %v4461_v21 = vld [vmem:[%s4885_s26 + $0x190] ss:$24 sps:$4 sm:$0xff]  }
  0x88   : > { %1999 = vmatprep.mubr.bf16.mxu1 %v4359_v22  ;;  %2288 = vmatprep.mubr.bf16.mxu0 %v4361_v23  ;;  %v4462_v22 = vld [vmem:[%s4885_s26 + $0x4b4] ss:$24 sps:$4 sm:$0xff]   ;;  %v4464_v23 = vld [vmem:[%s4885_s26 + $0x1c4] ss:$24 sps:$4 sm:$0xff]  }
  0x8f   : > { %2000 = vmatmul.mubr.bf16.gmra.mrb[36].mxu1 %v4363_v24  ;;  %2289 = vmatmul.mubr.bf16.gmra.mrb[36].mxu0 %v4364_v25  ;;  %v4466_v24 = vld [vmem:[%s4885_s26 + $0x4b0] ss:$24 sps:$4 sm:$0xff]   ;;  %v4467_v25 = vld [vmem:[%s4885_s26 + $0x1c0] ss:$24 sps:$4 sm:$0xff]  }
  0x90   : > { %2007 = vmatprep.mubr.bf16.mxu1 %v4366_v26  ;;  %2296 = vmatprep.mubr.bf16.mxu0 %v4368_v27  ;;  %v4468_v26 = vld [vmem:[%s4885_s26 + $0x4e4] ss:$24 sps:$4 sm:$0xff]   ;;  %v4470_v27 = vld [vmem:[%s4885_s26 + $0x1f4] ss:$24 sps:$4 sm:$0xff]  }
  0x97   : > { %2008 = vmatmul.mubr.bf16.gmra.mrb[40].mxu1 %v4370_v1  ;;  %2297 = vmatmul.mubr.bf16.gmra.mrb[40].mxu0 %v4371_v28  ;;  %v4472_v1 = vld [vmem:[%s4885_s26 + $0x4e0] ss:$24 sps:$4 sm:$0xff]   ;;  %v4473_v28 = vld [vmem:[%s4885_s26 + $0x1f0] ss:$24 sps:$4 sm:$0xff]  }
  0x98   : > { %2015 = vmatprep.mubr.bf16.mxu1 %v4373_v29  ;;  %2304 = vmatprep.mubr.bf16.mxu0 %v4375_v30  ;;  %v4474_v29 = vld [vmem:[%s4885_s26 + $0x514] ss:$24 sps:$4 sm:$0xff]   ;;  %v4476_v30 = vld [vmem:[%s4885_s26 + $0x224] ss:$24 sps:$4 sm:$0xff]  }
  0x9f   : > { %2016 = vmatmul.mubr.bf16.gmra.mrb[44].mxu1 %v4377_v31  ;;  %2305 = vmatmul.mubr.bf16.gmra.mrb[44].mxu0 %v4378_v32 }
  0xa0   : > { %2023 = vmatprep.mubr.bf16.mxu1 %v4380_v33  ;;  %2312 = vmatprep.mubr.bf16.mxu0 %v4382_v34  ;;  %v4478_v33 = vld [vmem:[%s4885_s26 + $0x510] ss:$24 sps:$4 sm:$0xff]  }
  0xa7   : > { %2024 = vmatmul.mubr.bf16.gmra.mrb[48].mxu1 %v4384_v35  ;;  %2313 = vmatmul.mubr.bf16.gmra.mrb[48].mxu0 %v4385_v36  ;;  %v4479_v35 = vld [vmem:[%s4885_s26 + $0x220] ss:$24 sps:$4 sm:$0xff]   ;;  %v4480_v36 = vld [vmem:[%s4885_s26 + $0x544] ss:$24 sps:$4 sm:$0xff]  }
  0xa8   : > { %2031 = vmatprep.mubr.bf16.mxu1 %v4387_v37  ;;  %2320 = vmatprep.mubr.bf16.mxu0 %v4389_v38  ;;  %v4482_v38 = vld [vmem:[%s4885_s26 + $0x254] ss:$24 sps:$4 sm:$0xff]  }
  0xaf   : > { %2032 = vmatmul.mubr.bf16.gmra.mrb[52].mxu1 %v4391_v39  ;;  %2321 = vmatmul.mubr.bf16.gmra.mrb[52].mxu0 %v4392_v40 }
  0xb0   : > { %2039 = vmatprep.mubr.bf16.mxu1 %v4394_v41  ;;  %2328 = vmatprep.mubr.bf16.mxu0 %v4396_v42  ;;  %v4484_v41 = vld [vmem:[%s4885_s26 + $0x540] ss:$24 sps:$4 sm:$0xff]  }
  0xb7   : > { %2040 = vmatmul.mubr.bf16.gmra.mrb[56].mxu1 %v4398_v43  ;;  %2329 = vmatmul.mubr.bf16.gmra.mrb[56].mxu0 %v4399_v44  ;;  %v4485_v43 = vld [vmem:[%s4885_s26 + $0x250] ss:$24 sps:$4 sm:$0xff]   ;;  %v4486_v44 = vld [vmem:[%s4885_s26 + $0x574] ss:$24 sps:$4 sm:$0xff]  }
  0xb8   : > { %2047 = vmatprep.mubr.bf16.mxu1 %v4401_v45  ;;  %2336 = vmatprep.mubr.bf16.mxu0 %v4403_v46  ;;  %v4488_v46 = vld [vmem:[%s4885_s26 + $0x284] ss:$24 sps:$4 sm:$0xff]  }
  0xbf   : > { %2048 = vmatmul.mubr.bf16.gmra.mrb[60].mxu1 %v4405_v47  ;;  %2337 = vmatmul.mubr.bf16.gmra.mrb[60].mxu0 %v4406_v48 }
  0xc0   : > { %2055 = vmatprep.mubr.bf16.mxu1 %v4408_v49  ;;  %2505 = vmatprep.mubr.bf16.mxu0 %v4412_v50  ;;  %v4490_v49 = vld [vmem:[%s4885_s26 + $0x570] ss:$24 sps:$4 sm:$0xff]  }
  0xc7   : > { %2056 = vmatmul.mubr.bf16.gmra.mrb[64].mxu1 %v4413_v51  ;;  %2506 = vmatmul.mubr.bf16.vlgmr.msra.gmra.mrb[0].mxu0 %v4410_v52  ;;  %v4491_v51 = vld [vmem:[%s4885_s26 + $0x280] ss:$24 sps:$4 sm:$0xff]   ;;  %v4492_v52 = vld [vmem:[%s4885_s26 + $0x5a4] ss:$24 sps:$4 sm:$0xff]  }
  0xc8   : > { %2063 = vmatprep.mubr.bf16.mxu1 %v4414_v53  ;;  %2513 = vmatprep.mubr.bf16.mxu0 %v4416_v54  ;;  %v4494_v54 = vld [vmem:[%s4885_s26 + $0x2b4] ss:$24 sps:$4 sm:$0xff]  }
  0xcf   : > { %2064 = vmatmul.mubr.bf16.gmra.mrb[68].mxu1 %v4418_v55  ;;  %2514 = vmatmul.mubr.bf16.gmra.mrb[4].mxu0 %v4419_v56 }
  0xd0   : > { %2071 = vmatprep.mubr.bf16.mxu1 %v4420_v57  ;;  %2521 = vmatprep.mubr.bf16.mxu0 %v4422_v58  ;;  %v4496_v57 = vld [vmem:[%s4885_s26 + $0x5a0] ss:$24 sps:$4 sm:$0xff]  }
  0xd7   : > { %2072 = vmatmul.mubr.bf16.gmra.mrb[72].mxu1 %v4424_v59  ;;  %2522 = vmatmul.mubr.bf16.gmra.mrb[8].mxu0 %v4425_v60  ;;  %v4497_v59 = vld [vmem:[%s4885_s26 + $0x2b0] ss:$24 sps:$4 sm:$0xff]   ;;  %v4498_v60 = vld [vmem:[%s4885_s26 + $0x5d4] ss:$24 sps:$4 sm:$0xff]  }
  0xd8   : > { %2079 = vmatprep.mubr.bf16.mxu1 %v4426_v61  ;;  %2529 = vmatprep.mubr.bf16.mxu0 %v4428_v62  ;;  %v4500_v62 = vld [vmem:[%s4885_s26 + $0x2e4] ss:$24 sps:$4 sm:$0xff]  }
  0xdf   : > { %2080 = vmatmul.mubr.bf16.gmra.mrb[76].mxu1 %v4430_v63  ;;  %2530 = vmatmul.mubr.bf16.gmra.mrb[12].mxu0 %v4431_v0 }
  0xe0   : > { %2087 = vmatprep.mubr.bf16.mxu1 %v4432_v2  ;;  %2537 = vmatprep.mubr.bf16.mxu0 %v4434_v3  ;;  %v4502_v2 = vld [vmem:[%s4885_s26 + $0x5d0] ss:$24 sps:$4 sm:$0xff]  }
  0xe7   : > { %2088 = vmatmul.mubr.bf16.gmra.mrb[80].mxu1 %v4436_v4  ;;  %2538 = vmatmul.mubr.bf16.gmra.mrb[16].mxu0 %v4437_v5  ;;  %v4503_v4 = vld [vmem:[%s4885_s26 + $0x2e0] ss:$24 sps:$4 sm:$0xff]   ;;  %v4506_v5 = vld [vmem:[%s4885_s26 + $0x30c] ss:$24 sps:$4 sm:$0xff]  }
  0xe8   : > { %2095 = vmatprep.mubr.bf16.mxu1 %v4438_v6  ;;  %2545 = vmatprep.mubr.bf16.mxu0 %v4440_v7  ;;  %v4507_v7 = vld [vmem:[%s4885_s26 + $0x314] ss:$24 sps:$4 sm:$0xff]  }
  0xef   : > { %2096 = vmatmul.mubr.bf16.gmra.mrb[84].mxu1 %v4442_v8  ;;  %2546 = vmatmul.mubr.bf16.gmra.mrb[20].mxu0 %v4443_v9 }
  0xf0   : > { %2103 = vmatprep.mubr.bf16.mxu1 %v4444_v10  ;;  %2553 = vmatprep.mubr.bf16.mxu0 %v4446_v11  ;;  %v4504_v10 = vld [vmem:[%s4885_s26 + $0x308] ss:$24 sps:$4 sm:$0xff]  }
  0xf7   : > { %2104 = vmatmul.mubr.bf16.gmra.mrb[88].mxu1 %v4448_v12  ;;  %2554 = vmatmul.mubr.bf16.gmra.mrb[24].mxu0 %v4449_v13  ;;  %v4509_v12 = vld [vmem:[%s4885_s26 + $0x310] ss:$24 sps:$4 sm:$0xff]   ;;  %v4510_v13 = vld [vmem:[%s4885_s26 + $0x33c] ss:$24 sps:$4 sm:$0xff]  }
  0xf8   : > { %2111 = vmatprep.mubr.bf16.mxu1 %v4450_v14  ;;  %2561 = vmatprep.mubr.bf16.mxu0 %v4452_v15  ;;  %v4512_v15 = vld [vmem:[%s4885_s26 + $0x344] ss:$24 sps:$4 sm:$0xff]  }
  0xff   : > { %2112 = vmatmul.mubr.bf16.gmra.mrb[92].mxu1 %v4454_v16  ;;  %2562 = vmatmul.mubr.bf16.gmra.mrb[28].mxu0 %v4455_v17 }
 0x100   : > { %2119 = vmatprep.mubr.bf16.mxu1 %v4456_v18  ;;  %2569 = vmatprep.mubr.bf16.mxu0 %v4458_v19  ;;  %v4514_v18 = vld [vmem:[%s4885_s26 + $0x338] ss:$24 sps:$4 sm:$0xff]  }
 0x107   : > { %2120 = vmatmul.mubr.bf16.gmra.mrb[96].mxu1 %v4460_v20  ;;  %2570 = vmatmul.mubr.bf16.gmra.mrb[32].mxu0 %v4461_v21  ;;  %v4515_v20 = vld [vmem:[%s4885_s26 + $0x340] ss:$24 sps:$4 sm:$0xff]   ;;  %v4516_v21 = vld [vmem:[%s4885_s26 + $0x36c] ss:$24 sps:$4 sm:$0xff]  }
 0x108   : > { %2127 = vmatprep.mubr.bf16.mxu1 %v4462_v22  ;;  %2577 = vmatprep.mubr.bf16.mxu0 %v4464_v23  ;;  %v4518_v23 = vld [vmem:[%s4885_s26 + $0x374] ss:$24 sps:$4 sm:$0xff]  }
 0x10f   : > { %2128 = vmatmul.mubr.bf16.gmra.mrb[100].mxu1 %v4466_v24  ;;  %2578 = vmatmul.mubr.bf16.gmra.mrb[36].mxu0 %v4467_v25 }
 0x110   : > { %2135 = vmatprep.mubr.bf16.mxu1 %v4468_v26  ;;  %2585 = vmatprep.mubr.bf16.mxu0 %v4470_v27  ;;  %v4520_v26 = vld [vmem:[%s4885_s26 + $0x368] ss:$24 sps:$4 sm:$0xff]  }
 0x117   : > { %2136 = vmatmul.mubr.bf16.gmra.mrb[104].mxu1 %v4472_v1  ;;  %2586 = vmatmul.mubr.bf16.gmra.mrb[40].mxu0 %v4473_v28  ;;  %v4521_v1 = vld [vmem:[%s4885_s26 + $0x370] ss:$24 sps:$4 sm:$0xff]   ;;  %v4522_v28 = vld [vmem:[%s4885_s26 + $0x39c] ss:$24 sps:$4 sm:$0xff]  }
 0x118   : > { %2143 = vmatprep.mubr.bf16.mxu1 %v4474_v29  ;;  %2593 = vmatprep.mubr.bf16.mxu0 %v4476_v30  ;;  %v4524_v30 = vld [vmem:[%s4885_s26 + $0x3a4] ss:$24 sps:$4 sm:$0xff]  }
 0x11a   : > { %v5179_v31 = vpop.f32.mrb[0].mxu1 }
 0x11b   : > { %v1931_v32 = vpop.f32.mrb[1].mxu1 }
 0x11c   : > { %v5182_v34 = vpop.f32.mrb[2].mxu1 }
 0x11d   : > { %v1934_v37 = vpop.f32.mrb[3].mxu1 }
 0x11e   : > { %v4527_v37 = vld [vmem:[%s4885_s26 + $0x3a0] ss:$24 sps:$4 sm:$0xff]  }
 0x11f   : > { %2144 = vmatmul.mubr.bf16.gmra.mrb[108].mxu1 %v4478_v33  ;;  %2594 = vmatmul.mubr.bf16.gmra.mrb[44].mxu0 %v4479_v35  ;;  %v4526_v35 = vld [vmem:[%s4885_s26 + $0x398] ss:$24 sps:$4 sm:$0xff]  }
 0x120   : > { %2151 = vmatprep.mubr.bf16.mxu1 %v4480_v36  ;;  %2601 = vmatprep.mubr.bf16.mxu0 %v4482_v38  ;;  %v4528_v38 = vld [vmem:[%s4885_s26 + $0x3cc] ss:$24 sps:$4 sm:$0xff]  }
 0x122   : > { %v5187_v39 = vpop.f32.mrb[4].mxu1 }
 0x123   : > { %v1939_v40 = vpop.f32.mrb[5].mxu1 }
 0x124   : > { %v5190_v42 = vpop.f32.mrb[6].mxu1 }
 0x125   : > { %v1942_v45 = vpop.f32.mrb[7].mxu1 }
 0x126   : > { %v4532_v45 = vld [vmem:[%s4885_s26 + $0x3c8] ss:$24 sps:$4 sm:$0xff]  }
 0x127   : > { %2152 = vmatmul.mubr.bf16.gmra.mrb[112].mxu1 %v4484_v41  ;;  %2602 = vmatmul.mubr.bf16.gmra.mrb[48].mxu0 %v4485_v43  ;;  %v4530_v41 = vld [vmem:[%s4885_s26 + $0x3d4] ss:$24 sps:$4 sm:$0xff]  }
 0x128   : > { %2159 = vmatprep.mubr.bf16.mxu1 %v4486_v44  ;;  %2609 = vmatprep.mubr.bf16.mxu0 %v4488_v46 }
 0x12a   : > { %v5195_v47 = vpop.f32.mrb[8].mxu1 }
 0x12b   : > { %v1947_v48 = vpop.f32.mrb[9].mxu1 }
 0x12c   : > { %v5198_v50 = vpop.f32.mrb[10].mxu1  ;;  %v4533_v48 = vld [vmem:[%s4885_s26 + $0x3d0] ss:$24 sps:$4 sm:$0xff]  }
 0x12d   : > { %v1950_v53 = vpop.f32.mrb[11].mxu1 }
 0x12f   : > { %2160 = vmatmul.mubr.bf16.gmra.mrb[116].mxu1 %v4490_v49  ;;  %2610 = vmatmul.mubr.bf16.gmra.mrb[52].mxu0 %v4491_v51  ;;  %v4534_v49 = vld [vmem:[%s4885_s26 + $0x3fc] ss:$24 sps:$4 sm:$0xff]  }
 0x130   : > { %2167 = vmatprep.mubr.bf16.mxu1 %v4492_v52  ;;  %2617 = vmatprep.mubr.bf16.mxu0 %v4494_v54  ;;  %v4536_v52 = vld [vmem:[%s4885_s26 + $0x404] ss:$24 sps:$4 sm:$0xff]  }
 0x132   : > { %v5203_v55 = vpop.f32.mrb[12].mxu1 }
 0x133   : > { %v1955_v56 = vpop.f32.mrb[13].mxu1 }
 0x134   : > { %v5206_v58 = vpop.f32.mrb[14].mxu1  ;;  %v4538_v56 = vld [vmem:[%s4885_s26 + $0x3f8] ss:$24 sps:$4 sm:$0xff]  }
 0x135   : > { %v1958_v61 = vpop.f32.mrb[15].mxu1 }
 0x137   : > { %2168 = vmatmul.mubr.bf16.gmra.mrb[120].mxu1 %v4496_v57  ;;  %2618 = vmatmul.mubr.bf16.gmra.mrb[56].mxu0 %v4497_v59  ;;  %v4539_v59 = vld [vmem:[%s4885_s26 + $0x400] ss:$24 sps:$4 sm:$0xff]  }
 0x138   : > { %2175 = vmatprep.mubr.bf16.mxu1 %v4498_v60  ;;  %2625 = vmatprep.mubr.bf16.mxu0 %v4500_v62  ;;  %v4540_v60 = vld [vmem:[%s4885_s26 + $0x42c] ss:$24 sps:$4 sm:$0xff]  }
 0x139   : > { %v4542_v62 = vld [vmem:[%s4885_s26 + $0x434] ss:$24 sps:$4 sm:$0xff]  }
 0x13a   : > { %v5211_v63 = vpop.f32.mrb[16].mxu1 }
 0x13b   : > { %v1963_v0 = vpop.f32.mrb[17].mxu1 }
 0x13c   : > { %v5214_v3 = vpop.f32.mrb[18].mxu1 }
 0x13d   : > { %v1966_v6 = vpop.f32.mrb[19].mxu1 }
 0x13e   : > { %v4545_v6 = vld [vmem:[%s4885_s26 + $0x430] ss:$24 sps:$4 sm:$0xff]  }
 0x13f   : > { %2176 = vmatmul.mubr.bf16.gmra.mrb[124].mxu1 %v4502_v2  ;;  %2626 = vmatmul.mubr.bf16.gmra.mrb[60].mxu0 %v4503_v4  ;;  %v4544_v4 = vld [vmem:[%s4885_s26 + $0x428] ss:$24 sps:$4 sm:$0xff]  }
 0x140   : > { %2344 = vmatprep.mubr.bf16.mxu1 %v4506_v5  ;;  %2633 = vmatprep.mubr.bf16.mxu0 %v4507_v7  ;;  %v4546_v7 = vld [vmem:[%s4885_s26 + $0x45c] ss:$24 sps:$4 sm:$0xff]  }
 0x142   : > { %v5219_v8 = vpop.f32.mrb[20].mxu1 }
 0x143   : > { %v1971_v9 = vpop.f32.mrb[21].mxu1 }
 0x144   : > { %v5222_v11 = vpop.f32.mrb[22].mxu1 }
 0x145   : > { %v1974_v14 = vpop.f32.mrb[23].mxu1 }
 0x146   : > { %v4550_v14 = vld [vmem:[%s4885_s26 + $0x458] ss:$24 sps:$4 sm:$0xff]  }
 0x147   : > { %2345 = vmatmul.mubr.bf16.vlgmr.msra.gmra.mrb[64].mxu1 %v4504_v10  ;;  %2634 = vmatmul.mubr.bf16.gmra.mrb[64].mxu0 %v4509_v12  ;;  %v4548_v10 = vld [vmem:[%s4885_s26 + $0x464] ss:$24 sps:$4 sm:$0xff]  }
 0x148   : > { %2352 = vmatprep.mubr.bf16.mxu1 %v4510_v13  ;;  %2641 = vmatprep.mubr.bf16.mxu0 %v4512_v15 }
 0x14a   : > { %v5227_v16 = vpop.f32.mrb[24].mxu1 }
 0x14b   : > { %v1979_v17 = vpop.f32.mrb[25].mxu1 }
 0x14c   : > { %v5230_v19 = vpop.f32.mrb[26].mxu1  ;;  %v4551_v17 = vld [vmem:[%s4885_s26 + $0x460] ss:$24 sps:$4 sm:$0xff]  }
 0x14d   : > { %v1982_v22 = vpop.f32.mrb[27].mxu1 }
 0x14f   : > { %2353 = vmatmul.mubr.bf16.gmra.mrb[68].mxu1 %v4514_v18  ;;  %2642 = vmatmul.mubr.bf16.gmra.mrb[68].mxu0 %v4515_v20  ;;  %v4552_v18 = vld [vmem:[%s4885_s26 + $0x48c] ss:$24 sps:$4 sm:$0xff]  }
 0x150   : > { %2360 = vmatprep.mubr.bf16.mxu1 %v4516_v21  ;;  %2649 = vmatprep.mubr.bf16.mxu0 %v4518_v23  ;;  %v4554_v21 = vld [vmem:[%s4885_s26 + $0x494] ss:$24 sps:$4 sm:$0xff]  }
 0x152   : > { %v5235_v24 = vpop.f32.mrb[28].mxu1 }
 0x153   : > { %v1987_v25 = vpop.f32.mrb[29].mxu1 }
 0x154   : > { %v5238_v27 = vpop.f32.mrb[30].mxu1  ;;  %v4556_v25 = vld [vmem:[%s4885_s26 + $0x488] ss:$24 sps:$4 sm:$0xff]  }
 0x155   : > { %v1990_v29 = vpop.f32.mrb[31].mxu1 }
 0x157   : > { %2361 = vmatmul.mubr.bf16.gmra.mrb[72].mxu1 %v4520_v26  ;;  %2650 = vmatmul.mubr.bf16.gmra.mrb[72].mxu0 %v4521_v1  ;;  %v4557_v1 = vld [vmem:[%s4885_s26 + $0x490] ss:$24 sps:$4 sm:$0xff]  }
 0x158   : > { %2368 = vmatprep.mubr.bf16.mxu1 %v4522_v28  ;;  %2657 = vmatprep.mubr.bf16.mxu0 %v4524_v30  ;;  %v4558_v28 = vld [vmem:[%s4885_s26 + $0x4bc] ss:$24 sps:$4 sm:$0xff]  }
 0x159   : > { %v4560_v30 = vld [vmem:[%s4885_s26 + $0x4c4] ss:$24 sps:$4 sm:$0xff]  }
 0x15a   : > { %v5243_v32 = vpop.f32.mrb[32].mxu1 }
 0x15b   : > { %v1995_v33 = vpop.f32.mrb[33].mxu1 }
 0x15c   : > { %v5246_v36 = vpop.f32.mrb[34].mxu1 }
 0x15d   : > { %v1998_v40 = vpop.f32.mrb[35].mxu1 }
 0x15e   : > { %v4563_v40 = vld [vmem:[%s4885_s26 + $0x4c0] ss:$24 sps:$4 sm:$0xff]  }
 0x15f   : > { %2369 = vmatmul.mubr.bf16.gmra.mrb[76].mxu1 %v4526_v35  ;;  %2658 = vmatmul.mubr.bf16.gmra.mrb[76].mxu0 %v4527_v37  ;;  %v4562_v37 = vld [vmem:[%s4885_s26 + $0x4b8] ss:$24 sps:$4 sm:$0xff]  }
 0x160   : > { %2376 = vmatprep.mubr.bf16.mxu1 %v4528_v38  ;;  %2665 = vmatprep.mubr.bf16.mxu0 %v4530_v41  ;;  %v4564_v41 = vld [vmem:[%s4885_s26 + $0x4ec] ss:$24 sps:$4 sm:$0xff]  }
 0x162   : > { %v5251_v43 = vpop.f32.mrb[36].mxu1 }
 0x163   : > { %v2003_v44 = vpop.f32.mrb[37].mxu1 }
 0x164   : > { %v5254_v46 = vpop.f32.mrb[38].mxu1 }
 0x165   : > { %v2006_v51 = vpop.f32.mrb[39].mxu1 }
 0x166   : > { %v4568_v51 = vld [vmem:[%s4885_s26 + $0x4e8] ss:$24 sps:$4 sm:$0xff]  }
 0x167   : > { %2377 = vmatmul.mubr.bf16.gmra.mrb[80].mxu1 %v4532_v45  ;;  %2666 = vmatmul.mubr.bf16.gmra.mrb[80].mxu0 %v4533_v48  ;;  %v4566_v45 = vld [vmem:[%s4885_s26 + $0x4f4] ss:$24 sps:$4 sm:$0xff]  }
 0x168   : > { %2384 = vmatprep.mubr.bf16.mxu1 %v4534_v49  ;;  %2673 = vmatprep.mubr.bf16.mxu0 %v4536_v52 }
 0x16a   : > { %v5259_v53 = vpop.f32.mrb[40].mxu1 }
 0x16b   : > { %v2011_v54 = vpop.f32.mrb[41].mxu1 }
 0x16c   : > { %v5262_v57 = vpop.f32.mrb[42].mxu1  ;;  %v4569_v54 = vld [vmem:[%s4885_s26 + $0x4f0] ss:$24 sps:$4 sm:$0xff]  }
 0x16d   : > { %v2014_v61 = vpop.f32.mrb[43].mxu1 }
 0x16f   : > { %2385 = vmatmul.mubr.bf16.gmra.mrb[84].mxu1 %v4538_v56  ;;  %2674 = vmatmul.mubr.bf16.gmra.mrb[84].mxu0 %v4539_v59  ;;  %v4570_v56 = vld [vmem:[%s4885_s26 + $0x51c] ss:$24 sps:$4 sm:$0xff]  }
 0x170   : > { %2392 = vmatprep.mubr.bf16.mxu1 %v4540_v60  ;;  %2681 = vmatprep.mubr.bf16.mxu0 %v4542_v62  ;;  %v4572_v60 = vld [vmem:[%s4885_s26 + $0x524] ss:$24 sps:$4 sm:$0xff]   ;;  %v4574_v62 = vld [vmem:[%s4885_s26 + $0x518] ss:$24 sps:$4 sm:$0xff]  }
 0x172   : > { %v5267_v0 = vpop.f32.mrb[44].mxu1 }
 0x173   : > { %v2019_v2 = vpop.f32.mrb[45].mxu1 }
 0x174   : > { %v5270_v5 = vpop.f32.mrb[46].mxu1 }
 0x175   : > { %v2022_v9 = vpop.f32.mrb[47].mxu1 }
 0x177   : > { %2393 = vmatmul.mubr.bf16.gmra.mrb[88].mxu1 %v4544_v4  ;;  %2682 = vmatmul.mubr.bf16.gmra.mrb[88].mxu0 %v4545_v6  ;;  %v4575_v6 = vld [vmem:[%s4885_s26 + $0x520] ss:$24 sps:$4 sm:$0xff]  }
 0x178   : > { %2400 = vmatprep.mubr.bf16.mxu1 %v4546_v7  ;;  %2689 = vmatprep.mubr.bf16.mxu0 %v4548_v10  ;;  %v4576_v7 = vld [vmem:[%s4885_s26 + $0x54c] ss:$24 sps:$4 sm:$0xff]  }
 0x179   : > { %v4578_v10 = vld [vmem:[%s4885_s26 + $0x554] ss:$24 sps:$4 sm:$0xff]  }
 0x17a   : > { %v5275_v12 = vpop.f32.mrb[48].mxu1 }
 0x17b   : > { %v2027_v13 = vpop.f32.mrb[49].mxu1 }
 0x17c   : > { %v5278_v15 = vpop.f32.mrb[50].mxu1 }
 0x17d   : > { %v2030_v20 = vpop.f32.mrb[51].mxu1 }
 0x17f   : > { %2401 = vmatmul.mubr.bf16.gmra.mrb[92].mxu1 %v4550_v14  ;;  %2690 = vmatmul.mubr.bf16.gmra.mrb[92].mxu0 %v4551_v17 }
 0x180   : > { %2408 = vmatprep.mubr.bf16.mxu1 %v4552_v18  ;;  %2697 = vmatprep.mubr.bf16.mxu0 %v4554_v21  ;;  %v4581_v21 = vld [vmem:[%s4885_s26 + $0x550] ss:$24 sps:$4 sm:$0xff]  }
 0x182   : > { %v5283_v22 = vpop.f32.mrb[52].mxu1 }
 0x183   : > { %v2035_v23 = vpop.f32.mrb[53].mxu1 }
 0x184   : > { %v5286_v26 = vpop.f32.mrb[54].mxu1  ;;  %v4582_v23 = vld [vmem:[%s4885_s26 + $0x57c] ss:$24 sps:$4 sm:$0xff]  }
 0x185   : > { %v2038_v29 = vpop.f32.mrb[55].mxu1 }
 0x187   : > { %2409 = vmatmul.mubr.bf16.gmra.mrb[96].mxu1 %v4556_v25  ;;  %2698 = vmatmul.mubr.bf16.gmra.mrb[96].mxu0 %v4557_v1  ;;  %v4584_v1 = vld [vmem:[%s4885_s26 + $0x584] ss:$24 sps:$4 sm:$0xff]  }
 0x188   : > { %2416 = vmatprep.mubr.bf16.mxu1 %v4558_v28  ;;  %2705 = vmatprep.mubr.bf16.mxu0 %v4560_v30 }
 0x18a   : > { %v5291_v33 = vpop.f32.mrb[56].mxu1 }
 0x18b   : > { %v2043_v35 = vpop.f32.mrb[57].mxu1 }
 0x18c   : > { %v5294_v38 = vpop.f32.mrb[58].mxu1  ;;  %v4586_v35 = vld [vmem:[%s4885_s26 + $0x578] ss:$24 sps:$4 sm:$0xff]  }
 0x18d   : > { %v2046_v44 = vpop.f32.mrb[59].mxu1 }
 0x18e   : > { %v4588_v44 = vld [vmem:[%s4885_s26 + $0x5ac] ss:$24 sps:$4 sm:$0xff]  }
 0x18f   : > { %2417 = vmatmul.mubr.bf16.gmra.mrb[100].mxu1 %v4562_v37  ;;  %2706 = vmatmul.mubr.bf16.gmra.mrb[100].mxu0 %v4563_v40 }
 0x190   : > { %2424 = vmatprep.mubr.bf16.mxu1 %v4564_v41  ;;  %2713 = vmatprep.mubr.bf16.mxu0 %v4566_v45  ;;  %v4587_v41 = vld [vmem:[%s4885_s26 + $0x580] ss:$24 sps:$4 sm:$0xff]  }
 0x192   : > { %v5299_v48 = vpop.f32.mrb[60].mxu1 }
 0x193   : > { %v2051_v49 = vpop.f32.mrb[61].mxu1 }
 0x194   : > { %v5302_v52 = vpop.f32.mrb[62].mxu1  ;;  %v4590_v49 = vld [vmem:[%s4885_s26 + $0x5b4] ss:$24 sps:$4 sm:$0xff]  }
 0x195   : > { %v2054_v59 = vpop.f32.mrb[63].mxu1 }
 0x197   : > { %2425 = vmatmul.mubr.bf16.gmra.mrb[104].mxu1 %v4568_v51  ;;  %2714 = vmatmul.mubr.bf16.gmra.mrb[104].mxu0 %v4569_v54 }
 0x198   : > { %2432 = vmatprep.mubr.bf16.mxu1 %v4570_v56  ;;  %2721 = vmatprep.mubr.bf16.mxu0 %v4572_v60 }
 0x19a   : > { %v2507_v61 = vpop.f32.mrb[0].mxu0 }
 0x19b   : > { %v4046_v2 = vadd.f32 %v2507_v61, %v5179_v31  ;;  %v2509_v4 = vpop.f32.mrb[1].mxu0  ;;  %v4580_v31 = vld [vmem:[%s4885_s26 + $0x548] ss:$24 sps:$4 sm:$0xff]  }
 0x19c   : > { %v2510_v9 = vpop.f32.mrb[2].mxu0  ;;  %v4592_v61 = vld [vmem:[%s4885_s26 + $0x5a8] ss:$24 sps:$4 sm:$0xff]  }
 0x19d   : > { %v4047_v13 = vadd.f32 %v2510_v9, %v5182_v34  ;;  %v2512_v14 = vpop.f32.mrb[3].mxu0  ;;  %4600 = vtanh.f32 %v4046_v2  ;;  %v4593_v4 = vld [vmem:[%s4885_s26 + $0x5b0] ss:$24 sps:$4 sm:$0xff]  }
 0x19f   : > { %2433 = vmatmul.mubr.bf16.gmra.mrb[108].mxu1 %v4574_v62  ;;  %4602 = vtanh.f32 %v4047_v13  ;;  %2722 = vmatmul.mubr.bf16.gmra.mrb[108].mxu0 %v4575_v6 }
 0x1a0   : > { %2440 = vmatprep.mubr.bf16.mxu1 %v4576_v7  ;;  %2729 = vmatprep.mubr.bf16.mxu0 %v4578_v10  ;;  %v4596_v7 = vld [vmem:[%s4885_s26 + $0x5e4] ss:$24 sps:$4 sm:$0xff]  }
 0x1a2   : > { %v2515_v17 = vpop.f32.mrb[4].mxu0 }
 0x1a3   : > { %v4048_v18 = vadd.f32 %v2515_v17, %v5187_v39  ;;  %v2517_v20 = vpop.f32.mrb[5].mxu0 }
 0x1a4   : > { %v2518_v25 = vpop.f32.mrb[6].mxu0 }
 0x1a5   : > { %v4049_v34 = vadd.f32 %v2518_v25, %v5190_v42  ;;  %v2520_v28 = vpop.f32.mrb[7].mxu0  ;;  %4604 = vtanh.f32 %v4048_v18 }
 0x1a7   : > { %2441 = vmatmul.mubr.bf16.gmra.mrb[112].mxu1 %v4580_v31  ;;  %4606 = vtanh.f32 %v4049_v34  ;;  %2730 = vmatmul.mubr.bf16.gmra.mrb[112].mxu0 %v4581_v21  ;;  %v4601_v29 = vpop.eup %4600  ;;  %v4598_v31 = vld [vmem:[%s4885_s26 + $0x5d8] ss:$24 sps:$4 sm:$0xff]  }
 0x1a8   : > { %2448 = vmatprep.mubr.bf16.mxu1 %v4582_v23  ;;  %2737 = vmatprep.mubr.bf16.mxu0 %v4584_v1  ;;  %v4599_v21 = vld [vmem:[%s4885_s26 + $0x5e0] ss:$24 sps:$4 sm:$0xff]  }
 0x1a9   : > { %v4603_v39 = vpop.eup %4602 }
 0x1aa   : > { %v3826_v42 = vpack.c.bf16 %v4603_v39, %v4601_v29  ;;  %v2523_v30 = vpop.f32.mrb[8].mxu0 }
 0x1ab   : > { %v4050_v37 = vadd.f32 %v2523_v30, %v5195_v47  ;;  %v2525_v40 = vpop.f32.mrb[9].mxu0 }
 0x1ac   : > { %3827 = vst [vmem:[%s5323_s22] sm:$0xff] %v3826_v42   ;;  %v2526_v45 = vpop.f32.mrb[10].mxu0 }
 0x1ad   : > { %v4051_v51 = vadd.f32 %v2526_v45, %v5198_v50  ;;  %v2528_v54 = vpop.f32.mrb[11].mxu0  ;;  %4608 = vtanh.f32 %v4050_v37  ;;  %v4594_v50 = vld [vmem:[%s4885_s26 + $0x5dc] ss:$24 sps:$4 sm:$0xff]  }
 0x1af   : > { %2449 = vmatmul.mubr.bf16.gmra.mrb[116].mxu1 %v4586_v35  ;;  %4610 = vtanh.f32 %v4051_v51  ;;  %2738 = vmatmul.mubr.bf16.gmra.mrb[116].mxu0 %v4587_v41  ;;  %v4605_v47 = vpop.eup %4604 }
 0x1b0   : > { %2456 = vmatprep.mubr.bf16.mxu1 %v4588_v44  ;;  %2745 = vmatprep.mubr.bf16.mxu0 %v4590_v49 }
 0x1b1   : > { %v4607_v56 = vpop.eup %4606 }
 0x1b2   : > { %v3831_v59 = vpack.c.bf16 %v4607_v56, %v4605_v47  ;;  %v2531_v60 = vpop.f32.mrb[12].mxu0 }
 0x1b3   : > { %v4052_v62 = vadd.f32 %v2531_v60, %v5203_v55  ;;  %v2533_v2 = vpop.f32.mrb[13].mxu0 }
 0x1b4   : > { %3983 = vst [vmem:[%s5323_s22 + $0x8] sm:$0xff] %v3831_v59   ;;  %v2534_v6 = vpop.f32.mrb[14].mxu0 }
 0x1b5   : > { %v4053_v9 = vadd.f32 %v2534_v6, %v5206_v58  ;;  %v2536_v10 = vpop.f32.mrb[15].mxu0  ;;  %4612 = vtanh.f32 %v4052_v62 }
 0x1b7   : > { %2457 = vmatmul.mubr.bf16.gmra.mrb[120].mxu1 %v4592_v61  ;;  %4614 = vtanh.f32 %v4053_v9  ;;  %2746 = vmatmul.mubr.bf16.gmra.mrb[120].mxu0 %v4593_v4  ;;  %v4609_v13 = vpop.eup %4608 }
 0x1b8   : > { %2464 = vmatprep.mubr.bf16.mxu1 %v4594_v50  ;;  %2753 = vmatprep.mubr.bf16.mxu0 %v4596_v7 }
 0x1b9   : > { %v4611_v55 = vpop.eup %4610 }
 0x1ba   : > { %v3836_v14 = vpack.c.bf16 %v4611_v55, %v4609_v13  ;;  %v2539_v17 = vpop.f32.mrb[16].mxu0 }
 0x1bb   : > { %v4054_v18 = vadd.f32 %v2539_v17, %v5211_v63  ;;  %v2541_v20 = vpop.f32.mrb[17].mxu0 }
 0x1bc   : > { %3984 = vst [vmem:[%s5323_s22 + $0x10] sm:$0xff] %v3836_v14   ;;  %v2542_v58 = vpop.f32.mrb[18].mxu0 }
 0x1bd   : > { %v4055_v23 = vadd.f32 %v2542_v58, %v5214_v3  ;;  %v2544_v25 = vpop.f32.mrb[19].mxu0  ;;  %4616 = vtanh.f32 %v4054_v18 }
 0x1bf   : > { %2465 = vmatmul.mubr.bf16.gmra.mrb[124].mxu1 %v4598_v31  ;;  %4618 = vtanh.f32 %v4055_v23  ;;  %2754 = vmatmul.mubr.bf16.gmra.mrb[124].mxu0 %v4599_v21  ;;  %v4613_v1 = vpop.eup %4612 }
 0x1c1   : > { %v4615_v34 = vpop.eup %4614 }
 0x1c2   : > { %v3841_v28 = vpack.c.bf16 %v4615_v34, %v4613_v1  ;;  %v2547_v29 = vpop.f32.mrb[20].mxu0 }
 0x1c3   : > { %v4056_v39 = vadd.f32 %v2547_v29, %v5219_v8  ;;  %v2549_v63 = vpop.f32.mrb[21].mxu0 }
 0x1c4   : > { %3985 = vst [vmem:[%s5323_s22 + $0x18] sm:$0xff] %v3841_v28   ;;  %v2550_v42 = vpop.f32.mrb[22].mxu0 }
 0x1c5   : > { %v4057_v30 = vadd.f32 %v2550_v42, %v5222_v11  ;;  %v2552_v35 = vpop.f32.mrb[23].mxu0  ;;  %4620 = vtanh.f32 %v4056_v39 }
 0x1c7   : > { %4622 = vtanh.f32 %v4057_v30  ;;  %v4617_v3 = vpop.eup %4616 }
 0x1c9   : > { %v4619_v37 = vpop.eup %4618 }
 0x1ca   : > { %v3846_v40 = vpack.c.bf16 %v4619_v37, %v4617_v3  ;;  %v2555_v41 = vpop.f32.mrb[24].mxu0 }
 0x1cb   : > { %v4058_v44 = vadd.f32 %v2555_v41, %v5227_v16  ;;  %v2557_v45 = vpop.f32.mrb[25].mxu0 }
 0x1cc   : > { %3986 = vst [vmem:[%s5323_s22 + $0x20] sm:$0xff] %v3846_v40   ;;  %v2558_v49 = vpop.f32.mrb[26].mxu0 }
 0x1cd   : > { %v4059_v8 = vadd.f32 %v2558_v49, %v5230_v19  ;;  %v2560_v51 = vpop.f32.mrb[27].mxu0  ;;  %4624 = vtanh.f32 %v4058_v44 }
 0x1cf   : > { %4626 = vtanh.f32 %v4059_v8  ;;  %v4621_v54 = vpop.eup %4620 }
 0x1d1   : > { %v4623_v11 = vpop.eup %4622 }
 0x1d2   : > { %v3851_v47 = vpack.c.bf16 %v4623_v11, %v4621_v54  ;;  %v2563_v56 = vpop.f32.mrb[28].mxu0 }
 0x1d3   : > { %v4060_v59 = vadd.f32 %v2563_v56, %v5235_v24  ;;  %v2565_v60 = vpop.f32.mrb[29].mxu0 }
 0x1d4   : > { %3987 = vst [vmem:[%s5323_s22 + $0x28] sm:$0xff] %v3851_v47   ;;  %v2566_v61 = vpop.f32.mrb[30].mxu0 }
 0x1d5   : > { %v4061_v16 = vadd.f32 %v2566_v61, %v5238_v27  ;;  %v2568_v62 = vpop.f32.mrb[31].mxu0  ;;  %4628 = vtanh.f32 %v4060_v59 }
 0x1d7   : > { %4630 = vtanh.f32 %v4061_v16  ;;  %v4625_v2 = vpop.eup %4624 }
 0x1d9   : > { %v4627_v19 = vpop.eup %4626 }
 0x1da   : > { %v3856_v4 = vpack.c.bf16 %v4627_v19, %v4625_v2  ;;  %v2571_v50 = vpop.f32.mrb[32].mxu0 }
 0x1db   : > { %v4062_v6 = vadd.f32 %v2571_v50, %v5243_v32  ;;  %v2573_v7 = vpop.f32.mrb[33].mxu0 }
 0x1dc   : > { %3988 = vst [vmem:[%s5323_s22 + $0x30] sm:$0xff] %v3856_v4   ;;  %v2574_v9 = vpop.f32.mrb[34].mxu0 }
 0x1dd   : > { %v4063_v24 = vadd.f32 %v2574_v9, %v5246_v36  ;;  %v2576_v10 = vpop.f32.mrb[35].mxu0  ;;  %4632 = vtanh.f32 %v4062_v6 }
 0x1df   : > { %4634 = vtanh.f32 %v4063_v24  ;;  %v4629_v13 = vpop.eup %4628 }
 0x1e1   : > { %v4631_v27 = vpop.eup %4630 }
 0x1e2   : > { %v3861_v55 = vpack.c.bf16 %v4631_v27, %v4629_v13  ;;  %v2579_v14 = vpop.f32.mrb[36].mxu0 }
 0x1e3   : > { %v4064_v17 = vadd.f32 %v2579_v14, %v5251_v43  ;;  %v2581_v31 = vpop.f32.mrb[37].mxu0 }
 0x1e4   : > { %3989 = vst [vmem:[%s5323_s22 + $0x38] sm:$0xff] %v3861_v55   ;;  %v2582_v18 = vpop.f32.mrb[38].mxu0 }
 0x1e5   : > { %v4065_v32 = vadd.f32 %v2582_v18, %v5254_v46  ;;  %v2584_v20 = vpop.f32.mrb[39].mxu0  ;;  %4636 = vtanh.f32 %v4064_v17 }
 0x1e7   : > { %4638 = vtanh.f32 %v4065_v32  ;;  %v4633_v21 = vpop.eup %4632 }
 0x1e9   : > { %v4635_v36 = vpop.eup %4634 }
 0x1ea   : > { %v3866_v58 = vpack.c.bf16 %v4635_v36, %v4633_v21  ;;  %v2587_v23 = vpop.f32.mrb[40].mxu0 }
 0x1eb   : > { %v4066_v25 = vadd.f32 %v2587_v23, %v5259_v53  ;;  %v2589_v1 = vpop.f32.mrb[41].mxu0 }
 0x1ec   : > { %3990 = vst [vmem:[%s5323_s22 + $0x40] sm:$0xff] %v3866_v58   ;;  %v2590_v34 = vpop.f32.mrb[42].mxu0 }
 0x1ed   : > { %v4067_v43 = vadd.f32 %v2590_v34, %v5262_v57  ;;  %v2592_v28 = vpop.f32.mrb[43].mxu0  ;;  %4640 = vtanh.f32 %v4066_v25 }
 0x1ef   : > { %4642 = vtanh.f32 %v4067_v43  ;;  %v4637_v29 = vpop.eup %4636 }
 0x1f1   : > { %v4639_v46 = vpop.eup %4638 }
 0x1f2   : > { %v3871_v39 = vpack.c.bf16 %v4639_v46, %v4637_v29  ;;  %v2595_v63 = vpop.f32.mrb[44].mxu0 }
 0x1f3   : > { %v4068_v42 = vadd.f32 %v2595_v63, %v5267_v0  ;;  %v2597_v30 = vpop.f32.mrb[45].mxu0 }
 0x1f4   : > { %3991 = vst [vmem:[%s5323_s22 + $0x48] sm:$0xff] %v3871_v39   ;;  %v2598_v35 = vpop.f32.mrb[46].mxu0 }
 0x1f5   : > { %v4069_v53 = vadd.f32 %v2598_v35, %v5270_v5  ;;  %v2600_v3 = vpop.f32.mrb[47].mxu0  ;;  %4644 = vtanh.f32 %v4068_v42 }
 0x1f7   : > { %4646 = vtanh.f32 %v4069_v53  ;;  %v4641_v37 = vpop.eup %4640 }
 0x1f9   : > { %v4643_v57 = vpop.eup %4642 }
 0x1fa   : > { %v3876_v40 = vpack.c.bf16 %v4643_v57, %v4641_v37  ;;  %v2603_v41 = vpop.f32.mrb[48].mxu0 }
 0x1fb   : > { %v4070_v44 = vadd.f32 %v2603_v41, %v5275_v12  ;;  %v2605_v45 = vpop.f32.mrb[49].mxu0 }
 0x1fc   : > { %3992 = vst [vmem:[%s5323_s22 + $0x50] sm:$0xff] %v3876_v40   ;;  %v2606_v49 = vpop.f32.mrb[50].mxu0 }
 0x1fd   : > { %v4071_v0 = vadd.f32 %v2606_v49, %v5278_v15  ;;  %v2608_v8 = vpop.f32.mrb[51].mxu0  ;;  %4648 = vtanh.f32 %v4070_v44 }
 0x1ff   : > { %4650 = vtanh.f32 %v4071_v0  ;;  %v4645_v51 = vpop.eup %4644 }
 0x201   : > { %v4647_v5 = vpop.eup %4646 }
 0x202   : > { %v3881_v54 = vpack.c.bf16 %v4647_v5, %v4645_v51  ;;  %v2611_v11 = vpop.f32.mrb[52].mxu0 }
 0x203   : > { %v4072_v47 = vadd.f32 %v2611_v11, %v5283_v22  ;;  %v2613_v56 = vpop.f32.mrb[53].mxu0 }
 0x204   : > { %3993 = vst [vmem:[%s5323_s22 + $0x58] sm:$0xff] %v3881_v54   ;;  %v2614_v59 = vpop.f32.mrb[54].mxu0 }
 0x205   : > { %v4073_v12 = vadd.f32 %v2614_v59, %v5286_v26  ;;  %v2616_v60 = vpop.f32.mrb[55].mxu0  ;;  %4652 = vtanh.f32 %v4072_v47 }
 0x207   : > { %4654 = vtanh.f32 %v4073_v12  ;;  %v4649_v61 = vpop.eup %4648 }
 0x209   : > { %v4651_v15 = vpop.eup %4650 }
 0x20a   : > { %v3886_v16 = vpack.c.bf16 %v4651_v15, %v4649_v61  ;;  %v2619_v62 = vpop.f32.mrb[56].mxu0 }
 0x20b   : > { %v4074_v2 = vadd.f32 %v2619_v62, %v5291_v33  ;;  %v2621_v19 = vpop.f32.mrb[57].mxu0 }
 0x20c   : > { %3994 = vst [vmem:[%s5323_s22 + $0x60] sm:$0xff] %v3886_v16   ;;  %v2622_v4 = vpop.f32.mrb[58].mxu0 }
 0x20d   : > { %v4075_v22 = vadd.f32 %v2622_v4, %v5294_v38  ;;  %v2624_v50 = vpop.f32.mrb[59].mxu0  ;;  %4656 = vtanh.f32 %v4074_v2 }
 0x20f   : > { %4658 = vtanh.f32 %v4075_v22  ;;  %v4653_v6 = vpop.eup %4652 }
 0x211   : > { %v4655_v26 = vpop.eup %4654 }
 0x212   : > { %v3891_v7 = vpack.c.bf16 %v4655_v26, %v4653_v6  ;;  %v2627_v9 = vpop.f32.mrb[60].mxu0 }
 0x213   : > { %v4076_v24 = vadd.f32 %v2627_v9, %v5299_v48  ;;  %v2629_v10 = vpop.f32.mrb[61].mxu0 }
 0x214   : > { %3995 = vst [vmem:[%s5323_s22 + $0x68] sm:$0xff] %v3891_v7   ;;  %v2630_v13 = vpop.f32.mrb[62].mxu0 }
 0x215   : > { %v4077_v33 = vadd.f32 %v2630_v13, %v5302_v52  ;;  %v2632_v27 = vpop.f32.mrb[63].mxu0  ;;  %4660 = vtanh.f32 %v4076_v24 }
 0x217   : > { %4662 = vtanh.f32 %v4077_v33  ;;  %v4657_v55 = vpop.eup %4656 }
 0x219   : > { %v4659_v38 = vpop.eup %4658 }
 0x21a   : > { %v2346_v14 = vpop.f32.mrb[64].mxu1  ;;  %v3896_v17 = vpack.c.bf16 %v4659_v38, %v4657_v55  ;;  %v2635_v31 = vpop.f32.mrb[64].mxu0 }
 0x21b   : > { %v2348_v18 = vpop.f32.mrb[65].mxu1  ;;  %v4078_v32 = vadd.f32 %v2635_v31, %v2346_v14  ;;  %v2637_v20 = vpop.f32.mrb[65].mxu0 }
 0x21c   : > { %v2349_v21 = vpop.f32.mrb[66].mxu1  ;;  %3996 = vst [vmem:[%s5323_s22 + $0x70] sm:$0xff] %v3896_v17   ;;  %v2638_v48 = vpop.f32.mrb[66].mxu0 }
 0x21d   : > { %v2351_v36 = vpop.f32.mrb[67].mxu1  ;;  %v4079_v58 = vadd.f32 %v2638_v48, %v2349_v21  ;;  %v2640_v23 = vpop.f32.mrb[67].mxu0  ;;  %4664 = vtanh.f32 %v4078_v32 }
 0x21f   : > { %4666 = vtanh.f32 %v4079_v58  ;;  %v4661_v52 = vpop.eup %4660 }
 0x221   : > { %v4663_v25 = vpop.eup %4662 }
 0x222   : > { %v2354_v1 = vpop.f32.mrb[68].mxu1  ;;  %v3901_v34 = vpack.c.bf16 %v4663_v25, %v4661_v52  ;;  %v2643_v43 = vpop.f32.mrb[68].mxu0 }
 0x223   : > { %v2356_v28 = vpop.f32.mrb[69].mxu1  ;;  %v4080_v29 = vadd.f32 %v2643_v43, %v2354_v1  ;;  %v2645_v46 = vpop.f32.mrb[69].mxu0 }
 0x224   : > { %v2357_v39 = vpop.f32.mrb[70].mxu1  ;;  %3997 = vst [vmem:[%s5323_s22 + $0x78] sm:$0xff] %v3901_v34   ;;  %v2646_v63 = vpop.f32.mrb[70].mxu0 }
 0x225   : > { %v2359_v42 = vpop.f32.mrb[71].mxu1  ;;  %v4081_v30 = vadd.f32 %v2646_v63, %v2357_v39  ;;  %v2648_v35 = vpop.f32.mrb[71].mxu0  ;;  %4668 = vtanh.f32 %v4080_v29 }
 0x227   : > { %4670 = vtanh.f32 %v4081_v30  ;;  %v4665_v53 = vpop.eup %4664 }
 0x229   : > { %v4667_v3 = vpop.eup %4666 }
 0x22a   : > { %v2362_v37 = vpop.f32.mrb[72].mxu1  ;;  %v3906_v57 = vpack.c.bf16 %v4667_v3, %v4665_v53  ;;  %v2651_v40 = vpop.f32.mrb[72].mxu0 }
 0x22b   : > { %v2364_v41 = vpop.f32.mrb[73].mxu1  ;;  %v4082_v44 = vadd.f32 %v2651_v40, %v2362_v37  ;;  %v2653_v45 = vpop.f32.mrb[73].mxu0 }
 0x22c   : > { %v2365_v49 = vpop.f32.mrb[74].mxu1  ;;  %3998 = vst [vmem:[%s5323_s22 + $0x80] sm:$0xff] %v3906_v57   ;;  %v2654_v0 = vpop.f32.mrb[74].mxu0 }
 0x22d   : > { %v2367_v8 = vpop.f32.mrb[75].mxu1  ;;  %v4083_v51 = vadd.f32 %v2654_v0, %v2365_v49  ;;  %v2656_v5 = vpop.f32.mrb[75].mxu0  ;;  %4672 = vtanh.f32 %v4082_v44 }
 0x22f   : > { %4674 = vtanh.f32 %v4083_v51  ;;  %v4669_v54 = vpop.eup %4668 }
 0x231   : > { %v4671_v11 = vpop.eup %4670 }
 0x232   : > { %v2370_v47 = vpop.f32.mrb[76].mxu1  ;;  %v3911_v56 = vpack.c.bf16 %v4671_v11, %v4669_v54  ;;  %v2659_v59 = vpop.f32.mrb[76].mxu0 }
 0x233   : > { %v2372_v12 = vpop.f32.mrb[77].mxu1  ;;  %v4084_v60 = vadd.f32 %v2659_v59, %v2370_v47  ;;  %v2661_v61 = vpop.f32.mrb[77].mxu0 }
 0x234   : > { %v2373_v15 = vpop.f32.mrb[78].mxu1  ;;  %3999 = vst [vmem:[%s5323_s22 + $0x88] sm:$0xff] %v3911_v56   ;;  %v2662_v16 = vpop.f32.mrb[78].mxu0 }
 0x235   : > { %v2375_v62 = vpop.f32.mrb[79].mxu1  ;;  %v4085_v2 = vadd.f32 %v2662_v16, %v2373_v15  ;;  %v2664_v19 = vpop.f32.mrb[79].mxu0  ;;  %4676 = vtanh.f32 %v4084_v60 }
 0x237   : > { %4678 = vtanh.f32 %v4085_v2  ;;  %v4673_v4 = vpop.eup %4672 }
 0x239   : > { %v4675_v22 = vpop.eup %4674 }
 0x23a   : > { %v2378_v50 = vpop.f32.mrb[80].mxu1  ;;  %v3916_v6 = vpack.c.bf16 %v4675_v22, %v4673_v4  ;;  %v2667_v26 = vpop.f32.mrb[80].mxu0 }
 0x23b   : > { %v2380_v7 = vpop.f32.mrb[81].mxu1  ;;  %v4086_v9 = vadd.f32 %v2667_v26, %v2378_v50  ;;  %v2669_v24 = vpop.f32.mrb[81].mxu0 }
 0x23c   : > { %v2381_v10 = vpop.f32.mrb[82].mxu1  ;;  %4000 = vst [vmem:[%s5323_s22 + $0x90] sm:$0xff] %v3916_v6   ;;  %v2670_v13 = vpop.f32.mrb[82].mxu0 }
 0x23d   : > { %v2383_v33 = vpop.f32.mrb[83].mxu1  ;;  %v4087_v27 = vadd.f32 %v2670_v13, %v2381_v10  ;;  %v2672_v55 = vpop.f32.mrb[83].mxu0  ;;  %4680 = vtanh.f32 %v4086_v9 }
 0x23f   : > { %4682 = vtanh.f32 %v4087_v27  ;;  %v4677_v38 = vpop.eup %4676 }
 0x241   : > { %v4679_v14 = vpop.eup %4678 }
 0x242   : > { %v2386_v17 = vpop.f32.mrb[84].mxu1  ;;  %v3921_v31 = vpack.c.bf16 %v4679_v14, %v4677_v38  ;;  %v2675_v18 = vpop.f32.mrb[84].mxu0 }
 0x243   : > { %v2388_v32 = vpop.f32.mrb[85].mxu1  ;;  %v4088_v20 = vadd.f32 %v2675_v18, %v2386_v17  ;;  %v2677_v21 = vpop.f32.mrb[85].mxu0 }
 0x244   : > { %v2389_v48 = vpop.f32.mrb[86].mxu1  ;;  %4001 = vst [vmem:[%s5323_s22 + $0x98] sm:$0xff] %v3921_v31   ;;  %v2678_v36 = vpop.f32.mrb[86].mxu0 }
 0x245   : > { %v2391_v58 = vpop.f32.mrb[87].mxu1  ;;  %v4089_v23 = vadd.f32 %v2678_v36, %v2389_v48  ;;  %v2680_v52 = vpop.f32.mrb[87].mxu0  ;;  %4684 = vtanh.f32 %v4088_v20 }
 0x247   : > { %4686 = vtanh.f32 %v4089_v23  ;;  %v4681_v25 = vpop.eup %4680 }
 0x249   : > { %v4683_v1 = vpop.eup %4682 }
 0x24a   : > { %v2394_v34 = vpop.f32.mrb[88].mxu1  ;;  %v3926_v43 = vpack.c.bf16 %v4683_v1, %v4681_v25  ;;  %v2683_v28 = vpop.f32.mrb[88].mxu0 }
 0x24b   : > { %v2396_v29 = vpop.f32.mrb[89].mxu1  ;;  %v4090_v46 = vadd.f32 %v2683_v28, %v2394_v34  ;;  %v2685_v39 = vpop.f32.mrb[89].mxu0 }
 0x24c   : > { %v2397_v63 = vpop.f32.mrb[90].mxu1  ;;  %4002 = vst [vmem:[%s5323_s22 + $0xa0] sm:$0xff] %v3926_v43   ;;  %v2686_v42 = vpop.f32.mrb[90].mxu0 }
 0x24d   : > { %v2399_v30 = vpop.f32.mrb[91].mxu1  ;;  %v4091_v35 = vadd.f32 %v2686_v42, %v2397_v63  ;;  %v2688_v53 = vpop.f32.mrb[91].mxu0  ;;  %4688 = vtanh.f32 %v4090_v46 }
 0x24f   : > { %4690 = vtanh.f32 %v4091_v35  ;;  %v4685_v3 = vpop.eup %4684 }
 0x251   : > { %v4687_v37 = vpop.eup %4686 }
 0x252   : > { %v2402_v57 = vpop.f32.mrb[92].mxu1  ;;  %v3931_v40 = vpack.c.bf16 %v4687_v37, %v4685_v3  ;;  %v2691_v41 = vpop.f32.mrb[92].mxu0 }
 0x253   : > { %v2404_v44 = vpop.f32.mrb[93].mxu1  ;;  %v4092_v45 = vadd.f32 %v2691_v41, %v2402_v57  ;;  %v2693_v49 = vpop.f32.mrb[93].mxu0 }
 0x254   : > { %v2405_v0 = vpop.f32.mrb[94].mxu1  ;;  %4003 = vst [vmem:[%s5323_s22 + $0xa8] sm:$0xff] %v3931_v40   ;;  %v2694_v8 = vpop.f32.mrb[94].mxu0 }
 0x255   : > { %v2407_v51 = vpop.f32.mrb[95].mxu1  ;;  %v4093_v5 = vadd.f32 %v2694_v8, %v2405_v0  ;;  %v2696_v54 = vpop.f32.mrb[95].mxu0  ;;  %4692 = vtanh.f32 %v4092_v45 }
 0x257   : > { %4694 = vtanh.f32 %v4093_v5  ;;  %v4689_v11 = vpop.eup %4688 }
 0x259   : > { %v4691_v47 = vpop.eup %4690 }
 0x25a   : > { %v2410_v56 = vpop.f32.mrb[96].mxu1  ;;  %v3936_v59 = vpack.c.bf16 %v4691_v47, %v4689_v11  ;;  %v2699_v12 = vpop.f32.mrb[96].mxu0 }
 0x25b   : > { %v2412_v60 = vpop.f32.mrb[97].mxu1  ;;  %v4094_v61 = vadd.f32 %v2699_v12, %v2410_v56  ;;  %v2701_v15 = vpop.f32.mrb[97].mxu0 }
 0x25c   : > { %v2413_v16 = vpop.f32.mrb[98].mxu1  ;;  %4004 = vst [vmem:[%s5323_s22 + $0xb0] sm:$0xff] %v3936_v59   ;;  %v2702_v62 = vpop.f32.mrb[98].mxu0 }
 0x25d   : > { %v2415_v2 = vpop.f32.mrb[99].mxu1  ;;  %v4095_v19 = vadd.f32 %v2702_v62, %v2413_v16  ;;  %v2704_v4 = vpop.f32.mrb[99].mxu0  ;;  %4696 = vtanh.f32 %v4094_v61 }
 0x25f   : > { %4698 = vtanh.f32 %v4095_v19  ;;  %v4693_v22 = vpop.eup %4692 }
 0x261   : > { %v4695_v50 = vpop.eup %4694 }
 0x262   : > { %v2418_v6 = vpop.f32.mrb[100].mxu1  ;;  %v3941_v26 = vpack.c.bf16 %v4695_v50, %v4693_v22  ;;  %v2707_v7 = vpop.f32.mrb[100].mxu0 }
 0x263   : > { %v2420_v9 = vpop.f32.mrb[101].mxu1  ;;  %v4096_v24 = vadd.f32 %v2707_v7, %v2418_v6  ;;  %v2709_v10 = vpop.f32.mrb[101].mxu0 }
 0x264   : > { %v2421_v13 = vpop.f32.mrb[102].mxu1  ;;  %4005 = vst [vmem:[%s5323_s22 + $0xb8] sm:$0xff] %v3941_v26   ;;  %v2710_v33 = vpop.f32.mrb[102].mxu0 }
 0x265   : > { %v2423_v27 = vpop.f32.mrb[103].mxu1  ;;  %v4097_v55 = vadd.f32 %v2710_v33, %v2421_v13  ;;  %v2712_v38 = vpop.f32.mrb[103].mxu0  ;;  %4700 = vtanh.f32 %v4096_v24 }
 0x267   : > { %4702 = vtanh.f32 %v4097_v55  ;;  %v4697_v14 = vpop.eup %4696 }
 0x269   : > { %v4699_v17 = vpop.eup %4698 }
 0x26a   : > { %v2426_v31 = vpop.f32.mrb[104].mxu1  ;;  %v3946_v18 = vpack.c.bf16 %v4699_v17, %v4697_v14  ;;  %v2715_v32 = vpop.f32.mrb[104].mxu0 }
 0x26b   : > { %v2428_v20 = vpop.f32.mrb[105].mxu1  ;;  %v4098_v21 = vadd.f32 %v2715_v32, %v2426_v31  ;;  %v2717_v48 = vpop.f32.mrb[105].mxu0 }
 0x26c   : > { %v2429_v36 = vpop.f32.mrb[106].mxu1  ;;  %4006 = vst [vmem:[%s5323_s22 + $0xc0] sm:$0xff] %v3946_v18   ;;  %v2718_v58 = vpop.f32.mrb[106].mxu0 }
 0x26d   : > { %v2431_v23 = vpop.f32.mrb[107].mxu1  ;;  %v4099_v52 = vadd.f32 %v2718_v58, %v2429_v36  ;;  %v2720_v25 = vpop.f32.mrb[107].mxu0  ;;  %4704 = vtanh.f32 %v4098_v21 }
 0x26f   : > { %4706 = vtanh.f32 %v4099_v52  ;;  %v4701_v1 = vpop.eup %4700 }
 0x271   : > { %v4703_v34 = vpop.eup %4702 }
 0x272   : > { %v2434_v43 = vpop.f32.mrb[108].mxu1  ;;  %v3951_v28 = vpack.c.bf16 %v4703_v34, %v4701_v1  ;;  %v2723_v29 = vpop.f32.mrb[108].mxu0 }
 0x273   : > { %v2436_v46 = vpop.f32.mrb[109].mxu1  ;;  %v4100_v39 = vadd.f32 %v2723_v29, %v2434_v43  ;;  %v2725_v63 = vpop.f32.mrb[109].mxu0 }
 0x274   : > { %v2437_v42 = vpop.f32.mrb[110].mxu1  ;;  %4007 = vst [vmem:[%s5323_s22 + $0xc8] sm:$0xff] %v3951_v28   ;;  %v2726_v30 = vpop.f32.mrb[110].mxu0 }
 0x275   : > { %v2439_v35 = vpop.f32.mrb[111].mxu1  ;;  %v4101_v53 = vadd.f32 %v2726_v30, %v2437_v42  ;;  %v2728_v3 = vpop.f32.mrb[111].mxu0  ;;  %4708 = vtanh.f32 %v4100_v39 }
 0x277   : > { %4710 = vtanh.f32 %v4101_v53  ;;  %v4705_v37 = vpop.eup %4704 }
 0x279   : > { %v4707_v57 = vpop.eup %4706 }
 0x27a   : > { %v2442_v40 = vpop.f32.mrb[112].mxu1  ;;  %v3956_v41 = vpack.c.bf16 %v4707_v57, %v4705_v37  ;;  %v2731_v44 = vpop.f32.mrb[112].mxu0 }
 0x27b   : > { %v2444_v45 = vpop.f32.mrb[113].mxu1  ;;  %v4102_v49 = vadd.f32 %v2731_v44, %v2442_v40  ;;  %v2733_v0 = vpop.f32.mrb[113].mxu0 }
 0x27c   : > { %v2445_v8 = vpop.f32.mrb[114].mxu1  ;;  %4008 = vst [vmem:[%s5323_s22 + $0xd0] sm:$0xff] %v3956_v41   ;;  %v2734_v51 = vpop.f32.mrb[114].mxu0 }
 0x27d   : > { %v2447_v5 = vpop.f32.mrb[115].mxu1  ;;  %v4103_v54 = vadd.f32 %v2734_v51, %v2445_v8  ;;  %v2736_v11 = vpop.f32.mrb[115].mxu0  ;;  %4712 = vtanh.f32 %v4102_v49 }
 0x27f   : > { %4714 = vtanh.f32 %v4103_v54  ;;  %v4709_v47 = vpop.eup %4708 }
 0x281   : > { %v4711_v56 = vpop.eup %4710 }
 0x282   : > { %v2450_v59 = vpop.f32.mrb[116].mxu1  ;;  %v3961_v12 = vpack.c.bf16 %v4711_v56, %v4709_v47  ;;  %v2739_v60 = vpop.f32.mrb[116].mxu0 }
 0x283   : > { %v2452_v61 = vpop.f32.mrb[117].mxu1  ;;  %v4104_v15 = vadd.f32 %v2739_v60, %v2450_v59  ;;  %v2741_v16 = vpop.f32.mrb[117].mxu0 }
 0x284   : > { %v2453_v62 = vpop.f32.mrb[118].mxu1  ;;  %4009 = vst [vmem:[%s5323_s22 + $0xd8] sm:$0xff] %v3961_v12   ;;  %v2742_v2 = vpop.f32.mrb[118].mxu0 }
 0x285   : > { %v2455_v19 = vpop.f32.mrb[119].mxu1  ;;  %v4105_v4 = vadd.f32 %v2742_v2, %v2453_v62  ;;  %v2744_v22 = vpop.f32.mrb[119].mxu0  ;;  %4716 = vtanh.f32 %v4104_v15 }
 0x287   : > { %4718 = vtanh.f32 %v4105_v4  ;;  %v4713_v50 = vpop.eup %4712 }
 0x289   : > { %v4715_v6 = vpop.eup %4714 }
 0x28a   : > { %v2458_v26 = vpop.f32.mrb[120].mxu1  ;;  %v3966_v7 = vpack.c.bf16 %v4715_v6, %v4713_v50  ;;  %v2747_v9 = vpop.f32.mrb[120].mxu0 }
 0x28b   : > { %v2460_v24 = vpop.f32.mrb[121].mxu1  ;;  %v4106_v10 = vadd.f32 %v2747_v9, %v2458_v26  ;;  %v2749_v13 = vpop.f32.mrb[121].mxu0 }
 0x28c   : > { %v2461_v33 = vpop.f32.mrb[122].mxu1  ;;  %4010 = vst [vmem:[%s5323_s22 + $0xe0] sm:$0xff] %v3966_v7   ;;  %v2750_v27 = vpop.f32.mrb[122].mxu0 }
 0x28d   : > { %v2463_v55 = vpop.f32.mrb[123].mxu1  ;;  %v4107_v38 = vadd.f32 %v2750_v27, %v2461_v33  ;;  %v2752_v14 = vpop.f32.mrb[123].mxu0  ;;  %4720 = vtanh.f32 %v4106_v10 }
 0x28f   : > { %4722 = vtanh.f32 %v4107_v38  ;;  %v4717_v17 = vpop.eup %4716 }
 0x291   : > { %v4719_v31 = vpop.eup %4718 }
 0x292   : > { %v2466_v18 = vpop.f32.mrb[124].mxu1  ;;  %v3971_v32 = vpack.c.bf16 %v4719_v31, %v4717_v17  ;;  %v2755_v20 = vpop.f32.mrb[124].mxu0 }
 0x293   : > { %v2468_v21 = vpop.f32.mrb[125].mxu1  ;;  %v4108_v48 = vadd.f32 %v2755_v20, %v2466_v18  ;;  %v2757_v36 = vpop.f32.mrb[125].mxu0 }
 0x294   : > { %v2469_v58 = vpop.f32.mrb[126].mxu1  ;;  %4011 = vst [vmem:[%s5323_s22 + $0xe8] sm:$0xff] %v3971_v32   ;;  %v2758_v23 = vpop.f32.mrb[126].mxu0 }
 0x295   : > { %v2471_v52 = vpop.f32.mrb[127].mxu1  ;;  %v4109_v25 = vadd.f32 %v2758_v23, %v2469_v58  ;;  %v2760_v1 = vpop.f32.mrb[127].mxu0  ;;  %4724 = vtanh.f32 %v4108_v48 }
 0x297   : > { %4726 = vtanh.f32 %v4109_v25  ;;  %v4721_v34 = vpop.eup %4720 }
 0x299   : > { %v4723_v43 = vpop.eup %4722 }
 0x29a   : > { %v3976_v28 = vpack.c.bf16 %v4723_v43, %v4721_v34 }
 0x29c   : > { %4012 = vst [vmem:[%s5323_s22 + $0xf0] sm:$0xff] %v3976_v28  }
 0x29f   : > { %v4725_v29 = vpop.eup %4724 }
 0x2a1   : > { %v4727_v46 = vpop.eup %4726 }
 0x2a2   : > { %v3981_v39 = vpack.c.bf16 %v4727_v46, %v4725_v29 }
 0x2a4   : > { %4013 = vst [vmem:[%s5323_s22 + $0xf8] sm:$0xff] %v3981_v39  }
 0x2a5 PF: > { %s12_s11 = sadd.s32 1, %s4750_s11   ;;  %s5407_s9 = smov %s4746_s10 }
 0x2a6   : > { %p9_p5 = scmp.ge.s32.totalorder %s12_s11, 11   ;;  %s5408_s10 = smov %s5410_s12 }
 0x2a8   :  { %11 = sbr.rel (!%p9_p5) target bundleno = 2 (0x2), region = 69 }

</bundles_post_ra>
